<compile_context>
chip_gen: v7x
topology: tpu7x:2x2x1
jax: 0.10.0
libtpu: 0.0.40
codegen_flags: <defaults>
</compile_context>

<pallas_src>
import numpy as np
import jax
import jax.numpy as jnp
from jax import lax
from jax.experimental import pallas as pl
from jax.experimental.pallas import tpu as pltpu


def _round_up(x, m):
    return ((x + m - 1) // m) * m


# ----------------------------------------------------------------------------
# Kernel 1: conv3x3(valid) + ReLU + maxpool2x2 for a tile of TB images.
#   x_ref : (TB, 2, HP+1, W*Cin) bf16  even/odd input-row planes (lane = w*Cin+ci)
#   w_ref : (3, W*Cin, 2*HALF)   bf16  banded row-conv matrices (one per kh tap);
#                                      columns = [even conv cols | odd conv cols],
#                                      each half padded to a multiple of 128 lanes
#   b_ref : (1, WP*Cout)         f32   channel bias tiled over pooled columns
#   o_ref : (TB, HP, WP*Cout)    bf16  pooled activations (lane = w*Cout + co)
# ----------------------------------------------------------------------------
def conv_pool_kernel(x_ref, w_ref, b_ref, o_ref):
    TB = x_ref.shape[0]
    HP = o_ref.shape[1]
    WpC = o_ref.shape[2]
    half = w_ref.shape[2] // 2
    w0 = w_ref[0]
    w1 = w_ref[1]
    w2 = w_ref[2]
    bias = b_ref[...]
    for n in range(TB):                       # static unroll, TB <= 8
        plane = x_ref[n]                      # (2, HP+1, WC)
        e, o = plane[0], plane[1]
        e0, e1 = e[:HP], e[1:HP + 1]
        o0, o1 = o[:HP], o[1:HP + 1]
        # conv output rows 2p (even) / 2p+1 (odd) for every pooled row p
        ce = (jnp.dot(e0, w0, preferred_element_type=jnp.float32)
              + jnp.dot(o0, w1, preferred_element_type=jnp.float32)
              + jnp.dot(e1, w2, preferred_element_type=jnp.float32))
        co = (jnp.dot(o0, w0, preferred_element_type=jnp.float32)
              + jnp.dot(e1, w1, preferred_element_type=jnp.float32)
              + jnp.dot(o1, w2, preferred_element_type=jnp.float32))
        z = jnp.maximum(ce, co)                           # vertical 2x2-pool max
        z = jnp.maximum(z[:, :half], z[:, half:])         # horizontal 2x2-pool max
        # bias + ReLU after the pool-max (exact: per-channel bias, monotone ReLU)
        z = jnp.maximum(z[:, :WpC] + bias, 0.0)
        o_ref[n] = z.astype(o_ref.dtype)


def _make_planes(rows):
    """rows (N, H, W*C) -> (N, 2, HP+1, W*C) even/odd input-row planes (no dup)."""
    _, H, _ = rows.shape
    HP = (H - 2) // 2
    even = rows[:, 0:2 * HP + 1:2, :]
    odd = rows[:, 1:2 * HP + 2:2, :]
    return jnp.stack([even, odd], axis=1)


def conv_relu_pool(rows, w, b, tb=8):
    """rows: (N, H, W*Cin) bf16; w: torch (Cout, Cin, 3, 3); b: (Cout,).
    Returns (N, HP, WP*Cout) bf16."""
    N, H, WC = rows.shape
    Cout, Cin = int(w.shape[0]), int(w.shape[1])
    W = WC // Cin
    HP, WP = (H - 2) // 2, (W - 2) // 2
    WpC = WP * Cout
    half = _round_up(WpC, 128)        # lane-align the even/odd column halves
    NC = 2 * half

    planes = _make_planes(rows)                       # (N, 2, HP+1, WC), 1x data
    TB = max(1, min(tb, N))
    Npad = _round_up(N, TB)
    if Npad != N:
        planes = jnp.pad(planes, ((0, Npad - N), (0, 0), (0, 0), (0, 0)))

    # Banded row-conv matrices:
    #   B[kh][(w*Cin+ci), a*half + q*Cout + co] = w[co, ci, kh, w-(2q+a)]
    # (zero outside the 3-tap band).  Built from a static 0/1 scatter + einsum.
    S = np.zeros((W, 2, WP, 3), np.float32)
    for a in range(2):
        for q in range(WP):
            for kw in range(3):
                S[2 * q + a + kw, a, q, kw] = 1.0
    wt = jnp.transpose(w, (2, 3, 1, 0))                          # (kh, kw, ci, co)
    B = jnp.einsum('waqk,hkio->hwiaqo', jnp.asarray(S), wt)      # (3,W,Cin,2,WP,Cout)
    B = B.reshape(3, WC, 2, WpC)
    B = jnp.pad(B, ((0, 0), (0, 0), (0, 0), (0, half - WpC)))
    B = B.reshape(3, WC, NC).astype(jnp.bfloat16)
    brow = jnp.tile(b, WP).reshape(1, WpC).astype(jnp.float32)

    out = pl.pallas_call(
        conv_pool_kernel,
        out_shape=jax.ShapeDtypeStruct((Npad, HP, WpC), jnp.bfloat16),
        grid=(Npad // TB,),
        in_specs=[
            pl.BlockSpec((TB, 2, HP + 1, WC), lambda i: (i, 0, 0, 0)),
            pl.BlockSpec((3, WC, NC), lambda i: (0, 0, 0)),
            pl.BlockSpec((1, WpC), lambda i: (0, 0)),
        ],
        out_specs=pl.BlockSpec((TB, HP, WpC), lambda i: (i, 0, 0)),
        compiler_params=pltpu.CompilerParams(dimension_semantics=("parallel",)),
    )(planes, B, brow)
    return out[:N]


# ----------------------------------------------------------------------------
# Kernel 2: fused tail = conv4 + pool(->1x1) + fc1 + ReLU + dropout + fc2
#           + log_softmax, batch-tiled.
# ----------------------------------------------------------------------------
def tail_kernel(x_ref, w4_ref, b4_ref, w1_ref, b1_ref, m_ref, w2_ref, b2_ref,
                o_ref):
    G = w4_ref.shape[1] // 4
    C4 = b4_ref.shape[1]
    # conv4 at the 4 positions of the single 2x2 pool window: one MXU matmul
    z = jnp.dot(x_ref[...], w4_ref[...], preferred_element_type=jnp.float32)
    z = jnp.maximum(jnp.maximum(z[:, 0:G], z[:, G:2 * G]),
                    jnp.maximum(z[:, 2 * G:3 * G], z[:, 3 * G:]))       # 2x2 pool
    a4 = jnp.maximum(z[:, :C4] + b4_ref[...], 0.0)                       # bias+ReLU
    h = jnp.dot(a4.astype(jnp.bfloat16), w1_ref[...],
                preferred_element_type=jnp.float32) + b1_ref[...]        # fc1
    h = jnp.maximum(h, 0.0) * m_ref[...].astype(jnp.float32)             # ReLU+drop
    s = jnp.dot(h.astype(jnp.bfloat16), w2_ref[...],
                preferred_element_type=jnp.float32) + b2_ref[...]        # fc2
    smax = jnp.max(s, axis=1, keepdims=True)
    lse = jnp.log(jnp.sum(jnp.exp(s - smax), axis=1, keepdims=True)) + smax
    o_ref[...] = s - lse                                                 # log_softmax


def tail_fused(rows, w4, b4, w1, b1, mask, w2, b2):
    """rows: (N, H4, W4*C3) bf16 conv4-input rows; final pooled spatial is 1x1."""
    N, H4, W4C3 = rows.shape
    C4, C3 = int(w4.shape[0]), int(w4.shape[1])
    W4 = W4C3 // C3
    G = _round_up(C4, 128)
    F1 = int(w1.shape[1])
    C = int(w2.shape[1])
    TB = min(128, _round_up(N, 8))
    Npad = _round_up(N, TB)

    xt = jnp.pad(rows.reshape(N, H4 * W4C3), ((0, Npad - N), (0, 0)))
    maskp = jnp.pad(mask.astype(jnp.bfloat16), ((0, Npad - N), (0, 0)))

    # conv4 weights scattered into one (H4*W4*C3, 4*G) matrix: 4 conv positions
    # of the single 2x2 pool window, each group lane-padded to G=128.
    S = np.zeros((H4, W4, 4, 3, 3), np.float32)
    for i in range(2):
        for j in range(2):
            for kh in range(3):
                for kw in range(3):
                    S[i + kh, j + kw, i * 2 + j, kh, kw] = 1.0
    wt = jnp.transpose(w4, (2, 3, 1, 0))                          # (kh, kw, ci, co)
    W4big = jnp.einsum('hwgyx,yxio->hwigo', jnp.asarray(S), wt)   # (H4,W4,C3,4,C4)
    W4big = W4big.reshape(H4 * W4 * C3, 4, C4)
    W4big = jnp.pad(W4big, ((0, 0), (0, 0), (0, G - C4)))
    W4big = W4big.reshape(H4 * W4 * C3, 4 * G).astype(jnp.bfloat16)

    out = pl.pallas_call(
        tail_kernel,
        out_shape=jax.ShapeDtypeStruct((Npad, C), jnp.float32),
        grid=(Npad // TB,),
        in_specs=[
            pl.BlockSpec((TB, H4 * W4C3), lambda i: (i, 0)),
            pl.BlockSpec((H4 * W4 * C3, 4 * G), lambda i: (0, 0)),
            pl.BlockSpec((1, C4), lambda i: (0, 0)),
            pl.BlockSpec((C4, F1), lambda i: (0, 0)),
            pl.BlockSpec((1, F1), lambda i: (0, 0)),
            pl.BlockSpec((TB, F1), lambda i: (i, 0)),
            pl.BlockSpec((F1, C), lambda i: (0, 0)),
            pl.BlockSpec((1, C), lambda i: (0, 0)),
        ],
        out_specs=pl.BlockSpec((TB, C), lambda i: (i, 0)),
        compiler_params=pltpu.CompilerParams(dimension_semantics=("parallel",)),
    )(xt, W4big, b4.reshape(1, C4).astype(jnp.float32),
      w1.astype(jnp.bfloat16), b1.reshape(1, F1).astype(jnp.float32),
      maskp, w2.astype(jnp.bfloat16), b2.reshape(1, C).astype(jnp.float32))
    return out[:N]


# ----------------------------------------------------------------------------
# Kernel 3: general classifier head (final spatial != 1x1), batch-tiled.
# ----------------------------------------------------------------------------
def head_kernel(x_ref, w1_ref, b1_ref, m_ref, w2_ref, b2_ref, o_ref):
    h = jnp.dot(x_ref[...], w1_ref[...],
                preferred_element_type=jnp.float32) + b1_ref[...]
    h = jnp.maximum(h, 0.0) * m_ref[...].astype(jnp.float32)
    s = jnp.dot(h.astype(jnp.bfloat16), w2_ref[...],
                preferred_element_type=jnp.float32) + b2_ref[...]
    smax = jnp.max(s, axis=1, keepdims=True)
    lse = jnp.log(jnp.sum(jnp.exp(s - smax), axis=1, keepdims=True)) + smax
    o_ref[...] = s - lse


def head(flat, w1, b1, mask, w2, b2):
    N, F = flat.shape
    F1 = int(w1.shape[1])
    C = int(w2.shape[1])
    TB = min(128, _round_up(N, 8))
    Npad = _round_up(N, TB)
    flat = jnp.pad(flat.astype(jnp.bfloat16), ((0, Npad - N), (0, 0)))
    maskp = jnp.pad(mask.astype(jnp.bfloat16), ((0, Npad - N), (0, 0)))
    out = pl.pallas_call(
        head_kernel,
        out_shape=jax.ShapeDtypeStruct((Npad, C), jnp.float32),
        grid=(Npad // TB,),
        in_specs=[
            pl.BlockSpec((TB, F), lambda i: (i, 0)),
            pl.BlockSpec((F, F1), lambda i: (0, 0)),
            pl.BlockSpec((1, F1), lambda i: (0, 0)),
            pl.BlockSpec((TB, F1), lambda i: (i, 0)),
            pl.BlockSpec((F1, C), lambda i: (0, 0)),
            pl.BlockSpec((1, C), lambda i: (0, 0)),
        ],
        out_specs=pl.BlockSpec((TB, C), lambda i: (i, 0)),
        compiler_params=pltpu.CompilerParams(dimension_semantics=("parallel",)),
    )(flat, w1.astype(jnp.bfloat16), b1.reshape(1, F1).astype(jnp.float32),
      maskp, w2.astype(jnp.bfloat16), b2.reshape(1, C).astype(jnp.float32))
    return out[:N]


# ----------------------------------------------------------------------------
# Full forward pass (Pallas) and a matched-precision pure-JAX reference
# ----------------------------------------------------------------------------
def network_forward(x_nchw, params):
    N, Cin, H, W = x_nchw.shape
    rows = (jnp.transpose(x_nchw, (0, 2, 3, 1))
               .reshape(N, H, W * Cin).astype(jnp.bfloat16))
    convs = params["convs"]
    for (w, b) in convs[:-1]:
        rows = conv_relu_pool(rows, w, b)
    w4, b4 = convs[-1]
    C3 = int(w4.shape[1])
    H4 = rows.shape[1]
    W4 = rows.shape[2] // C3
    HPf, WPf = (H4 - 2) // 2, (W4 - 2) // 2
    if HPf == 1 and WPf == 1:
        # conv4 + pool collapse to 1x1 spatial -> fuse with the classifier head
        return tail_fused(rows, w4, b4, params["w1"], params["b1"],
                          params["drop_mask"], params["w2"], params["b2"])
    # general path: conv4 stage kernel, torch (C,H,W)-order flatten, head kernel
    y4 = conv_relu_pool(rows, w4, b4)
    C4 = int(w4.shape[0])
    flat = (y4.reshape(N, HPf, WPf, C4).transpose(0, 3, 1, 2)
              .reshape(N, C4 * HPf * WPf))
    return head(flat, params["w1"], params["b1"], params["drop_mask"],
                params["w2"], params["b2"])


def reference_forward(x_nchw, params):
    """Pure-JAX reference with the same bf16-in / f32-accumulate policy,
    ops in the original torch order (conv -> +bias -> ReLU -> maxpool)."""
    x = jnp.transpose(x_nchw, (0, 2, 3, 1)).astype(jnp.bfloat16)
    for (w, b) in params["convs"]:
        w_hwio = jnp.transpose(w, (2, 3, 1, 0)).astype(jnp.bfloat16)
        z = lax.conv_general_dilated(x, w_hwio, (1, 1), "VALID",
                                     dimension_numbers=("NHWC", "HWIO", "NHWC"),
                                     preferred_element_type=jnp.float32)
        a = jnp.maximum(z + b.reshape(1, 1, 1, -1), 0.0)
        p = lax.reduce_window(a, -jnp.inf, lax.max,
                              (1, 2, 2, 1), (1, 2, 2, 1), "VALID")
        x = p.astype(jnp.bfloat16)
    N = x.shape[0]
    flat = jnp.transpose(x, (0, 3, 1, 2)).reshape(N, -1)   # torch (C,H,W) flatten
    h = jnp.dot(flat, params["w1"].astype(jnp.bfloat16),
                preferred_element_type=jnp.float32) + params["b1"]
    h = jnp.maximum(h, 0.0) * params["drop_mask"].astype(jnp.float32)
    z = jnp.dot(h.astype(jnp.bfloat16), params["w2"].astype(jnp.bfloat16),
                preferred_element_type=jnp.float32) + params["b2"]
    return jax.nn.log_softmax(z, axis=1)


def init_params(key, N, Cin, init_f, num_fc1, num_classes, num_flatten, p_drop):
    keys = jax.random.split(key, 13)
    convs = []
    cin = Cin
    for i in range(4):
        cout = init_f * (2 ** i)
        bound = float(1.0 / (cin * 9) ** 0.5)    # PyTorch Conv2d default-ish init
        w = jax.random.uniform(keys[2 * i], (cout, cin, 3, 3), jnp.float32,
                               -bound, bound)
        b = jax.random.uniform(keys[2 * i + 1], (cout,), jnp.float32,
                               -bound, bound)
        convs.append((w, b))
        cin = cout
    b1w = float(1.0 / num_flatten ** 0.5)
    w1 = jax.random.uniform(keys[8], (num_flatten, num_fc1), jnp.float32, -b1w, b1w)
    b1 = jax.random.uniform(keys[9], (num_fc1,), jnp.float32, -b1w, b1w)
    b2w = float(1.0 / num_fc1 ** 0.5)
    w2 = jax.random.uniform(keys[10], (num_fc1, num_classes), jnp.float32, -b2w, b2w)
    b2 = jax.random.uniform(keys[11], (num_classes,), jnp.float32, -b2w, b2w)
    # F.dropout(X, p) defaults to training=True -> active dropout.  Modeled as a
    # deterministic Bernoulli keep-mask, pre-scaled by 1/(1-p) and stored in bf16
    # so the kernel and the reference see bit-identical dropout values.
    keep = jax.random.bernoulli(keys[12], 1.0 - p_drop, (N, num_fc1))
    drop_mask = (keep.astype(jnp.float32) / (1.0 - p_drop)).astype(jnp.bfloat16)
    return {"convs": convs, "w1": w1, "b1": b1, "w2": w2, "b2": b2,
            "drop_mask": drop_mask}


def _num_flatten(Hin, Win, init_f):
    h, w = Hin, Win
    for _ in range(4):
        h, w = (h - 2) // 2, (w - 2) // 2
    return h * w * 8 * init_f


def _run_case(name, key, N, Cin, Hin, Win, init_f=8, num_fc1=32, num_classes=2,
              p_drop=0.25):
    kx, kp = jax.random.split(key)
    x = jax.random.normal(kx, (N, Cin, Hin, Win), jnp.float32)
    params = init_params(kp, N, Cin, init_f, num_fc1, num_classes,
                         _num_flatten(Hin, Win, init_f), p_drop)
    out = jax.block_until_ready(jax.jit(network_forward)(x, params))
    ref = jax.block_until_ready(jax.jit(reference_forward)(x, params))
    assert out.shape == (N, num_classes)
    if not bool(jnp.allclose(out, ref, atol=3e-2, rtol=3e-2)):
        raise AssertionError(f"{name}: Pallas output does not match JAX reference")


if __name__ == "__main__":
    key = jax.random.PRNGKey(0)
    k1, k2 = jax.random.split(key)
    # 48x48 input -> final pooled spatial 1x1 -> fused conv4+fc tail kernel
    _run_case("tail_fused", k1, N=2, Cin=3, Hin=48, Win=48)
    # 64x64 input -> final pooled spatial 2x2 -> conv4 stage + batch-tiled head
    _run_case("general_head", k2, N=3, Cin=3, Hin=64, Win=64)
    print("KERNEL_OK")
</pallas_src>

<mosaic_0001>
module attributes {stable_mosaic.version = 11 : i64} {
  func.func @conv_pool_kernel(%arg0: i32, %arg1: memref<2x2x24x144xbf16, #tpu.memory_space<vmem>>, %arg2: memref<3x144x512xbf16, #tpu.memory_space<vmem>>, %arg3: memref<1x184xf32, #tpu.memory_space<vmem>>, %arg4: memref<2x23x184xbf16, #tpu.memory_space<vmem>>) attributes {dimension_semantics = [#tpu.dimension_semantics<parallel>], iteration_bounds = array<i64: 1>, scalar_prefetch = 0 : i64, scratch_operands = 0 : i64, tpu.core_type = #tpu.core_type<tc>, window_params = [{transform_indices = @transform_0, window_bounds = array<i64: 2, 2, 24, 144>}, {pipeline_mode = #tpu.pipeline_mode<synchronous>, transform_indices = @transform_1, window_bounds = array<i64: 3, 144, 512>}, {pipeline_mode = #tpu.pipeline_mode<synchronous>, transform_indices = @transform_2, window_bounds = array<i64: 1, 184>}, {transform_indices = @transform_3, window_bounds = array<i64: 2, 23, 184>}]} {
    %c0 = arith.constant 0 : index
    %c0_0 = arith.constant 0 : index
    %c0_1 = arith.constant 0 : index
    %0 = vector.load %arg2[%c0, %c0_0, %c0_1] : memref<3x144x512xbf16, #tpu.memory_space<vmem>>, vector<1x144x512xbf16>
    %1 = vector.shape_cast %0 : vector<1x144x512xbf16> to vector<144x512xbf16>
    %c1 = arith.constant 1 : index
    %c0_2 = arith.constant 0 : index
    %c0_3 = arith.constant 0 : index
    %2 = vector.load %arg2[%c1, %c0_2, %c0_3] : memref<3x144x512xbf16, #tpu.memory_space<vmem>>, vector<1x144x512xbf16>
    %3 = vector.shape_cast %2 : vector<1x144x512xbf16> to vector<144x512xbf16>
    %c2 = arith.constant 2 : index
    %c0_4 = arith.constant 0 : index
    %c0_5 = arith.constant 0 : index
    %4 = vector.load %arg2[%c2, %c0_4, %c0_5] : memref<3x144x512xbf16, #tpu.memory_space<vmem>>, vector<1x144x512xbf16>
    %5 = vector.shape_cast %4 : vector<1x144x512xbf16> to vector<144x512xbf16>
    %c0_6 = arith.constant 0 : index
    %c0_7 = arith.constant 0 : index
    %6 = vector.load %arg3[%c0_6, %c0_7] : memref<1x184xf32, #tpu.memory_space<vmem>>, vector<1x184xf32>
    %c0_8 = arith.constant 0 : index
    %c0_9 = arith.constant 0 : index
    %c0_10 = arith.constant 0 : index
    %c0_11 = arith.constant 0 : index
    %7 = vector.load %arg1[%c0_8, %c0_9, %c0_10, %c0_11] : memref<2x2x24x144xbf16, #tpu.memory_space<vmem>>, vector<1x2x24x144xbf16>
    %8 = vector.shape_cast %7 : vector<1x2x24x144xbf16> to vector<2x24x144xbf16>
    %9 = vector.extract_strided_slice %8 {offsets = [0, 0, 0], sizes = [1, 24, 144], strides = [1, 1, 1]} : vector<2x24x144xbf16> to vector<1x24x144xbf16>
    %10 = vector.shape_cast %9 : vector<1x24x144xbf16> to vector<24x144xbf16>
    %11 = vector.extract_strided_slice %8 {offsets = [1, 0, 0], sizes = [1, 24, 144], strides = [1, 1, 1]} : vector<2x24x144xbf16> to vector<1x24x144xbf16>
    %12 = vector.shape_cast %11 : vector<1x24x144xbf16> to vector<24x144xbf16>
    %13 = vector.extract_strided_slice %10 {offsets = [0, 0], sizes = [23, 144], strides = [1, 1]} : vector<24x144xbf16> to vector<23x144xbf16>
    %14 = vector.extract_strided_slice %10 {offsets = [1, 0], sizes = [23, 144], strides = [1, 1]} : vector<24x144xbf16> to vector<23x144xbf16>
    %15 = vector.extract_strided_slice %12 {offsets = [0, 0], sizes = [23, 144], strides = [1, 1]} : vector<24x144xbf16> to vector<23x144xbf16>
    %16 = vector.extract_strided_slice %12 {offsets = [1, 0], sizes = [23, 144], strides = [1, 1]} : vector<24x144xbf16> to vector<23x144xbf16>
    %cst = arith.constant dense<0.000000e+00> : vector<23x512xf32>
    %17 = tpu.matmul %13, %1, %cst {dimension_numbers = #tpu.dot_dimension_numbers<[1], [0], [0], [1], [0, 0, 1, 1], [], []>} : vector<23x144xbf16>, vector<144x512xbf16>, vector<23x512xf32> -> vector<23x512xf32>
    %cst_12 = arith.constant dense<0.000000e+00> : vector<23x512xf32>
    %18 = tpu.matmul %15, %3, %cst_12 {dimension_numbers = #tpu.dot_dimension_numbers<[1], [0], [0], [1], [0, 0, 1, 1], [], []>} : vector<23x144xbf16>, vector<144x512xbf16>, vector<23x512xf32> -> vector<23x512xf32>
    %19 = arith.addf %17, %18 : vector<23x512xf32>
    %cst_13 = arith.constant dense<0.000000e+00> : vector<23x512xf32>
    %20 = tpu.matmul %14, %5, %cst_13 {dimension_numbers = #tpu.dot_dimension_numbers<[1], [0], [0], [1], [0, 0, 1, 1], [], []>} : vector<23x144xbf16>, vector<144x512xbf16>, vector<23x512xf32> -> vector<23x512xf32>
    %21 = arith.addf %19, %20 : vector<23x512xf32>
    %cst_14 = arith.constant dense<0.000000e+00> : vector<23x512xf32>
    %22 = tpu.matmul %15, %1, %cst_14 {dimension_numbers = #tpu.dot_dimension_numbers<[1], [0], [0], [1], [0, 0, 1, 1], [], []>} : vector<23x144xbf16>, vector<144x512xbf16>, vector<23x512xf32> -> vector<23x512xf32>
    %cst_15 = arith.constant dense<0.000000e+00> : vector<23x512xf32>
    %23 = tpu.matmul %14, %3, %cst_15 {dimension_numbers = #tpu.dot_dimension_numbers<[1], [0], [0], [1], [0, 0, 1, 1], [], []>} : vector<23x144xbf16>, vector<144x512xbf16>, vector<23x512xf32> -> vector<23x512xf32>
    %24 = arith.addf %22, %23 : vector<23x512xf32>
    %cst_16 = arith.constant dense<0.000000e+00> : vector<23x512xf32>
    %25 = tpu.matmul %16, %5, %cst_16 {dimension_numbers = #tpu.dot_dimension_numbers<[1], [0], [0], [1], [0, 0, 1, 1], [], []>} : vector<23x144xbf16>, vector<144x512xbf16>, vector<23x512xf32> -> vector<23x512xf32>
    %26 = arith.addf %24, %25 : vector<23x512xf32>
    %27 = arith.maximumf %21, %26 : vector<23x512xf32>
    %28 = vector.extract_strided_slice %27 {offsets = [0, 0], sizes = [23, 256], strides = [1, 1]} : vector<23x512xf32> to vector<23x256xf32>
    %29 = vector.extract_strided_slice %27 {offsets = [0, 256], sizes = [23, 256], strides = [1, 1]} : vector<23x512xf32> to vector<23x256xf32>
    %30 = arith.maximumf %28, %29 : vector<23x256xf32>
    %31 = vector.extract_strided_slice %30 {offsets = [0, 0], sizes = [23, 184], strides = [1, 1]} : vector<23x256xf32> to vector<23x184xf32>
    %32 = vector.broadcast %6 : vector<1x184xf32> to vector<23x184xf32>
    %33 = arith.addf %31, %32 : vector<23x184xf32>
    %cst_17 = arith.constant 0.000000e+00 : f32
    %34 = vector.broadcast %cst_17 : f32 to vector<23x184xf32>
    %35 = arith.maximumf %33, %34 : vector<23x184xf32>
    %36 = arith.truncf %35 : vector<23x184xf32> to vector<23x184xbf16>
    %c0_18 = arith.constant 0 : index
    %c0_19 = arith.constant 0 : index
    %c0_20 = arith.constant 0 : index
    %37 = vector.load %arg4[%c0_18, %c0_19, %c0_20] : memref<2x23x184xbf16, #tpu.memory_space<vmem>>, vector<1x23x184xbf16>
    %38 = vector.shape_cast %37 : vector<1x23x184xbf16> to vector<23x184xbf16>
    %39 = vector.shape_cast %36 : vector<23x184xbf16> to vector<1x23x184xbf16>
    tpu.vector_store %arg4[%c0_18, %c0_19, %c0_20], %39 {strides = array<i32>} : memref<2x23x184xbf16, #tpu.memory_space<vmem>>, vector<1x23x184xbf16>,
    %c1_21 = arith.constant 1 : index
    %c0_22 = arith.constant 0 : index
    %c0_23 = arith.constant 0 : index
    %c0_24 = arith.constant 0 : index
    %40 = vector.load %arg1[%c1_21, %c0_22, %c0_23, %c0_24] : memref<2x2x24x144xbf16, #tpu.memory_space<vmem>>, vector<1x2x24x144xbf16>
    %41 = vector.shape_cast %40 : vector<1x2x24x144xbf16> to vector<2x24x144xbf16>
    %42 = vector.extract_strided_slice %41 {offsets = [0, 0, 0], sizes = [1, 24, 144], strides = [1, 1, 1]} : vector<2x24x144xbf16> to vector<1x24x144xbf16>
    %43 = vector.shape_cast %42 : vector<1x24x144xbf16> to vector<24x144xbf16>
    %44 = vector.extract_strided_slice %41 {offsets = [1, 0, 0], sizes = [1, 24, 144], strides = [1, 1, 1]} : vector<2x24x144xbf16> to vector<1x24x144xbf16>
    %45 = vector.shape_cast %44 : vector<1x24x144xbf16> to vector<24x144xbf16>
    %46 = vector.extract_strided_slice %43 {offsets = [0, 0], sizes = [23, 144], strides = [1, 1]} : vector<24x144xbf16> to vector<23x144xbf16>
    %47 = vector.extract_strided_slice %43 {offsets = [1, 0], sizes = [23, 144], strides = [1, 1]} : vector<24x144xbf16> to vector<23x144xbf16>
    %48 = vector.extract_strided_slice %45 {offsets = [0, 0], sizes = [23, 144], strides = [1, 1]} : vector<24x144xbf16> to vector<23x144xbf16>
    %49 = vector.extract_strided_slice %45 {offsets = [1, 0], sizes = [23, 144], strides = [1, 1]} : vector<24x144xbf16> to vector<23x144xbf16>
    %cst_25 = arith.constant dense<0.000000e+00> : vector<23x512xf32>
    %50 = tpu.matmul %46, %1, %cst_25 {dimension_numbers = #tpu.dot_dimension_numbers<[1], [0], [0], [1], [0, 0, 1, 1], [], []>} : vector<23x144xbf16>, vector<144x512xbf16>, vector<23x512xf32> -> vector<23x512xf32>
    %cst_26 = arith.constant dense<0.000000e+00> : vector<23x512xf32>
    %51 = tpu.matmul %48, %3, %cst_26 {dimension_numbers = #tpu.dot_dimension_numbers<[1], [0], [0], [1], [0, 0, 1, 1], [], []>} : vector<23x144xbf16>, vector<144x512xbf16>, vector<23x512xf32> -> vector<23x512xf32>
    %52 = arith.addf %50, %51 : vector<23x512xf32>
    %cst_27 = arith.constant dense<0.000000e+00> : vector<23x512xf32>
    %53 = tpu.matmul %47, %5, %cst_27 {dimension_numbers = #tpu.dot_dimension_numbers<[1], [0], [0], [1], [0, 0, 1, 1], [], []>} : vector<23x144xbf16>, vector<144x512xbf16>, vector<23x512xf32> -> vector<23x512xf32>
    %54 = arith.addf %52, %53 : vector<23x512xf32>
    %cst_28 = arith.constant dense<0.000000e+00> : vector<23x512xf32>
    %55 = tpu.matmul %48, %1, %cst_28 {dimension_numbers = #tpu.dot_dimension_numbers<[1], [0], [0], [1], [0, 0, 1, 1], [], []>} : vector<23x144xbf16>, vector<144x512xbf16>, vector<23x512xf32> -> vector<23x512xf32>
    %cst_29 = arith.constant dense<0.000000e+00> : vector<23x512xf32>
    %56 = tpu.matmul %47, %3, %cst_29 {dimension_numbers = #tpu.dot_dimension_numbers<[1], [0], [0], [1], [0, 0, 1, 1], [], []>} : vector<23x144xbf16>, vector<144x512xbf16>, vector<23x512xf32> -> vector<23x512xf32>
    %57 = arith.addf %55, %56 : vector<23x512xf32>
    %cst_30 = arith.constant dense<0.000000e+00> : vector<23x512xf32>
    %58 = tpu.matmul %49, %5, %cst_30 {dimension_numbers = #tpu.dot_dimension_numbers<[1], [0], [0], [1], [0, 0, 1, 1], [], []>} : vector<23x144xbf16>, vector<144x512xbf16>, vector<23x512xf32> -> vector<23x512xf32>
    %59 = arith.addf %57, %58 : vector<23x512xf32>
    %60 = arith.maximumf %54, %59 : vector<23x512xf32>
    %61 = vector.extract_strided_slice %60 {offsets = [0, 0], sizes = [23, 256], strides = [1, 1]} : vector<23x512xf32> to vector<23x256xf32>
    %62 = vector.extract_strided_slice %60 {offsets = [0, 256], sizes = [23, 256], strides = [1, 1]} : vector<23x512xf32> to vector<23x256xf32>
    %63 = arith.maximumf %61, %62 : vector<23x256xf32>
    %64 = vector.extract_strided_slice %63 {offsets = [0, 0], sizes = [23, 184], strides = [1, 1]} : vector<23x256xf32> to vector<23x184xf32>
    %65 = vector.broadcast %6 : vector<1x184xf32> to vector<23x184xf32>
    %66 = arith.addf %64, %65 : vector<23x184xf32>
    %cst_31 = arith.constant 0.000000e+00 : f32
    %67 = vector.broadcast %cst_31 : f32 to vector<23x184xf32>
    %68 = arith.maximumf %66, %67 : vector<23x184xf32>
    %69 = arith.truncf %68 : vector<23x184xf32> to vector<23x184xbf16>
    %c1_32 = arith.constant 1 : index
    %c0_33 = arith.constant 0 : index
    %c0_34 = arith.constant 0 : index
    %70 = vector.load %arg4[%c1_32, %c0_33, %c0_34] : memref<2x23x184xbf16, #tpu.memory_space<vmem>>, vector<1x23x184xbf16>
    %71 = vector.shape_cast %70 : vector<1x23x184xbf16> to vector<23x184xbf16>
    %72 = vector.shape_cast %69 : vector<23x184xbf16> to vector<1x23x184xbf16>
    tpu.vector_store %arg4[%c1_32, %c0_33, %c0_34], %72 {strides = array<i32>} : memref<2x23x184xbf16, #tpu.memory_space<vmem>>, vector<1x23x184xbf16>,
    return
  }
  func.func @transform_0(%arg0: i32) -> (i32, i32, i32, i32) {
    %c0_i32 = arith.constant 0 : i32
    %c0_i32_0 = arith.constant 0 : i32
    %c0_i32_1 = arith.constant 0 : i32
    %c0_i32_2 = arith.constant 0 : i32
    return %arg0, %c0_i32, %c0_i32_0, %c0_i32_1 : i32, i32, i32, i32
  }
  func.func @transform_1(%arg0: i32) -> (i32, i32, i32) {
    %c0_i32 = arith.constant 0 : i32
    %c0_i32_0 = arith.constant 0 : i32
    %c0_i32_1 = arith.constant 0 : i32
    %c0_i32_2 = arith.constant 0 : i32
    return %c0_i32, %c0_i32_0, %c0_i32_1 : i32, i32, i32
  }
  func.func @transform_2(%arg0: i32) -> (i32, i32) {
    %c0_i32 = arith.constant 0 : i32
    %c0_i32_0 = arith.constant 0 : i32
    %c0_i32_1 = arith.constant 0 : i32
    return %c0_i32, %c0_i32_0 : i32, i32
  }
  func.func @transform_3(%arg0: i32) -> (i32, i32, i32) {
    %c0_i32 = arith.constant 0 : i32
    %c0_i32_0 = arith.constant 0 : i32
    %c0_i32_1 = arith.constant 0 : i32
    return %arg0, %c0_i32, %c0_i32_0 : i32, i32, i32
  }
}

module attributes {stable_mosaic.version = 11 : i64} {
  func.func @conv_pool_kernel(%arg0: i32, %arg1: memref<2x2x11x184xbf16, #tpu.memory_space<vmem>>, %arg2: memref<3x184x512xbf16, #tpu.memory_space<vmem>>, %arg3: memref<1x160xf32, #tpu.memory_space<vmem>>, %arg4: memref<2x10x160xbf16, #tpu.memory_space<vmem>>) attributes {dimension_semantics = [#tpu.dimension_semantics<parallel>], iteration_bounds = array<i64: 1>, scalar_prefetch = 0 : i64, scratch_operands = 0 : i64, tpu.core_type = #tpu.core_type<tc>, window_params = [{transform_indices = @transform_0, window_bounds = array<i64: 2, 2, 11, 184>}, {pipeline_mode = #tpu.pipeline_mode<synchronous>, transform_indices = @transform_1, window_bounds = array<i64: 3, 184, 512>}, {pipeline_mode = #tpu.pipeline_mode<synchronous>, transform_indices = @transform_2, window_bounds = array<i64: 1, 160>}, {transform_indices = @transform_3, window_bounds = array<i64: 2, 10, 160>}]} {
    %c0 = arith.constant 0 : index
    %c0_0 = arith.constant 0 : index
    %c0_1 = arith.constant 0 : index
    %0 = vector.load %arg2[%c0, %c0_0, %c0_1] : memref<3x184x512xbf16, #tpu.memory_space<vmem>>, vector<1x184x512xbf16>
    %1 = vector.shape_cast %0 : vector<1x184x512xbf16> to vector<184x512xbf16>
    %c1 = arith.constant 1 : index
    %c0_2 = arith.constant 0 : index
    %c0_3 = arith.constant 0 : index
    %2 = vector.load %arg2[%c1, %c0_2, %c0_3] : memref<3x184x512xbf16, #tpu.memory_space<vmem>>, vector<1x184x512xbf16>
    %3 = vector.shape_cast %2 : vector<1x184x512xbf16> to vector<184x512xbf16>
    %c2 = arith.constant 2 : index
    %c0_4 = arith.constant 0 : index
    %c0_5 = arith.constant 0 : index
    %4 = vector.load %arg2[%c2, %c0_4, %c0_5] : memref<3x184x512xbf16, #tpu.memory_space<vmem>>, vector<1x184x512xbf16>
    %5 = vector.shape_cast %4 : vector<1x184x512xbf16> to vector<184x512xbf16>
    %c0_6 = arith.constant 0 : index
    %c0_7 = arith.constant 0 : index
    %6 = vector.load %arg3[%c0_6, %c0_7] : memref<1x160xf32, #tpu.memory_space<vmem>>, vector<1x160xf32>
    %c0_8 = arith.constant 0 : index
    %c0_9 = arith.constant 0 : index
    %c0_10 = arith.constant 0 : index
    %c0_11 = arith.constant 0 : index
    %7 = vector.load %arg1[%c0_8, %c0_9, %c0_10, %c0_11] : memref<2x2x11x184xbf16, #tpu.memory_space<vmem>>, vector<1x2x11x184xbf16>
    %8 = vector.shape_cast %7 : vector<1x2x11x184xbf16> to vector<2x11x184xbf16>
    %9 = vector.extract_strided_slice %8 {offsets = [0, 0, 0], sizes = [1, 11, 184], strides = [1, 1, 1]} : vector<2x11x184xbf16> to vector<1x11x184xbf16>
    %10 = vector.shape_cast %9 : vector<1x11x184xbf16> to vector<11x184xbf16>
    %11 = vector.extract_strided_slice %8 {offsets = [1, 0, 0], sizes = [1, 11, 184], strides = [1, 1, 1]} : vector<2x11x184xbf16> to vector<1x11x184xbf16>
    %12 = vector.shape_cast %11 : vector<1x11x184xbf16> to vector<11x184xbf16>
    %13 = vector.extract_strided_slice %10 {offsets = [0, 0], sizes = [10, 184], strides = [1, 1]} : vector<11x184xbf16> to vector<10x184xbf16>
    %14 = vector.extract_strided_slice %10 {offsets = [1, 0], sizes = [10, 184], strides = [1, 1]} : vector<11x184xbf16> to vector<10x184xbf16>
    %15 = vector.extract_strided_slice %12 {offsets = [0, 0], sizes = [10, 184], strides = [1, 1]} : vector<11x184xbf16> to vector<10x184xbf16>
    %16 = vector.extract_strided_slice %12 {offsets = [1, 0], sizes = [10, 184], strides = [1, 1]} : vector<11x184xbf16> to vector<10x184xbf16>
    %cst = arith.constant dense<0.000000e+00> : vector<10x512xf32>
    %17 = tpu.matmul %13, %1, %cst {dimension_numbers = #tpu.dot_dimension_numbers<[1], [0], [0], [1], [0, 0, 1, 1], [], []>} : vector<10x184xbf16>, vector<184x512xbf16>, vector<10x512xf32> -> vector<10x512xf32>
    %cst_12 = arith.constant dense<0.000000e+00> : vector<10x512xf32>
    %18 = tpu.matmul %15, %3, %cst_12 {dimension_numbers = #tpu.dot_dimension_numbers<[1], [0], [0], [1], [0, 0, 1, 1], [], []>} : vector<10x184xbf16>, vector<184x512xbf16>, vector<10x512xf32> -> vector<10x512xf32>
    %19 = arith.addf %17, %18 : vector<10x512xf32>
    %cst_13 = arith.constant dense<0.000000e+00> : vector<10x512xf32>
    %20 = tpu.matmul %14, %5, %cst_13 {dimension_numbers = #tpu.dot_dimension_numbers<[1], [0], [0], [1], [0, 0, 1, 1], [], []>} : vector<10x184xbf16>, vector<184x512xbf16>, vector<10x512xf32> -> vector<10x512xf32>
    %21 = arith.addf %19, %20 : vector<10x512xf32>
    %cst_14 = arith.constant dense<0.000000e+00> : vector<10x512xf32>
    %22 = tpu.matmul %15, %1, %cst_14 {dimension_numbers = #tpu.dot_dimension_numbers<[1], [0], [0], [1], [0, 0, 1, 1], [], []>} : vector<10x184xbf16>, vector<184x512xbf16>, vector<10x512xf32> -> vector<10x512xf32>
    %cst_15 = arith.constant dense<0.000000e+00> : vector<10x512xf32>
    %23 = tpu.matmul %14, %3, %cst_15 {dimension_numbers = #tpu.dot_dimension_numbers<[1], [0], [0], [1], [0, 0, 1, 1], [], []>} : vector<10x184xbf16>, vector<184x512xbf16>, vector<10x512xf32> -> vector<10x512xf32>
    %24 = arith.addf %22, %23 : vector<10x512xf32>
    %cst_16 = arith.constant dense<0.000000e+00> : vector<10x512xf32>
    %25 = tpu.matmul %16, %5, %cst_16 {dimension_numbers = #tpu.dot_dimension_numbers<[1], [0], [0], [1], [0, 0, 1, 1], [], []>} : vector<10x184xbf16>, vector<184x512xbf16>, vector<10x512xf32> -> vector<10x512xf32>
    %26 = arith.addf %24, %25 : vector<10x512xf32>
    %27 = arith.maximumf %21, %26 : vector<10x512xf32>
    %28 = vector.extract_strided_slice %27 {offsets = [0, 0], sizes = [10, 256], strides = [1, 1]} : vector<10x512xf32> to vector<10x256xf32>
    %29 = vector.extract_strided_slice %27 {offsets = [0, 256], sizes = [10, 256], strides = [1, 1]} : vector<10x512xf32> to vector<10x256xf32>
    %30 = arith.maximumf %28, %29 : vector<10x256xf32>
    %31 = vector.extract_strided_slice %30 {offsets = [0, 0], sizes = [10, 160], strides = [1, 1]} : vector<10x256xf32> to vector<10x160xf32>
    %32 = vector.broadcast %6 : vector<1x160xf32> to vector<10x160xf32>
    %33 = arith.addf %31, %32 : vector<10x160xf32>
    %cst_17 = arith.constant 0.000000e+00 : f32
    %34 = vector.broadcast %cst_17 : f32 to vector<10x160xf32>
    %35 = arith.maximumf %33, %34 : vector<10x160xf32>
    %36 = arith.truncf %35 : vector<10x160xf32> to vector<10x160xbf16>
    %c0_18 = arith.constant 0 : index
    %c0_19 = arith.constant 0 : index
    %c0_20 = arith.constant 0 : index
    %37 = vector.load %arg4[%c0_18, %c0_19, %c0_20] : memref<2x10x160xbf16, #tpu.memory_space<vmem>>, vector<1x10x160xbf16>
    %38 = vector.shape_cast %37 : vector<1x10x160xbf16> to vector<10x160xbf16>
    %39 = vector.shape_cast %36 : vector<10x160xbf16> to vector<1x10x160xbf16>
    tpu.vector_store %arg4[%c0_18, %c0_19, %c0_20], %39 {strides = array<i32>} : memref<2x10x160xbf16, #tpu.memory_space<vmem>>, vector<1x10x160xbf16>,
    %c1_21 = arith.constant 1 : index
    %c0_22 = arith.constant 0 : index
    %c0_23 = arith.constant 0 : index
    %c0_24 = arith.constant 0 : index
    %40 = vector.load %arg1[%c1_21, %c0_22, %c0_23, %c0_24] : memref<2x2x11x184xbf16, #tpu.memory_space<vmem>>, vector<1x2x11x184xbf16>
    %41 = vector.shape_cast %40 : vector<1x2x11x184xbf16> to vector<2x11x184xbf16>
    %42 = vector.extract_strided_slice %41 {offsets = [0, 0, 0], sizes = [1, 11, 184], strides = [1, 1, 1]} : vector<2x11x184xbf16> to vector<1x11x184xbf16>
    %43 = vector.shape_cast %42 : vector<1x11x184xbf16> to vector<11x184xbf16>
    %44 = vector.extract_strided_slice %41 {offsets = [1, 0, 0], sizes = [1, 11, 184], strides = [1, 1, 1]} : vector<2x11x184xbf16> to vector<1x11x184xbf16>
    %45 = vector.shape_cast %44 : vector<1x11x184xbf16> to vector<11x184xbf16>
    %46 = vector.extract_strided_slice %43 {offsets = [0, 0], sizes = [10, 184], strides = [1, 1]} : vector<11x184xbf16> to vector<10x184xbf16>
    %47 = vector.extract_strided_slice %43 {offsets = [1, 0], sizes = [10, 184], strides = [1, 1]} : vector<11x184xbf16> to vector<10x184xbf16>
    %48 = vector.extract_strided_slice %45 {offsets = [0, 0], sizes = [10, 184], strides = [1, 1]} : vector<11x184xbf16> to vector<10x184xbf16>
    %49 = vector.extract_strided_slice %45 {offsets = [1, 0], sizes = [10, 184], strides = [1, 1]} : vector<11x184xbf16> to vector<10x184xbf16>
    %cst_25 = arith.constant dense<0.000000e+00> : vector<10x512xf32>
    %50 = tpu.matmul %46, %1, %cst_25 {dimension_numbers = #tpu.dot_dimension_numbers<[1], [0], [0], [1], [0, 0, 1, 1], [], []>} : vector<10x184xbf16>, vector<184x512xbf16>, vector<10x512xf32> -> vector<10x512xf32>
    %cst_26 = arith.constant dense<0.000000e+00> : vector<10x512xf32>
    %51 = tpu.matmul %48, %3, %cst_26 {dimension_numbers = #tpu.dot_dimension_numbers<[1], [0], [0], [1], [0, 0, 1, 1], [], []>} : vector<10x184xbf16>, vector<184x512xbf16>, vector<10x512xf32> -> vector<10x512xf32>
    %52 = arith.addf %50, %51 : vector<10x512xf32>
    %cst_27 = arith.constant dense<0.000000e+00> : vector<10x512xf32>
    %53 = tpu.matmul %47, %5, %cst_27 {dimension_numbers = #tpu.dot_dimension_numbers<[1], [0], [0], [1], [0, 0, 1, 1], [], []>} : vector<10x184xbf16>, vector<184x512xbf16>, vector<10x512xf32> -> vector<10x512xf32>
    %54 = arith.addf %52, %53 : vector<10x512xf32>
    %cst_28 = arith.constant dense<0.000000e+00> : vector<10x512xf32>
    %55 = tpu.matmul %48, %1, %cst_28 {dimension_numbers = #tpu.dot_dimension_numbers<[1], [0], [0], [1], [0, 0, 1, 1], [], []>} : vector<10x184xbf16>, vector<184x512xbf16>, vector<10x512xf32> -> vector<10x512xf32>
    %cst_29 = arith.constant dense<0.000000e+00> : vector<10x512xf32>
    %56 = tpu.matmul %47, %3, %cst_29 {dimension_numbers = #tpu.dot_dimension_numbers<[1], [0], [0], [1], [0, 0, 1, 1], [], []>} : vector<10x184xbf16>, vector<184x512xbf16>, vector<10x512xf32> -> vector<10x512xf32>
    %57 = arith.addf %55, %56 : vector<10x512xf32>
    %cst_30 = arith.constant dense<0.000000e+00> : vector<10x512xf32>
    %58 = tpu.matmul %49, %5, %cst_30 {dimension_numbers = #tpu.dot_dimension_numbers<[1], [0], [0], [1], [0, 0, 1, 1], [], []>} : vector<10x184xbf16>, vector<184x512xbf16>, vector<10x512xf32> -> vector<10x512xf32>
    %59 = arith.addf %57, %58 : vector<10x512xf32>
    %60 = arith.maximumf %54, %59 : vector<10x512xf32>
    %61 = vector.extract_strided_slice %60 {offsets = [0, 0], sizes = [10, 256], strides = [1, 1]} : vector<10x512xf32> to vector<10x256xf32>
    %62 = vector.extract_strided_slice %60 {offsets = [0, 256], sizes = [10, 256], strides = [1, 1]} : vector<10x512xf32> to vector<10x256xf32>
    %63 = arith.maximumf %61, %62 : vector<10x256xf32>
    %64 = vector.extract_strided_slice %63 {offsets = [0, 0], sizes = [10, 160], strides = [1, 1]} : vector<10x256xf32> to vector<10x160xf32>
    %65 = vector.broadcast %6 : vector<1x160xf32> to vector<10x160xf32>
    %66 = arith.addf %64, %65 : vector<10x160xf32>
    %cst_31 = arith.constant 0.000000e+00 : f32
    %67 = vector.broadcast %cst_31 : f32 to vector<10x160xf32>
    %68 = arith.maximumf %66, %67 : vector<10x160xf32>
    %69 = arith.truncf %68 : vector<10x160xf32> to vector<10x160xbf16>
    %c1_32 = arith.constant 1 : index
    %c0_33 = arith.constant 0 : index
    %c0_34 = arith.constant 0 : index
    %70 = vector.load %arg4[%c1_32, %c0_33, %c0_34] : memref<2x10x160xbf16, #tpu.memory_space<vmem>>, vector<1x10x160xbf16>
    %71 = vector.shape_cast %70 : vector<1x10x160xbf16> to vector<10x160xbf16>
    %72 = vector.shape_cast %69 : vector<10x160xbf16> to vector<1x10x160xbf16>
    tpu.vector_store %arg4[%c1_32, %c0_33, %c0_34], %72 {strides = array<i32>} : memref<2x10x160xbf16, #tpu.memory_space<vmem>>, vector<1x10x160xbf16>,
    return
  }
  func.func @transform_0(%arg0: i32) -> (i32, i32, i32, i32) {
    %c0_i32 = arith.constant 0 : i32
    %c0_i32_0 = arith.constant 0 : i32
    %c0_i32_1 = arith.constant 0 : i32
    %c0_i32_2 = arith.constant 0 : i32
    return %arg0, %c0_i32, %c0_i32_0, %c0_i32_1 : i32, i32, i32, i32
  }
  func.func @transform_1(%arg0: i32) -> (i32, i32, i32) {
    %c0_i32 = arith.constant 0 : i32
    %c0_i32_0 = arith.constant 0 : i32
    %c0_i32_1 = arith.constant 0 : i32
    %c0_i32_2 = arith.constant 0 : i32
    return %c0_i32, %c0_i32_0, %c0_i32_1 : i32, i32, i32
  }
  func.func @transform_2(%arg0: i32) -> (i32, i32) {
    %c0_i32 = arith.constant 0 : i32
    %c0_i32_0 = arith.constant 0 : i32
    %c0_i32_1 = arith.constant 0 : i32
    return %c0_i32, %c0_i32_0 : i32, i32
  }
  func.func @transform_3(%arg0: i32) -> (i32, i32, i32) {
    %c0_i32 = arith.constant 0 : i32
    %c0_i32_0 = arith.constant 0 : i32
    %c0_i32_1 = arith.constant 0 : i32
    return %arg0, %c0_i32, %c0_i32_0 : i32, i32, i32
  }
}

module attributes {stable_mosaic.version = 11 : i64} {
  func.func @conv_pool_kernel(%arg0: i32, %arg1: memref<2x2x5x160xbf16, #tpu.memory_space<vmem>>, %arg2: memref<3x160x256xbf16, #tpu.memory_space<vmem>>, %arg3: memref<1x128xf32, #tpu.memory_space<vmem>>, %arg4: memref<2x4x128xbf16, #tpu.memory_space<vmem>>) attributes {dimension_semantics = [#tpu.dimension_semantics<parallel>], iteration_bounds = array<i64: 1>, scalar_prefetch = 0 : i64, scratch_operands = 0 : i64, tpu.core_type = #tpu.core_type<tc>, window_params = [{transform_indices = @transform_0, window_bounds = array<i64: 2, 2, 5, 160>}, {pipeline_mode = #tpu.pipeline_mode<synchronous>, transform_indices = @transform_1, window_bounds = array<i64: 3, 160, 256>}, {pipeline_mode = #tpu.pipeline_mode<synchronous>, transform_indices = @transform_2, window_bounds = array<i64: 1, 128>}, {transform_indices = @transform_3, window_bounds = array<i64: 2, 4, 128>}]} {
    %c0 = arith.constant 0 : index
    %c0_0 = arith.constant 0 : index
    %c0_1 = arith.constant 0 : index
    %0 = vector.load %arg2[%c0, %c0_0, %c0_1] : memref<3x160x256xbf16, #tpu.memory_space<vmem>>, vector<1x160x256xbf16>
    %1 = vector.shape_cast %0 : vector<1x160x256xbf16> to vector<160x256xbf16>
    %c1 = arith.constant 1 : index
    %c0_2 = arith.constant 0 : index
    %c0_3 = arith.constant 0 : index
    %2 = vector.load %arg2[%c1, %c0_2, %c0_3] : memref<3x160x256xbf16, #tpu.memory_space<vmem>>, vector<1x160x256xbf16>
    %3 = vector.shape_cast %2 : vector<1x160x256xbf16> to vector<160x256xbf16>
    %c2 = arith.constant 2 : index
    %c0_4 = arith.constant 0 : index
    %c0_5 = arith.constant 0 : index
    %4 = vector.load %arg2[%c2, %c0_4, %c0_5] : memref<3x160x256xbf16, #tpu.memory_space<vmem>>, vector<1x160x256xbf16>
    %5 = vector.shape_cast %4 : vector<1x160x256xbf16> to vector<160x256xbf16>
    %c0_6 = arith.constant 0 : index
    %c0_7 = arith.constant 0 : index
    %6 = vector.load %arg3[%c0_6, %c0_7] : memref<1x128xf32, #tpu.memory_space<vmem>>, vector<1x128xf32>
    %c0_8 = arith.constant 0 : index
    %c0_9 = arith.constant 0 : index
    %c0_10 = arith.constant 0 : index
    %c0_11 = arith.constant 0 : index
    %7 = vector.load %arg1[%c0_8, %c0_9, %c0_10, %c0_11] : memref<2x2x5x160xbf16, #tpu.memory_space<vmem>>, vector<1x2x5x160xbf16>
    %8 = vector.shape_cast %7 : vector<1x2x5x160xbf16> to vector<2x5x160xbf16>
    %9 = vector.extract_strided_slice %8 {offsets = [0, 0, 0], sizes = [1, 5, 160], strides = [1, 1, 1]} : vector<2x5x160xbf16> to vector<1x5x160xbf16>
    %10 = vector.shape_cast %9 : vector<1x5x160xbf16> to vector<5x160xbf16>
    %11 = vector.extract_strided_slice %8 {offsets = [1, 0, 0], sizes = [1, 5, 160], strides = [1, 1, 1]} : vector<2x5x160xbf16> to vector<1x5x160xbf16>
    %12 = vector.shape_cast %11 : vector<1x5x160xbf16> to vector<5x160xbf16>
    %13 = vector.extract_strided_slice %10 {offsets = [0, 0], sizes = [4, 160], strides = [1, 1]} : vector<5x160xbf16> to vector<4x160xbf16>
    %14 = vector.extract_strided_slice %10 {offsets = [1, 0], sizes = [4, 160], strides = [1, 1]} : vector<5x160xbf16> to vector<4x160xbf16>
    %15 = vector.extract_strided_slice %12 {offsets = [0, 0], sizes = [4, 160], strides = [1, 1]} : vector<5x160xbf16> to vector<4x160xbf16>
    %16 = vector.extract_strided_slice %12 {offsets = [1, 0], sizes = [4, 160], strides = [1, 1]} : vector<5x160xbf16> to vector<4x160xbf16>
    %cst = arith.constant dense<0.000000e+00> : vector<4x256xf32>
    %17 = tpu.matmul %13, %1, %cst {dimension_numbers = #tpu.dot_dimension_numbers<[1], [0], [0], [1], [0, 0, 1, 1], [], []>} : vector<4x160xbf16>, vector<160x256xbf16>, vector<4x256xf32> -> vector<4x256xf32>
    %cst_12 = arith.constant dense<0.000000e+00> : vector<4x256xf32>
    %18 = tpu.matmul %15, %3, %cst_12 {dimension_numbers = #tpu.dot_dimension_numbers<[1], [0], [0], [1], [0, 0, 1, 1], [], []>} : vector<4x160xbf16>, vector<160x256xbf16>, vector<4x256xf32> -> vector<4x256xf32>
    %19 = arith.addf %17, %18 : vector<4x256xf32>
    %cst_13 = arith.constant dense<0.000000e+00> : vector<4x256xf32>
    %20 = tpu.matmul %14, %5, %cst_13 {dimension_numbers = #tpu.dot_dimension_numbers<[1], [0], [0], [1], [0, 0, 1, 1], [], []>} : vector<4x160xbf16>, vector<160x256xbf16>, vector<4x256xf32> -> vector<4x256xf32>
    %21 = arith.addf %19, %20 : vector<4x256xf32>
    %cst_14 = arith.constant dense<0.000000e+00> : vector<4x256xf32>
    %22 = tpu.matmul %15, %1, %cst_14 {dimension_numbers = #tpu.dot_dimension_numbers<[1], [0], [0], [1], [0, 0, 1, 1], [], []>} : vector<4x160xbf16>, vector<160x256xbf16>, vector<4x256xf32> -> vector<4x256xf32>
    %cst_15 = arith.constant dense<0.000000e+00> : vector<4x256xf32>
    %23 = tpu.matmul %14, %3, %cst_15 {dimension_numbers = #tpu.dot_dimension_numbers<[1], [0], [0], [1], [0, 0, 1, 1], [], []>} : vector<4x160xbf16>, vector<160x256xbf16>, vector<4x256xf32> -> vector<4x256xf32>
    %24 = arith.addf %22, %23 : vector<4x256xf32>
    %cst_16 = arith.constant dense<0.000000e+00> : vector<4x256xf32>
    %25 = tpu.matmul %16, %5, %cst_16 {dimension_numbers = #tpu.dot_dimension_numbers<[1], [0], [0], [1], [0, 0, 1, 1], [], []>} : vector<4x160xbf16>, vector<160x256xbf16>, vector<4x256xf32> -> vector<4x256xf32>
    %26 = arith.addf %24, %25 : vector<4x256xf32>
    %27 = arith.maximumf %21, %26 : vector<4x256xf32>
    %28 = vector.extract_strided_slice %27 {offsets = [0, 0], sizes = [4, 128], strides = [1, 1]} : vector<4x256xf32> to vector<4x128xf32>
    %29 = vector.extract_strided_slice %27 {offsets = [0, 128], sizes = [4, 128], strides = [1, 1]} : vector<4x256xf32> to vector<4x128xf32>
    %30 = arith.maximumf %28, %29 : vector<4x128xf32>
    %31 = vector.broadcast %6 : vector<1x128xf32> to vector<4x128xf32>
    %32 = arith.addf %30, %31 : vector<4x128xf32>
    %cst_17 = arith.constant 0.000000e+00 : f32
    %33 = vector.broadcast %cst_17 : f32 to vector<4x128xf32>
    %34 = arith.maximumf %32, %33 : vector<4x128xf32>
    %35 = arith.truncf %34 : vector<4x128xf32> to vector<4x128xbf16>
    %c0_18 = arith.constant 0 : index
    %c0_19 = arith.constant 0 : index
    %c0_20 = arith.constant 0 : index
    %36 = vector.load %arg4[%c0_18, %c0_19, %c0_20] : memref<2x4x128xbf16, #tpu.memory_space<vmem>>, vector<1x4x128xbf16>
    %37 = vector.shape_cast %36 : vector<1x4x128xbf16> to vector<4x128xbf16>
    %38 = vector.shape_cast %35 : vector<4x128xbf16> to vector<1x4x128xbf16>
    tpu.vector_store %arg4[%c0_18, %c0_19, %c0_20], %38 {strides = array<i32>} : memref<2x4x128xbf16, #tpu.memory_space<vmem>>, vector<1x4x128xbf16>,
    %c1_21 = arith.constant 1 : index
    %c0_22 = arith.constant 0 : index
    %c0_23 = arith.constant 0 : index
    %c0_24 = arith.constant 0 : index
    %39 = vector.load %arg1[%c1_21, %c0_22, %c0_23, %c0_24] : memref<2x2x5x160xbf16, #tpu.memory_space<vmem>>, vector<1x2x5x160xbf16>
    %40 = vector.shape_cast %39 : vector<1x2x5x160xbf16> to vector<2x5x160xbf16>
    %41 = vector.extract_strided_slice %40 {offsets = [0, 0, 0], sizes = [1, 5, 160], strides = [1, 1, 1]} : vector<2x5x160xbf16> to vector<1x5x160xbf16>
    %42 = vector.shape_cast %41 : vector<1x5x160xbf16> to vector<5x160xbf16>
    %43 = vector.extract_strided_slice %40 {offsets = [1, 0, 0], sizes = [1, 5, 160], strides = [1, 1, 1]} : vector<2x5x160xbf16> to vector<1x5x160xbf16>
    %44 = vector.shape_cast %43 : vector<1x5x160xbf16> to vector<5x160xbf16>
    %45 = vector.extract_strided_slice %42 {offsets = [0, 0], sizes = [4, 160], strides = [1, 1]} : vector<5x160xbf16> to vector<4x160xbf16>
    %46 = vector.extract_strided_slice %42 {offsets = [1, 0], sizes = [4, 160], strides = [1, 1]} : vector<5x160xbf16> to vector<4x160xbf16>
    %47 = vector.extract_strided_slice %44 {offsets = [0, 0], sizes = [4, 160], strides = [1, 1]} : vector<5x160xbf16> to vector<4x160xbf16>
    %48 = vector.extract_strided_slice %44 {offsets = [1, 0], sizes = [4, 160], strides = [1, 1]} : vector<5x160xbf16> to vector<4x160xbf16>
    %cst_25 = arith.constant dense<0.000000e+00> : vector<4x256xf32>
    %49 = tpu.matmul %45, %1, %cst_25 {dimension_numbers = #tpu.dot_dimension_numbers<[1], [0], [0], [1], [0, 0, 1, 1], [], []>} : vector<4x160xbf16>, vector<160x256xbf16>, vector<4x256xf32> -> vector<4x256xf32>
    %cst_26 = arith.constant dense<0.000000e+00> : vector<4x256xf32>
    %50 = tpu.matmul %47, %3, %cst_26 {dimension_numbers = #tpu.dot_dimension_numbers<[1], [0], [0], [1], [0, 0, 1, 1], [], []>} : vector<4x160xbf16>, vector<160x256xbf16>, vector<4x256xf32> -> vector<4x256xf32>
    %51 = arith.addf %49, %50 : vector<4x256xf32>
    %cst_27 = arith.constant dense<0.000000e+00> : vector<4x256xf32>
    %52 = tpu.matmul %46, %5, %cst_27 {dimension_numbers = #tpu.dot_dimension_numbers<[1], [0], [0], [1], [0, 0, 1, 1], [], []>} : vector<4x160xbf16>, vector<160x256xbf16>, vector<4x256xf32> -> vector<4x256xf32>
    %53 = arith.addf %51, %52 : vector<4x256xf32>
    %cst_28 = arith.constant dense<0.000000e+00> : vector<4x256xf32>
    %54 = tpu.matmul %47, %1, %cst_28 {dimension_numbers = #tpu.dot_dimension_numbers<[1], [0], [0], [1], [0, 0, 1, 1], [], []>} : vector<4x160xbf16>, vector<160x256xbf16>, vector<4x256xf32> -> vector<4x256xf32>
    %cst_29 = arith.constant dense<0.000000e+00> : vector<4x256xf32>
    %55 = tpu.matmul %46, %3, %cst_29 {dimension_numbers = #tpu.dot_dimension_numbers<[1], [0], [0], [1], [0, 0, 1, 1], [], []>} : vector<4x160xbf16>, vector<160x256xbf16>, vector<4x256xf32> -> vector<4x256xf32>
    %56 = arith.addf %54, %55 : vector<4x256xf32>
    %cst_30 = arith.constant dense<0.000000e+00> : vector<4x256xf32>
    %57 = tpu.matmul %48, %5, %cst_30 {dimension_numbers = #tpu.dot_dimension_numbers<[1], [0], [0], [1], [0, 0, 1, 1], [], []>} : vector<4x160xbf16>, vector<160x256xbf16>, vector<4x256xf32> -> vector<4x256xf32>
    %58 = arith.addf %56, %57 : vector<4x256xf32>
    %59 = arith.maximumf %53, %58 : vector<4x256xf32>
    %60 = vector.extract_strided_slice %59 {offsets = [0, 0], sizes = [4, 128], strides = [1, 1]} : vector<4x256xf32> to vector<4x128xf32>
    %61 = vector.extract_strided_slice %59 {offsets = [0, 128], sizes = [4, 128], strides = [1, 1]} : vector<4x256xf32> to vector<4x128xf32>
    %62 = arith.maximumf %60, %61 : vector<4x128xf32>
    %63 = vector.broadcast %6 : vector<1x128xf32> to vector<4x128xf32>
    %64 = arith.addf %62, %63 : vector<4x128xf32>
    %cst_31 = arith.constant 0.000000e+00 : f32
    %65 = vector.broadcast %cst_31 : f32 to vector<4x128xf32>
    %66 = arith.maximumf %64, %65 : vector<4x128xf32>
    %67 = arith.truncf %66 : vector<4x128xf32> to vector<4x128xbf16>
    %c1_32 = arith.constant 1 : index
    %c0_33 = arith.constant 0 : index
    %c0_34 = arith.constant 0 : index
    %68 = vector.load %arg4[%c1_32, %c0_33, %c0_34] : memref<2x4x128xbf16, #tpu.memory_space<vmem>>, vector<1x4x128xbf16>
    %69 = vector.shape_cast %68 : vector<1x4x128xbf16> to vector<4x128xbf16>
    %70 = vector.shape_cast %67 : vector<4x128xbf16> to vector<1x4x128xbf16>
    tpu.vector_store %arg4[%c1_32, %c0_33, %c0_34], %70 {strides = array<i32>} : memref<2x4x128xbf16, #tpu.memory_space<vmem>>, vector<1x4x128xbf16>,
    return
  }
  func.func @transform_0(%arg0: i32) -> (i32, i32, i32, i32) {
    %c0_i32 = arith.constant 0 : i32
    %c0_i32_0 = arith.constant 0 : i32
    %c0_i32_1 = arith.constant 0 : i32
    %c0_i32_2 = arith.constant 0 : i32
    return %arg0, %c0_i32, %c0_i32_0, %c0_i32_1 : i32, i32, i32, i32
  }
  func.func @transform_1(%arg0: i32) -> (i32, i32, i32) {
    %c0_i32 = arith.constant 0 : i32
    %c0_i32_0 = arith.constant 0 : i32
    %c0_i32_1 = arith.constant 0 : i32
    %c0_i32_2 = arith.constant 0 : i32
    return %c0_i32, %c0_i32_0, %c0_i32_1 : i32, i32, i32
  }
  func.func @transform_2(%arg0: i32) -> (i32, i32) {
    %c0_i32 = arith.constant 0 : i32
    %c0_i32_0 = arith.constant 0 : i32
    %c0_i32_1 = arith.constant 0 : i32
    return %c0_i32, %c0_i32_0 : i32, i32
  }
  func.func @transform_3(%arg0: i32) -> (i32, i32, i32) {
    %c0_i32 = arith.constant 0 : i32
    %c0_i32_0 = arith.constant 0 : i32
    %c0_i32_1 = arith.constant 0 : i32
    return %arg0, %c0_i32, %c0_i32_0 : i32, i32, i32
  }
}

module attributes {stable_mosaic.version = 11 : i64} {
  func.func @tail_kernel(%arg0: i32, %arg1: memref<8x512xbf16, #tpu.memory_space<vmem>>, %arg2: memref<512x512xbf16, #tpu.memory_space<vmem>>, %arg3: memref<1x64xf32, #tpu.memory_space<vmem>>, %arg4: memref<64x32xbf16, #tpu.memory_space<vmem>>, %arg5: memref<1x32xf32, #tpu.memory_space<vmem>>, %arg6: memref<8x32xbf16, #tpu.memory_space<vmem>>, %arg7: memref<32x2xbf16, #tpu.memory_space<vmem>>, %arg8: memref<1x2xf32, #tpu.memory_space<vmem>>, %arg9: memref<8x2xf32, #tpu.memory_space<vmem>>) attributes {dimension_semantics = [#tpu.dimension_semantics<parallel>], iteration_bounds = array<i64: 1>, scalar_prefetch = 0 : i64, scratch_operands = 0 : i64, tpu.core_type = #tpu.core_type<tc>, window_params = [{transform_indices = @transform_0, window_bounds = array<i64: 8, 512>}, {pipeline_mode = #tpu.pipeline_mode<synchronous>, transform_indices = @transform_1, window_bounds = array<i64: 512, 512>}, {pipeline_mode = #tpu.pipeline_mode<synchronous>, transform_indices = @transform_2, window_bounds = array<i64: 1, 64>}, {pipeline_mode = #tpu.pipeline_mode<synchronous>, transform_indices = @transform_3, window_bounds = array<i64: 64, 32>}, {pipeline_mode = #tpu.pipeline_mode<synchronous>, transform_indices = @transform_4, window_bounds = array<i64: 1, 32>}, {transform_indices = @transform_5, window_bounds = array<i64: 8, 32>}, {pipeline_mode = #tpu.pipeline_mode<synchronous>, transform_indices = @transform_6, window_bounds = array<i64: 32, 2>}, {pipeline_mode = #tpu.pipeline_mode<synchronous>, transform_indices = @transform_7, window_bounds = array<i64: 1, 2>}, {transform_indices = @transform_8, window_bounds = array<i64: 8, 2>}]} {
    %c0 = arith.constant 0 : index
    %c0_0 = arith.constant 0 : index
    %0 = vector.load %arg1[%c0, %c0_0] : memref<8x512xbf16, #tpu.memory_space<vmem>>, vector<8x512xbf16>
    %c0_1 = arith.constant 0 : index
    %c0_2 = arith.constant 0 : index
    %1 = vector.load %arg2[%c0_1, %c0_2] : memref<512x512xbf16, #tpu.memory_space<vmem>>, vector<512x512xbf16>
    %cst = arith.constant dense<0.000000e+00> : vector<8x512xf32>
    %2 = tpu.matmul %0, %1, %cst {dimension_numbers = #tpu.dot_dimension_numbers<[1], [0], [0], [1], [0, 0, 1, 1], [], []>} : vector<8x512xbf16>, vector<512x512xbf16>, vector<8x512xf32> -> vector<8x512xf32>
    %3 = vector.extract_strided_slice %2 {offsets = [0, 0], sizes = [8, 128], strides = [1, 1]} : vector<8x512xf32> to vector<8x128xf32>
    %4 = vector.extract_strided_slice %2 {offsets = [0, 128], sizes = [8, 128], strides = [1, 1]} : vector<8x512xf32> to vector<8x128xf32>
    %5 = arith.maximumf %3, %4 : vector<8x128xf32>
    %6 = vector.extract_strided_slice %2 {offsets = [0, 256], sizes = [8, 128], strides = [1, 1]} : vector<8x512xf32> to vector<8x128xf32>
    %7 = vector.extract_strided_slice %2 {offsets = [0, 384], sizes = [8, 128], strides = [1, 1]} : vector<8x512xf32> to vector<8x128xf32>
    %8 = arith.maximumf %6, %7 : vector<8x128xf32>
    %9 = arith.maximumf %5, %8 : vector<8x128xf32>
    %10 = vector.extract_strided_slice %9 {offsets = [0, 0], sizes = [8, 64], strides = [1, 1]} : vector<8x128xf32> to vector<8x64xf32>
    %c0_3 = arith.constant 0 : index
    %c0_4 = arith.constant 0 : index
    %11 = vector.load %arg3[%c0_3, %c0_4] : memref<1x64xf32, #tpu.memory_space<vmem>>, vector<1x64xf32>
    %12 = vector.broadcast %11 : vector<1x64xf32> to vector<8x64xf32>
    %13 = arith.addf %10, %12 : vector<8x64xf32>
    %cst_5 = arith.constant 0.000000e+00 : f32
    %14 = vector.broadcast %cst_5 : f32 to vector<8x64xf32>
    %15 = arith.maximumf %13, %14 : vector<8x64xf32>
    %16 = arith.truncf %15 : vector<8x64xf32> to vector<8x64xbf16>
    %c0_6 = arith.constant 0 : index
    %c0_7 = arith.constant 0 : index
    %17 = vector.load %arg4[%c0_6, %c0_7] : memref<64x32xbf16, #tpu.memory_space<vmem>>, vector<64x32xbf16>
    %cst_8 = arith.constant dense<0.000000e+00> : vector<8x32xf32>
    %18 = tpu.matmul %16, %17, %cst_8 {dimension_numbers = #tpu.dot_dimension_numbers<[1], [0], [0], [1], [0, 0, 1, 1], [], []>} : vector<8x64xbf16>, vector<64x32xbf16>, vector<8x32xf32> -> vector<8x32xf32>
    %c0_9 = arith.constant 0 : index
    %c0_10 = arith.constant 0 : index
    %19 = vector.load %arg5[%c0_9, %c0_10] : memref<1x32xf32, #tpu.memory_space<vmem>>, vector<1x32xf32>
    %20 = vector.broadcast %19 : vector<1x32xf32> to vector<8x32xf32>
    %21 = arith.addf %18, %20 : vector<8x32xf32>
    %cst_11 = arith.constant 0.000000e+00 : f32
    %22 = vector.broadcast %cst_11 : f32 to vector<8x32xf32>
    %23 = arith.maximumf %21, %22 : vector<8x32xf32>
    %c0_12 = arith.constant 0 : index
    %c0_13 = arith.constant 0 : index
    %24 = vector.load %arg6[%c0_12, %c0_13] : memref<8x32xbf16, #tpu.memory_space<vmem>>, vector<8x32xbf16>
    %25 = arith.extf %24 : vector<8x32xbf16> to vector<8x32xf32>
    %26 = arith.mulf %23, %25 : vector<8x32xf32>
    %27 = arith.truncf %26 : vector<8x32xf32> to vector<8x32xbf16>
    %c0_14 = arith.constant 0 : index
    %c0_15 = arith.constant 0 : index
    %28 = vector.load %arg7[%c0_14, %c0_15] : memref<32x2xbf16, #tpu.memory_space<vmem>>, vector<32x2xbf16>
    %cst_16 = arith.constant dense<0.000000e+00> : vector<8x2xf32>
    %29 = tpu.matmul %27, %28, %cst_16 {dimension_numbers = #tpu.dot_dimension_numbers<[1], [0], [0], [1], [0, 0, 1, 1], [], []>} : vector<8x32xbf16>, vector<32x2xbf16>, vector<8x2xf32> -> vector<8x2xf32>
    %c0_17 = arith.constant 0 : index
    %c0_18 = arith.constant 0 : index
    %30 = vector.load %arg8[%c0_17, %c0_18] : memref<1x2xf32, #tpu.memory_space<vmem>>, vector<1x2xf32>
    %31 = vector.broadcast %30 : vector<1x2xf32> to vector<8x2xf32>
    %32 = arith.addf %29, %31 : vector<8x2xf32>
    %cst_19 = arith.constant dense<0xFF800000> : vector<8xf32>
    %33 = vector.multi_reduction <maximumf>, %32, %cst_19 [1] : vector<8x2xf32> to vector<8xf32>
    %34 = vector.shape_cast %33 : vector<8xf32> to vector<8x1xf32>
    %35 = vector.broadcast %34 : vector<8x1xf32> to vector<8x2xf32>
    %36 = arith.subf %32, %35 : vector<8x2xf32>
    %37 = math.exp %36 : vector<8x2xf32>
    %cst_20 = arith.constant dense<0.000000e+00> : vector<8xf32>
    %38 = vector.multi_reduction <add>, %37, %cst_20 [1] : vector<8x2xf32> to vector<8xf32>
    %39 = vector.shape_cast %38 : vector<8xf32> to vector<8x1xf32>
    %40 = math.log %39 : vector<8x1xf32>
    %41 = arith.addf %40, %34 : vector<8x1xf32>
    %42 = vector.broadcast %41 : vector<8x1xf32> to vector<8x2xf32>
    %43 = arith.subf %32, %42 : vector<8x2xf32>
    %c0_21 = arith.constant 0 : index
    %c0_22 = arith.constant 0 : index
    %44 = vector.load %arg9[%c0_21, %c0_22] : memref<8x2xf32, #tpu.memory_space<vmem>>, vector<8x2xf32>
    tpu.vector_store %arg9[%c0_21, %c0_22], %43 {strides = array<i32>} : memref<8x2xf32, #tpu.memory_space<vmem>>, vector<8x2xf32>,
    return
  }
  func.func @transform_0(%arg0: i32) -> (i32, i32) {
    %c0_i32 = arith.constant 0 : i32
    %c0_i32_0 = arith.constant 0 : i32
    return %arg0, %c0_i32 : i32, i32
  }
  func.func @transform_1(%arg0: i32) -> (i32, i32) {
    %c0_i32 = arith.constant 0 : i32
    %c0_i32_0 = arith.constant 0 : i32
    %c0_i32_1 = arith.constant 0 : i32
    return %c0_i32, %c0_i32_0 : i32, i32
  }
  func.func @transform_2(%arg0: i32) -> (i32, i32) {
    %c0_i32 = arith.constant 0 : i32
    %c0_i32_0 = arith.constant 0 : i32
    %c0_i32_1 = arith.constant 0 : i32
    return %c0_i32, %c0_i32_0 : i32, i32
  }
  func.func @transform_3(%arg0: i32) -> (i32, i32) {
    %c0_i32 = arith.constant 0 : i32
    %c0_i32_0 = arith.constant 0 : i32
    %c0_i32_1 = arith.constant 0 : i32
    return %c0_i32, %c0_i32_0 : i32, i32
  }
  func.func @transform_4(%arg0: i32) -> (i32, i32) {
    %c0_i32 = arith.constant 0 : i32
    %c0_i32_0 = arith.constant 0 : i32
    %c0_i32_1 = arith.constant 0 : i32
    return %c0_i32, %c0_i32_0 : i32, i32
  }
  func.func @transform_5(%arg0: i32) -> (i32, i32) {
    %c0_i32 = arith.constant 0 : i32
    %c0_i32_0 = arith.constant 0 : i32
    return %arg0, %c0_i32 : i32, i32
  }
  func.func @transform_6(%arg0: i32) -> (i32, i32) {
    %c0_i32 = arith.constant 0 : i32
    %c0_i32_0 = arith.constant 0 : i32
    %c0_i32_1 = arith.constant 0 : i32
    return %c0_i32, %c0_i32_0 : i32, i32
  }
  func.func @transform_7(%arg0: i32) -> (i32, i32) {
    %c0_i32 = arith.constant 0 : i32
    %c0_i32_0 = arith.constant 0 : i32
    %c0_i32_1 = arith.constant 0 : i32
    return %c0_i32, %c0_i32_0 : i32, i32
  }
  func.func @transform_8(%arg0: i32) -> (i32, i32) {
    %c0_i32 = arith.constant 0 : i32
    %c0_i32_0 = arith.constant 0 : i32
    return %arg0, %c0_i32 : i32, i32
  }
}

</mosaic_0001>

<bundles_post_ra>
// kernel: tile.18
= control target key start
LH: loop header
LB: loop body
LE: loop exit
PB: predicated region body
PF: predicated region fallthrough
CT: control target
= control target key end

     0   :  { %s34_s0 = inlined_call_operand.vmem [shape: f32[8], index: 0, kind: input, shape index: {}]   ;;  %s35_s1 = inlined_call_operand.vmem [shape: f32[23,8], index: 1, kind: output, shape index: {}]  }
   0x1   :  { %v4_v0 = vld [vmem:[%s34_s0] ss:$0 sm:$0xff] }
   0x2   :  { %5 = vst [vmem:[%s35_s1] sm:$0xff] %v4_v0  ;;  %10 = vst [vmem:[%s35_s1 + $0x8] sm:$0xff] %v4_v0 }
   0x3   :  { %11 = vst [vmem:[%s35_s1 + $0x10] sm:$0xff] %v4_v0 }

// kernel: tile.19
= control target key start
LH: loop header
LB: loop body
LE: loop exit
PB: predicated region body
PF: predicated region fallthrough
CT: control target
= control target key end

     0   :  { %s144_s10 = smov 120   ;;  %s145_s11 = smov 104   ;;  %vm4_vm0 = vcmask 64512   ;;  %vm10_vm1 = vcmask 1048512   ;;  %vm16_vm2 = vcmask 982912   ;;  %vm22_vm3 = vcmask 917312   ;;  %s223_s0 = inlined_call_operand.vmem [shape: f32[23,8], index: 0, kind: input, shape index: {}]   ;;  %s224_s1 = inlined_call_operand.vmem [shape: f32[1,184], index: 1, kind: output, shape index: {}]  }
   0x1   :  { %v113_v0 = vld [vmem:[%s223_s0 + $0xf] sm:$0x1]   ;;  %v115_v1 = vld [vmem:[%s223_s0 + $0xd] sm:$0x1]   ;;  %v114_v2 = vld [vmem:[%s223_s0 + $0xe] sm:$0x1]  }
   0x2   :  { %8 = vrot.lane.b32.xlu0 %v113_v0, %s144_s10  ;;  %20 = vrot.lane.b32.xlu1 %v115_v1, %s145_s11  ;;  %v116_v3 = vld [vmem:[%s223_s0 + $0xc] sm:$0x1]   ;;  %s146_s16 = smov 112   ;;  %s147_s17 = smov 96   ;;  %v117_v4 = vld [vmem:[%s223_s0 + $0xb] sm:$0x1]  }
   0x3   :  { %v118_v5 = vld [vmem:[%s223_s0 + $0xa] sm:$0x1]   ;;  %s148_s22 = smov 88   ;;  %s149_s23 = smov 80   ;;  %v119_v6 = vld [vmem:[%s223_s0 + $0x9] sm:$0x1]  }
   0x4   :  { %v120_v7 = vld [vmem:[%s223_s0 + $0x8] sm:$0x1]   ;;  %s2_s28 = smov 3  ;;  %s61_s29 = smov 3  ;;  %v121_v9 = vld [vmem:[%s223_s0 + $0x7] sm:$0x1]  }
   0x5   :  { %v3_v8 = vld [vmem:[%s223_s0] ss:$16 sm:%s2_s28]   ;;  %s150_s3 = smov 72   ;;  %s151_s4 = smov 64   ;;  %v122_v10 = vld [vmem:[%s223_s0 + $0x6] ss:$16 sm:%s61_s29]  }
   0x6   :  { %14 = vrot.lane.b32.xlu0 %v114_v2, %s146_s16  ;;  %26 = vrot.lane.b32.xlu1 %v116_v3, %s147_s17  ;;  %5 = vst.msk [vmem:[#allocation0] ss:$8 sm:$0x3] %vm4_vm0, %v3_v8   ;;  %s68_s9 = smov 3  ;;  %s75_s10 = smov 3  ;;  %vm28_vm4 = vcmask 851712  }
   0x7   :  { %s152_s11 = smov 56   ;;  %s153_s12 = smov 48   ;;  %v123_v11 = vld [vmem:[%s223_s0 + $0x5] ss:$16 sm:%s68_s9]   ;;  %v124_v12 = vld [vmem:[%s223_s0 + $0x4] ss:$16 sm:%s75_s10]  }
   0x8   :  { %s82_s17 = smov 3  ;;  %s89_s18 = smov 3  ;;  %vm34_vm5 = vcmask 786112   ;;  %vm40_vm6 = vcmask 720512   ;;  %vm46_vm7 = vcmask 654912   ;;  %vm52_vm8 = vcmask 589312  }
   0x9   :  { %s154_s19 = smov 40   ;;  %s155_s20 = smov 32   ;;  %v125_v13 = vld [vmem:[%s223_s0 + $0x3] ss:$16 sm:%s82_s17]   ;;  %v126_v14 = vld [vmem:[%s223_s0 + $0x2] ss:$16 sm:%s89_s18]  }
   0xa   :  { %32 = vrot.lane.b32.xlu0 %v117_v4, %s148_s22  ;;  %38 = vrot.lane.b32.xlu1 %v118_v5, %s149_s23  ;;  %s96_s25 = smov 3  ;;  %s156_s26 = smov 24   ;;  %vm58_vm9 = vcmask 523712   ;;  %vm65_vm10 = vcmask 458112   ;;  %vm72_vm11 = vcmask 392512   ;;  %vm79_vm12 = vcmask 326912  }
   0xb   :  { %s157_s27 = smov 16   ;;  %v127_v15 = vld [vmem:[%s223_s0 + $0x1] ss:$16 sm:%s96_s25]   ;;  %s158_s0 = smov 8   ;;  %vm86_vm13 = vcmask 261312   ;;  %vm93_vm14 = vcmask 195712  }
   0xc   :  { %vm100_vm15 = vcmask 130112  }
   0xe   :  { %44 = vrot.lane.b32.xlu0 %v119_v6, %s150_s3  ;;  %50 = vrot.lane.b32.xlu1 %v120_v7, %s151_s4 }
  0x12   :  { %56 = vrot.lane.b32.xlu0 %v121_v9, %s152_s11  ;;  %63 = vrot.lane.b32.xlu1 %v122_v10, %s153_s12 }
  0x16   :  { %70 = vrot.lane.b32.xlu0 %v123_v11, %s154_s19  ;;  %77 = vrot.lane.b32.xlu1 %v124_v12, %s155_s20 }
  0x1a   :  { %84 = vrot.lane.b32.xlu0 %v125_v13, %s156_s26  ;;  %91 = vrot.lane.b32.xlu1 %v126_v14, %s157_s27 }
  0x1e   :  { %98 = vrot.lane.b32.xlu0 %v127_v15, %s158_s0 }
  0x74   :  { %v9_v16 = vpop.permute.xlu0 %8   ;;  %v21_v17 = vpop.permute.xlu1 %20  }
  0x75   :  { %11 = vst.msk [vmem:[#allocation0] sm:$0x1] %vm10_vm1, %v9_v16  }
  0x78   :  { %v15_v18 = vpop.permute.xlu0 %14   ;;  %v27_v19 = vpop.permute.xlu1 %26  }
  0x79   :  { %17 = vst.msk [vmem:[#allocation0] sm:$0x1] %vm16_vm2, %v15_v18  }
  0x7a   :  { %23 = vst.msk [vmem:[#allocation0] sm:$0x1] %vm22_vm3, %v21_v17  }
  0x7b   :  { %29 = vst.msk [vmem:[#allocation0] sm:$0x1] %vm28_vm4, %v27_v19  }
  0x7c   :  { %v33_v20 = vpop.permute.xlu0 %32   ;;  %v39_v21 = vpop.permute.xlu1 %38  }
  0x7d   :  { %35 = vst.msk [vmem:[#allocation0] sm:$0x1] %vm34_vm5, %v33_v20  }
  0x7e   :  { %41 = vst.msk [vmem:[#allocation0] sm:$0x1] %vm40_vm6, %v39_v21  }
  0x80   :  { %v45_v22 = vpop.permute.xlu0 %44   ;;  %v51_v23 = vpop.permute.xlu1 %50  }
  0x81   :  { %47 = vst.msk [vmem:[#allocation0] sm:$0x1] %vm46_vm7, %v45_v22  }
  0x82   :  { %53 = vst.msk [vmem:[#allocation0] sm:$0x1] %vm52_vm8, %v51_v23  }
  0x84   :  { %v57_v24 = vpop.permute.xlu0 %56   ;;  %v64_v25 = vpop.permute.xlu1 %63  }
  0x85   :  { %59 = vst.msk [vmem:[#allocation0] sm:$0x1] %vm58_vm9, %v57_v24  }
  0x86   :  { %66 = vst.msk [vmem:[#allocation0] ss:$8 sm:$0x3] %vm65_vm10, %v64_v25  }
  0x88   :  { %v71_v26 = vpop.permute.xlu0 %70   ;;  %v78_v27 = vpop.permute.xlu1 %77  }
  0x89   :  { %73 = vst.msk [vmem:[#allocation0] ss:$8 sm:$0x3] %vm72_vm11, %v71_v26  }
  0x8a   :  { %80 = vst.msk [vmem:[#allocation0] ss:$8 sm:$0x3] %vm79_vm12, %v78_v27  }
  0x8c   :  { %v85_v28 = vpop.permute.xlu0 %84   ;;  %v92_v29 = vpop.permute.xlu1 %91  }
  0x8d   :  { %87 = vst.msk [vmem:[#allocation0] ss:$8 sm:$0x3] %vm86_vm13, %v85_v28  }
  0x8e   :  { %94 = vst.msk [vmem:[#allocation0] ss:$8 sm:$0x3] %vm93_vm14, %v92_v29  }
  0x90   :  { %v99_v30 = vpop.permute.xlu0 %98  }
  0x91   :  { %101 = vst.msk [vmem:[#allocation0] ss:$8 sm:$0x3] %vm100_vm15, %v99_v30  }
  0x98   :  { %v105_v31 = vld [vmem:[#allocation0] sm:$0x1]  ;;  %v109_v32 = vld [vmem:[#allocation0 + $0x8] sm:$0x1] }
  0x99   :  { %107 = vst [vmem:[%s224_s1] sm:$0x1] %v105_v31  ;;  %128 = vst [vmem:[%s224_s1 + $0x1] sm:$0x1] %v109_v32 }

// kernel: network_forward.4
= control target key start
LH: loop header
LB: loop body
LE: loop exit
PB: predicated region body
PF: predicated region fallthrough
CT: control target
= control target key end

     0   :  { %vm327_vm0 = vcmask 130048   ;;  %vm739_vm1 = vsmask.f32 7424  ;;  %vm1485_vm2 = vcmask 1043456   ;;  %vm1486_vm3 = vcmask 457732   ;;  %s4523_s1 = inlined_call_operand.vmem [shape: bf16[3,144,512], index: 1, kind: input, shape index: {}]   ;;  %s4524_s0 = inlined_call_operand.vmem [shape: bf16[2,2,24,144], index: 0, kind: input, shape index: {}]   ;;  %s4525_s2 = inlined_call_operand.vmem [shape: f32[1,184], index: 2, kind: input, shape index: {}]   ;;  %s4526_s3 = inlined_call_operand.vmem [shape: bf16[2,23,184], index: 3, kind: output, shape index: {}]  }
   0x1   :  { %v2997_v0 = vld [vmem:[%s4523_s1 + $0x124] ss:$16 sps:$4 sm:$0xff]   ;;  %v3002_v1 = vld [vmem:[%s4523_s1 + $0x12c] ss:$16 sps:$4 sm:$0xff]   ;;  %v3008_v2 = vld [vmem:[%s4523_s1 + $0x120] ss:$16 sps:$4 sm:$0xff]  }
   0x2   :  { %334 = vmatprep.subr.bf16.mxu0 %v2997_v0  ;;  %v3013_v3 = vld [vmem:[%s4523_s1 + $0x128] ss:$16 sps:$4 sm:$0xff]   ;;  %385 = vmatprep.subr.bf16.mxu1 %v3002_v1  ;;  %v3019_v4 = vld [vmem:[%s4523_s1 + $0x144] ss:$16 sps:$4 sm:$0xff]   ;;  %v3026_v5 = vld [vmem:[%s4523_s1 + $0x14c] ss:$16 sps:$4 sm:$0xff]  }
   0x3   :  { %335 = vmatpush1.bf16.msra.mxu0 %v3008_v2  ;;  %386 = vmatpush1.bf16.msra.mxu1 %v3013_v3  ;;  %v3031_v6 = vld [vmem:[%s4523_s1 + $0x140] ss:$16 sps:$4 sm:$0xff]   ;;  %v3037_v7 = vld [vmem:[%s4523_s1 + $0x148] ss:$16 sps:$4 sm:$0xff]   ;;  %v3043_v8 = vld [vmem:[%s4523_s1 + $0x164] ss:$16 sps:$4 sm:$0xff]  }
   0x4   :  { %336 = vmatprep.subr.bf16.mxu0 %v3019_v4  ;;  %387 = vmatprep.subr.bf16.mxu1 %v3026_v5  ;;  %v3048_v9 = vld [vmem:[%s4523_s1 + $0x16c] ss:$16 sps:$4 sm:$0xff]   ;;  %v3053_v10 = vld [vmem:[%s4523_s1 + $0x160] ss:$16 sps:$4 sm:$0xff]   ;;  %v3058_v11 = vld [vmem:[%s4523_s1 + $0x168] ss:$16 sps:$4 sm:$0xff]  }
   0x5   :  { %v3065_v12 = vld [vmem:[%s4523_s1 + $0x184] ss:$16 sps:$4 sm:$0xff]   ;;  %v3072_v13 = vld [vmem:[%s4523_s1 + $0x18c] ss:$16 sps:$4 sm:$0xff]   ;;  %v3077_v14 = vld [vmem:[%s4523_s1 + $0x180] ss:$16 sps:$4 sm:$0xff]  }
   0x6   :  { %v3084_v15 = vld [vmem:[%s4523_s1 + $0x188] ss:$16 sps:$4 sm:$0xff]   ;;  %v3089_v16 = vld [vmem:[%s4523_s1 + $0x1a4] ss:$16 sps:$4 sm:$0xff]   ;;  %v3096_v17 = vld [vmem:[%s4523_s1 + $0x1ac] ss:$16 sps:$4 sm:$0xff]  }
   0x7   :  { %337 = vmatpush1.bf16.msra.mxu0 %v3031_v6  ;;  %388 = vmatpush1.bf16.msra.mxu1 %v3037_v7  ;;  %v3101_v18 = vld [vmem:[%s4523_s1 + $0x1a0] ss:$16 sps:$4 sm:$0xff]   ;;  %v3106_v19 = vld [vmem:[%s4523_s1 + $0x1a8] ss:$16 sps:$4 sm:$0xff]   ;;  %v3113_v20 = vld [vmem:[%s4523_s1 + $0x1c4] ss:$16 sps:$4 sm:$0xff]  }
   0x8   :  { %338 = vmatprep.subr.bf16.mxu0 %v3043_v8  ;;  %389 = vmatprep.subr.bf16.mxu1 %v3048_v9  ;;  %v3120_v21 = vld [vmem:[%s4523_s1 + $0x1cc] ss:$16 sps:$4 sm:$0xff]   ;;  %v3125_v22 = vld [vmem:[%s4523_s1 + $0x1c0] ss:$16 sps:$4 sm:$0xff]   ;;  %v3132_v23 = vld [vmem:[%s4523_s1 + $0x1c8] ss:$16 sps:$4 sm:$0xff]  }
   0x9   :  { %v3137_v24 = vld [vmem:[%s4523_s1 + $0x1e4] ss:$16 sps:$4 sm:$0xff]   ;;  %v3144_v25 = vld [vmem:[%s4523_s1 + $0x1ec] ss:$16 sps:$4 sm:$0xff]   ;;  %v3149_v26 = vld [vmem:[%s4523_s1 + $0x1e0] ss:$16 sps:$4 sm:$0xff]  }
   0xa   :  { %v3154_v27 = vld [vmem:[%s4523_s1 + $0x1e8] ss:$16 sps:$4 sm:$0xff]   ;;  %v3159_v28 = vld [vmem:[%s4523_s1 + $0x204] ss:$16 sps:$4 sm:$0xff]   ;;  %v3173_v30 = vld [vmem:[%s4523_s1 + $0x20c] ss:$16 sps:$4 sm:$0xff]  }
   0xb   :  { %339 = vmatpush1.bf16.msra.mxu0 %v3053_v10  ;;  %390 = vmatpush1.bf16.msra.mxu1 %v3058_v11  ;;  %v3166_v29 = vld [vmem:[%s4524_s0 + $0x1c] ss:$8 sps:$4 sm:$0xff]   ;;  %v3182_v31 = vld [vmem:[%s4523_s1 + $0x200] ss:$16 sps:$4 sm:$0xff]   ;;  %v3187_v32 = vld [vmem:[%s4523_s1 + $0x208] ss:$16 sps:$4 sm:$0xff]  }
   0xc   :  { %340 = vmatprep.subr.bf16.mxu0 %v3065_v12  ;;  %391 = vmatprep.subr.bf16.mxu1 %v3072_v13  ;;  %4652 = vst [vmem:[#allocation2_spill] sm:$0xff] %v3166_v29  ;;  %v3194_v33 = vld [vmem:[%s4523_s1 + $0x224] ss:$16 sps:$4 sm:$0xff]   ;;  %v3201_v34 = vld [vmem:[%s4523_s1 + $0x22c] ss:$16 sps:$4 sm:$0xff]   ;;  %vm4450_vm4 = vmor %vm1486_vm3, %vm1485_vm2 }
   0xd   :  { %2428 = vmatprep.mubr.msk.bf16.mxu0 %vm327_vm0, %v3166_v29  ;;  %2430 = vmatprep.mubr.msk.bf16.mxu1 %vm327_vm0, %v3166_v29  ;;  %v3206_v35 = vld [vmem:[%s4523_s1 + $0x220] ss:$16 sps:$4 sm:$0xff]   ;;  %v3213_v36 = vld [vmem:[%s4523_s1 + $0x228] ss:$16 sps:$4 sm:$0xff]   ;;  %v3218_v37 = vld [vmem:[%s4523_s1 + $0x4] ss:$16 sps:$4 sm:$0xff]  }
   0xe   :  { %v3225_v38 = vld [vmem:[%s4523_s1 + $0xc] ss:$16 sps:$4 sm:$0xff]   ;;  %v3230_v39 = vld [vmem:[%s4524_s0 + $0x18] ss:$8 sps:$4 sm:$0xff]   ;;  %v3247_v42 = vld [vmem:[%s4523_s1 + $0x24] ss:$16 sps:$4 sm:$0xff]  }
   0xf   :  { %341 = vmatpush1.bf16.msra.mxu0 %v3077_v14  ;;  %392 = vmatpush1.bf16.msra.mxu1 %v3084_v15  ;;  %4653 = vst [vmem:[#allocation3_spill] sm:$0xff] %v3230_v39  ;;  %v3235_v40 = vld [vmem:[%s4523_s1] ss:$16 sps:$4 sm:$0xff]   ;;  %v3240_v41 = vld [vmem:[%s4523_s1 + $0x8] ss:$16 sps:$4 sm:$0xff]   ;;  %vm4477_vm7 = vmand %vm1486_vm3, %vm739_vm1 }
  0x10   :  { %342 = vmatprep.subr.bf16.mxu0 %v3089_v16  ;;  %393 = vmatprep.subr.bf16.mxu1 %v3096_v17  ;;  %v3254_v43 = vld [vmem:[%s4523_s1 + $0x2c] ss:$16 sps:$4 sm:$0xff]   ;;  %v3261_v44 = vld [vmem:[%s4523_s1 + $0x20] ss:$16 sps:$4 sm:$0xff]   ;;  %v3268_v45 = vld [vmem:[%s4523_s1 + $0x28] ss:$16 sps:$4 sm:$0xff]  }
  0x11   :  { %v3273_v46 = vld [vmem:[%s4523_s1 + $0x44] ss:$16 sps:$4 sm:$0xff]   ;;  %v3280_v47 = vld [vmem:[%s4523_s1 + $0x4c] ss:$16 sps:$4 sm:$0xff]   ;;  %v3285_v48 = vld [vmem:[%s4523_s1 + $0x40] ss:$16 sps:$4 sm:$0xff]  }
  0x12   :  { %v3290_v49 = vld [vmem:[%s4523_s1 + $0x48] ss:$16 sps:$4 sm:$0xff]   ;;  %v3295_v50 = vld [vmem:[%s4523_s1 + $0x64] ss:$16 sps:$4 sm:$0xff]   ;;  %v3307_v52 = vld [vmem:[%s4523_s1 + $0x6c] ss:$16 sps:$4 sm:$0xff]  }
  0x13   :  { %343 = vmatpush1.bf16.msra.mxu0 %v3101_v18  ;;  %394 = vmatpush1.bf16.msra.mxu1 %v3106_v19  ;;  %4654 = vst [vmem:[#allocation4_spill] sm:$0xff] %v3295_v50  ;;  %v131_v51 = vld [vmem:[%s4524_s0 + $0x28] sm:$0xff]  ;;  %4655 = vst [vmem:[#allocation5_spill] sm:$0xff] %v3307_v52  ;;  %v3316_v55 = vld [vmem:[%s4523_s1 + $0x60] ss:$16 sps:$4 sm:$0xff]  }
  0x14   :  { %344 = vmatprep.subr.bf16.mxu0 %v3113_v20  ;;  %395 = vmatprep.subr.bf16.mxu1 %v3120_v21  ;;  %v3309_v53 = vcombine.high %v131_v51, %v131_v51  ;;  %v3311_v54 = vcombine.low %v131_v51, %v131_v51  ;;  %4658 = vst [vmem:[#allocation8_spill] sm:$0xff] %v3316_v55  ;;  %v3327_v56 = vld [vmem:[%s4523_s1 + $0x68] ss:$16 sps:$4 sm:$0xff]   ;;  %v3334_v57 = vld [vmem:[%s4523_s1 + $0x84] ss:$16 sps:$4 sm:$0xff]  }
  0x15   :  { %4659 = vst [vmem:[#allocation9_spill] sm:$0xff] %v3327_v56  ;;  %4660 = vst [vmem:[#allocation10_spill] sm:$0xff] %v3334_v57  ;;  %v3339_v58 = vld [vmem:[%s4523_s1 + $0x8c] ss:$16 sps:$4 sm:$0xff]   ;;  %v3351_v60 = vld [vmem:[%s4523_s1 + $0x80] ss:$16 sps:$4 sm:$0xff]  }
  0x16   :  { %4656 = vst [vmem:[#allocation6_spill] sm:$0xff] %v3309_v53  ;;  %4657 = vst [vmem:[#allocation7_spill] sm:$0xff] %v3311_v54  ;;  %v3346_v59 = vld [vmem:[%s4524_s0 + $0x4] ss:$8 sps:$4 sm:$0xff]   ;;  %v3358_v61 = vld [vmem:[%s4523_s1 + $0x88] ss:$16 sps:$4 sm:$0xff]  }
  0x17   :  { %345 = vmatpush1.bf16.msra.mxu0 %v3125_v22  ;;  %396 = vmatpush1.bf16.msra.mxu1 %v3132_v23  ;;  %4661 = vst [vmem:[#allocation11_spill] sm:$0xff] %v3339_v58  ;;  %4662 = vst [vmem:[#allocation12_spill] sm:$0xff] %v3351_v60  ;;  %v3365_v62 = vld [vmem:[%s4523_s1 + $0xa4] ss:$16 sps:$4 sm:$0xff]   ;;  %v3370_v63 = vld [vmem:[%s4523_s1 + $0xac] ss:$16 sps:$4 sm:$0xff]  }
  0x18   :  { %346 = vmatprep.subr.bf16.mxu0 %v3137_v24  ;;  %397 = vmatprep.subr.bf16.mxu1 %v3144_v25  ;;  %4663 = vst [vmem:[#allocation13_spill] sm:$0xff] %v3358_v61  ;;  %4664 = vst [vmem:[#allocation14_spill] sm:$0xff] %v3365_v62  ;;  %v3379_v51 = vld [vmem:[%s4523_s1 + $0xa0] ss:$16 sps:$4 sm:$0xff]   ;;  %v3528_v29 = vld [vmem:[%s4523_s1 + $0x284] ss:$16 sps:$4 sm:$0xff]  }
  0x19   :  { %4665 = vst [vmem:[#allocation15_spill] sm:$0xff] %v3370_v63  ;;  %4666 = vst [vmem:[#allocation16_spill] sm:$0xff] %v3379_v51  ;;  %vm1491_vm5 = vsmask.f32 3328 }
  0x1a   :  { %4688 = vst [vmem:[#allocation38_spill] sm:$0xff] %v3528_v29  ;;  %vm4465_vm6 = vmand %vm1485_vm2, %vm1491_vm5 }
  0x1b   :  { %347 = vmatpush1.bf16.msra.mxu0 %v3149_v26  ;;  %398 = vmatpush1.bf16.msra.mxu1 %v3154_v27  ;;  %vm1495_vm8 = vmor %vm4477_vm7, %vm4465_vm6 }
  0x1c   :  { %348 = vmatprep.subr.bf16.mxu0 %v3159_v28  ;;  %399 = vmatprep.subr.bf16.mxu1 %v3173_v30 }
  0x1f   :  { %349 = vmatpush1.bf16.msra.mxu0 %v3182_v31  ;;  %400 = vmatpush1.bf16.msra.mxu1 %v3187_v32 }
  0x20   :  { %350 = vmatprep.subr.bf16.mxu0 %v3194_v33  ;;  %401 = vmatprep.subr.bf16.mxu1 %v3201_v34 }
  0x23   :  { %351 = vmatpush1.bf16.msra.mxu0 %v3206_v35  ;;  %402 = vmatpush1.bf16.msra.mxu1 %v3213_v36 }
  0x24   :  { %637 = vmatprep.subr.bf16.mxu0 %v3218_v37  ;;  %688 = vmatprep.subr.bf16.mxu1 %v3225_v38 }
  0x26   :  { %367 = vmatmul.mubr.bf16.vlgmr.msra.gmra.mrb[0].mxu0 %v3230_v39  ;;  %418 = vmatmul.mubr.bf16.vlgmr.msra.gmra.mrb[0].mxu1 %v3230_v39  ;;  %v3398_v39 = vld [vmem:[%s4523_s1 + $0xcc] ss:$16 sps:$4 sm:$0xff]  }
  0x27   :  { %638 = vmatpush1.bf16.msra.mxu0 %v3235_v40  ;;  %689 = vmatpush1.bf16.msra.mxu1 %v3240_v41  ;;  %4669 = vst [vmem:[#allocation19_spill] sm:$0xff] %v3398_v39 }
  0x28   :  { %639 = vmatprep.subr.bf16.mxu0 %v3247_v42  ;;  %690 = vmatprep.subr.bf16.mxu1 %v3254_v43 }
  0x29   :  { %2429 = vmatprep.mubr.msk.bf16.mxu0 %vm327_vm0, %v3309_v53  ;;  %2431 = vmatprep.mubr.msk.bf16.mxu1 %vm327_vm0, %v3309_v53  ;;  %v3391_v53 = vld [vmem:[%s4523_s1 + $0xc4] ss:$16 sps:$4 sm:$0xff]  }
  0x2a   :  { %4668 = vst [vmem:[#allocation18_spill] sm:$0xff] %v3391_v53 }
  0x2b   :  { %640 = vmatpush1.bf16.msra.mxu0 %v3261_v44  ;;  %691 = vmatpush1.bf16.msra.mxu1 %v3268_v45 }
  0x2c   :  { %641 = vmatprep.subr.bf16.mxu0 %v3273_v46  ;;  %692 = vmatprep.subr.bf16.mxu1 %v3280_v47 }
  0x2e   :  { %377 = vmatmul.mubr.bf16.gmra.mrb[4].mxu0 %v3311_v54  ;;  %428 = vmatmul.mubr.bf16.gmra.mrb[4].mxu1 %v3311_v54  ;;  %v3384_v54 = vld [vmem:[%s4523_s1 + $0xa8] ss:$16 sps:$4 sm:$0xff]  }
  0x2f   :  { %642 = vmatpush1.bf16.msra.mxu0 %v3285_v48  ;;  %693 = vmatpush1.bf16.msra.mxu1 %v3290_v49  ;;  %4667 = vst [vmem:[#allocation17_spill] sm:$0xff] %v3384_v54 }
  0x30   :  { %643 = vmatprep.subr.bf16.mxu0 %v3295_v50  ;;  %694 = vmatprep.subr.bf16.mxu1 %v3307_v52  ;;  %v3553_v52 = vld [vmem:[%s4523_s1 + $0x288] ss:$16 sps:$4 sm:$0xff]  }
  0x31   :  { %2472 = vmatprep.mubr.msk.bf16.mxu0 %vm327_vm0, %v3346_v59  ;;  %2474 = vmatprep.mubr.msk.bf16.mxu1 %vm327_vm0, %v3346_v59  ;;  %4691 = vst [vmem:[#allocation41_spill] sm:$0xff] %v3553_v52 }
  0x33   :  { %644 = vmatpush1.bf16.msra.mxu0 %v3316_v55  ;;  %695 = vmatpush1.bf16.msra.mxu1 %v3327_v56  ;;  %v752_v56 = vshrl.u32 %v3346_v59, 16  ;;  %v3513_v55 = vld [vmem:[%s4523_s1 + $0x260] ss:$16 sps:$4 sm:$0xff]  }
  0x34   :  { %645 = vmatprep.subr.bf16.mxu0 %v3334_v57  ;;  %696 = vmatprep.subr.bf16.mxu1 %v3339_v58  ;;  %v3491_v58 = vld [vmem:[%s4523_s1 + $0x248] ss:$16 sps:$4 sm:$0xff]   ;;  %v3496_v57 = vld [vmem:[%s4523_s1 + $0x264] ss:$16 sps:$4 sm:$0xff]   ;;  %4686 = vst [vmem:[#allocation36_spill] sm:$0xff] %v3513_v55 }
  0x35   :  { %4683 = vst [vmem:[#allocation33_spill] sm:$0xff] %v3491_v58  ;;  %4684 = vst [vmem:[#allocation34_spill] sm:$0xff] %v3496_v57 }
  0x37   :  { %646 = vmatpush1.bf16.msra.mxu0 %v3351_v60  ;;  %697 = vmatpush1.bf16.msra.mxu1 %v3358_v61  ;;  %v3403_v60 = vld [vmem:[%s4523_s1 + $0xc0] ss:$16 sps:$4 sm:$0xff]   ;;  %v3446_v61 = vld [vmem:[%s4523_s1 + $0x10c] ss:$16 sps:$4 sm:$0xff]  }
  0x38   :  { %647 = vmatprep.subr.bf16.mxu0 %v3365_v62  ;;  %698 = vmatprep.subr.bf16.mxu1 %v3370_v63  ;;  %4670 = vst [vmem:[#allocation20_spill] sm:$0xff] %v3403_v60  ;;  %v3410_v62 = vld [vmem:[%s4523_s1 + $0xc8] ss:$16 sps:$4 sm:$0xff]   ;;  %v3417_v63 = vld [vmem:[%s4523_s1 + $0xe4] ss:$16 sps:$4 sm:$0xff]   ;;  %4677 = vst [vmem:[#allocation27_spill] sm:$0xff] %v3446_v61 }
  0x39   :  { %4671 = vst [vmem:[#allocation21_spill] sm:$0xff] %v3410_v62  ;;  %4672 = vst [vmem:[#allocation22_spill] sm:$0xff] %v3417_v63 }
  0x3b   :  { %648 = vmatpush1.bf16.msra.mxu0 %v3379_v51  ;;  %699 = vmatpush1.bf16.msra.mxu1 %v3384_v54  ;;  %v3422_v51 = vld [vmem:[%s4523_s1 + $0xec] ss:$16 sps:$4 sm:$0xff]   ;;  %v3427_v54 = vld [vmem:[%s4523_s1 + $0xe0] ss:$16 sps:$4 sm:$0xff]  }
  0x3c   :  { %649 = vmatprep.subr.bf16.mxu0 %v3391_v53  ;;  %700 = vmatprep.subr.bf16.mxu1 %v3398_v39  ;;  %4673 = vst [vmem:[#allocation23_spill] sm:$0xff] %v3422_v51  ;;  %4674 = vst [vmem:[#allocation24_spill] sm:$0xff] %v3427_v54  ;;  %v3432_v53 = vld [vmem:[%s4523_s1 + $0xe8] ss:$16 sps:$4 sm:$0xff]   ;;  %v3439_v39 = vld [vmem:[%s4523_s1 + $0x104] ss:$16 sps:$4 sm:$0xff]  }
  0x3d   :  { %4675 = vst [vmem:[#allocation25_spill] sm:$0xff] %v3432_v53  ;;  %4676 = vst [vmem:[#allocation26_spill] sm:$0xff] %v3439_v39 }
  0x3f   :  { %650 = vmatpush1.bf16.msra.mxu0 %v3403_v60  ;;  %701 = vmatpush1.bf16.msra.mxu1 %v3410_v62  ;;  %v3451_v60 = vld [vmem:[%s4523_s1 + $0x100] ss:$16 sps:$4 sm:$0xff]   ;;  %v754_v62 = vshll.u32 %v3346_v59, 16  ;;  %v3521_v59 = vld [vmem:[%s4523_s1 + $0x268] ss:$16 sps:$4 sm:$0xff]  }
  0x40   :  { %651 = vmatprep.subr.bf16.mxu0 %v3417_v63  ;;  %702 = vmatprep.subr.bf16.mxu1 %v3422_v51  ;;  %4678 = vst [vmem:[#allocation28_spill] sm:$0xff] %v3451_v60  ;;  %v3458_v63 = vld [vmem:[%s4523_s1 + $0x108] ss:$16 sps:$4 sm:$0xff]   ;;  %4687 = vst [vmem:[#allocation37_spill] sm:$0xff] %v3521_v59 }
  0x41   :  { %4679 = vst [vmem:[#allocation29_spill] sm:$0xff] %v3458_v63  ;;  %v3465_v51 = vld [vmem:[%s4524_s0] ss:$8 sps:$4 sm:$0xff]  }
  0x43   :  { %652 = vmatpush1.bf16.msra.mxu0 %v3427_v54  ;;  %703 = vmatpush1.bf16.msra.mxu1 %v3432_v53  ;;  %v3470_v54 = vld [vmem:[%s4523_s1 + $0x244] ss:$16 sps:$4 sm:$0xff]   ;;  %v3475_v53 = vld [vmem:[%s4523_s1 + $0x24c] ss:$16 sps:$4 sm:$0xff]  }
  0x44   :  { %653 = vmatprep.subr.bf16.mxu0 %v3439_v39  ;;  %704 = vmatprep.subr.bf16.mxu1 %v3446_v61  ;;  %4680 = vst [vmem:[#allocation30_spill] sm:$0xff] %v3470_v54  ;;  %4681 = vst [vmem:[#allocation31_spill] sm:$0xff] %v3475_v53  ;;  %v128_v39 = vld [vmem:[%s4524_s0 + $0x10] sm:$0xff] }
  0x45   :  { %v3483_v61 = vld [vmem:[%s4523_s1 + $0x240] ss:$16 sps:$4 sm:$0xff]  }
  0x46   :  { %4682 = vst [vmem:[#allocation32_spill] sm:$0xff] %v3483_v61 }
  0x47   :  { %654 = vmatpush1.bf16.msra.mxu0 %v3451_v60  ;;  %705 = vmatpush1.bf16.msra.mxu1 %v3458_v63  ;;  %v3503_v60 = vld [vmem:[%s4523_s1 + $0x26c] ss:$16 sps:$4 sm:$0xff]   ;;  %v3505_v63 = vcombine.high %v128_v39, %v128_v39 }
  0x48   :  { %956 = vmatprep.subr.bf16.mxu0 %v3470_v54  ;;  %1007 = vmatprep.subr.bf16.mxu1 %v3475_v53  ;;  %4685 = vst [vmem:[#allocation35_spill] sm:$0xff] %v3503_v60  ;;  %v756_v54 = vrot.slane %v754_v62, 1  ;;  %v3533_v62 = vld [vmem:[%s4523_s1 + $0x28c] ss:$16 sps:$4 sm:$0xff]  }
  0x49   :  { %v758_v53 = vshll.u32 %v3505_v63, 16  ;;  %4689 = vst [vmem:[#allocation39_spill] sm:$0xff] %v3533_v62 }
  0x4a   :  { %670 = vmatmul.mubr.bf16.vlgmr.msra.gmra.mrb[0].mxu0 %v3465_v51  ;;  %721 = vmatmul.mubr.bf16.vlgmr.msra.gmra.mrb[0].mxu1 %v3465_v51 }
  0x4b   :  { %957 = vmatpush1.bf16.msra.mxu0 %v3483_v61  ;;  %1008 = vmatpush1.bf16.msra.mxu1 %v3491_v58  ;;  %v3539_v58 = vcombine.low %v128_v39, %v128_v39  ;;  %v3548_v61 = vld [vmem:[%s4523_s1 + $0x280] ss:$16 sps:$4 sm:$0xff]   ;;  %v3560_v39 = vld [vmem:[%s4523_s1 + $0x2a4] ss:$16 sps:$4 sm:$0xff]  }
  0x4c   :  { %958 = vmatprep.subr.bf16.mxu0 %v3496_v57  ;;  %1009 = vmatprep.subr.bf16.mxu1 %v3503_v60  ;;  %v757_v57 = vor.u32 %v756_v54, %v752_v56  ;;  %v3541_v60 = vrot.slane %v758_v53, 1  ;;  %4690 = vst [vmem:[#allocation40_spill] sm:$0xff] %v3548_v61  ;;  %4692 = vst [vmem:[#allocation42_spill] sm:$0xff] %v3560_v39  ;;  %v3565_v53 = vld [vmem:[%s4523_s1 + $0x2ac] ss:$16 sps:$4 sm:$0xff]  }
  0x4d   :  { %2473 = vmatprep.mubr.msk.bf16.mxu0 %vm327_vm0, %v3505_v63  ;;  %2475 = vmatprep.mubr.msk.bf16.mxu1 %vm327_vm0, %v3505_v63  ;;  %4693 = vst [vmem:[#allocation43_spill] sm:$0xff] %v3565_v53  ;;  %v3578_v56 = vld [vmem:[%s4523_s1 + $0x2a0] ss:$16 sps:$4 sm:$0xff]  }
  0x4e   :  { %v3571_v54 = vsel %vm739_vm1, %v757_v57, %v3541_v60  ;;  %4694 = vst [vmem:[#allocation44_spill] sm:$0xff] %v3578_v56  ;;  %v3590_v57 = vld [vmem:[%s4523_s1 + $0x2c4] ss:$16 sps:$4 sm:$0xff]  }
  0x4f   :  { %959 = vmatpush1.bf16.msra.mxu0 %v3513_v55  ;;  %1010 = vmatpush1.bf16.msra.mxu1 %v3521_v59  ;;  %4696 = vst [vmem:[#allocation46_spill] sm:$0xff] %v3590_v57  ;;  %v748_v55 = vshll.u32 %v3539_v58, 16 }
  0x50   :  { %960 = vmatprep.subr.bf16.mxu0 %v3528_v29  ;;  %1011 = vmatprep.subr.bf16.mxu1 %v3533_v62  ;;  %v3583_v62 = vld [vmem:[%s4523_s1 + $0x2a8] ss:$16 sps:$4 sm:$0xff]   ;;  %v741_v29 = vshrl.u32 %v3465_v51, 16 }
  0x51   :  { %4695 = vst [vmem:[#allocation45_spill] sm:$0xff] %v3583_v62 }
  0x52   :  { %680 = vmatmul.mubr.bf16.gmra.mrb[4].mxu0 %v3539_v58  ;;  %731 = vmatmul.mubr.bf16.gmra.mrb[4].mxu1 %v3539_v58 }
  0x53   :  { %961 = vmatpush1.bf16.msra.mxu0 %v3548_v61  ;;  %1012 = vmatpush1.bf16.msra.mxu1 %v3553_v52  ;;  %v3595_v52 = vld [vmem:[%s4523_s1 + $0x2cc] ss:$16 sps:$4 sm:$0xff]   ;;  %v743_v61 = vshll.u32 %v3465_v51, 16  ;;  %v3693_v51 = vld [vmem:[%s4523_s1 + $0x344] ss:$16 sps:$4 sm:$0xff]  }
  0x54   :  { %962 = vmatprep.subr.bf16.mxu0 %v3560_v39  ;;  %1013 = vmatprep.subr.bf16.mxu1 %v3565_v53  ;;  %4697 = vst [vmem:[#allocation47_spill] sm:$0xff] %v3595_v52  ;;  %v3606_v53 = vld [vmem:[%s4523_s1 + $0x2c0] ss:$16 sps:$4 sm:$0xff]   ;;  %v3611_v39 = vld [vmem:[%s4523_s1 + $0x2c8] ss:$16 sps:$4 sm:$0xff]  }
  0x55   :  { %2512 = vmatprep.mubr.msk.bf16.mxu0 %vm327_vm0, %v3571_v54  ;;  %2514 = vmatprep.mubr.msk.bf16.mxu1 %vm327_vm0, %v3571_v54  ;;  %4698 = vst [vmem:[#allocation48_spill] sm:$0xff] %v3606_v53  ;;  %4699 = vst [vmem:[#allocation49_spill] sm:$0xff] %v3611_v39  ;;  %v745_v59 = vrot.slane %v743_v61, 1  ;;  %v3705_v61 = vld [vmem:[%s4523_s1 + $0x340] ss:$16 sps:$4 sm:$0xff]  }
  0x57   :  { %963 = vmatpush1.bf16.msra.mxu0 %v3578_v56  ;;  %1014 = vmatpush1.bf16.msra.mxu1 %v3583_v62  ;;  %v3618_v56 = vld [vmem:[%s4523_s1 + $0x2e4] ss:$16 sps:$4 sm:$0xff]   ;;  %v3623_v62 = vld [vmem:[%s4523_s1 + $0x2ec] ss:$16 sps:$4 sm:$0xff]  }
  0x58   :  { %964 = vmatprep.subr.bf16.mxu0 %v3590_v57  ;;  %1015 = vmatprep.subr.bf16.mxu1 %v3595_v52  ;;  %4700 = vst [vmem:[#allocation50_spill] sm:$0xff] %v3618_v56  ;;  %4701 = vst [vmem:[#allocation51_spill] sm:$0xff] %v3623_v62  ;;  %v3630_v57 = vld [vmem:[%s4523_s1 + $0x2e0] ss:$16 sps:$4 sm:$0xff]   ;;  %v3635_v52 = vld [vmem:[%s4523_s1 + $0x2e8] ss:$16 sps:$4 sm:$0xff]  }
  0x59   :  { %4702 = vst [vmem:[#allocation52_spill] sm:$0xff] %v3630_v57  ;;  %4703 = vst [vmem:[#allocation53_spill] sm:$0xff] %v3635_v52 }
  0x5b   :  { %965 = vmatpush1.bf16.msra.mxu0 %v3606_v53  ;;  %1016 = vmatpush1.bf16.msra.mxu1 %v3611_v39  ;;  %v3642_v53 = vld [vmem:[%s4523_s1 + $0x304] ss:$16 sps:$4 sm:$0xff]   ;;  %v3647_v39 = vld [vmem:[%s4523_s1 + $0x30c] ss:$16 sps:$4 sm:$0xff]  }
  0x5c   :  { %966 = vmatprep.subr.bf16.mxu0 %v3618_v56  ;;  %1017 = vmatprep.subr.bf16.mxu1 %v3623_v62  ;;  %4704 = vst [vmem:[#allocation54_spill] sm:$0xff] %v3642_v53  ;;  %4705 = vst [vmem:[#allocation55_spill] sm:$0xff] %v3647_v39  ;;  %v3654_v56 = vld [vmem:[%s4523_s1 + $0x300] ss:$16 sps:$4 sm:$0xff]   ;;  %v3659_v62 = vld [vmem:[%s4523_s1 + $0x308] ss:$16 sps:$4 sm:$0xff]  }
  0x5d   :  { %4706 = vst [vmem:[#allocation56_spill] sm:$0xff] %v3654_v56  ;;  %4707 = vst [vmem:[#allocation57_spill] sm:$0xff] %v3659_v62 }
  0x5f   :  { %967 = vmatpush1.bf16.msra.mxu0 %v3630_v57  ;;  %1018 = vmatpush1.bf16.msra.mxu1 %v3635_v52  ;;  %v3667_v52 = vld [vmem:[%s4523_s1 + $0x324] ss:$16 sps:$4 sm:$0xff]   ;;  %v3672_v57 = vld [vmem:[%s4523_s1 + $0x32c] ss:$16 sps:$4 sm:$0xff]  }
  0x60   :  { %968 = vmatprep.subr.bf16.mxu0 %v3642_v53  ;;  %1019 = vmatprep.subr.bf16.mxu1 %v3647_v39  ;;  %4708 = vst [vmem:[#allocation58_spill] sm:$0xff] %v3667_v52  ;;  %4709 = vst [vmem:[#allocation59_spill] sm:$0xff] %v3672_v57  ;;  %v3680_v39 = vld [vmem:[%s4523_s1 + $0x320] ss:$16 sps:$4 sm:$0xff]   ;;  %v3685_v53 = vld [vmem:[%s4523_s1 + $0x328] ss:$16 sps:$4 sm:$0xff]  }
  0x61   :  { %4710 = vst [vmem:[#allocation60_spill] sm:$0xff] %v3680_v39  ;;  %4711 = vst [vmem:[#allocation61_spill] sm:$0xff] %v3685_v53 }
  0x63   :  { %969 = vmatpush1.bf16.msra.mxu0 %v3654_v56  ;;  %1020 = vmatpush1.bf16.msra.mxu1 %v3659_v62  ;;  %v3698_v62 = vld [vmem:[%s4523_s1 + $0x34c] ss:$16 sps:$4 sm:$0xff]   ;;  %v750_v56 = vrot.slane %v748_v55, 1 }
  0x64   :  { %970 = vmatprep.subr.bf16.mxu0 %v3667_v52  ;;  %1021 = vmatprep.subr.bf16.mxu1 %v3672_v57  ;;  %v3710_v57 = vld [vmem:[%s4523_s1 + $0x348] ss:$16 sps:$4 sm:$0xff]   ;;  %v746_v52 = vor.u32 %v745_v59, %v741_v29  ;;  %v762_v29 = vshrl.u32 %v3539_v58, 16  ;;  %v4729_v58 = vld [vmem:[#allocation22_spill] sm:$0xff] }
  0x65   :  { %v4728_v55 = vld [vmem:[#allocation21_spill] sm:$0xff] }
  0x66   :  { %v4732_v59 = vld [vmem:[#allocation25_spill] sm:$0xff] }
  0x67   :  { %971 = vmatpush1.bf16.msra.mxu0 %v3680_v39  ;;  %1022 = vmatpush1.bf16.msra.mxu1 %v3685_v53  ;;  %v765_v39 = vshrl.u32 %v3505_v63, 16  ;;  %v751_v53 = vsel %vm739_vm1, %v746_v52, %v750_v56  ;;  %v4727_v52 = vld [vmem:[#allocation20_spill] sm:$0xff] }
  0x68   :  { %972 = vmatprep.subr.bf16.mxu0 %v3693_v51  ;;  %1023 = vmatprep.subr.bf16.mxu1 %v3698_v62  ;;  %v4731_v63 = vld [vmem:[#allocation24_spill] sm:$0xff] }
  0x69   :  { %v767_v50 = vor.u32 %v765_v39, %v3541_v60  ;;  %v4730_v60 = vld [vmem:[#allocation23_spill] sm:$0xff]  ;;  %v4733_v39 = vld [vmem:[#allocation26_spill] sm:$0xff] }
  0x6b   :  { %973 = vmatpush1.bf16.msra.mxu0 %v3705_v61  ;;  %1024 = vmatpush1.bf16.msra.mxu1 %v3710_v57 }
  0x6c   :  { %1070 = vmatprep.subr.bf16.mxu0 %v2997_v0  ;;  %1121 = vmatprep.subr.bf16.mxu1 %v3002_v1  ;;  %v764_v0 = vor.u32 %v762_v29, %v750_v56  ;;  %v4712_v1 = vld [vmem:[#allocation4_spill] sm:$0xff]  ;;  %v4736_v29 = vld [vmem:[#allocation29_spill] sm:$0xff] }
  0x6d   :  { %v4735_v56 = vld [vmem:[#allocation28_spill] sm:$0xff] }
  0x6e   :  { %989 = vmatmul.mubr.bf16.vlgmr.msra.gmra.mrb[0].mxu0 %v751_v53  ;;  %1040 = vmatmul.mubr.bf16.vlgmr.msra.gmra.mrb[0].mxu1 %v751_v53 }
  0x6f   :  { %1071 = vmatpush1.bf16.msra.mxu0 %v3008_v2  ;;  %1122 = vmatpush1.bf16.msra.mxu1 %v3013_v3  ;;  %v4713_v2 = vld [vmem:[#allocation5_spill] sm:$0xff]  ;;  %v4714_v3 = vld [vmem:[#allocation2_spill] sm:$0xff] }
  0x70   :  { %1072 = vmatprep.subr.bf16.mxu0 %v3019_v4  ;;  %1123 = vmatprep.subr.bf16.mxu1 %v3026_v5  ;;  %v4715_v4 = vld [vmem:[#allocation8_spill] sm:$0xff]  ;;  %v4716_v5 = vld [vmem:[#allocation9_spill] sm:$0xff] }
  0x71   :  { %2513 = vmatprep.mubr.msk.bf16.mxu0 %vm327_vm0, %v767_v50  ;;  %2515 = vmatprep.mubr.msk.bf16.mxu1 %vm327_vm0, %v767_v50 }
  0x73   :  { %1073 = vmatpush1.bf16.msra.mxu0 %v3031_v6  ;;  %1124 = vmatpush1.bf16.msra.mxu1 %v3037_v7  ;;  %v4717_v6 = vld [vmem:[#allocation10_spill] sm:$0xff]  ;;  %v4718_v7 = vld [vmem:[#allocation11_spill] sm:$0xff] }
  0x74   :  { %1074 = vmatprep.subr.bf16.mxu0 %v3043_v8  ;;  %1125 = vmatprep.subr.bf16.mxu1 %v3048_v9  ;;  %v4719_v8 = vld [vmem:[#allocation12_spill] sm:$0xff]  ;;  %v4720_v9 = vld [vmem:[#allocation13_spill] sm:$0xff] }
  0x76   :  { %999 = vmatmul.mubr.bf16.gmra.mrb[4].mxu0 %v764_v0  ;;  %1050 = vmatmul.mubr.bf16.gmra.mrb[4].mxu1 %v764_v0 }
  0x77   :  { %1075 = vmatpush1.bf16.msra.mxu0 %v3053_v10  ;;  %1126 = vmatpush1.bf16.msra.mxu1 %v3058_v11  ;;  %v4721_v10 = vld [vmem:[#allocation14_spill] sm:$0xff]  ;;  %v4722_v11 = vld [vmem:[#allocation15_spill] sm:$0xff] }
  0x78   :  { %1076 = vmatprep.subr.bf16.mxu0 %v3065_v12  ;;  %1127 = vmatprep.subr.bf16.mxu1 %v3072_v13  ;;  %v4723_v12 = vld [vmem:[#allocation16_spill] sm:$0xff]  ;;  %v4724_v13 = vld [vmem:[#allocation17_spill] sm:$0xff] }
  0x79   :  { %2516 = vmatprep.mubr.msk.bf16.mxu0 %vm327_vm0, %v3571_v54  ;;  %2518 = vmatprep.mubr.msk.bf16.mxu1 %vm327_vm0, %v3571_v54  ;;  %v1288_v54 = vshll.u32 %v4714_v3, 16 }
  0x7b   :  { %1077 = vmatpush1.bf16.msra.mxu0 %v3077_v14  ;;  %1128 = vmatpush1.bf16.msra.mxu1 %v3084_v15  ;;  %v4725_v14 = vld [vmem:[#allocation18_spill] sm:$0xff] }
  0x7c   :  { %1078 = vmatprep.subr.bf16.mxu0 %v3089_v16  ;;  %1129 = vmatprep.subr.bf16.mxu1 %v3096_v17 }
  0x7f   :  { %1079 = vmatpush1.bf16.msra.mxu0 %v3101_v18  ;;  %1130 = vmatpush1.bf16.msra.mxu1 %v3106_v19 }
  0x80   :  { %1080 = vmatprep.subr.bf16.mxu0 %v3113_v20  ;;  %1131 = vmatprep.subr.bf16.mxu1 %v3120_v21 }
  0x83   :  { %1081 = vmatpush1.bf16.msra.mxu0 %v3125_v22  ;;  %1132 = vmatpush1.bf16.msra.mxu1 %v3132_v23 }
  0x84   :  { %1082 = vmatprep.subr.bf16.mxu0 %v3137_v24  ;;  %1133 = vmatprep.subr.bf16.mxu1 %v3144_v25 }
  0x87   :  { %1083 = vmatpush1.bf16.msra.mxu0 %v3149_v26  ;;  %1134 = vmatpush1.bf16.msra.mxu1 %v3154_v27 }
  0x88   :  { %1084 = vmatprep.subr.bf16.mxu0 %v3159_v28  ;;  %1135 = vmatprep.subr.bf16.mxu1 %v3173_v30 }
  0x8b   :  { %1085 = vmatpush1.bf16.msra.mxu0 %v3182_v31  ;;  %1136 = vmatpush1.bf16.msra.mxu1 %v3187_v32 }
  0x8c   :  { %1086 = vmatprep.subr.bf16.mxu0 %v3194_v33  ;;  %1137 = vmatprep.subr.bf16.mxu1 %v3201_v34 }
  0x8f   :  { %1087 = vmatpush1.bf16.msra.mxu0 %v3206_v35  ;;  %1138 = vmatpush1.bf16.msra.mxu1 %v3213_v36 }
  0x90   :  { %1172 = vmatprep.subr.bf16.mxu0 %v3218_v37  ;;  %1223 = vmatprep.subr.bf16.mxu1 %v3225_v38 }
  0x92   :  { %1103 = vmatmul.mubr.bf16.vlgmr.msra.gmra.mrb[8].mxu0 %v751_v53  ;;  %1154 = vmatmul.mubr.bf16.vlgmr.msra.gmra.mrb[8].mxu1 %v751_v53  ;;  %v4734_v53 = vld [vmem:[#allocation27_spill] sm:$0xff] }
  0x93   :  { %1173 = vmatpush1.bf16.msra.mxu0 %v3235_v40  ;;  %1224 = vmatpush1.bf16.msra.mxu1 %v3240_v41 }
  0x94   :  { %1174 = vmatprep.subr.bf16.mxu0 %v3247_v42  ;;  %1225 = vmatprep.subr.bf16.mxu1 %v3254_v43 }
  0x95   :  { %2517 = vmatprep.mubr.msk.bf16.mxu0 %vm327_vm0, %v767_v50  ;;  %2519 = vmatprep.mubr.msk.bf16.mxu1 %vm327_vm0, %v767_v50  ;;  %v4726_v50 = vld [vmem:[#allocation19_spill] sm:$0xff] }
  0x97   :  { %1175 = vmatpush1.bf16.msra.mxu0 %v3261_v44  ;;  %1226 = vmatpush1.bf16.msra.mxu1 %v3268_v45 }
  0x98   :  { %1176 = vmatprep.subr.bf16.mxu0 %v3273_v46  ;;  %1227 = vmatprep.subr.bf16.mxu1 %v3280_v47 }
  0x9a   :  { %1113 = vmatmul.mubr.bf16.gmra.mrb[12].mxu0 %v764_v0  ;;  %1164 = vmatmul.mubr.bf16.gmra.mrb[12].mxu1 %v764_v0  ;;  %v4737_v0 = vld [vmem:[#allocation30_spill] sm:$0xff] }
  0x9b   :  { %1177 = vmatpush1.bf16.msra.mxu0 %v3285_v48  ;;  %1228 = vmatpush1.bf16.msra.mxu1 %v3290_v49 }
  0x9c   :  { %1178 = vmatprep.subr.bf16.mxu0 %v4712_v1  ;;  %1229 = vmatprep.subr.bf16.mxu1 %v4713_v2 }
  0x9d   :  { %2520 = vmatprep.mubr.msk.bf16.mxu0 %vm327_vm0, %v4714_v3  ;;  %2522 = vmatprep.mubr.msk.bf16.mxu1 %vm327_vm0, %v4714_v3 }
  0x9f   :  { %1179 = vmatpush1.bf16.msra.mxu0 %v4715_v4  ;;  %1230 = vmatpush1.bf16.msra.mxu1 %v4716_v5 }
  0xa0   :  { %1180 = vmatprep.subr.bf16.mxu0 %v4717_v6  ;;  %1231 = vmatprep.subr.bf16.mxu1 %v4718_v7 }
  0xa3   :  { %1181 = vmatpush1.bf16.msra.mxu0 %v4719_v8  ;;  %1232 = vmatpush1.bf16.msra.mxu1 %v4720_v9 }
  0xa4   :  { %1182 = vmatprep.subr.bf16.mxu0 %v4721_v10  ;;  %1233 = vmatprep.subr.bf16.mxu1 %v4722_v11 }
  0xa7   :  { %1183 = vmatpush1.bf16.msra.mxu0 %v4723_v12  ;;  %1234 = vmatpush1.bf16.msra.mxu1 %v4724_v13  ;;  %v4771_v13 = vld [vmem:[#allocation61_spill] sm:$0xff] }
  0xa8   :  { %1184 = vmatprep.subr.bf16.mxu0 %v4725_v14  ;;  %1235 = vmatprep.subr.bf16.mxu1 %v4726_v50  ;;  %v4747_v50 = vld [vmem:[#allocation38_spill] sm:$0xff]  ;;  %v4751_v14 = vld [vmem:[#allocation41_spill] sm:$0xff] }
  0xab   :  { %1185 = vmatpush1.bf16.msra.mxu0 %v4727_v52  ;;  %1236 = vmatpush1.bf16.msra.mxu1 %v4728_v55  ;;  %v4738_v55 = vld [vmem:[#allocation31_spill] sm:$0xff]  ;;  %v4742_v52 = vld [vmem:[#allocation33_spill] sm:$0xff] }
  0xac   :  { %1186 = vmatprep.subr.bf16.mxu0 %v4729_v58  ;;  %1237 = vmatprep.subr.bf16.mxu1 %v4730_v60  ;;  %v4739_v58 = vld [vmem:[#allocation3_spill] sm:$0xff] }
  0xaf   :  { %1187 = vmatpush1.bf16.msra.mxu0 %v4731_v63  ;;  %1238 = vmatpush1.bf16.msra.mxu1 %v4732_v59  ;;  %v1286_v59 = vshrl.u32 %v4714_v3, 16  ;;  %v1290_v63 = vrot.slane %v1288_v54, 1  ;;  %v4745_v3 = vld [vmem:[#allocation36_spill] sm:$0xff]  ;;  %v4746_v54 = vld [vmem:[#allocation37_spill] sm:$0xff] }
  0xb0   :  { %1188 = vmatprep.subr.bf16.mxu0 %v4733_v39  ;;  %1239 = vmatprep.subr.bf16.mxu1 %v4734_v53  ;;  %v4740_v39 = vld [vmem:[#allocation6_spill] sm:$0xff]  ;;  %v4741_v53 = vld [vmem:[#allocation32_spill] sm:$0xff] }
  0xb1   :  { %v1292_v60 = vshll.u32 %v4740_v39, 16 }
  0xb3   :  { %1189 = vmatpush1.bf16.msra.mxu0 %v4735_v56  ;;  %1240 = vmatpush1.bf16.msra.mxu1 %v4736_v29  ;;  %v4743_v56 = vld [vmem:[#allocation34_spill] sm:$0xff]  ;;  %v4744_v29 = vld [vmem:[#allocation35_spill] sm:$0xff] }
  0xb4   :  { %1310 = vmatprep.subr.bf16.mxu0 %v4737_v0  ;;  %1361 = vmatprep.subr.bf16.mxu1 %v4738_v55  ;;  %v1291_v55 = vor.u32 %v1290_v63, %v1286_v59  ;;  %v1294_v0 = vrot.slane %v1292_v60, 1  ;;  %v4752_v63 = vld [vmem:[#allocation42_spill] sm:$0xff]  ;;  %v4753_v60 = vld [vmem:[#allocation43_spill] sm:$0xff]  ;;  %v4754_v59 = vld [vmem:[#allocation44_spill] sm:$0xff] }
  0xb6   :  { %1205 = vmatmul.mubr.bf16.vlgmr.msra.gmra.mrb[8].mxu0 %v4739_v58  ;;  %1256 = vmatmul.mubr.bf16.vlgmr.msra.gmra.mrb[8].mxu1 %v4739_v58 }
  0xb7   :  { %1311 = vmatpush1.bf16.msra.mxu0 %v4741_v53  ;;  %1362 = vmatpush1.bf16.msra.mxu1 %v4742_v52  ;;  %v4748_v53 = vld [vmem:[#allocation39_spill] sm:$0xff] }
  0xb8   :  { %1312 = vmatprep.subr.bf16.mxu0 %v4743_v56  ;;  %1363 = vmatprep.subr.bf16.mxu1 %v4744_v29  ;;  %v4749_v52 = vld [vmem:[#allocation7_spill] sm:$0xff]  ;;  %v1295_v29 = vsel %vm739_vm1, %v1291_v55, %v1294_v0  ;;  %v4750_v56 = vld [vmem:[#allocation40_spill] sm:$0xff] }
  0xb9   :  { %2521 = vmatprep.mubr.msk.bf16.mxu0 %vm327_vm0, %v4740_v39  ;;  %2523 = vmatprep.mubr.msk.bf16.mxu1 %vm327_vm0, %v4740_v39  ;;  %v4758_v55 = vld [vmem:[#allocation48_spill] sm:$0xff] }
  0xbb   :  { %1313 = vmatpush1.bf16.msra.mxu0 %v4745_v3  ;;  %1364 = vmatpush1.bf16.msra.mxu1 %v4746_v54  ;;  %v4757_v54 = vld [vmem:[#allocation47_spill] sm:$0xff]  ;;  %v4763_v3 = vld [vmem:[#allocation53_spill] sm:$0xff] }
  0xbc   :  { %1314 = vmatprep.subr.bf16.mxu0 %v4747_v50  ;;  %1365 = vmatprep.subr.bf16.mxu1 %v4748_v53  ;;  %v4755_v53 = vld [vmem:[#allocation45_spill] sm:$0xff]  ;;  %v4756_v50 = vld [vmem:[#allocation46_spill] sm:$0xff] }
  0xbe   :  { %1215 = vmatmul.mubr.bf16.gmra.mrb[12].mxu0 %v4749_v52  ;;  %1266 = vmatmul.mubr.bf16.gmra.mrb[12].mxu1 %v4749_v52 }
  0xbf   :  { %1315 = vmatpush1.bf16.msra.mxu0 %v4750_v56  ;;  %1366 = vmatpush1.bf16.msra.mxu1 %v4751_v14  ;;  %v4759_v56 = vld [vmem:[#allocation49_spill] sm:$0xff]  ;;  %v4760_v14 = vld [vmem:[#allocation50_spill] sm:$0xff] }
  0xc0   :  { %1316 = vmatprep.subr.bf16.mxu0 %v4752_v63  ;;  %1367 = vmatprep.subr.bf16.mxu1 %v4753_v60  ;;  %v4761_v63 = vld [vmem:[#allocation51_spill] sm:$0xff]  ;;  %v4762_v60 = vld [vmem:[#allocation52_spill] sm:$0xff] }
  0xc1   :  { %2524 = vmatprep.mubr.msk.bf16.mxu0 %vm327_vm0, %v1295_v29  ;;  %2526 = vmatprep.mubr.msk.bf16.mxu1 %vm327_vm0, %v1295_v29  ;;  %v1277_v29 = vshll.u32 %v4739_v58, 16 }
  0xc3   :  { %1317 = vmatpush1.bf16.msra.mxu0 %v4754_v59  ;;  %1368 = vmatpush1.bf16.msra.mxu1 %v4755_v53  ;;  %v4764_v59 = vld [vmem:[#allocation54_spill] sm:$0xff]  ;;  %v4765_v53 = vld [vmem:[#allocation55_spill] sm:$0xff] }
  0xc4   :  { %1318 = vmatprep.subr.bf16.mxu0 %v4756_v50  ;;  %1369 = vmatprep.subr.bf16.mxu1 %v4757_v54  ;;  %v4766_v50 = vld [vmem:[#allocation56_spill] sm:$0xff]  ;;  %v4767_v54 = vld [vmem:[#allocation57_spill] sm:$0xff] }
  0xc7   :  { %1319 = vmatpush1.bf16.msra.mxu0 %v4758_v55  ;;  %1370 = vmatpush1.bf16.msra.mxu1 %v4759_v56  ;;  %v1275_v56 = vshrl.u32 %v4739_v58, 16  ;;  %v1279_v55 = vrot.slane %v1277_v29, 1  ;;  %v3862_v29 = vld [vmem:[%s4523_s1 + $0x124] ss:$16 sps:$4 sm:$0xff]  }
  0xc8   :  { %1320 = vmatprep.subr.bf16.mxu0 %v4760_v14  ;;  %1371 = vmatprep.subr.bf16.mxu1 %v4761_v63  ;;  %v1282_v14 = vshll.u32 %v4749_v52, 16  ;;  %v4768_v63 = vld [vmem:[#allocation58_spill] sm:$0xff] }
  0xca   :  { %v1284_v12 = vrot.slane %v1282_v14, 1  ;;  %v3868_v14 = vld [vmem:[%s4523_s1 + $0x12c] ss:$16 sps:$4 sm:$0xff]  }
  0xcb   :  { %1321 = vmatpush1.bf16.msra.mxu0 %v4762_v60  ;;  %1372 = vmatpush1.bf16.msra.mxu1 %v4763_v3  ;;  %v4769_v60 = vld [vmem:[#allocation59_spill] sm:$0xff]  ;;  %v4770_v3 = vld [vmem:[#allocation60_spill] sm:$0xff] }
  0xcc   :  { %1322 = vmatprep.subr.bf16.mxu0 %v4764_v59  ;;  %1373 = vmatprep.subr.bf16.mxu1 %v4765_v53  ;;  %v1280_v59 = vor.u32 %v1279_v55, %v1275_v56  ;;  %v1296_v56 = vshrl.u32 %v4749_v52, 16  ;;  %v3881_v55 = vld [vmem:[%s4523_s1 + $0x128] ss:$16 sps:$4 sm:$0xff]   ;;  %v3893_v52 = vld [vmem:[%s4523_s1 + $0x14c] ss:$16 sps:$4 sm:$0xff]  }
  0xcd   :  { %4773 = vst [vmem:[#allocation5_spill] sm:$0xff] %v3893_v52 }
  0xce   :  { %v1285_v58 = vsel %vm739_vm1, %v1280_v59, %v1284_v12  ;;  %v3875_v59 = vld [vmem:[%s4523_s1 + $0x120] ss:$16 sps:$4 sm:$0xff]  }
  0xcf   :  { %1323 = vmatpush1.bf16.msra.mxu0 %v4766_v50  ;;  %1374 = vmatpush1.bf16.msra.mxu1 %v4767_v54  ;;  %v1299_v54 = vshrl.u32 %v4740_v39, 16 }
  0xd0   :  { %1324 = vmatprep.subr.bf16.mxu0 %v4768_v63  ;;  %1375 = vmatprep.subr.bf16.mxu1 %v4769_v60 }
  0xd1   :  { %v1301_v39 = vor.u32 %v1299_v54, %v1294_v0  ;;  %v3887_v0 = vld [vmem:[%s4523_s1 + $0x144] ss:$16 sps:$4 sm:$0xff]   ;;  %v1298_v54 = vor.u32 %v1296_v56, %v1284_v12  ;;  %v3919_v12 = vld [vmem:[%s4523_s1 + $0x16c] ss:$16 sps:$4 sm:$0xff]   ;;  %v3930_v56 = vld [vmem:[%s4523_s1 + $0x160] ss:$16 sps:$4 sm:$0xff]  }
  0xd2   :  { %4772 = vst [vmem:[#allocation4_spill] sm:$0xff] %v3887_v0  ;;  %4775 = vst [vmem:[#allocation8_spill] sm:$0xff] %v3919_v12 }
  0xd3   :  { %1325 = vmatpush1.bf16.msra.mxu0 %v4770_v3  ;;  %1376 = vmatpush1.bf16.msra.mxu1 %v4771_v13 }
  0xd4   :  { %1326 = vmatprep.subr.bf16.mxu0 %v3693_v51  ;;  %1377 = vmatprep.subr.bf16.mxu1 %v3698_v62 }
  0xd7   :  { %1327 = vmatpush1.bf16.msra.mxu0 %v3705_v61  ;;  %1378 = vmatpush1.bf16.msra.mxu1 %v3710_v57 }
  0xd8   :  { %1527 = vmatprep.subr.bf16.mxu0 %v3862_v29  ;;  %1578 = vmatprep.subr.bf16.mxu1 %v3868_v14 }
  0xda   :  { %1343 = vmatmul.mubr.bf16.vlgmr.msra.gmra.mrb[8].mxu0 %v1285_v58  ;;  %1394 = vmatmul.mubr.bf16.vlgmr.msra.gmra.mrb[8].mxu1 %v1285_v58  ;;  %v3901_v58 = vld [vmem:[%s4523_s1 + $0x140] ss:$16 sps:$4 sm:$0xff]  }
  0xdb   :  { %1528 = vmatpush1.bf16.msra.mxu0 %v3875_v59  ;;  %1579 = vmatpush1.bf16.msra.mxu1 %v3881_v55 }
  0xdc   :  { %1529 = vmatprep.subr.bf16.mxu0 %v3887_v0  ;;  %1580 = vmatprep.subr.bf16.mxu1 %v3893_v52  ;;  %v3907_v0 = vld [vmem:[%s4523_s1 + $0x148] ss:$16 sps:$4 sm:$0xff]   ;;  %v3913_v52 = vld [vmem:[%s4523_s1 + $0x164] ss:$16 sps:$4 sm:$0xff]  }
  0xdd   :  { %2525 = vmatprep.mubr.msk.bf16.mxu0 %vm327_vm0, %v1301_v39  ;;  %2527 = vmatprep.mubr.msk.bf16.mxu1 %vm327_vm0, %v1301_v39  ;;  %4774 = vst [vmem:[#allocation2_spill] sm:$0xff] %v3913_v52  ;;  %v3925_v39 = vld [vmem:[%s4524_s0 + $0x4c] ss:$8 sps:$4 sm:$0xff]  }
  0xdf   :  { %1530 = vmatpush1.bf16.msra.mxu0 %v3901_v58  ;;  %1581 = vmatpush1.bf16.msra.mxu1 %v3907_v0 }
  0xe0   :  { %1531 = vmatprep.subr.bf16.mxu0 %v3913_v52  ;;  %1582 = vmatprep.subr.bf16.mxu1 %v3919_v12  ;;  %v3936_v52 = vld [vmem:[%s4523_s1 + $0x168] ss:$16 sps:$4 sm:$0xff]   ;;  %v3942_v12 = vld [vmem:[%s4523_s1 + $0x184] ss:$16 sps:$4 sm:$0xff]  }
  0xe1   :  { %4776 = vst [vmem:[#allocation9_spill] sm:$0xff] %v3936_v52 }
  0xe2   :  { %1353 = vmatmul.mubr.bf16.gmra.mrb[12].mxu0 %v1298_v54  ;;  %1404 = vmatmul.mubr.bf16.gmra.mrb[12].mxu1 %v1298_v54  ;;  %v3948_v54 = vld [vmem:[%s4523_s1 + $0x18c] ss:$16 sps:$4 sm:$0xff]  }
  0xe3   :  { %1532 = vmatpush1.bf16.msra.mxu0 %v3930_v56  ;;  %1583 = vmatpush1.bf16.msra.mxu1 %v3936_v52  ;;  %v3958_v52 = vld [vmem:[%s4523_s1 + $0x180] ss:$16 sps:$4 sm:$0xff]  }
  0xe4   :  { %1533 = vmatprep.subr.bf16.mxu0 %v3942_v12  ;;  %1584 = vmatprep.subr.bf16.mxu1 %v3948_v54 }
  0xe5   :  { %2541 = vmatprep.mubr.msk.bf16.mxu0 %vm327_vm0, %v3925_v39  ;;  %2543 = vmatprep.mubr.msk.bf16.mxu1 %vm327_vm0, %v3925_v39 }
  0xe7   :  { %1534 = vmatpush1.bf16.msra.mxu0 %v3958_v52  ;;  %1585 = vmatpush1.bf16.msra.mxu1 %v3084_v15  ;;  %v3983_v15 = vld [vmem:[%s4524_s0 + $0x48] ss:$8 sps:$4 sm:$0xff]  }
  0xe8   :  { %1535 = vmatprep.subr.bf16.mxu0 %v3089_v16  ;;  %1586 = vmatprep.subr.bf16.mxu1 %v3096_v17  ;;  %v2536_v16 = vld [vmem:[%s4524_s0 + $0x58] sm:$0xff] }
  0xe9   :  { %v3992_v17 = vcombine.high %v2536_v16, %v2536_v16 }
  0xeb   :  { %1536 = vmatpush1.bf16.msra.mxu0 %v3101_v18  ;;  %1587 = vmatpush1.bf16.msra.mxu1 %v3106_v19  ;;  %v4004_v18 = vcombine.low %v2536_v16, %v2536_v16  ;;  %v2889_v19 = vld [vmem:[%s4524_s0 + $0x34] ss:$8 sps:$4 sm:$0xff]   ;;  %v4804_v16 = vld [vmem:[#allocation43_spill] sm:$0xff] }
  0xec   :  { %1537 = vmatprep.subr.bf16.mxu0 %v3113_v20  ;;  %1588 = vmatprep.subr.bf16.mxu1 %v3120_v21  ;;  %v4777_v20 = vld [vmem:[#allocation16_spill] sm:$0xff]  ;;  %v4778_v21 = vld [vmem:[#allocation17_spill] sm:$0xff] }
  0xef   :  { %1538 = vmatpush1.bf16.msra.mxu0 %v3125_v22  ;;  %1589 = vmatpush1.bf16.msra.mxu1 %v3132_v23  ;;  %v4779_v22 = vld [vmem:[#allocation18_spill] sm:$0xff]  ;;  %v4780_v23 = vld [vmem:[#allocation19_spill] sm:$0xff] }
  0xf0   :  { %1539 = vmatprep.subr.bf16.mxu0 %v3137_v24  ;;  %1590 = vmatprep.subr.bf16.mxu1 %v3144_v25  ;;  %v4781_v24 = vld [vmem:[#allocation20_spill] sm:$0xff]  ;;  %v4782_v25 = vld [vmem:[#allocation21_spill] sm:$0xff] }
  0xf3   :  { %1540 = vmatpush1.bf16.msra.mxu0 %v3149_v26  ;;  %1591 = vmatpush1.bf16.msra.mxu1 %v3154_v27  ;;  %v4783_v26 = vld [vmem:[#allocation22_spill] sm:$0xff]  ;;  %v4784_v27 = vld [vmem:[#allocation23_spill] sm:$0xff] }
  0xf4   :  { %1541 = vmatprep.subr.bf16.mxu0 %v3159_v28  ;;  %1592 = vmatprep.subr.bf16.mxu1 %v3173_v30  ;;  %v4785_v28 = vld [vmem:[#allocation24_spill] sm:$0xff]  ;;  %v4786_v30 = vld [vmem:[#allocation25_spill] sm:$0xff] }
  0xf7   :  { %1542 = vmatpush1.bf16.msra.mxu0 %v3182_v31  ;;  %1593 = vmatpush1.bf16.msra.mxu1 %v3187_v32  ;;  %v4787_v31 = vld [vmem:[#allocation26_spill] sm:$0xff]  ;;  %v4788_v32 = vld [vmem:[#allocation27_spill] sm:$0xff] }
  0xf8   :  { %1543 = vmatprep.subr.bf16.mxu0 %v3194_v33  ;;  %1594 = vmatprep.subr.bf16.mxu1 %v3201_v34  ;;  %v2533_v33 = vld [vmem:[%s4524_s0 + $0x40] sm:$0xff]  ;;  %v2887_v34 = vld [vmem:[%s4524_s0 + $0x30] ss:$8 sps:$4 sm:$0xff]  }
  0xfb   :  { %1544 = vmatpush1.bf16.msra.mxu0 %v3206_v35  ;;  %1595 = vmatpush1.bf16.msra.mxu1 %v3213_v36  ;;  %v1766_v35 = vshll.u32 %v2889_v19, 16  ;;  %v4789_v36 = vld [vmem:[#allocation28_spill] sm:$0xff] }
  0xfc   :  { %1650 = vmatprep.subr.bf16.mxu0 %v3218_v37  ;;  %1701 = vmatprep.subr.bf16.mxu1 %v3225_v38  ;;  %v4790_v37 = vld [vmem:[#allocation29_spill] sm:$0xff]  ;;  %v4791_v38 = vld [vmem:[#allocation30_spill] sm:$0xff] }
  0xfe   :  { %1560 = vmatmul.mubr.bf16.vlgmr.msra.gmra.mrb[16].mxu0 %v3983_v15  ;;  %1611 = vmatmul.mubr.bf16.vlgmr.msra.gmra.mrb[16].mxu1 %v3983_v15 }
  0xff   :  { %1651 = vmatpush1.bf16.msra.mxu0 %v3235_v40  ;;  %1702 = vmatpush1.bf16.msra.mxu1 %v3240_v41  ;;  %v4792_v40 = vld [vmem:[#allocation31_spill] sm:$0xff]  ;;  %v4051_v41 = vcombine.high %v2533_v33, %v2533_v33 }
 0x100   :  { %1652 = vmatprep.subr.bf16.mxu0 %v3247_v42  ;;  %1703 = vmatprep.subr.bf16.mxu1 %v3254_v43  ;;  %v1764_v42 = vshrl.u32 %v2889_v19, 16  ;;  %v1768_v43 = vrot.slane %v1766_v35, 1 }
 0x101   :  { %2542 = vmatprep.mubr.msk.bf16.mxu0 %vm327_vm0, %v3992_v17  ;;  %2544 = vmatprep.mubr.msk.bf16.mxu1 %vm327_vm0, %v3992_v17 }
 0x103   :  { %1653 = vmatpush1.bf16.msra.mxu0 %v3261_v44  ;;  %1704 = vmatpush1.bf16.msra.mxu1 %v3268_v45  ;;  %v1770_v44 = vshll.u32 %v4051_v41, 16  ;;  %v4793_v45 = vld [vmem:[#allocation32_spill] sm:$0xff] }
 0x104   :  { %1654 = vmatprep.subr.bf16.mxu0 %v3273_v46  ;;  %1705 = vmatprep.subr.bf16.mxu1 %v3280_v47  ;;  %v4794_v46 = vld [vmem:[#allocation33_spill] sm:$0xff]  ;;  %v4795_v47 = vld [vmem:[#allocation34_spill] sm:$0xff] }
 0x106   :  { %1570 = vmatmul.mubr.bf16.gmra.mrb[20].mxu0 %v4004_v18  ;;  %1621 = vmatmul.mubr.bf16.gmra.mrb[20].mxu1 %v4004_v18 }
 0x107   :  { %1655 = vmatpush1.bf16.msra.mxu0 %v3285_v48  ;;  %1706 = vmatpush1.bf16.msra.mxu1 %v3290_v49  ;;  %v4796_v48 = vld [vmem:[#allocation35_spill] sm:$0xff]  ;;  %v4062_v49 = vcombine.low %v2533_v33, %v2533_v33  ;;  %v1753_v33 = vshrl.u32 %v2887_v34, 16 }
 0x108   :  { %1656 = vmatprep.subr.bf16.mxu0 %v4712_v1  ;;  %1707 = vmatprep.subr.bf16.mxu1 %v4713_v2  ;;  %v1769_v1 = vor.u32 %v1768_v43, %v1764_v42  ;;  %v1772_v2 = vrot.slane %v1770_v44, 1  ;;  %v1777_v42 = vshrl.u32 %v4051_v41, 16 }
 0x109   :  { %2549 = vmatprep.mubr.msk.bf16.mxu0 %vm327_vm0, %v2889_v19  ;;  %2551 = vmatprep.mubr.msk.bf16.mxu1 %vm327_vm0, %v2889_v19  ;;  %v4805_v19 = vld [vmem:[#allocation44_spill] sm:$0xff] }
 0x10b   :  { %1657 = vmatpush1.bf16.msra.mxu0 %v4715_v4  ;;  %1708 = vmatpush1.bf16.msra.mxu1 %v4716_v5  ;;  %v4797_v4 = vld [vmem:[#allocation36_spill] sm:$0xff]  ;;  %v4798_v5 = vld [vmem:[#allocation37_spill] sm:$0xff] }
 0x10c   :  { %1658 = vmatprep.subr.bf16.mxu0 %v4717_v6  ;;  %1709 = vmatprep.subr.bf16.mxu1 %v4718_v7  ;;  %v4799_v6 = vld [vmem:[#allocation38_spill] sm:$0xff]  ;;  %v4800_v7 = vld [vmem:[#allocation39_spill] sm:$0xff] }
 0x10f   :  { %1659 = vmatpush1.bf16.msra.mxu0 %v4719_v8  ;;  %1710 = vmatpush1.bf16.msra.mxu1 %v4720_v9  ;;  %v4071_v8 = vsel %vm739_vm1, %v1769_v1, %v1772_v2  ;;  %v4801_v9 = vld [vmem:[#allocation40_spill] sm:$0xff] }
 0x110   :  { %1660 = vmatprep.subr.bf16.mxu0 %v4721_v10  ;;  %1711 = vmatprep.subr.bf16.mxu1 %v4722_v11  ;;  %v4802_v10 = vld [vmem:[#allocation41_spill] sm:$0xff]  ;;  %v4803_v11 = vld [vmem:[#allocation42_spill] sm:$0xff] }
 0x113   :  { %1661 = vmatpush1.bf16.msra.mxu0 %v4777_v20  ;;  %1712 = vmatpush1.bf16.msra.mxu1 %v4778_v21  ;;  %v4806_v20 = vld [vmem:[#allocation45_spill] sm:$0xff]  ;;  %v4807_v21 = vld [vmem:[#allocation46_spill] sm:$0xff] }
 0x114   :  { %1662 = vmatprep.subr.bf16.mxu0 %v4779_v22  ;;  %1713 = vmatprep.subr.bf16.mxu1 %v4780_v23  ;;  %v4808_v22 = vld [vmem:[#allocation47_spill] sm:$0xff]  ;;  %v4809_v23 = vld [vmem:[#allocation48_spill] sm:$0xff] }
 0x117   :  { %1663 = vmatpush1.bf16.msra.mxu0 %v4781_v24  ;;  %1714 = vmatpush1.bf16.msra.mxu1 %v4782_v25  ;;  %v4810_v24 = vld [vmem:[#allocation49_spill] sm:$0xff]  ;;  %v4811_v25 = vld [vmem:[#allocation50_spill] sm:$0xff] }
 0x118   :  { %1664 = vmatprep.subr.bf16.mxu0 %v4783_v26  ;;  %1715 = vmatprep.subr.bf16.mxu1 %v4784_v27  ;;  %v4812_v26 = vld [vmem:[#allocation51_spill] sm:$0xff]  ;;  %v4813_v27 = vld [vmem:[#allocation52_spill] sm:$0xff] }
 0x11b   :  { %1665 = vmatpush1.bf16.msra.mxu0 %v4785_v28  ;;  %1716 = vmatpush1.bf16.msra.mxu1 %v4786_v30  ;;  %v4814_v28 = vld [vmem:[#allocation53_spill] sm:$0xff]  ;;  %v1755_v30 = vshll.u32 %v2887_v34, 16 }
 0x11c   :  { %1666 = vmatprep.subr.bf16.mxu0 %v4787_v31  ;;  %1717 = vmatprep.subr.bf16.mxu1 %v4788_v32  ;;  %v4815_v31 = vld [vmem:[#allocation54_spill] sm:$0xff]  ;;  %v4816_v32 = vld [vmem:[#allocation57_spill] sm:$0xff] }
 0x11d   :  { %v1757_v35 = vrot.slane %v1755_v30, 1 }
 0x11f   :  { %1667 = vmatpush1.bf16.msra.mxu0 %v4789_v36  ;;  %1718 = vmatpush1.bf16.msra.mxu1 %v4790_v37  ;;  %v1760_v36 = vshll.u32 %v4062_v49, 16  ;;  %v1758_v37 = vor.u32 %v1757_v35, %v1753_v33  ;;  %v4819_v35 = vld [vmem:[#allocation2_spill] sm:$0xff] }
 0x120   :  { %1788 = vmatprep.subr.bf16.mxu0 %v4791_v38  ;;  %1839 = vmatprep.subr.bf16.mxu1 %v4792_v40 }
 0x121   :  { %v1762_v38 = vrot.slane %v1760_v36, 1  ;;  %v4820_v36 = vld [vmem:[#allocation8_spill] sm:$0xff] }
 0x122   :  { %1683 = vmatmul.mubr.bf16.vlgmr.msra.gmra.mrb[16].mxu0 %v2887_v34  ;;  %1734 = vmatmul.mubr.bf16.vlgmr.msra.gmra.mrb[16].mxu1 %v2887_v34 }
 0x123   :  { %1789 = vmatpush1.bf16.msra.mxu0 %v4793_v45  ;;  %1840 = vmatpush1.bf16.msra.mxu1 %v4794_v46 }
 0x124   :  { %1790 = vmatprep.subr.bf16.mxu0 %v4795_v47  ;;  %1841 = vmatprep.subr.bf16.mxu1 %v4796_v48  ;;  %v4118_v47 = vsel %vm739_vm1, %v1758_v37, %v1762_v38  ;;  %v4821_v37 = vld [vmem:[#allocation9_spill] sm:$0xff] }
 0x125   :  { %2550 = vmatprep.mubr.msk.bf16.mxu0 %vm327_vm0, %v4051_v41  ;;  %2552 = vmatprep.mubr.msk.bf16.mxu1 %vm327_vm0, %v4051_v41  ;;  %v4126_v41 = vor.u32 %v1777_v42, %v1772_v2  ;;  %v2915_v42 = vld [vmem:[%s4523_s1 + $0x1c8] ss:$16 sps:$4 sm:$0xff]  }
 0x127   :  { %1791 = vmatpush1.bf16.msra.mxu0 %v4797_v4  ;;  %1842 = vmatpush1.bf16.msra.mxu1 %v4798_v5  ;;  %v1774_v4 = vshrl.u32 %v4062_v49, 16  ;;  %v4817_v5 = vld [vmem:[#allocation4_spill] sm:$0xff] }
 0x128   :  { %1792 = vmatprep.subr.bf16.mxu0 %v4799_v6  ;;  %1843 = vmatprep.subr.bf16.mxu1 %v4800_v7  ;;  %v4818_v6 = vld [vmem:[#allocation5_spill] sm:$0xff] }
 0x12a   :  { %1693 = vmatmul.mubr.bf16.gmra.mrb[20].mxu0 %v4062_v49  ;;  %1744 = vmatmul.mubr.bf16.gmra.mrb[20].mxu1 %v4062_v49 }
 0x12b   :  { %1793 = vmatpush1.bf16.msra.mxu0 %v4801_v9  ;;  %1844 = vmatpush1.bf16.msra.mxu1 %v4802_v10 }
 0x12c   :  { %1794 = vmatprep.subr.bf16.mxu0 %v4803_v11  ;;  %1845 = vmatprep.subr.bf16.mxu1 %v4804_v16 }
 0x12d   :  { %2553 = vmatprep.mubr.msk.bf16.mxu0 %vm327_vm0, %v4071_v8  ;;  %2555 = vmatprep.mubr.msk.bf16.mxu1 %vm327_vm0, %v4071_v8 }
 0x12f   :  { %1795 = vmatpush1.bf16.msra.mxu0 %v4805_v19  ;;  %1846 = vmatpush1.bf16.msra.mxu1 %v4806_v20 }
 0x130   :  { %1796 = vmatprep.subr.bf16.mxu0 %v4807_v21  ;;  %1847 = vmatprep.subr.bf16.mxu1 %v4808_v22 }
 0x133   :  { %1797 = vmatpush1.bf16.msra.mxu0 %v4809_v23  ;;  %1848 = vmatpush1.bf16.msra.mxu1 %v4810_v24 }
 0x134   :  { %1798 = vmatprep.subr.bf16.mxu0 %v4811_v25  ;;  %1849 = vmatprep.subr.bf16.mxu1 %v4812_v26 }
 0x137   :  { %1799 = vmatpush1.bf16.msra.mxu0 %v4813_v27  ;;  %1850 = vmatpush1.bf16.msra.mxu1 %v4814_v28 }
 0x138   :  { %1800 = vmatprep.subr.bf16.mxu0 %v4815_v31  ;;  %1851 = vmatprep.subr.bf16.mxu1 %v4765_v53 }
 0x13b   :  { %1801 = vmatpush1.bf16.msra.mxu0 %v4766_v50  ;;  %1852 = vmatpush1.bf16.msra.mxu1 %v4816_v32 }
 0x13c   :  { %1802 = vmatprep.subr.bf16.mxu0 %v4768_v63  ;;  %1853 = vmatprep.subr.bf16.mxu1 %v4769_v60 }
 0x13f   :  { %1803 = vmatpush1.bf16.msra.mxu0 %v4770_v3  ;;  %1854 = vmatpush1.bf16.msra.mxu1 %v4771_v13 }
 0x140   :  { %1804 = vmatprep.subr.bf16.mxu0 %v3693_v51  ;;  %1855 = vmatprep.subr.bf16.mxu1 %v3698_v62 }
 0x141   :  { %v4102_v40 = vpop.f32.mrb[0].mxu0  ;;  %v4104_v34 = vpop.f32.mrb[0].mxu1 }
 0x142   :  { %v4107_v43 = vpop.f32.mrb[1].mxu0  ;;  %v4109_v44 = vpop.f32.mrb[1].mxu1 }
 0x143   :  { %v4111_v45 = vpop.f32.mrb[2].mxu0  ;;  %v4113_v46 = vpop.f32.mrb[2].mxu1  ;;  %1805 = vmatpush1.bf16.msra.mxu0 %v3705_v61  ;;  %1856 = vmatpush1.bf16.msra.mxu1 %v3710_v57 }
 0x144   :  { %v4120_v48 = vpop.f32.mrb[3].mxu0  ;;  %v4122_v1 = vpop.f32.mrb[3].mxu1  ;;  %1902 = vmatprep.subr.bf16.mxu0 %v3862_v29  ;;  %1953 = vmatprep.subr.bf16.mxu1 %v3868_v14 }
 0x146   :  { %1821 = vmatmul.mubr.bf16.vlgmr.msra.gmra.mrb[16].mxu0 %v4118_v47  ;;  %1872 = vmatmul.mubr.bf16.vlgmr.msra.gmra.mrb[16].mxu1 %v4118_v47 }
 0x147   :  { %1903 = vmatpush1.bf16.msra.mxu0 %v3875_v59  ;;  %1954 = vmatpush1.bf16.msra.mxu1 %v3881_v55  ;;  %v4147_v59 = vor.u32 %v1774_v4, %v1762_v38  ;;  %v2914_v38 = vld [vmem:[%s4523_s1 + $0x1c0] ss:$16 sps:$4 sm:$0xff]   ;;  %v2916_v4 = vld [vmem:[%s4523_s1 + $0x1e4] ss:$16 sps:$4 sm:$0xff]  }
 0x148   :  { %1904 = vmatprep.subr.bf16.mxu0 %v4817_v5  ;;  %1955 = vmatprep.subr.bf16.mxu1 %v4818_v6  ;;  %v2917_v5 = vld [vmem:[%s4523_s1 + $0x1ec] ss:$16 sps:$4 sm:$0xff]   ;;  %v2918_v6 = vld [vmem:[%s4523_s1 + $0x1e0] ss:$16 sps:$4 sm:$0xff]  }
 0x149   :  { %v4135_v7 = vpop.f32.mrb[4].mxu0  ;;  %v4137_v29 = vpop.f32.mrb[4].mxu1  ;;  %2554 = vmatprep.mubr.msk.bf16.mxu0 %vm327_vm0, %v4126_v41  ;;  %2556 = vmatprep.mubr.msk.bf16.mxu1 %vm327_vm0, %v4126_v41 }
 0x14a   :  { %v4143_v14 = vpop.f32.mrb[5].mxu0  ;;  %v4145_v49 = vpop.f32.mrb[5].mxu1 }
 0x14b   :  { %v1004_v55 = vpop.f32.mrb[6].mxu0  ;;  %v1055_v2 = vpop.f32.mrb[6].mxu1  ;;  %1905 = vmatpush1.bf16.msra.mxu0 %v3901_v58  ;;  %1956 = vmatpush1.bf16.msra.mxu1 %v3907_v0  ;;  %v2907_v0 = vld [vmem:[%s4523_s1 + $0x188] ss:$16 sps:$4 sm:$0xff]   ;;  %v2908_v58 = vld [vmem:[%s4523_s1 + $0x1a4] ss:$16 sps:$4 sm:$0xff]  }
 0x14c   :  { %v1005_v30 = vpop.f32.mrb[7].mxu0  ;;  %v1056_v33 = vpop.f32.mrb[7].mxu1  ;;  %1906 = vmatprep.subr.bf16.mxu0 %v4819_v35  ;;  %1957 = vmatprep.subr.bf16.mxu1 %v4820_v36  ;;  %v2919_v55 = vld [vmem:[%s4523_s1 + $0x1e8] ss:$16 sps:$4 sm:$0xff]   ;;  %v2920_v2 = vld [vmem:[%s4523_s1 + $0x204] ss:$16 sps:$4 sm:$0xff]  }
 0x14d   :  { %v2921_v30 = vld [vmem:[%s4523_s1 + $0x20c] ss:$16 sps:$4 sm:$0xff]   ;;  %v2922_v33 = vld [vmem:[%s4523_s1 + $0x200] ss:$16 sps:$4 sm:$0xff]   ;;  %v2923_v35 = vld [vmem:[%s4523_s1 + $0x208] ss:$16 sps:$4 sm:$0xff]  }
 0x14e   :  { %1831 = vmatmul.mubr.bf16.gmra.mrb[20].mxu0 %v4147_v59  ;;  %1882 = vmatmul.mubr.bf16.gmra.mrb[20].mxu1 %v4147_v59  ;;  %v2924_v36 = vld [vmem:[%s4523_s1 + $0x224] ss:$16 sps:$4 sm:$0xff]  }
 0x14f   :  { %1907 = vmatpush1.bf16.msra.mxu0 %v3930_v56  ;;  %1958 = vmatpush1.bf16.msra.mxu1 %v4821_v37  ;;  %v2910_v56 = vld [vmem:[%s4523_s1 + $0x1a0] ss:$16 sps:$4 sm:$0xff]   ;;  %v2925_v37 = vld [vmem:[%s4523_s1 + $0x22c] ss:$16 sps:$4 sm:$0xff]  }
 0x150   :  { %1908 = vmatprep.subr.bf16.mxu0 %v3942_v12  ;;  %1959 = vmatprep.subr.bf16.mxu1 %v3948_v54  ;;  %v2909_v12 = vld [vmem:[%s4523_s1 + $0x1ac] ss:$16 sps:$4 sm:$0xff]   ;;  %v2912_v54 = vld [vmem:[%s4523_s1 + $0x1c4] ss:$16 sps:$4 sm:$0xff]  }
 0x151   :  { %2557 = vmatprep.mubr.msk.bf16.mxu0 %vm327_vm0, %v4071_v8  ;;  %2559 = vmatprep.mubr.msk.bf16.mxu1 %vm327_vm0, %v4071_v8  ;;  %v2913_v8 = vld [vmem:[%s4523_s1 + $0x1cc] ss:$16 sps:$4 sm:$0xff]  }
 0x153   :  { %1909 = vmatpush1.bf16.msra.mxu0 %v3958_v52  ;;  %1960 = vmatpush1.bf16.msra.mxu1 %v2907_v0  ;;  %v2911_v52 = vld [vmem:[%s4523_s1 + $0x1a8] ss:$16 sps:$4 sm:$0xff]   ;;  %v2926_v0 = vld [vmem:[%s4523_s1 + $0x220] ss:$16 sps:$4 sm:$0xff]  }
 0x154   :  { %1910 = vmatprep.subr.bf16.mxu0 %v2908_v58  ;;  %1961 = vmatprep.subr.bf16.mxu1 %v2909_v12  ;;  %v2927_v58 = vld [vmem:[%s4523_s1 + $0x228] ss:$16 sps:$4 sm:$0xff]   ;;  %v2928_v12 = vld [vmem:[%s4523_s1 + $0x4] ss:$16 sps:$4 sm:$0xff]  }
 0x157   :  { %1911 = vmatpush1.bf16.msra.mxu0 %v2910_v56  ;;  %1962 = vmatpush1.bf16.msra.mxu1 %v2911_v52  ;;  %v2929_v56 = vld [vmem:[%s4523_s1 + $0xc] ss:$16 sps:$4 sm:$0xff]   ;;  %v2930_v52 = vld [vmem:[%s4523_s1] ss:$16 sps:$4 sm:$0xff]  }
 0x158   :  { %1912 = vmatprep.subr.bf16.mxu0 %v2912_v54  ;;  %1963 = vmatprep.subr.bf16.mxu1 %v2913_v8  ;;  %v2931_v54 = vld [vmem:[%s4523_s1 + $0x8] ss:$16 sps:$4 sm:$0xff]   ;;  %v2932_v8 = vld [vmem:[%s4523_s1 + $0x24] ss:$16 sps:$4 sm:$0xff]  }
 0x15b   :  { %1913 = vmatpush1.bf16.msra.mxu0 %v2914_v38  ;;  %1964 = vmatpush1.bf16.msra.mxu1 %v2915_v42  ;;  %v2933_v38 = vld [vmem:[%s4523_s1 + $0x2c] ss:$16 sps:$4 sm:$0xff]   ;;  %v2935_v42 = vld [vmem:[%s4523_s1 + $0x28] ss:$16 sps:$4 sm:$0xff]  }
 0x15c   :  { %1914 = vmatprep.subr.bf16.mxu0 %v2916_v4  ;;  %1965 = vmatprep.subr.bf16.mxu1 %v2917_v5  ;;  %v2936_v4 = vld [vmem:[%s4523_s1 + $0x44] ss:$16 sps:$4 sm:$0xff]   ;;  %v2937_v5 = vld [vmem:[%s4523_s1 + $0x4c] ss:$16 sps:$4 sm:$0xff]  }
 0x15f   :  { %1915 = vmatpush1.bf16.msra.mxu0 %v2918_v6  ;;  %1966 = vmatpush1.bf16.msra.mxu1 %v2919_v55  ;;  %v2939_v6 = vld [vmem:[%s4523_s1 + $0x48] ss:$16 sps:$4 sm:$0xff]   ;;  %v2940_v55 = vld [vmem:[%s4523_s1 + $0x64] ss:$16 sps:$4 sm:$0xff]  }
 0x160   :  { %1916 = vmatprep.subr.bf16.mxu0 %v2920_v2  ;;  %1967 = vmatprep.subr.bf16.mxu1 %v2921_v30  ;;  %v2941_v2 = vld [vmem:[%s4523_s1 + $0x6c] ss:$16 sps:$4 sm:$0xff]   ;;  %v2943_v30 = vld [vmem:[%s4523_s1 + $0x68] ss:$16 sps:$4 sm:$0xff]  }
 0x163   :  { %1917 = vmatpush1.bf16.msra.mxu0 %v2922_v33  ;;  %1968 = vmatpush1.bf16.msra.mxu1 %v2923_v35  ;;  %v2944_v33 = vld [vmem:[%s4523_s1 + $0x84] ss:$16 sps:$4 sm:$0xff]   ;;  %v2945_v35 = vld [vmem:[%s4523_s1 + $0x8c] ss:$16 sps:$4 sm:$0xff]  }
 0x164   :  { %1918 = vmatprep.subr.bf16.mxu0 %v2924_v36  ;;  %1969 = vmatprep.subr.bf16.mxu1 %v2925_v37  ;;  %v2946_v36 = vld [vmem:[%s4523_s1 + $0x80] ss:$16 sps:$4 sm:$0xff]   ;;  %v2947_v37 = vld [vmem:[%s4523_s1 + $0x88] ss:$16 sps:$4 sm:$0xff]  }
 0x167   :  { %1919 = vmatpush1.bf16.msra.mxu0 %v2926_v0  ;;  %1970 = vmatpush1.bf16.msra.mxu1 %v2927_v58  ;;  %v2948_v0 = vld [vmem:[%s4523_s1 + $0xa4] ss:$16 sps:$4 sm:$0xff]   ;;  %v2949_v58 = vld [vmem:[%s4523_s1 + $0xac] ss:$16 sps:$4 sm:$0xff]  }
 0x168   :  { %2004 = vmatprep.subr.bf16.mxu0 %v2928_v12  ;;  %2055 = vmatprep.subr.bf16.mxu1 %v2929_v56  ;;  %v2950_v12 = vld [vmem:[%s4523_s1 + $0xa0] ss:$16 sps:$4 sm:$0xff]   ;;  %v2951_v56 = vld [vmem:[%s4523_s1 + $0xa8] ss:$16 sps:$4 sm:$0xff]  }
 0x16a   :  { %1935 = vmatmul.mubr.bf16.vlgmr.msra.gmra.mrb[24].mxu0 %v4118_v47  ;;  %1986 = vmatmul.mubr.bf16.vlgmr.msra.gmra.mrb[24].mxu1 %v4118_v47  ;;  %v2934_v47 = vld [vmem:[%s4523_s1 + $0x20] ss:$16 sps:$4 sm:$0xff]  }
 0x16b   :  { %2005 = vmatpush1.bf16.msra.mxu0 %v2930_v52  ;;  %2056 = vmatpush1.bf16.msra.mxu1 %v2931_v54  ;;  %v2952_v52 = vld [vmem:[%s4523_s1 + $0xc4] ss:$16 sps:$4 sm:$0xff]   ;;  %v2953_v54 = vld [vmem:[%s4523_s1 + $0xcc] ss:$16 sps:$4 sm:$0xff]  }
 0x16c   :  { %2006 = vmatprep.subr.bf16.mxu0 %v2932_v8  ;;  %2057 = vmatprep.subr.bf16.mxu1 %v2933_v38  ;;  %v2954_v8 = vld [vmem:[%s4523_s1 + $0xc0] ss:$16 sps:$4 sm:$0xff]   ;;  %v2955_v38 = vld [vmem:[%s4523_s1 + $0xc8] ss:$16 sps:$4 sm:$0xff]  }
 0x16d   :  { %2558 = vmatprep.mubr.msk.bf16.mxu0 %vm327_vm0, %v4126_v41  ;;  %2560 = vmatprep.mubr.msk.bf16.mxu1 %vm327_vm0, %v4126_v41  ;;  %v2938_v41 = vld [vmem:[%s4523_s1 + $0x40] ss:$16 sps:$4 sm:$0xff]  }
 0x16f   :  { %2007 = vmatpush1.bf16.msra.mxu0 %v2934_v47  ;;  %2058 = vmatpush1.bf16.msra.mxu1 %v2935_v42  ;;  %v2956_v47 = vld [vmem:[%s4523_s1 + $0xe4] ss:$16 sps:$4 sm:$0xff]   ;;  %v2957_v42 = vld [vmem:[%s4523_s1 + $0xec] ss:$16 sps:$4 sm:$0xff]  }
 0x170   :  { %2008 = vmatprep.subr.bf16.mxu0 %v2936_v4  ;;  %2059 = vmatprep.subr.bf16.mxu1 %v2937_v5  ;;  %v2958_v4 = vld [vmem:[%s4523_s1 + $0xe0] ss:$16 sps:$4 sm:$0xff]   ;;  %v2959_v5 = vld [vmem:[%s4523_s1 + $0xe8] ss:$16 sps:$4 sm:$0xff]  }
 0x172   :  { %1945 = vmatmul.mubr.bf16.gmra.mrb[28].mxu0 %v4147_v59  ;;  %1996 = vmatmul.mubr.bf16.gmra.mrb[28].mxu1 %v4147_v59  ;;  %v2942_v59 = vld [vmem:[%s4523_s1 + $0x60] ss:$16 sps:$4 sm:$0xff]  }
 0x173   :  { %2009 = vmatpush1.bf16.msra.mxu0 %v2938_v41  ;;  %2060 = vmatpush1.bf16.msra.mxu1 %v2939_v6  ;;  %v2960_v41 = vld [vmem:[%s4523_s1 + $0x104] ss:$16 sps:$4 sm:$0xff]   ;;  %v2961_v6 = vld [vmem:[%s4523_s1 + $0x10c] ss:$16 sps:$4 sm:$0xff]  }
 0x174   :  { %2010 = vmatprep.subr.bf16.mxu0 %v2940_v55  ;;  %2061 = vmatprep.subr.bf16.mxu1 %v2941_v2  ;;  %v2120_v55 = vshll.u32 %v3925_v39, 16  ;;  %v2962_v2 = vld [vmem:[%s4523_s1 + $0x100] ss:$16 sps:$4 sm:$0xff]  }
 0x175   :  { %2561 = vmatprep.mubr.msk.bf16.mxu0 %vm327_vm0, %v3925_v39  ;;  %2563 = vmatprep.mubr.msk.bf16.mxu1 %vm327_vm0, %v3925_v39 }
 0x177   :  { %2011 = vmatpush1.bf16.msra.mxu0 %v2942_v59  ;;  %2062 = vmatpush1.bf16.msra.mxu1 %v2943_v30  ;;  %v2963_v59 = vld [vmem:[%s4523_s1 + $0x108] ss:$16 sps:$4 sm:$0xff]   ;;  %v2964_v30 = vld [vmem:[%s4523_s1 + $0x244] ss:$16 sps:$4 sm:$0xff]  }
 0x178   :  { %2012 = vmatprep.subr.bf16.mxu0 %v2944_v33  ;;  %2063 = vmatprep.subr.bf16.mxu1 %v2945_v35  ;;  %v2965_v33 = vld [vmem:[%s4523_s1 + $0x24c] ss:$16 sps:$4 sm:$0xff]   ;;  %v2118_v35 = vshrl.u32 %v3925_v39, 16 }
 0x179   :  { %v2969_v39 = vld [vmem:[%s4523_s1 + $0x26c] ss:$16 sps:$4 sm:$0xff]  }
 0x17b   :  { %2013 = vmatpush1.bf16.msra.mxu0 %v2946_v36  ;;  %2064 = vmatpush1.bf16.msra.mxu1 %v2947_v37  ;;  %v2122_v36 = vrot.slane %v2120_v55, 1  ;;  %v2124_v37 = vshll.u32 %v3992_v17, 16  ;;  %v2128_v55 = vshrl.u32 %v4004_v18, 16 }
 0x17c   :  { %2014 = vmatprep.subr.bf16.mxu0 %v2948_v0  ;;  %2065 = vmatprep.subr.bf16.mxu1 %v2949_v58  ;;  %v2966_v0 = vld [vmem:[%s4523_s1 + $0x240] ss:$16 sps:$4 sm:$0xff]   ;;  %v2967_v58 = vld [vmem:[%s4523_s1 + $0x248] ss:$16 sps:$4 sm:$0xff]  }
 0x17f   :  { %2015 = vmatpush1.bf16.msra.mxu0 %v2950_v12  ;;  %2066 = vmatpush1.bf16.msra.mxu1 %v2951_v56  ;;  %v2968_v12 = vld [vmem:[%s4523_s1 + $0x264] ss:$16 sps:$4 sm:$0xff]   ;;  %v2123_v56 = vor.u32 %v2122_v36, %v2118_v35 }
 0x180   :  { %2016 = vmatprep.subr.bf16.mxu0 %v2952_v52  ;;  %2067 = vmatprep.subr.bf16.mxu1 %v2953_v54  ;;  %v4374_v52 = vrot.slane %v2124_v37, 1  ;;  %v2970_v54 = vld [vmem:[%s4523_s1 + $0x260] ss:$16 sps:$4 sm:$0xff]  }
 0x183   :  { %2017 = vmatpush1.bf16.msra.mxu0 %v2954_v8  ;;  %2068 = vmatpush1.bf16.msra.mxu1 %v2955_v38  ;;  %v2971_v8 = vld [vmem:[%s4523_s1 + $0x268] ss:$16 sps:$4 sm:$0xff]   ;;  %v2972_v38 = vld [vmem:[%s4523_s1 + $0x284] ss:$16 sps:$4 sm:$0xff]  }
 0x184   :  { %2018 = vmatprep.subr.bf16.mxu0 %v2956_v47  ;;  %2069 = vmatprep.subr.bf16.mxu1 %v2957_v42  ;;  %v2973_v47 = vld [vmem:[%s4523_s1 + $0x28c] ss:$16 sps:$4 sm:$0xff]   ;;  %v2127_v42 = vsel %vm739_vm1, %v2123_v56, %v4374_v52 }
 0x187   :  { %2019 = vmatpush1.bf16.msra.mxu0 %v2958_v4  ;;  %2070 = vmatpush1.bf16.msra.mxu1 %v2959_v5 }
 0x188   :  { %2020 = vmatprep.subr.bf16.mxu0 %v2960_v41  ;;  %2071 = vmatprep.subr.bf16.mxu1 %v2961_v6 }
 0x18b   :  { %2021 = vmatpush1.bf16.msra.mxu0 %v2962_v2  ;;  %2072 = vmatpush1.bf16.msra.mxu1 %v2963_v59 }
 0x18c   :  { %2142 = vmatprep.subr.bf16.mxu0 %v2964_v30  ;;  %2193 = vmatprep.subr.bf16.mxu1 %v2965_v33 }
 0x18e   :  { %2037 = vmatmul.mubr.bf16.vlgmr.msra.gmra.mrb[24].mxu0 %v3983_v15  ;;  %2088 = vmatmul.mubr.bf16.vlgmr.msra.gmra.mrb[24].mxu1 %v3983_v15 }
 0x18f   :  { %2143 = vmatpush1.bf16.msra.mxu0 %v2966_v0  ;;  %2194 = vmatpush1.bf16.msra.mxu1 %v2967_v58 }
 0x190   :  { %2144 = vmatprep.subr.bf16.mxu0 %v2968_v12  ;;  %2195 = vmatprep.subr.bf16.mxu1 %v2969_v39 }
 0x191   :  { %2562 = vmatprep.mubr.msk.bf16.mxu0 %vm327_vm0, %v3992_v17  ;;  %2564 = vmatprep.mubr.msk.bf16.mxu1 %vm327_vm0, %v3992_v17 }
 0x193   :  { %2145 = vmatpush1.bf16.msra.mxu0 %v2970_v54  ;;  %2196 = vmatpush1.bf16.msra.mxu1 %v2971_v8 }
 0x194   :  { %2146 = vmatprep.subr.bf16.mxu0 %v2972_v38  ;;  %2197 = vmatprep.subr.bf16.mxu1 %v2973_v47 }
 0x196   :  { %2047 = vmatmul.mubr.bf16.gmra.mrb[28].mxu0 %v4004_v18  ;;  %2098 = vmatmul.mubr.bf16.gmra.mrb[28].mxu1 %v4004_v18 }
 0x197   :  { %2147 = vmatpush1.bf16.msra.mxu0 %v4801_v9  ;;  %2198 = vmatpush1.bf16.msra.mxu1 %v4802_v10  ;;  %v1443_v9 = vlaneseq  ;;  %v2109_v10 = vshll.u32 %v3983_v15, 16 }
 0x198   :  { %2148 = vmatprep.subr.bf16.mxu0 %v4803_v11  ;;  %2199 = vmatprep.subr.bf16.mxu1 %v4804_v16  ;;  %v2107_v16 = vshrl.u32 %v3983_v15, 16 }
 0x199   :  { %2565 = vmatprep.mubr.msk.bf16.mxu0 %vm327_vm0, %v2127_v42  ;;  %2567 = vmatprep.mubr.msk.bf16.mxu1 %vm327_vm0, %v2127_v42  ;;  %v1444_v11 = vshrl.u32 %v1443_v9, 7 }
 0x19b   :  { %2149 = vmatpush1.bf16.msra.mxu0 %v4805_v19  ;;  %2200 = vmatpush1.bf16.msra.mxu1 %v4806_v20  ;;  %v2111_v19 = vrot.slane %v2109_v10, 1  ;;  %v2114_v20 = vshll.u32 %v4004_v18, 16 }
 0x19c   :  { %2150 = vmatprep.subr.bf16.mxu0 %v4807_v21  ;;  %2201 = vmatprep.subr.bf16.mxu1 %v4808_v22  ;;  %v1445_v21 = vsub.s32 0, %v1444_v11  ;;  %v125_v22 = vld [vmem:[%s4525_s2] sm:$0x3] }
 0x19e   :  { %v4425_v15 = vrot.slane %v125_v22, %v1445_v21 }
 0x19f   :  { %2151 = vmatpush1.bf16.msra.mxu0 %v4809_v23  ;;  %2202 = vmatpush1.bf16.msra.mxu1 %v4810_v24  ;;  %v2112_v23 = vor.u32 %v2111_v19, %v2107_v16  ;;  %v2116_v24 = vrot.slane %v2114_v20, 1  ;;  %v1496_v20 = vld [vmem:[%s4526_s3 + $0x10] sm:$0xff] }
 0x1a0   :  { %2152 = vmatprep.subr.bf16.mxu0 %v4811_v25  ;;  %2203 = vmatprep.subr.bf16.mxu1 %v4812_v26 }
 0x1a1   :  { %v2130_v33 = vor.u32 %v2128_v55, %v2116_v24 }
 0x1a3   :  { %2153 = vmatpush1.bf16.msra.mxu0 %v4813_v27  ;;  %2204 = vmatpush1.bf16.msra.mxu1 %v4814_v28 }
 0x1a4   :  { %2154 = vmatprep.subr.bf16.mxu0 %v4815_v31  ;;  %2205 = vmatprep.subr.bf16.mxu1 %v4765_v53  ;;  %v1449_v53 = vsub.s32 1, %v1444_v11 }
 0x1a6   :  { %v4429_v31 = vrot.slane %v125_v22, %v1449_v53 }
 0x1a7   :  { %2155 = vmatpush1.bf16.msra.mxu0 %v4766_v50  ;;  %2206 = vmatpush1.bf16.msra.mxu1 %v4816_v32  ;;  %v2131_v50 = vshrl.u32 %v3992_v17, 16 }
 0x1a8   :  { %2156 = vmatprep.subr.bf16.mxu0 %v4768_v63  ;;  %2207 = vmatprep.subr.bf16.mxu1 %v4769_v60 }
 0x1a9   :  { %v2133_v32 = vor.u32 %v2131_v50, %v4374_v52 }
 0x1ab   :  { %2157 = vmatpush1.bf16.msra.mxu0 %v4770_v3  ;;  %2208 = vmatpush1.bf16.msra.mxu1 %v4771_v13  ;;  %v2117_v13 = vsel %vm739_vm1, %v2112_v23, %v2116_v24 }
 0x1ac   :  { %2158 = vmatprep.subr.bf16.mxu0 %v3693_v51  ;;  %2209 = vmatprep.subr.bf16.mxu1 %v3698_v62 }
 0x1ad   :  { %v1344_v63 = vpop.f32.mrb[8].mxu0  ;;  %v1395_v60 = vpop.f32.mrb[8].mxu1 }
 0x1ae   :  { %v1424_v25 = vmax.f32 %v4102_v40, %v1344_v63  ;;  %v1426_v26 = vmax.f32 %v4104_v34, %v1395_v60  ;;  %v1346_v27 = vpop.f32.mrb[9].mxu0  ;;  %v1397_v28 = vpop.f32.mrb[9].mxu1 }
 0x1af   :  { %v1425_v3 = vmax.f32 %v4107_v43, %v1346_v27  ;;  %v1427_v51 = vmax.f32 %v4109_v44, %v1397_v28  ;;  %v1348_v17 = vpop.f32.mrb[10].mxu0  ;;  %v1399_v62 = vpop.f32.mrb[10].mxu1  ;;  %2159 = vmatpush1.bf16.msra.mxu0 %v3705_v61  ;;  %2210 = vmatpush1.bf16.msra.mxu1 %v3710_v57 }
 0x1b0   :  { %v1436_v40 = vmax.f32 %v1424_v25, %v1426_v26  ;;  %v1428_v34 = vmax.f32 %v4111_v45, %v1348_v17  ;;  %v1430_v4 = vmax.f32 %v4113_v46, %v1399_v62  ;;  %v1350_v5 = vpop.f32.mrb[11].mxu0  ;;  %v1401_v41 = vpop.f32.mrb[11].mxu1 }
 0x1b1   :  { %v1437_v6 = vmax.f32 %v1425_v3, %v1427_v51  ;;  %v1429_v43 = vmax.f32 %v4120_v48, %v1350_v5  ;;  %v1431_v44 = vmax.f32 %v4122_v1, %v1401_v41 }
 0x1b2   :  { %v1453_v61 = vadd.f32 %v4425_v15, %v1436_v40  ;;  %v1438_v2 = vmax.f32 %v1428_v34, %v1430_v4  ;;  %2175 = vmatmul.mubr.bf16.vlgmr.msra.gmra.mrb[24].mxu0 %v2117_v13  ;;  %2226 = vmatmul.mubr.bf16.vlgmr.msra.gmra.mrb[24].mxu1 %v2117_v13 }
 0x1b3   :  { %v1454_v57 = vadd.f32 %v4429_v31, %v1437_v6  ;;  %v1439_v45 = vmax.f32 %v1429_v43, %v1431_v44  ;;  %2566 = vmatprep.mubr.msk.bf16.mxu0 %vm327_vm0, %v2133_v32  ;;  %2568 = vmatprep.mubr.msk.bf16.mxu1 %vm327_vm0, %v2133_v32 }
 0x1b4   :  { %v1459_v46 = vmax.f32 %v1453_v61, 0.0  ;;  %v1455_v48 = vadd.f32 %v4425_v15, %v1438_v2 }
 0x1b5   :  { %v1460_v1 = vmax.f32 %v1454_v57, 0.0  ;;  %v1456_v18 = vadd.f32 %v4429_v31, %v1439_v45  ;;  %v1354_v59 = vpop.f32.mrb[12].mxu0  ;;  %v1405_v30 = vpop.f32.mrb[12].mxu1 }
 0x1b6   :  { %v1461_v36 = vmax.f32 %v1455_v48, 0.0  ;;  %v1432_v37 = vmax.f32 %v4135_v7, %v1354_v59  ;;  %v1434_v0 = vmax.f32 %v4137_v29, %v1405_v30  ;;  %v1356_v58 = vpop.f32.mrb[13].mxu0  ;;  %v1407_v12 = vpop.f32.mrb[13].mxu1 }
 0x1b7   :  { %v2576_v39 = vpack.c.bf16 %v1460_v1, %v1459_v46  ;;  %v1462_v56 = vmax.f32 %v1456_v18, 0.0  ;;  %v1433_v52 = vmax.f32 %v4143_v14, %v1356_v58  ;;  %v1435_v54 = vmax.f32 %v4145_v49, %v1407_v12  ;;  %v1358_v8 = vpop.f32.mrb[14].mxu0  ;;  %v1409_v38 = vpop.f32.mrb[14].mxu1 }
 0x1b8   :  { %v1440_v47 = vmax.f32 %v1432_v37, %v1434_v0  ;;  %v1359_v42 = vpop.f32.mrb[15].mxu0  ;;  %v1410_v9 = vpop.f32.mrb[15].mxu1 }
 0x1b9   :  { %1488 = vst.msk [vmem:[%s4526_s3] sm:$0xff] %vm4450_vm4, %v2576_v39  ;;  %v2577_v7 = vpack.c.bf16 %v1462_v56, %v1461_v36  ;;  %v1441_v29 = vmax.f32 %v1433_v52, %v1435_v54 }
 0x1ba   :  { %v1457_v10 = vadd.f32 %v4425_v15, %v1440_v47  ;;  %2185 = vmatmul.mubr.bf16.gmra.mrb[28].mxu0 %v2130_v33  ;;  %2236 = vmatmul.mubr.bf16.gmra.mrb[28].mxu1 %v2130_v33 }
 0x1bb   :  { %1489 = vst.msk [vmem:[%s4526_s3 + $0x8] sm:$0xff] %vm4450_vm4, %v2577_v7  ;;  %v1458_v49 = vadd.f32 %v4429_v31, %v1441_v29 }
 0x1bc   :  { %v1463_v16 = vmax.f32 %v1457_v10, 0.0 }
 0x1bd   :  { %v1464_v19 = vmax.f32 %v1458_v49, 0.0 }
 0x1bf   :  { %v2578_v21 = vpack.c.bf16 %v1464_v19, %v1463_v16 }
 0x1c1   :  { %v1497_v22 = vsel %vm1495_vm8, %v2578_v21, %v1496_v20 }
 0x1c2   :  { %1498 = vst [vmem:[%s4526_s3 + $0x10] sm:$0xff] %v1497_v22 }
 0x219   :  { %v1822_v53 = vpop.f32.mrb[16].mxu0  ;;  %v1873_v23 = vpop.f32.mrb[16].mxu1 }
 0x21a   :  { %v1824_v24 = vpop.f32.mrb[17].mxu0  ;;  %v1875_v50 = vpop.f32.mrb[17].mxu1 }
 0x21b   :  { %v1826_v63 = vpop.f32.mrb[18].mxu0  ;;  %v1877_v60 = vpop.f32.mrb[18].mxu1 }
 0x21c   :  { %v1828_v25 = vpop.f32.mrb[19].mxu0  ;;  %v1879_v26 = vpop.f32.mrb[19].mxu1 }
 0x221   :  { %v1832_v27 = vpop.f32.mrb[20].mxu0  ;;  %v1883_v28 = vpop.f32.mrb[20].mxu1 }
 0x222   :  { %v1834_v13 = vpop.f32.mrb[21].mxu0  ;;  %v1885_v3 = vpop.f32.mrb[21].mxu1 }
 0x223   :  { %v1836_v51 = vpop.f32.mrb[22].mxu0  ;;  %v1887_v17 = vpop.f32.mrb[22].mxu1 }
 0x224   :  { %v1837_v62 = vpop.f32.mrb[23].mxu0  ;;  %v1888_v32 = vpop.f32.mrb[23].mxu1 }
 0x285   :  { %v2176_v40 = vpop.f32.mrb[24].mxu0  ;;  %v2227_v34 = vpop.f32.mrb[24].mxu1 }
 0x286   :  { %v2256_v4 = vmax.f32 %v1822_v53, %v2176_v40  ;;  %v2258_v5 = vmax.f32 %v1873_v23, %v2227_v34  ;;  %v2178_v41 = vpop.f32.mrb[25].mxu0  ;;  %v2229_v6 = vpop.f32.mrb[25].mxu1 }
 0x287   :  { %v2257_v43 = vmax.f32 %v1824_v24, %v2178_v41  ;;  %v2259_v44 = vmax.f32 %v1875_v50, %v2229_v6  ;;  %v2180_v55 = vpop.f32.mrb[26].mxu0  ;;  %v2231_v61 = vpop.f32.mrb[26].mxu1 }
 0x288   :  { %v2268_v2 = vmax.f32 %v2256_v4, %v2258_v5  ;;  %v2260_v57 = vmax.f32 %v1826_v63, %v2180_v55  ;;  %v2262_v45 = vmax.f32 %v1877_v60, %v2231_v61  ;;  %v2182_v46 = vpop.f32.mrb[27].mxu0  ;;  %v2233_v48 = vpop.f32.mrb[27].mxu1  ;;  %v2574_v60 = vld [vmem:[%s4526_s3 + $0x28] sm:$0xff] }
 0x289   :  { %v2269_v1 = vmax.f32 %v2257_v43, %v2259_v44  ;;  %v2261_v18 = vmax.f32 %v1828_v25, %v2182_v46  ;;  %v2263_v59 = vmax.f32 %v1879_v26, %v2233_v48 }
 0x28a   :  { %v2274_v30 = vadd.f32 %v2268_v2, %v4425_v15  ;;  %v2270_v33 = vmax.f32 %v2260_v57, %v2262_v45 }
 0x28b   :  { %v2275_v36 = vadd.f32 %v2269_v1, %v4429_v31  ;;  %v2271_v37 = vmax.f32 %v2261_v18, %v2263_v59 }
 0x28c   :  { %v2280_v0 = vmax.f32 %v2274_v30, 0.0  ;;  %v2276_v58 = vadd.f32 %v2270_v33, %v4425_v15 }
 0x28d   :  { %v2281_v12 = vmax.f32 %v2275_v36, 0.0  ;;  %v2277_v39 = vadd.f32 %v2271_v37, %v4429_v31  ;;  %v2186_v56 = vpop.f32.mrb[28].mxu0  ;;  %v2237_v52 = vpop.f32.mrb[28].mxu1 }
 0x28e   :  { %v2282_v54 = vmax.f32 %v2276_v58, 0.0  ;;  %v2264_v8 = vmax.f32 %v1832_v27, %v2186_v56  ;;  %v2266_v38 = vmax.f32 %v1883_v28, %v2237_v52  ;;  %v2188_v47 = vpop.f32.mrb[29].mxu0  ;;  %v2239_v42 = vpop.f32.mrb[29].mxu1 }
 0x28f   :  { %v2579_v9 = vpack.c.bf16 %v2281_v12, %v2280_v0  ;;  %v2283_v7 = vmax.f32 %v2277_v39, 0.0  ;;  %v2265_v29 = vmax.f32 %v1834_v13, %v2188_v47  ;;  %v2267_v10 = vmax.f32 %v1885_v3, %v2239_v42  ;;  %v2190_v49 = vpop.f32.mrb[30].mxu0  ;;  %v2241_v16 = vpop.f32.mrb[30].mxu1 }
 0x290   :  { %v2272_v19 = vmax.f32 %v2264_v8, %v2266_v38  ;;  %v2191_v20 = vpop.f32.mrb[31].mxu0  ;;  %v2242_v21 = vpop.f32.mrb[31].mxu1 }
 0x291   :  { %2572 = vst.msk [vmem:[%s4526_s3 + $0x18] sm:$0xff] %vm4450_vm4, %v2579_v9  ;;  %v2580_v22 = vpack.c.bf16 %v2283_v7, %v2282_v54  ;;  %v2273_v53 = vmax.f32 %v2265_v29, %v2267_v10 }
 0x292   :  { %v2278_v23 = vadd.f32 %v2272_v19, %v4425_v15 }
 0x293   :  { %2573 = vst.msk [vmem:[%s4526_s3 + $0x20] sm:$0xff] %vm4450_vm4, %v2580_v22  ;;  %v2279_v24 = vadd.f32 %v2273_v53, %v4429_v31 }
 0x294   :  { %v2284_v50 = vmax.f32 %v2278_v23, 0.0 }
 0x295   :  { %v2285_v63 = vmax.f32 %v2279_v24, 0.0 }
 0x297   :  { %v2581_v25 = vpack.c.bf16 %v2285_v63, %v2284_v50 }
 0x299   :  { %v2310_v15 = vsel %vm1495_vm8, %v2581_v25, %v2574_v60 }
 0x29a   :  { %2575 = vst [vmem:[%s4526_s3 + $0x28] sm:$0xff] %v2310_v15 }

// kernel: tile.23
= control target key start
LH: loop header
LB: loop body
LE: loop exit
PB: predicated region body
PF: predicated region fallthrough
CT: control target
= control target key end

     0   :  { %s28_s0 = inlined_call_operand.vmem [shape: f32[16], index: 0, kind: input, shape index: {}]   ;;  %s29_s1 = inlined_call_operand.vmem [shape: f32[10,16], index: 1, kind: output, shape index: {}]  }
   0x1   :  { %v4_v0 = vld [vmem:[%s28_s0] ss:$0 sm:$0xff] }
   0x2   :  { %5 = vst [vmem:[%s29_s1] sm:$0xff] %v4_v0  ;;  %8 = vst [vmem:[%s29_s1 + $0x8] sm:$0xff] %v4_v0 }

// kernel: tile.24
= control target key start
LH: loop header
LB: loop body
LE: loop exit
PB: predicated region body
PF: predicated region fallthrough
CT: control target
= control target key end

     0   :  { %s75_s10 = smov 112   ;;  %s76_s11 = smov 80   ;;  %vm4_vm0 = vcmask 130048   ;;  %vm10_vm1 = vcmask 1048448   ;;  %vm16_vm2 = vcmask 917248   ;;  %vm22_vm3 = vcmask 786048   ;;  %s122_s0 = inlined_call_operand.vmem [shape: f32[10,16], index: 0, kind: input, shape index: {}]   ;;  %s123_s1 = inlined_call_operand.vmem [shape: f32[1,160], index: 1, kind: output, shape index: {}]  }
   0x1   :  { %v60_v0 = vld [vmem:[%s122_s0 + $0x7] sm:$0x1]   ;;  %v62_v1 = vld [vmem:[%s122_s0 + $0x5] sm:$0x1]   ;;  %v61_v2 = vld [vmem:[%s122_s0 + $0x6] sm:$0x1]  }
   0x2   :  { %8 = vrot.lane.b32.xlu0 %v60_v0, %s75_s10  ;;  %20 = vrot.lane.b32.xlu1 %v62_v1, %s76_s11  ;;  %v63_v3 = vld [vmem:[%s122_s0 + $0x4] sm:$0x1]   ;;  %s2_s16 = smov 3  ;;  %s77_s17 = smov 96   ;;  %v64_v5 = vld [vmem:[%s122_s0 + $0x3] sm:$0x1]  }
   0x3   :  { %s78_s18 = smov 64   ;;  %v3_v4 = vld [vmem:[%s122_s0] ss:$8 sm:%s2_s16]   ;;  %v65_v6 = vld [vmem:[%s122_s0 + $0x2] sm:$0x1]   ;;  %s43_s25 = smov 3 }
   0x4   :  { %5 = vst.msk [vmem:[#allocation0] ss:$8 sm:$0x3] %vm4_vm0, %v3_v4   ;;  %s79_s26 = smov 48   ;;  %s80_s27 = smov 32   ;;  %vm28_vm4 = vcmask 654848  }
   0x5   :  { %v66_v7 = vld [vmem:[%s122_s0 + $0x1] ss:$8 sm:%s43_s25]   ;;  %s81_s0 = smov 16   ;;  %vm34_vm5 = vcmask 523648   ;;  %vm40_vm6 = vcmask 392448   ;;  %vm47_vm7 = vcmask 261248  }
   0x6   :  { %14 = vrot.lane.b32.xlu0 %v61_v2, %s77_s17  ;;  %26 = vrot.lane.b32.xlu1 %v63_v3, %s78_s18 }
   0xa   :  { %32 = vrot.lane.b32.xlu0 %v64_v5, %s79_s26  ;;  %38 = vrot.lane.b32.xlu1 %v65_v6, %s80_s27 }
   0xe   :  { %45 = vrot.lane.b32.xlu0 %v66_v7, %s81_s0 }
  0x74   :  { %v9_v8 = vpop.permute.xlu0 %8   ;;  %v21_v9 = vpop.permute.xlu1 %20  }
  0x75   :  { %11 = vst.msk [vmem:[#allocation0] sm:$0x1] %vm10_vm1, %v9_v8  }
  0x78   :  { %v15_v10 = vpop.permute.xlu0 %14   ;;  %v27_v11 = vpop.permute.xlu1 %26  }
  0x79   :  { %17 = vst.msk [vmem:[#allocation0] sm:$0x1] %vm16_vm2, %v15_v10  }
  0x7a   :  { %23 = vst.msk [vmem:[#allocation0] sm:$0x1] %vm22_vm3, %v21_v9  }
  0x7b   :  { %29 = vst.msk [vmem:[#allocation0] sm:$0x1] %vm28_vm4, %v27_v11  }
  0x7c   :  { %v33_v12 = vpop.permute.xlu0 %32   ;;  %v39_v13 = vpop.permute.xlu1 %38  }
  0x7d   :  { %35 = vst.msk [vmem:[#allocation0] sm:$0x1] %vm34_vm5, %v33_v12  }
  0x7e   :  { %41 = vst.msk [vmem:[#allocation0] sm:$0x1] %vm40_vm6, %v39_v13  }
  0x80   :  { %v46_v14 = vpop.permute.xlu0 %45  }
  0x81   :  { %48 = vst.msk [vmem:[#allocation0] ss:$8 sm:$0x3] %vm47_vm7, %v46_v14  }
  0x88   :  { %v52_v15 = vld [vmem:[#allocation0] sm:$0x1]  ;;  %v56_v16 = vld [vmem:[#allocation0 + $0x8] sm:$0x1] }
  0x89   :  { %54 = vst [vmem:[%s123_s1] sm:$0x1] %v52_v15  ;;  %67 = vst [vmem:[%s123_s1 + $0x1] sm:$0x1] %v56_v16 }

// kernel: network_forward.5
= control target key start
LH: loop header
LB: loop body
LE: loop exit
PB: predicated region body
PF: predicated region fallthrough
CT: control target
= control target key end

     0   :  { %vm399_vm0 = vcmask 457728   ;;  %vm403_vm1 = vcmask 1043456   ;;  %vm1521_vm2 = vcmask 261124   ;;  %vm1524_vm3 = vcmask 1040384   ;;  %s4795_s1 = inlined_call_operand.vmem [shape: bf16[3,184,512], index: 1, kind: input, shape index: {}]   ;;  %s4796_s0 = inlined_call_operand.vmem [shape: bf16[2,2,11,184], index: 0, kind: input, shape index: {}]   ;;  %s4797_s2 = inlined_call_operand.vmem [shape: f32[1,160], index: 2, kind: input, shape index: {}]   ;;  %s4798_s3 = inlined_call_operand.vmem [shape: bf16[2,10,160], index: 3, kind: output, shape index: {}]  }
   0x1   :  { %v2909_v0 = vld [vmem:[%s4795_s1 + $0x174] ss:$16 sps:$4 sm:$0xff]   ;;  %v2914_v1 = vld [vmem:[%s4795_s1 + $0x17c] ss:$16 sps:$4 sm:$0xff]   ;;  %v2920_v2 = vld [vmem:[%s4795_s1 + $0x170] ss:$16 sps:$4 sm:$0xff]  }
   0x2   :  { %416 = vmatprep.subr.bf16.mxu0 %v2909_v0  ;;  %v2925_v3 = vld [vmem:[%s4795_s1 + $0x178] ss:$16 sps:$4 sm:$0xff]   ;;  %459 = vmatprep.subr.bf16.mxu1 %v2914_v1  ;;  %v2931_v4 = vld [vmem:[%s4795_s1 + $0x194] ss:$16 sps:$4 sm:$0xff]   ;;  %v2938_v5 = vld [vmem:[%s4795_s1 + $0x19c] ss:$16 sps:$4 sm:$0xff]  }
   0x3   :  { %417 = vmatpush1.bf16.msra.mxu0 %v2920_v2  ;;  %460 = vmatpush1.bf16.msra.mxu1 %v2925_v3  ;;  %v2943_v6 = vld [vmem:[%s4795_s1 + $0x190] ss:$16 sps:$4 sm:$0xff]   ;;  %v2949_v7 = vld [vmem:[%s4795_s1 + $0x198] ss:$16 sps:$4 sm:$0xff]   ;;  %v2955_v8 = vld [vmem:[%s4795_s1 + $0x1b4] ss:$16 sps:$4 sm:$0xff]  }
   0x4   :  { %418 = vmatprep.subr.bf16.mxu0 %v2931_v4  ;;  %461 = vmatprep.subr.bf16.mxu1 %v2938_v5  ;;  %v2960_v9 = vld [vmem:[%s4795_s1 + $0x1bc] ss:$16 sps:$4 sm:$0xff]   ;;  %v2965_v10 = vld [vmem:[%s4795_s1 + $0x1b0] ss:$16 sps:$4 sm:$0xff]   ;;  %v2970_v11 = vld [vmem:[%s4795_s1 + $0x1b8] ss:$16 sps:$4 sm:$0xff]  }
   0x5   :  { %v2977_v12 = vld [vmem:[%s4795_s1 + $0x1d4] ss:$16 sps:$4 sm:$0xff]   ;;  %v2984_v13 = vld [vmem:[%s4795_s1 + $0x1dc] ss:$16 sps:$4 sm:$0xff]   ;;  %v2989_v14 = vld [vmem:[%s4795_s1 + $0x1d0] ss:$16 sps:$4 sm:$0xff]  }
   0x6   :  { %v2996_v15 = vld [vmem:[%s4795_s1 + $0x1d8] ss:$16 sps:$4 sm:$0xff]   ;;  %v3001_v16 = vld [vmem:[%s4795_s1 + $0x1f4] ss:$16 sps:$4 sm:$0xff]   ;;  %v3008_v17 = vld [vmem:[%s4795_s1 + $0x1fc] ss:$16 sps:$4 sm:$0xff]  }
   0x7   :  { %419 = vmatpush1.bf16.msra.mxu0 %v2943_v6  ;;  %462 = vmatpush1.bf16.msra.mxu1 %v2949_v7  ;;  %v3013_v18 = vld [vmem:[%s4795_s1 + $0x1f0] ss:$16 sps:$4 sm:$0xff]   ;;  %v3018_v19 = vld [vmem:[%s4795_s1 + $0x1f8] ss:$16 sps:$4 sm:$0xff]   ;;  %v3025_v20 = vld [vmem:[%s4795_s1 + $0x214] ss:$16 sps:$4 sm:$0xff]  }
   0x8   :  { %420 = vmatprep.subr.bf16.mxu0 %v2955_v8  ;;  %463 = vmatprep.subr.bf16.mxu1 %v2960_v9  ;;  %v3032_v21 = vld [vmem:[%s4795_s1 + $0x21c] ss:$16 sps:$4 sm:$0xff]   ;;  %v3037_v22 = vld [vmem:[%s4795_s1 + $0x210] ss:$16 sps:$4 sm:$0xff]   ;;  %v3044_v23 = vld [vmem:[%s4795_s1 + $0x218] ss:$16 sps:$4 sm:$0xff]  }
   0x9   :  { %v3049_v24 = vld [vmem:[%s4795_s1 + $0x234] ss:$16 sps:$4 sm:$0xff]   ;;  %v3056_v25 = vld [vmem:[%s4795_s1 + $0x23c] ss:$16 sps:$4 sm:$0xff]   ;;  %v3061_v26 = vld [vmem:[%s4795_s1 + $0x230] ss:$16 sps:$4 sm:$0xff]  }
   0xa   :  { %v3066_v27 = vld [vmem:[%s4795_s1 + $0x238] ss:$16 sps:$4 sm:$0xff]   ;;  %v3073_v28 = vld [vmem:[%s4795_s1 + $0x254] ss:$16 sps:$4 sm:$0xff]   ;;  %v3080_v29 = vld [vmem:[%s4795_s1 + $0x25c] ss:$16 sps:$4 sm:$0xff]  }
   0xb   :  { %421 = vmatpush1.bf16.msra.mxu0 %v2965_v10  ;;  %464 = vmatpush1.bf16.msra.mxu1 %v2970_v11  ;;  %v3087_v30 = vld [vmem:[%s4795_s1 + $0x250] ss:$16 sps:$4 sm:$0xff]   ;;  %v3092_v31 = vld [vmem:[%s4795_s1 + $0x258] ss:$16 sps:$4 sm:$0xff]   ;;  %v3099_v32 = vld [vmem:[%s4795_s1 + $0x274] ss:$16 sps:$4 sm:$0xff]  }
   0xc   :  { %422 = vmatprep.subr.bf16.mxu0 %v2977_v12  ;;  %465 = vmatprep.subr.bf16.mxu1 %v2984_v13  ;;  %v3104_v33 = vld [vmem:[%s4795_s1 + $0x27c] ss:$16 sps:$4 sm:$0xff]   ;;  %v3114_v35 = vld [vmem:[%s4795_s1 + $0x270] ss:$16 sps:$4 sm:$0xff]   ;;  %v3121_v36 = vld [vmem:[%s4795_s1 + $0x278] ss:$16 sps:$4 sm:$0xff]  }
   0xd   :  { %v3109_v34 = vld [vmem:[%s4796_s0 + $0x14] ss:$8 sps:$4 sm:$0x3f]   ;;  %v3138_v39 = vld [vmem:[%s4795_s1 + $0x290] ss:$16 sps:$4 sm:$0xff]   ;;  %vm1525_vm4 = vcmask 258052   ;;  %vm4569_vm5 = vmor %vm1521_vm2, %vm403_vm1 }
   0xe   :  { %5025 = vst [vmem:[#allocation2_spill] sm:$0xff] %v3109_v34  ;;  %v3128_v37 = vld [vmem:[%s4795_s1 + $0x294] ss:$16 sps:$4 sm:$0xff]   ;;  %v3133_v38 = vld [vmem:[%s4795_s1 + $0x29c] ss:$16 sps:$4 sm:$0xff]   ;;  %2305 = vmatprep.mubr.msk.bf16.mxu0 %vm399_vm0, %v3109_v34  ;;  %2307 = vmatprep.mubr.msk.bf16.mxu1 %vm399_vm0, %v3109_v34  ;;  %vm4579_vm6 = vmor %vm1525_vm4, %vm1524_vm3 }
   0xf   :  { %423 = vmatpush1.bf16.msra.mxu0 %v2989_v14  ;;  %466 = vmatpush1.bf16.msra.mxu1 %v2996_v15  ;;  %v3147_v40 = vld [vmem:[%s4795_s1 + $0x298] ss:$16 sps:$4 sm:$0xff]   ;;  %v3154_v41 = vld [vmem:[%s4795_s1 + $0x2b4] ss:$16 sps:$4 sm:$0xff]   ;;  %v3159_v42 = vld [vmem:[%s4795_s1 + $0x2bc] ss:$16 sps:$4 sm:$0xff]  }
  0x10   :  { %424 = vmatprep.subr.bf16.mxu0 %v3001_v16  ;;  %467 = vmatprep.subr.bf16.mxu1 %v3008_v17  ;;  %v2206_v43 = vld [vmem:[%s4795_s1 + $0x2d0] sm:$0xff]  ;;  %v2207_v44 = vld [vmem:[%s4795_s1 + $0x2d8] sm:$0xff]  ;;  %v59_v34 = vld [vmem:[%s4795_s1 + $0x160] sm:$0xff] }
  0x11   :  { %v3172_v45 = vld [vmem:[%s4795_s1 + $0x2b0] ss:$16 sps:$4 sm:$0xff]   ;;  %v3179_v46 = vld [vmem:[%s4795_s1 + $0x2b8] ss:$16 sps:$4 sm:$0xff]   ;;  %v3181_v47 = vcombine.high %v2206_v43, %v2206_v43  ;;  %v3185_v48 = vcombine.high %v2207_v44, %v2207_v44  ;;  %v2300_v49 = vcombine.low %v2206_v43, %v2206_v43  ;;  %v2302_v50 = vcombine.low %v2207_v44, %v2207_v44  ;;  %v3192_v51 = vld [vmem:[%s4795_s1 + $0x4] ss:$16 sps:$4 sm:$0xff]  }
  0x12   :  { %v3207_v54 = vld [vmem:[%s4795_s1 + $0xc] ss:$16 sps:$4 sm:$0xff]   ;;  %v3212_v55 = vld [vmem:[%s4796_s0 + $0x10] ss:$8 sps:$4 sm:$0x3f]  }
  0x13   :  { %425 = vmatpush1.bf16.msra.mxu0 %v3013_v18  ;;  %468 = vmatpush1.bf16.msra.mxu1 %v3018_v19  ;;  %5026 = vst [vmem:[#allocation3_spill] sm:$0xff] %v3185_v48  ;;  %v3199_v52 = vsel %vm403_vm1, %v2300_v49, 0  ;;  %v3202_v53 = vsel %vm403_vm1, %v2302_v50, 0  ;;  %5028 = vst [vmem:[#allocation5_spill] sm:$0xff] %v3207_v54  ;;  %v3217_v56 = vld [vmem:[%s4795_s1] ss:$16 sps:$4 sm:$0xff]  }
  0x14   :  { %426 = vmatprep.subr.bf16.mxu0 %v3025_v20  ;;  %469 = vmatprep.subr.bf16.mxu1 %v3032_v21  ;;  %5027 = vst [vmem:[#allocation4_spill] sm:$0xff] %v3199_v52  ;;  %5029 = vst [vmem:[#allocation6_spill] sm:$0xff] %v3212_v55  ;;  %v3224_v57 = vld [vmem:[%s4795_s1 + $0x8] ss:$16 sps:$4 sm:$0xff]   ;;  %v3231_v58 = vld [vmem:[%s4795_s1 + $0x24] ss:$16 sps:$4 sm:$0xff]  }
  0x15   :  { %5030 = vst [vmem:[#allocation7_spill] sm:$0xff] %v3217_v56  ;;  %5031 = vst [vmem:[#allocation8_spill] sm:$0xff] %v3224_v57  ;;  %v3236_v59 = vld [vmem:[%s4795_s1 + $0x2c] ss:$16 sps:$4 sm:$0xff]   ;;  %v3243_v60 = vld [vmem:[%s4795_s1 + $0x20] ss:$16 sps:$4 sm:$0xff]  }
  0x16   :  { %5032 = vst [vmem:[#allocation9_spill] sm:$0xff] %v3231_v58  ;;  %5033 = vst [vmem:[#allocation10_spill] sm:$0xff] %v3236_v59  ;;  %v3250_v61 = vld [vmem:[%s4795_s1 + $0x28] ss:$16 sps:$4 sm:$0xff]   ;;  %v3255_v62 = vld [vmem:[%s4795_s1 + $0x44] ss:$16 sps:$4 sm:$0xff]  }
  0x17   :  { %427 = vmatpush1.bf16.msra.mxu0 %v3037_v22  ;;  %470 = vmatpush1.bf16.msra.mxu1 %v3044_v23  ;;  %5034 = vst [vmem:[#allocation11_spill] sm:$0xff] %v3243_v60  ;;  %5035 = vst [vmem:[#allocation12_spill] sm:$0xff] %v3250_v61  ;;  %v3262_v63 = vld [vmem:[%s4795_s1 + $0x4c] ss:$16 sps:$4 sm:$0xff]   ;;  %v3267_v43 = vld [vmem:[%s4795_s1 + $0x40] ss:$16 sps:$4 sm:$0xff]  }
  0x18   :  { %428 = vmatprep.subr.bf16.mxu0 %v3049_v24  ;;  %471 = vmatprep.subr.bf16.mxu1 %v3056_v25  ;;  %5036 = vst [vmem:[#allocation13_spill] sm:$0xff] %v3255_v62  ;;  %5037 = vst [vmem:[#allocation14_spill] sm:$0xff] %v3262_v63  ;;  %v3274_v44 = vld [vmem:[%s4795_s1 + $0x48] ss:$16 sps:$4 sm:$0xff]   ;;  %v3281_v49 = vld [vmem:[%s4795_s1 + $0x64] ss:$16 sps:$4 sm:$0xff]  }
  0x19   :  { %5038 = vst [vmem:[#allocation15_spill] sm:$0xff] %v3267_v43  ;;  %5039 = vst [vmem:[#allocation16_spill] sm:$0xff] %v3274_v44  ;;  %v3286_v50 = vld [vmem:[%s4795_s1 + $0x6c] ss:$16 sps:$4 sm:$0xff]  }
  0x1a   :  { %5040 = vst [vmem:[#allocation17_spill] sm:$0xff] %v3281_v49  ;;  %5041 = vst [vmem:[#allocation18_spill] sm:$0xff] %v3286_v50 }
  0x1b   :  { %429 = vmatpush1.bf16.msra.mxu0 %v3061_v26  ;;  %472 = vmatpush1.bf16.msra.mxu1 %v3066_v27 }
  0x1c   :  { %430 = vmatprep.subr.bf16.mxu0 %v3073_v28  ;;  %473 = vmatprep.subr.bf16.mxu1 %v3080_v29 }
  0x1f   :  { %431 = vmatpush1.bf16.msra.mxu0 %v3087_v30  ;;  %474 = vmatpush1.bf16.msra.mxu1 %v3092_v31 }
  0x20   :  { %432 = vmatprep.subr.bf16.mxu0 %v3099_v32  ;;  %475 = vmatprep.subr.bf16.mxu1 %v3104_v33 }
  0x23   :  { %433 = vmatpush1.bf16.msra.mxu0 %v3114_v35  ;;  %476 = vmatpush1.bf16.msra.mxu1 %v3121_v36 }
  0x24   :  { %434 = vmatprep.subr.bf16.mxu0 %v3128_v37  ;;  %477 = vmatprep.subr.bf16.mxu1 %v3133_v38 }
  0x27   :  { %435 = vmatpush1.bf16.msra.mxu0 %v3138_v39  ;;  %478 = vmatpush1.bf16.msra.mxu1 %v3147_v40 }
  0x28   :  { %436 = vmatprep.subr.bf16.mxu0 %v3154_v41  ;;  %479 = vmatprep.subr.bf16.mxu1 %v3159_v42 }
  0x2b   :  { %437 = vmatpush1.bf16.msra.mxu0 %v3172_v45  ;;  %480 = vmatpush1.bf16.msra.mxu1 %v3179_v46 }
  0x2c   :  { %2304 = vmatprep.subr.msk.bf16.mxu0 %vm403_vm1, %v3181_v47  ;;  %2306 = vmatprep.subr.msk.bf16.mxu1 %vm403_vm1, %v3185_v48 }
  0x2f   :  { %439 = vmatpush1.bf16.msra.mxu0 %v3199_v52  ;;  %482 = vmatpush1.bf16.msra.mxu1 %v3202_v53 }
  0x30   :  { %756 = vmatprep.subr.bf16.mxu0 %v3192_v51  ;;  %799 = vmatprep.subr.bf16.mxu1 %v3207_v54 }
  0x32   :  { %449 = vmatmul.mubr.bf16.vlgmr.msra.gmra.mrb[0].mxu0 %v3212_v55  ;;  %492 = vmatmul.mubr.bf16.vlgmr.msra.gmra.mrb[0].mxu1 %v3212_v55  ;;  %v3293_v55 = vld [vmem:[%s4795_s1 + $0x60] ss:$16 sps:$4 sm:$0xff]  }
  0x33   :  { %757 = vmatpush1.bf16.msra.mxu0 %v3217_v56  ;;  %800 = vmatpush1.bf16.msra.mxu1 %v3224_v57  ;;  %5042 = vst [vmem:[#allocation19_spill] sm:$0xff] %v3293_v55 }
  0x34   :  { %758 = vmatprep.subr.bf16.mxu0 %v3231_v58  ;;  %801 = vmatprep.subr.bf16.mxu1 %v3236_v59  ;;  %v60_v59 = vld [vmem:[%s4795_s1 + $0x168] sm:$0xff]  ;;  %v2354_v58 = vcombine.low %v59_v34, %v59_v34 }
  0x35   :  { %v2356_v57 = vcombine.low %v60_v59, %v60_v59 }
  0x37   :  { %759 = vmatpush1.bf16.msra.mxu0 %v3243_v60  ;;  %802 = vmatpush1.bf16.msra.mxu1 %v3250_v61  ;;  %v3360_v61 = vld [vmem:[%s4795_s1 + $0xc4] ss:$16 sps:$4 sm:$0xff]   ;;  %v3367_v60 = vld [vmem:[%s4795_s1 + $0xcc] ss:$16 sps:$4 sm:$0xff]  }
  0x38   :  { %760 = vmatprep.subr.bf16.mxu0 %v3255_v62  ;;  %803 = vmatprep.subr.bf16.mxu1 %v3262_v63  ;;  %v3298_v63 = vld [vmem:[%s4795_s1 + $0x68] ss:$16 sps:$4 sm:$0xff]   ;;  %v3303_v62 = vld [vmem:[%s4795_s1 + $0x84] ss:$16 sps:$4 sm:$0xff]   ;;  %5052 = vst [vmem:[#allocation29_spill] sm:$0xff] %v3360_v61  ;;  %5053 = vst [vmem:[#allocation30_spill] sm:$0xff] %v3367_v60 }
  0x39   :  { %5043 = vst [vmem:[#allocation20_spill] sm:$0xff] %v3298_v63  ;;  %5044 = vst [vmem:[#allocation21_spill] sm:$0xff] %v3303_v62 }
  0x3b   :  { %761 = vmatpush1.bf16.msra.mxu0 %v3267_v43  ;;  %804 = vmatpush1.bf16.msra.mxu1 %v3274_v44  ;;  %v3310_v44 = vld [vmem:[%s4795_s1 + $0x8c] ss:$16 sps:$4 sm:$0xff]  }
  0x3c   :  { %762 = vmatprep.subr.bf16.mxu0 %v3281_v49  ;;  %805 = vmatprep.subr.bf16.mxu1 %v3286_v50  ;;  %5045 = vst [vmem:[#allocation22_spill] sm:$0xff] %v3310_v44  ;;  %v3315_v43 = vld [vmem:[%s4796_s0 + $0x4] ss:$8 sps:$4 sm:$0x3f]   ;;  %v3322_v49 = vld [vmem:[%s4795_s1 + $0x80] ss:$16 sps:$4 sm:$0xff]  }
  0x3d   :  { %5046 = vst [vmem:[#allocation23_spill] sm:$0xff] %v3322_v49  ;;  %v3327_v50 = vld [vmem:[%s4795_s1 + $0x88] ss:$16 sps:$4 sm:$0xff]   ;;  %2359 = vmatprep.mubr.msk.bf16.mxu0 %vm399_vm0, %v3315_v43  ;;  %2361 = vmatprep.mubr.msk.bf16.mxu1 %vm399_vm0, %v3315_v43  ;;  %v851_v56 = vshll.u32 %v3315_v43, 16 }
  0x3e   :  { %5047 = vst [vmem:[#allocation24_spill] sm:$0xff] %v3327_v50 }
  0x3f   :  { %763 = vmatpush1.bf16.msra.mxu0 %v3293_v55  ;;  %806 = vmatpush1.bf16.msra.mxu1 %v3298_v63  ;;  %v3334_v55 = vld [vmem:[%s4795_s1 + $0xa4] ss:$16 sps:$4 sm:$0xff]   ;;  %v3339_v63 = vld [vmem:[%s4795_s1 + $0xac] ss:$16 sps:$4 sm:$0xff]  }
  0x40   :  { %764 = vmatprep.subr.bf16.mxu0 %v3303_v62  ;;  %807 = vmatprep.subr.bf16.mxu1 %v3310_v44  ;;  %5048 = vst [vmem:[#allocation25_spill] sm:$0xff] %v3334_v55  ;;  %5049 = vst [vmem:[#allocation26_spill] sm:$0xff] %v3339_v63  ;;  %v3348_v44 = vld [vmem:[%s4795_s1 + $0xa0] ss:$16 sps:$4 sm:$0xff]   ;;  %v3353_v62 = vld [vmem:[%s4795_s1 + $0xa8] ss:$16 sps:$4 sm:$0xff]  }
  0x41   :  { %5050 = vst [vmem:[#allocation27_spill] sm:$0xff] %v3348_v44  ;;  %5051 = vst [vmem:[#allocation28_spill] sm:$0xff] %v3353_v62 }
  0x43   :  { %765 = vmatpush1.bf16.msra.mxu0 %v3322_v49  ;;  %808 = vmatpush1.bf16.msra.mxu1 %v3327_v50  ;;  %v3372_v49 = vld [vmem:[%s4795_s1 + $0xc0] ss:$16 sps:$4 sm:$0xff]   ;;  %v3415_v50 = vld [vmem:[%s4795_s1 + $0x10c] ss:$16 sps:$4 sm:$0xff]  }
  0x44   :  { %766 = vmatprep.subr.bf16.mxu0 %v3334_v55  ;;  %809 = vmatprep.subr.bf16.mxu1 %v3339_v63  ;;  %5054 = vst [vmem:[#allocation31_spill] sm:$0xff] %v3372_v49  ;;  %v3379_v55 = vld [vmem:[%s4795_s1 + $0xc8] ss:$16 sps:$4 sm:$0xff]   ;;  %v3386_v63 = vld [vmem:[%s4795_s1 + $0xe4] ss:$16 sps:$4 sm:$0xff]   ;;  %5061 = vst [vmem:[#allocation38_spill] sm:$0xff] %v3415_v50 }
  0x45   :  { %5055 = vst [vmem:[#allocation32_spill] sm:$0xff] %v3379_v55  ;;  %5056 = vst [vmem:[#allocation33_spill] sm:$0xff] %v3386_v63 }
  0x47   :  { %767 = vmatpush1.bf16.msra.mxu0 %v3348_v44  ;;  %810 = vmatpush1.bf16.msra.mxu1 %v3353_v62  ;;  %v3391_v44 = vld [vmem:[%s4795_s1 + $0xec] ss:$16 sps:$4 sm:$0xff]   ;;  %v3396_v62 = vld [vmem:[%s4795_s1 + $0xe0] ss:$16 sps:$4 sm:$0xff]  }
  0x48   :  { %768 = vmatprep.subr.bf16.mxu0 %v3360_v61  ;;  %811 = vmatprep.subr.bf16.mxu1 %v3367_v60  ;;  %5057 = vst [vmem:[#allocation34_spill] sm:$0xff] %v3391_v44  ;;  %5058 = vst [vmem:[#allocation35_spill] sm:$0xff] %v3396_v62  ;;  %v3401_v61 = vld [vmem:[%s4795_s1 + $0xe8] ss:$16 sps:$4 sm:$0xff]   ;;  %v3408_v60 = vld [vmem:[%s4795_s1 + $0x104] ss:$16 sps:$4 sm:$0xff]  }
  0x49   :  { %5059 = vst [vmem:[#allocation36_spill] sm:$0xff] %v3401_v61  ;;  %5060 = vst [vmem:[#allocation37_spill] sm:$0xff] %v3408_v60 }
  0x4b   :  { %769 = vmatpush1.bf16.msra.mxu0 %v3372_v49  ;;  %812 = vmatpush1.bf16.msra.mxu1 %v3379_v55  ;;  %v3420_v49 = vld [vmem:[%s4795_s1 + $0x100] ss:$16 sps:$4 sm:$0xff]   ;;  %v3461_v55 = vld [vmem:[%s4795_s1 + $0x14c] ss:$16 sps:$4 sm:$0xff]  }
  0x4c   :  { %770 = vmatprep.subr.bf16.mxu0 %v3386_v63  ;;  %813 = vmatprep.subr.bf16.mxu1 %v3391_v44  ;;  %5062 = vst [vmem:[#allocation39_spill] sm:$0xff] %v3420_v49  ;;  %v3427_v63 = vld [vmem:[%s4795_s1 + $0x108] ss:$16 sps:$4 sm:$0xff]   ;;  %v3434_v44 = vld [vmem:[%s4795_s1 + $0x124] ss:$16 sps:$4 sm:$0xff]   ;;  %5069 = vst [vmem:[#allocation46_spill] sm:$0xff] %v3461_v55 }
  0x4d   :  { %5063 = vst [vmem:[#allocation40_spill] sm:$0xff] %v3427_v63  ;;  %5064 = vst [vmem:[#allocation41_spill] sm:$0xff] %v3434_v44 }
  0x4f   :  { %771 = vmatpush1.bf16.msra.mxu0 %v3396_v62  ;;  %814 = vmatpush1.bf16.msra.mxu1 %v3401_v61  ;;  %v3439_v62 = vld [vmem:[%s4795_s1 + $0x12c] ss:$16 sps:$4 sm:$0xff]   ;;  %v3444_v61 = vld [vmem:[%s4795_s1 + $0x120] ss:$16 sps:$4 sm:$0xff]  }
  0x50   :  { %772 = vmatprep.subr.bf16.mxu0 %v3408_v60  ;;  %815 = vmatprep.subr.bf16.mxu1 %v3415_v50  ;;  %5065 = vst [vmem:[#allocation42_spill] sm:$0xff] %v3439_v62  ;;  %5066 = vst [vmem:[#allocation43_spill] sm:$0xff] %v3444_v61  ;;  %v3449_v60 = vld [vmem:[%s4795_s1 + $0x128] ss:$16 sps:$4 sm:$0xff]   ;;  %v3454_v50 = vld [vmem:[%s4795_s1 + $0x144] ss:$16 sps:$4 sm:$0xff]  }
  0x51   :  { %5067 = vst [vmem:[#allocation44_spill] sm:$0xff] %v3449_v60  ;;  %5068 = vst [vmem:[#allocation45_spill] sm:$0xff] %v3454_v50 }
  0x53   :  { %773 = vmatpush1.bf16.msra.mxu0 %v3420_v49  ;;  %816 = vmatpush1.bf16.msra.mxu1 %v3427_v63  ;;  %v3474_v63 = vld [vmem:[%s4795_s1 + $0x140] ss:$16 sps:$4 sm:$0xff]   ;;  %v3487_v49 = vcombine.high %v60_v59, %v60_v59  ;;  %v3510_v59 = vsel %vm403_vm1, %v2356_v57, 0  ;;  %v3528_v57 = vld [vmem:[%s4795_s1 + $0x2e8] ss:$16 sps:$4 sm:$0xff]  }
  0x54   :  { %774 = vmatprep.subr.bf16.mxu0 %v3434_v44  ;;  %817 = vmatprep.subr.bf16.mxu1 %v3439_v62  ;;  %5070 = vst [vmem:[#allocation47_spill] sm:$0xff] %v3474_v63  ;;  %v3481_v62 = vld [vmem:[%s4795_s1 + $0x148] ss:$16 sps:$4 sm:$0xff]   ;;  %v3483_v44 = vcombine.high %v59_v34, %v59_v34  ;;  %v3507_v34 = vsel %vm403_vm1, %v2354_v58, 0  ;;  %5077 = vst [vmem:[#allocation54_spill] sm:$0xff] %v3510_v59 }
  0x55   :  { %5071 = vst [vmem:[#allocation48_spill] sm:$0xff] %v3481_v62  ;;  %5073 = vst [vmem:[#allocation50_spill] sm:$0xff] %v3487_v49  ;;  %v3523_v58 = vld [vmem:[%s4795_s1 + $0x2e0] ss:$16 sps:$4 sm:$0xff]  }
  0x56   :  { %5072 = vst [vmem:[#allocation49_spill] sm:$0xff] %v3483_v44  ;;  %5076 = vst [vmem:[#allocation53_spill] sm:$0xff] %v3507_v34 }
  0x57   :  { %775 = vmatpush1.bf16.msra.mxu0 %v3444_v61  ;;  %818 = vmatpush1.bf16.msra.mxu1 %v3449_v60  ;;  %v3495_v60 = vld [vmem:[%s4795_s1 + $0x2e4] ss:$16 sps:$4 sm:$0xff]   ;;  %5078 = vst [vmem:[#allocation55_spill] sm:$0xff] %v3523_v58  ;;  %5079 = vst [vmem:[#allocation56_spill] sm:$0xff] %v3528_v57 }
  0x58   :  { %776 = vmatprep.subr.bf16.mxu0 %v3454_v50  ;;  %819 = vmatprep.subr.bf16.mxu1 %v3461_v55  ;;  %5074 = vst [vmem:[#allocation51_spill] sm:$0xff] %v3495_v60  ;;  %v3500_v50 = vld [vmem:[%s4795_s1 + $0x2ec] ss:$16 sps:$4 sm:$0xff]   ;;  %v3516_v55 = vld [vmem:[%s4796_s0] ss:$8 sps:$4 sm:$0x3f]  }
  0x59   :  { %5075 = vst [vmem:[#allocation52_spill] sm:$0xff] %v3500_v50  ;;  %v843_v61 = vshrl.u32 %v3516_v55, 16 }
  0x5b   :  { %777 = vmatpush1.bf16.msra.mxu0 %v3474_v63  ;;  %820 = vmatpush1.bf16.msra.mxu1 %v3481_v62  ;;  %v849_v62 = vshrl.u32 %v3315_v43, 16  ;;  %v853_v63 = vrot.slane %v851_v56, 1  ;;  %v3535_v56 = vld [vmem:[%s4795_s1 + $0x304] ss:$16 sps:$4 sm:$0xff]   ;;  %v3540_v43 = vld [vmem:[%s4795_s1 + $0x30c] ss:$16 sps:$4 sm:$0xff]  }
  0x5c   :  { %2358 = vmatprep.subr.msk.bf16.mxu0 %vm403_vm1, %v3483_v44  ;;  %2360 = vmatprep.subr.msk.bf16.mxu1 %vm403_vm1, %v3487_v49  ;;  %5080 = vst [vmem:[#allocation57_spill] sm:$0xff] %v3535_v56  ;;  %5081 = vst [vmem:[#allocation58_spill] sm:$0xff] %v3540_v43 }
  0x5f   :  { %779 = vmatpush1.bf16.msra.mxu0 %v3507_v34  ;;  %822 = vmatpush1.bf16.msra.mxu1 %v3510_v59  ;;  %v3542_v59 = vor.u32 %v853_v63, %v849_v62  ;;  %v3563_v62 = vld [vmem:[%s4795_s1 + $0x324] ss:$16 sps:$4 sm:$0xff]   ;;  %v3568_v63 = vld [vmem:[%s4795_s1 + $0x32c] ss:$16 sps:$4 sm:$0xff]   ;;  %v3783_v34 = vld [vmem:[%s4795_s1 + $0x428] ss:$16 sps:$4 sm:$0xff]  }
  0x60   :  { %1101 = vmatprep.subr.bf16.mxu0 %v3495_v60  ;;  %1144 = vmatprep.subr.bf16.mxu1 %v3500_v50  ;;  %v3551_v50 = vld [vmem:[%s4795_s1 + $0x300] ss:$16 sps:$4 sm:$0xff]   ;;  %v3556_v60 = vld [vmem:[%s4795_s1 + $0x308] ss:$16 sps:$4 sm:$0xff]   ;;  %5084 = vst [vmem:[#allocation61_spill] sm:$0xff] %v3563_v62  ;;  %5085 = vst [vmem:[#allocation62_spill] sm:$0xff] %v3568_v63 }
  0x61   :  { %5082 = vst [vmem:[#allocation59_spill] sm:$0xff] %v3551_v50  ;;  %5083 = vst [vmem:[#allocation60_spill] sm:$0xff] %v3556_v60 }
  0x62   :  { %789 = vmatmul.mubr.bf16.vlgmr.msra.gmra.mrb[0].mxu0 %v3516_v55  ;;  %832 = vmatmul.mubr.bf16.vlgmr.msra.gmra.mrb[0].mxu1 %v3516_v55 }
  0x63   :  { %1102 = vmatpush1.bf16.msra.mxu0 %v3523_v58  ;;  %1145 = vmatpush1.bf16.msra.mxu1 %v3528_v57  ;;  %v2252_v57 = vld [vmem:[%s4795_s1 + $0x440] sm:$0xff] }
  0x64   :  { %1103 = vmatprep.subr.bf16.mxu0 %v3535_v56  ;;  %1146 = vmatprep.subr.bf16.mxu1 %v3540_v43  ;;  %v3579_v43 = vld [vmem:[%s4795_s1 + $0x320] ss:$16 sps:$4 sm:$0xff]   ;;  %v3584_v56 = vld [vmem:[%s4795_s1 + $0x328] ss:$16 sps:$4 sm:$0xff]   ;;  %v3785_v49 = vcombine.high %v2252_v57, %v2252_v57 }
  0x65   :  { %2411 = vmatprep.mubr.msk.bf16.mxu0 %vm399_vm0, %v3542_v59  ;;  %2413 = vmatprep.mubr.msk.bf16.mxu1 %vm399_vm0, %v3542_v59  ;;  %5086 = vst [vmem:[#allocation63_spill] sm:$0xff] %v3579_v43  ;;  %5087 = vst [vmem:[#allocation64_spill] sm:$0xff] %v3584_v56  ;;  %v3778_v58 = vld [vmem:[%s4795_s1 + $0x420] ss:$16 sps:$4 sm:$0xff]  }
  0x67   :  { %1104 = vmatpush1.bf16.msra.mxu0 %v3551_v50  ;;  %1147 = vmatpush1.bf16.msra.mxu1 %v3556_v60  ;;  %v3591_v50 = vld [vmem:[%s4795_s1 + $0x344] ss:$16 sps:$4 sm:$0xff]   ;;  %v3596_v60 = vld [vmem:[%s4795_s1 + $0x34c] ss:$16 sps:$4 sm:$0xff]  }
  0x68   :  { %1105 = vmatprep.subr.bf16.mxu0 %v3563_v62  ;;  %1148 = vmatprep.subr.bf16.mxu1 %v3568_v63  ;;  %5088 = vst [vmem:[#allocation65_spill] sm:$0xff] %v3591_v50  ;;  %5089 = vst [vmem:[#allocation66_spill] sm:$0xff] %v3596_v60  ;;  %v3603_v62 = vld [vmem:[%s4795_s1 + $0x340] ss:$16 sps:$4 sm:$0xff]   ;;  %v3608_v63 = vld [vmem:[%s4795_s1 + $0x348] ss:$16 sps:$4 sm:$0xff]  }
  0x69   :  { %5090 = vst [vmem:[#allocation67_spill] sm:$0xff] %v3603_v62  ;;  %5091 = vst [vmem:[#allocation68_spill] sm:$0xff] %v3608_v63 }
  0x6b   :  { %1106 = vmatpush1.bf16.msra.mxu0 %v3579_v43  ;;  %1149 = vmatpush1.bf16.msra.mxu1 %v3584_v56  ;;  %v3615_v43 = vld [vmem:[%s4795_s1 + $0x364] ss:$16 sps:$4 sm:$0xff]   ;;  %v3620_v56 = vld [vmem:[%s4795_s1 + $0x36c] ss:$16 sps:$4 sm:$0xff]  }
  0x6c   :  { %1107 = vmatprep.subr.bf16.mxu0 %v3591_v50  ;;  %1150 = vmatprep.subr.bf16.mxu1 %v3596_v60  ;;  %5092 = vst [vmem:[#allocation69_spill] sm:$0xff] %v3615_v43  ;;  %5093 = vst [vmem:[#allocation70_spill] sm:$0xff] %v3620_v56  ;;  %v3627_v50 = vld [vmem:[%s4795_s1 + $0x360] ss:$16 sps:$4 sm:$0xff]   ;;  %v3632_v60 = vld [vmem:[%s4795_s1 + $0x368] ss:$16 sps:$4 sm:$0xff]  }
  0x6d   :  { %5094 = vst [vmem:[#allocation71_spill] sm:$0xff] %v3627_v50  ;;  %5095 = vst [vmem:[#allocation72_spill] sm:$0xff] %v3632_v60 }
  0x6f   :  { %1108 = vmatpush1.bf16.msra.mxu0 %v3603_v62  ;;  %1151 = vmatpush1.bf16.msra.mxu1 %v3608_v63  ;;  %v3639_v62 = vld [vmem:[%s4795_s1 + $0x384] ss:$16 sps:$4 sm:$0xff]   ;;  %v3644_v63 = vld [vmem:[%s4795_s1 + $0x38c] ss:$16 sps:$4 sm:$0xff]  }
  0x70   :  { %1109 = vmatprep.subr.bf16.mxu0 %v3615_v43  ;;  %1152 = vmatprep.subr.bf16.mxu1 %v3620_v56  ;;  %5096 = vst [vmem:[#allocation73_spill] sm:$0xff] %v3639_v62  ;;  %5097 = vst [vmem:[#allocation74_spill] sm:$0xff] %v3644_v63  ;;  %v3651_v43 = vld [vmem:[%s4795_s1 + $0x380] ss:$16 sps:$4 sm:$0xff]   ;;  %v3656_v56 = vld [vmem:[%s4795_s1 + $0x388] ss:$16 sps:$4 sm:$0xff]  }
  0x71   :  { %5098 = vst [vmem:[#allocation75_spill] sm:$0xff] %v3651_v43  ;;  %5099 = vst [vmem:[#allocation76_spill] sm:$0xff] %v3656_v56 }
  0x73   :  { %1110 = vmatpush1.bf16.msra.mxu0 %v3627_v50  ;;  %1153 = vmatpush1.bf16.msra.mxu1 %v3632_v60  ;;  %v3663_v50 = vld [vmem:[%s4795_s1 + $0x3a4] ss:$16 sps:$4 sm:$0xff]   ;;  %v3668_v60 = vld [vmem:[%s4795_s1 + $0x3ac] ss:$16 sps:$4 sm:$0xff]  }
  0x74   :  { %1111 = vmatprep.subr.bf16.mxu0 %v3639_v62  ;;  %1154 = vmatprep.subr.bf16.mxu1 %v3644_v63  ;;  %5100 = vst [vmem:[#allocation77_spill] sm:$0xff] %v3663_v50  ;;  %5101 = vst [vmem:[#allocation78_spill] sm:$0xff] %v3668_v60  ;;  %v3675_v62 = vld [vmem:[%s4795_s1 + $0x3a0] ss:$16 sps:$4 sm:$0xff]   ;;  %v3680_v63 = vld [vmem:[%s4795_s1 + $0x3a8] ss:$16 sps:$4 sm:$0xff]  }
  0x75   :  { %5102 = vst [vmem:[#allocation79_spill] sm:$0xff] %v3675_v62  ;;  %5103 = vst [vmem:[#allocation80_spill] sm:$0xff] %v3680_v63 }
  0x77   :  { %1112 = vmatpush1.bf16.msra.mxu0 %v3651_v43  ;;  %1155 = vmatpush1.bf16.msra.mxu1 %v3656_v56  ;;  %v3687_v43 = vld [vmem:[%s4795_s1 + $0x3c4] ss:$16 sps:$4 sm:$0xff]   ;;  %v3692_v56 = vld [vmem:[%s4795_s1 + $0x3cc] ss:$16 sps:$4 sm:$0xff]  }
  0x78   :  { %1113 = vmatprep.subr.bf16.mxu0 %v3663_v50  ;;  %1156 = vmatprep.subr.bf16.mxu1 %v3668_v60  ;;  %5104 = vst [vmem:[#allocation81_spill] sm:$0xff] %v3687_v43  ;;  %5105 = vst [vmem:[#allocation82_spill] sm:$0xff] %v3692_v56  ;;  %v3699_v50 = vld [vmem:[%s4795_s1 + $0x3c0] ss:$16 sps:$4 sm:$0xff]   ;;  %v3704_v60 = vld [vmem:[%s4795_s1 + $0x3c8] ss:$16 sps:$4 sm:$0xff]  }
  0x79   :  { %5106 = vst [vmem:[#allocation83_spill] sm:$0xff] %v3699_v50  ;;  %5107 = vst [vmem:[#allocation84_spill] sm:$0xff] %v3704_v60 }
  0x7b   :  { %1114 = vmatpush1.bf16.msra.mxu0 %v3675_v62  ;;  %1157 = vmatpush1.bf16.msra.mxu1 %v3680_v63  ;;  %v3711_v62 = vld [vmem:[%s4795_s1 + $0x3e4] ss:$16 sps:$4 sm:$0xff]   ;;  %v3716_v63 = vld [vmem:[%s4795_s1 + $0x3ec] ss:$16 sps:$4 sm:$0xff]  }
  0x7c   :  { %1115 = vmatprep.subr.bf16.mxu0 %v3687_v43  ;;  %1158 = vmatprep.subr.bf16.mxu1 %v3692_v56  ;;  %5108 = vst [vmem:[#allocation85_spill] sm:$0xff] %v3711_v62  ;;  %5109 = vst [vmem:[#allocation86_spill] sm:$0xff] %v3716_v63  ;;  %v3723_v43 = vld [vmem:[%s4795_s1 + $0x3e0] ss:$16 sps:$4 sm:$0xff]   ;;  %v3728_v56 = vld [vmem:[%s4795_s1 + $0x3e8] ss:$16 sps:$4 sm:$0xff]  }
  0x7d   :  { %5110 = vst [vmem:[#allocation87_spill] sm:$0xff] %v3723_v43  ;;  %5111 = vst [vmem:[#allocation88_spill] sm:$0xff] %v3728_v56 }
  0x7f   :  { %1116 = vmatpush1.bf16.msra.mxu0 %v3699_v50  ;;  %1159 = vmatpush1.bf16.msra.mxu1 %v3704_v60  ;;  %v3735_v50 = vld [vmem:[%s4795_s1 + $0x404] ss:$16 sps:$4 sm:$0xff]   ;;  %v3740_v60 = vld [vmem:[%s4795_s1 + $0x40c] ss:$16 sps:$4 sm:$0xff]  }
  0x80   :  { %1117 = vmatprep.subr.bf16.mxu0 %v3711_v62  ;;  %1160 = vmatprep.subr.bf16.mxu1 %v3716_v63  ;;  %5112 = vst [vmem:[#allocation89_spill] sm:$0xff] %v3735_v50  ;;  %5113 = vst [vmem:[#allocation90_spill] sm:$0xff] %v3740_v60  ;;  %v3747_v62 = vld [vmem:[%s4795_s1 + $0x400] ss:$16 sps:$4 sm:$0xff]   ;;  %v3752_v63 = vld [vmem:[%s4795_s1 + $0x408] ss:$16 sps:$4 sm:$0xff]  }
  0x81   :  { %5114 = vst [vmem:[#allocation91_spill] sm:$0xff] %v3747_v62  ;;  %5115 = vst [vmem:[#allocation92_spill] sm:$0xff] %v3752_v63 }
  0x83   :  { %1118 = vmatpush1.bf16.msra.mxu0 %v3723_v43  ;;  %1161 = vmatpush1.bf16.msra.mxu1 %v3728_v56  ;;  %v3759_v43 = vld [vmem:[%s4795_s1 + $0x424] ss:$16 sps:$4 sm:$0xff]   ;;  %v3764_v56 = vld [vmem:[%s4795_s1 + $0x42c] ss:$16 sps:$4 sm:$0xff]  }
  0x84   :  { %1119 = vmatprep.subr.bf16.mxu0 %v3735_v50  ;;  %1162 = vmatprep.subr.bf16.mxu1 %v3740_v60  ;;  %5116 = vst [vmem:[#allocation93_spill] sm:$0xff] %v3759_v43  ;;  %5117 = vst [vmem:[#allocation94_spill] sm:$0xff] %v3764_v56  ;;  %v2253_v50 = vld [vmem:[%s4795_s1 + $0x448] sm:$0xff]  ;;  %v845_v60 = vshll.u32 %v3516_v55, 16  ;;  %v5163_v55 = vld [vmem:[#allocation50_spill] sm:$0xff] }
  0x85   :  { %v3789_v44 = vcombine.high %v2253_v50, %v2253_v50 }
  0x86   :  { %v847_v54 = vrot.slane %v845_v60, 1 }
  0x87   :  { %1120 = vmatpush1.bf16.msra.mxu0 %v3747_v62  ;;  %1163 = vmatpush1.bf16.msra.mxu1 %v3752_v63  ;;  %v2406_v62 = vcombine.low %v2252_v57, %v2252_v57  ;;  %v2408_v63 = vcombine.low %v2253_v50, %v2253_v50  ;;  %v5165_v57 = vld [vmem:[#allocation54_spill] sm:$0xff] }
  0x88   :  { %1121 = vmatprep.subr.bf16.mxu0 %v3759_v43  ;;  %1164 = vmatprep.subr.bf16.mxu1 %v3764_v56  ;;  %v848_v50 = vor.u32 %v847_v54, %v843_v61  ;;  %v5162_v54 = vld [vmem:[#allocation49_spill] sm:$0xff] }
  0x89   :  { %v3799_v43 = vsel %vm403_vm1, %v2406_v62, 0  ;;  %v3802_v56 = vsel %vm403_vm1, %v2408_v63, 0  ;;  %v5166_v62 = vld [vmem:[#allocation51_spill] sm:$0xff]  ;;  %v5167_v63 = vld [vmem:[#allocation52_spill] sm:$0xff] }
  0x8b   :  { %1122 = vmatpush1.bf16.msra.mxu0 %v3778_v58  ;;  %1165 = vmatpush1.bf16.msra.mxu1 %v3783_v34 }
  0x8c   :  { %2410 = vmatprep.subr.msk.bf16.mxu0 %vm403_vm1, %v3785_v49  ;;  %2412 = vmatprep.subr.msk.bf16.mxu1 %vm403_vm1, %v3789_v44 }
  0x8f   :  { %1124 = vmatpush1.bf16.msra.mxu0 %v3799_v43  ;;  %1167 = vmatpush1.bf16.msra.mxu1 %v3802_v56 }
  0x90   :  { %1195 = vmatprep.subr.bf16.mxu0 %v2909_v0  ;;  %1238 = vmatprep.subr.bf16.mxu1 %v2914_v1  ;;  %v5118_v0 = vld [vmem:[#allocation5_spill] sm:$0xff]  ;;  %v5119_v1 = vld [vmem:[#allocation7_spill] sm:$0xff] }
  0x92   :  { %1134 = vmatmul.mubr.bf16.vlgmr.msra.gmra.mrb[0].mxu0 %v848_v50  ;;  %1177 = vmatmul.mubr.bf16.vlgmr.msra.gmra.mrb[0].mxu1 %v848_v50 }
  0x93   :  { %1196 = vmatpush1.bf16.msra.mxu0 %v2920_v2  ;;  %1239 = vmatpush1.bf16.msra.mxu1 %v2925_v3  ;;  %v5120_v2 = vld [vmem:[#allocation8_spill] sm:$0xff]  ;;  %v5121_v3 = vld [vmem:[#allocation9_spill] sm:$0xff] }
  0x94   :  { %1197 = vmatprep.subr.bf16.mxu0 %v2931_v4  ;;  %1240 = vmatprep.subr.bf16.mxu1 %v2938_v5  ;;  %v5122_v4 = vld [vmem:[#allocation10_spill] sm:$0xff] }
  0x95   :  { %2415 = vmatprep.mubr.msk.bf16.mxu0 %vm399_vm0, %v3542_v59  ;;  %2417 = vmatprep.mubr.msk.bf16.mxu1 %vm399_vm0, %v3542_v59  ;;  %v5123_v5 = vld [vmem:[#allocation2_spill] sm:$0xff]  ;;  %v5164_v59 = vld [vmem:[#allocation53_spill] sm:$0xff] }
  0x96   :  { %v1374_v60 = vshrl.u32 %v5123_v5, 16 }
  0x97   :  { %1198 = vmatpush1.bf16.msra.mxu0 %v2943_v6  ;;  %1241 = vmatpush1.bf16.msra.mxu1 %v2949_v7  ;;  %v5124_v6 = vld [vmem:[#allocation11_spill] sm:$0xff]  ;;  %v5125_v7 = vld [vmem:[#allocation12_spill] sm:$0xff] }
  0x98   :  { %1199 = vmatprep.subr.bf16.mxu0 %v2955_v8  ;;  %1242 = vmatprep.subr.bf16.mxu1 %v2960_v9  ;;  %v5126_v8 = vld [vmem:[#allocation13_spill] sm:$0xff]  ;;  %v5127_v9 = vld [vmem:[#allocation14_spill] sm:$0xff] }
  0x9b   :  { %1200 = vmatpush1.bf16.msra.mxu0 %v2965_v10  ;;  %1243 = vmatpush1.bf16.msra.mxu1 %v2970_v11  ;;  %v5128_v10 = vld [vmem:[#allocation15_spill] sm:$0xff]  ;;  %v5129_v11 = vld [vmem:[#allocation16_spill] sm:$0xff] }
  0x9c   :  { %1201 = vmatprep.subr.bf16.mxu0 %v2977_v12  ;;  %1244 = vmatprep.subr.bf16.mxu1 %v2984_v13  ;;  %v5130_v12 = vld [vmem:[#allocation17_spill] sm:$0xff]  ;;  %v5131_v13 = vld [vmem:[#allocation18_spill] sm:$0xff] }
  0x9f   :  { %1202 = vmatpush1.bf16.msra.mxu0 %v2989_v14  ;;  %1245 = vmatpush1.bf16.msra.mxu1 %v2996_v15  ;;  %v5132_v14 = vld [vmem:[#allocation19_spill] sm:$0xff]  ;;  %v5133_v15 = vld [vmem:[#allocation20_spill] sm:$0xff] }
  0xa0   :  { %1203 = vmatprep.subr.bf16.mxu0 %v3001_v16  ;;  %1246 = vmatprep.subr.bf16.mxu1 %v3008_v17  ;;  %v5134_v16 = vld [vmem:[#allocation21_spill] sm:$0xff]  ;;  %v5135_v17 = vld [vmem:[#allocation22_spill] sm:$0xff] }
  0xa3   :  { %1204 = vmatpush1.bf16.msra.mxu0 %v3013_v18  ;;  %1247 = vmatpush1.bf16.msra.mxu1 %v3018_v19  ;;  %v5136_v18 = vld [vmem:[#allocation23_spill] sm:$0xff]  ;;  %v5137_v19 = vld [vmem:[#allocation24_spill] sm:$0xff] }
  0xa4   :  { %1205 = vmatprep.subr.bf16.mxu0 %v3025_v20  ;;  %1248 = vmatprep.subr.bf16.mxu1 %v3032_v21  ;;  %v5138_v20 = vld [vmem:[#allocation25_spill] sm:$0xff]  ;;  %v5139_v21 = vld [vmem:[#allocation26_spill] sm:$0xff] }
  0xa7   :  { %1206 = vmatpush1.bf16.msra.mxu0 %v3037_v22  ;;  %1249 = vmatpush1.bf16.msra.mxu1 %v3044_v23  ;;  %v5140_v22 = vld [vmem:[#allocation27_spill] sm:$0xff]  ;;  %v5141_v23 = vld [vmem:[#allocation28_spill] sm:$0xff] }
  0xa8   :  { %1207 = vmatprep.subr.bf16.mxu0 %v3049_v24  ;;  %1250 = vmatprep.subr.bf16.mxu1 %v3056_v25  ;;  %v5142_v24 = vld [vmem:[#allocation29_spill] sm:$0xff]  ;;  %v5143_v25 = vld [vmem:[#allocation30_spill] sm:$0xff] }
  0xab   :  { %1208 = vmatpush1.bf16.msra.mxu0 %v3061_v26  ;;  %1251 = vmatpush1.bf16.msra.mxu1 %v3066_v27  ;;  %v5144_v26 = vld [vmem:[#allocation31_spill] sm:$0xff]  ;;  %v5145_v27 = vld [vmem:[#allocation32_spill] sm:$0xff] }
  0xac   :  { %1209 = vmatprep.subr.bf16.mxu0 %v3073_v28  ;;  %1252 = vmatprep.subr.bf16.mxu1 %v3080_v29  ;;  %v5146_v28 = vld [vmem:[#allocation33_spill] sm:$0xff]  ;;  %v5147_v29 = vld [vmem:[#allocation34_spill] sm:$0xff] }
  0xaf   :  { %1210 = vmatpush1.bf16.msra.mxu0 %v3087_v30  ;;  %1253 = vmatpush1.bf16.msra.mxu1 %v3092_v31  ;;  %v5148_v30 = vld [vmem:[#allocation35_spill] sm:$0xff]  ;;  %v5149_v31 = vld [vmem:[#allocation36_spill] sm:$0xff] }
  0xb0   :  { %1211 = vmatprep.subr.bf16.mxu0 %v3099_v32  ;;  %1254 = vmatprep.subr.bf16.mxu1 %v3104_v33  ;;  %v5150_v32 = vld [vmem:[#allocation37_spill] sm:$0xff]  ;;  %v5151_v33 = vld [vmem:[#allocation38_spill] sm:$0xff] }
  0xb3   :  { %1212 = vmatpush1.bf16.msra.mxu0 %v3114_v35  ;;  %1255 = vmatpush1.bf16.msra.mxu1 %v3121_v36  ;;  %v5152_v35 = vld [vmem:[#allocation39_spill] sm:$0xff]  ;;  %v5153_v36 = vld [vmem:[#allocation40_spill] sm:$0xff] }
  0xb4   :  { %1213 = vmatprep.subr.bf16.mxu0 %v3128_v37  ;;  %1256 = vmatprep.subr.bf16.mxu1 %v3133_v38  ;;  %v5154_v37 = vld [vmem:[#allocation41_spill] sm:$0xff]  ;;  %v5155_v38 = vld [vmem:[#allocation42_spill] sm:$0xff] }
  0xb7   :  { %1214 = vmatpush1.bf16.msra.mxu0 %v3138_v39  ;;  %1257 = vmatpush1.bf16.msra.mxu1 %v3147_v40  ;;  %v5156_v39 = vld [vmem:[#allocation43_spill] sm:$0xff]  ;;  %v5157_v40 = vld [vmem:[#allocation44_spill] sm:$0xff] }
  0xb8   :  { %1215 = vmatprep.subr.bf16.mxu0 %v3154_v41  ;;  %1258 = vmatprep.subr.bf16.mxu1 %v3159_v42  ;;  %v5158_v41 = vld [vmem:[#allocation45_spill] sm:$0xff]  ;;  %v5159_v42 = vld [vmem:[#allocation46_spill] sm:$0xff] }
  0xbb   :  { %1216 = vmatpush1.bf16.msra.mxu0 %v3172_v45  ;;  %1259 = vmatpush1.bf16.msra.mxu1 %v3179_v46  ;;  %v1376_v45 = vshll.u32 %v5123_v5, 16  ;;  %v5160_v46 = vld [vmem:[#allocation47_spill] sm:$0xff] }
  0xbc   :  { %2414 = vmatprep.subr.msk.bf16.mxu0 %vm403_vm1, %v3181_v47  ;;  %2416 = vmatprep.subr.msk.bf16.mxu1 %vm403_vm1, %v3185_v48 }
  0xbd   :  { %v1378_v61 = vrot.slane %v1376_v45, 1  ;;  %v5173_v45 = vld [vmem:[#allocation59_spill] sm:$0xff] }
  0xbf   :  { %1218 = vmatpush1.bf16.msra.mxu0 %v3199_v52  ;;  %1261 = vmatpush1.bf16.msra.mxu1 %v3202_v53 }
  0xc0   :  { %1281 = vmatprep.subr.bf16.mxu0 %v3192_v51  ;;  %1324 = vmatprep.subr.bf16.mxu1 %v5118_v0  ;;  %v5161_v51 = vld [vmem:[#allocation48_spill] sm:$0xff]  ;;  %v5168_v0 = vld [vmem:[#allocation6_spill] sm:$0xff] }
  0xc2   :  { %1228 = vmatmul.mubr.bf16.vlgmr.msra.gmra.mrb[4].mxu0 %v848_v50  ;;  %1271 = vmatmul.mubr.bf16.vlgmr.msra.gmra.mrb[4].mxu1 %v848_v50  ;;  %v1379_v50 = vor.u32 %v1378_v61, %v1374_v60  ;;  %v5175_v60 = vld [vmem:[#allocation61_spill] sm:$0xff]  ;;  %v5176_v61 = vld [vmem:[#allocation62_spill] sm:$0xff] }
  0xc3   :  { %1282 = vmatpush1.bf16.msra.mxu0 %v5119_v1  ;;  %1325 = vmatpush1.bf16.msra.mxu1 %v5120_v2 }
  0xc4   :  { %1283 = vmatprep.subr.bf16.mxu0 %v5121_v3  ;;  %1326 = vmatprep.subr.bf16.mxu1 %v5122_v4 }
  0xc5   :  { %2419 = vmatprep.mubr.msk.bf16.mxu0 %vm399_vm0, %v5123_v5  ;;  %2421 = vmatprep.mubr.msk.bf16.mxu1 %vm399_vm0, %v5123_v5  ;;  %v5172_v5 = vld [vmem:[#allocation58_spill] sm:$0xff] }
  0xc7   :  { %1284 = vmatpush1.bf16.msra.mxu0 %v5124_v6  ;;  %1327 = vmatpush1.bf16.msra.mxu1 %v5125_v7 }
  0xc8   :  { %1285 = vmatprep.subr.bf16.mxu0 %v5126_v8  ;;  %1328 = vmatprep.subr.bf16.mxu1 %v5127_v9 }
  0xcb   :  { %1286 = vmatpush1.bf16.msra.mxu0 %v5128_v10  ;;  %1329 = vmatpush1.bf16.msra.mxu1 %v5129_v11 }
  0xcc   :  { %1287 = vmatprep.subr.bf16.mxu0 %v5130_v12  ;;  %1330 = vmatprep.subr.bf16.mxu1 %v5131_v13 }
  0xcf   :  { %1288 = vmatpush1.bf16.msra.mxu0 %v5132_v14  ;;  %1331 = vmatpush1.bf16.msra.mxu1 %v5133_v15 }
  0xd0   :  { %1289 = vmatprep.subr.bf16.mxu0 %v5134_v16  ;;  %1332 = vmatprep.subr.bf16.mxu1 %v5135_v17 }
  0xd3   :  { %1290 = vmatpush1.bf16.msra.mxu0 %v5136_v18  ;;  %1333 = vmatpush1.bf16.msra.mxu1 %v5137_v19 }
  0xd4   :  { %1291 = vmatprep.subr.bf16.mxu0 %v5138_v20  ;;  %1334 = vmatprep.subr.bf16.mxu1 %v5139_v21 }
  0xd7   :  { %1292 = vmatpush1.bf16.msra.mxu0 %v5140_v22  ;;  %1335 = vmatpush1.bf16.msra.mxu1 %v5141_v23 }
  0xd8   :  { %1293 = vmatprep.subr.bf16.mxu0 %v5142_v24  ;;  %1336 = vmatprep.subr.bf16.mxu1 %v5143_v25 }
  0xdb   :  { %1294 = vmatpush1.bf16.msra.mxu0 %v5144_v26  ;;  %1337 = vmatpush1.bf16.msra.mxu1 %v5145_v27 }
  0xdc   :  { %1295 = vmatprep.subr.bf16.mxu0 %v5146_v28  ;;  %1338 = vmatprep.subr.bf16.mxu1 %v5147_v29 }
  0xdf   :  { %1296 = vmatpush1.bf16.msra.mxu0 %v5148_v30  ;;  %1339 = vmatpush1.bf16.msra.mxu1 %v5149_v31 }
  0xe0   :  { %1297 = vmatprep.subr.bf16.mxu0 %v5150_v32  ;;  %1340 = vmatprep.subr.bf16.mxu1 %v5151_v33 }
  0xe3   :  { %1298 = vmatpush1.bf16.msra.mxu0 %v5152_v35  ;;  %1341 = vmatpush1.bf16.msra.mxu1 %v5153_v36 }
  0xe4   :  { %1299 = vmatprep.subr.bf16.mxu0 %v5154_v37  ;;  %1342 = vmatprep.subr.bf16.mxu1 %v5155_v38 }
  0xe7   :  { %1300 = vmatpush1.bf16.msra.mxu0 %v5156_v39  ;;  %1343 = vmatpush1.bf16.msra.mxu1 %v5157_v40 }
  0xe8   :  { %1301 = vmatprep.subr.bf16.mxu0 %v5158_v41  ;;  %1344 = vmatprep.subr.bf16.mxu1 %v5159_v42 }
  0xeb   :  { %1302 = vmatpush1.bf16.msra.mxu0 %v5160_v46  ;;  %1345 = vmatpush1.bf16.msra.mxu1 %v5161_v51  ;;  %v5170_v51 = vld [vmem:[#allocation56_spill] sm:$0xff] }
  0xec   :  { %2418 = vmatprep.subr.msk.bf16.mxu0 %vm403_vm1, %v5162_v54  ;;  %2420 = vmatprep.subr.msk.bf16.mxu1 %vm403_vm1, %v5163_v55  ;;  %v5169_v54 = vld [vmem:[#allocation55_spill] sm:$0xff]  ;;  %v5171_v55 = vld [vmem:[#allocation57_spill] sm:$0xff] }
  0xef   :  { %1304 = vmatpush1.bf16.msra.mxu0 %v5164_v59  ;;  %1347 = vmatpush1.bf16.msra.mxu1 %v5165_v57  ;;  %v5182_v57 = vld [vmem:[#allocation68_spill] sm:$0xff] }
  0xf0   :  { %1384 = vmatprep.subr.bf16.mxu0 %v5166_v62  ;;  %1427 = vmatprep.subr.bf16.mxu1 %v5167_v63  ;;  %v5174_v63 = vld [vmem:[#allocation60_spill] sm:$0xff]  ;;  %v5177_v62 = vld [vmem:[#allocation63_spill] sm:$0xff] }
  0xf2   :  { %1314 = vmatmul.mubr.bf16.vlgmr.msra.gmra.mrb[4].mxu0 %v5168_v0  ;;  %1357 = vmatmul.mubr.bf16.vlgmr.msra.gmra.mrb[4].mxu1 %v5168_v0 }
  0xf3   :  { %1385 = vmatpush1.bf16.msra.mxu0 %v5169_v54  ;;  %1428 = vmatpush1.bf16.msra.mxu1 %v5170_v51  ;;  %v5178_v54 = vld [vmem:[#allocation64_spill] sm:$0xff]  ;;  %v5179_v51 = vld [vmem:[#allocation65_spill] sm:$0xff] }
  0xf4   :  { %1386 = vmatprep.subr.bf16.mxu0 %v5171_v55  ;;  %1429 = vmatprep.subr.bf16.mxu1 %v5172_v5  ;;  %v5180_v55 = vld [vmem:[#allocation66_spill] sm:$0xff]  ;;  %v5181_v5 = vld [vmem:[#allocation67_spill] sm:$0xff] }
  0xf5   :  { %2423 = vmatprep.mubr.msk.bf16.mxu0 %vm399_vm0, %v1379_v50  ;;  %2425 = vmatprep.mubr.msk.bf16.mxu1 %vm399_vm0, %v1379_v50  ;;  %v5183_v50 = vld [vmem:[#allocation69_spill] sm:$0xff] }
  0xf7   :  { %1387 = vmatpush1.bf16.msra.mxu0 %v5173_v45  ;;  %1430 = vmatpush1.bf16.msra.mxu1 %v5174_v63  ;;  %v5184_v45 = vld [vmem:[#allocation70_spill] sm:$0xff]  ;;  %v5185_v63 = vld [vmem:[#allocation71_spill] sm:$0xff] }
  0xf8   :  { %1388 = vmatprep.subr.bf16.mxu0 %v5175_v60  ;;  %1431 = vmatprep.subr.bf16.mxu1 %v5176_v61  ;;  %v5186_v60 = vld [vmem:[#allocation72_spill] sm:$0xff]  ;;  %v5187_v61 = vld [vmem:[#allocation73_spill] sm:$0xff] }
  0xfb   :  { %1389 = vmatpush1.bf16.msra.mxu0 %v5177_v62  ;;  %1432 = vmatpush1.bf16.msra.mxu1 %v5178_v54  ;;  %v5188_v62 = vld [vmem:[#allocation74_spill] sm:$0xff]  ;;  %v5189_v54 = vld [vmem:[#allocation75_spill] sm:$0xff] }
  0xfc   :  { %1390 = vmatprep.subr.bf16.mxu0 %v5179_v51  ;;  %1433 = vmatprep.subr.bf16.mxu1 %v5180_v55  ;;  %v5190_v51 = vld [vmem:[#allocation76_spill] sm:$0xff]  ;;  %v5191_v55 = vld [vmem:[#allocation77_spill] sm:$0xff] }
  0xff   :  { %1391 = vmatpush1.bf16.msra.mxu0 %v5181_v5  ;;  %1434 = vmatpush1.bf16.msra.mxu1 %v5182_v57  ;;  %v5192_v5 = vld [vmem:[#allocation78_spill] sm:$0xff]  ;;  %v5193_v57 = vld [vmem:[#allocation79_spill] sm:$0xff] }
 0x100   :  { %1392 = vmatprep.subr.bf16.mxu0 %v5183_v50  ;;  %1435 = vmatprep.subr.bf16.mxu1 %v5184_v45  ;;  %v5194_v50 = vld [vmem:[#allocation80_spill] sm:$0xff]  ;;  %v5195_v45 = vld [vmem:[#allocation81_spill] sm:$0xff] }
 0x103   :  { %1393 = vmatpush1.bf16.msra.mxu0 %v5185_v63  ;;  %1436 = vmatpush1.bf16.msra.mxu1 %v5186_v60  ;;  %v5196_v63 = vld [vmem:[#allocation82_spill] sm:$0xff]  ;;  %v5197_v60 = vld [vmem:[#allocation83_spill] sm:$0xff] }
 0x104   :  { %1394 = vmatprep.subr.bf16.mxu0 %v5187_v61  ;;  %1437 = vmatprep.subr.bf16.mxu1 %v5188_v62  ;;  %v5198_v61 = vld [vmem:[#allocation84_spill] sm:$0xff]  ;;  %v5199_v62 = vld [vmem:[#allocation85_spill] sm:$0xff] }
 0x107   :  { %1395 = vmatpush1.bf16.msra.mxu0 %v5189_v54  ;;  %1438 = vmatpush1.bf16.msra.mxu1 %v5190_v51  ;;  %v5200_v54 = vld [vmem:[#allocation86_spill] sm:$0xff]  ;;  %v5201_v51 = vld [vmem:[#allocation87_spill] sm:$0xff] }
 0x108   :  { %1396 = vmatprep.subr.bf16.mxu0 %v5191_v55  ;;  %1439 = vmatprep.subr.bf16.mxu1 %v5192_v5  ;;  %v5202_v55 = vld [vmem:[#allocation88_spill] sm:$0xff]  ;;  %v5203_v5 = vld [vmem:[#allocation89_spill] sm:$0xff] }
 0x10b   :  { %1397 = vmatpush1.bf16.msra.mxu0 %v5193_v57  ;;  %1440 = vmatpush1.bf16.msra.mxu1 %v5194_v50  ;;  %v5204_v57 = vld [vmem:[#allocation90_spill] sm:$0xff]  ;;  %v5205_v50 = vld [vmem:[#allocation91_spill] sm:$0xff] }
 0x10c   :  { %1398 = vmatprep.subr.bf16.mxu0 %v5195_v45  ;;  %1441 = vmatprep.subr.bf16.mxu1 %v5196_v63  ;;  %v1370_v45 = vshll.u32 %v5168_v0, 16  ;;  %v5206_v63 = vld [vmem:[#allocation92_spill] sm:$0xff] }
 0x10f   :  { %1399 = vmatpush1.bf16.msra.mxu0 %v5197_v60  ;;  %1442 = vmatpush1.bf16.msra.mxu1 %v5198_v61  ;;  %v5207_v60 = vld [vmem:[#allocation93_spill] sm:$0xff]  ;;  %v5208_v61 = vld [vmem:[#allocation94_spill] sm:$0xff] }
 0x110   :  { %1400 = vmatprep.subr.bf16.mxu0 %v5199_v62  ;;  %1443 = vmatprep.subr.bf16.mxu1 %v5200_v54  ;;  %v1368_v54 = vshrl.u32 %v5168_v0, 16  ;;  %v1372_v62 = vrot.slane %v1370_v45, 1  ;;  %v3975_v0 = vld [vmem:[%s4795_s1 + $0x174] ss:$16 sps:$4 sm:$0xff]   ;;  %v3981_v45 = vld [vmem:[%s4795_s1 + $0x17c] ss:$16 sps:$4 sm:$0xff]  }
 0x111   :  { %5209 = vst [vmem:[#allocation5_spill] sm:$0xff] %v3975_v0  ;;  %5210 = vst [vmem:[#allocation7_spill] sm:$0xff] %v3981_v45 }
 0x113   :  { %1401 = vmatpush1.bf16.msra.mxu0 %v5201_v51  ;;  %1444 = vmatpush1.bf16.msra.mxu1 %v5202_v55 }
 0x114   :  { %1402 = vmatprep.subr.bf16.mxu0 %v5203_v5  ;;  %1445 = vmatprep.subr.bf16.mxu1 %v5204_v57 }
 0x117   :  { %1403 = vmatpush1.bf16.msra.mxu0 %v5205_v50  ;;  %1446 = vmatpush1.bf16.msra.mxu1 %v5206_v63  ;;  %v1373_v50 = vor.u32 %v1372_v62, %v1368_v54  ;;  %v3987_v54 = vld [vmem:[%s4796_s0 + $0x34] ss:$8 sps:$4 sm:$0x3f]   ;;  %v3992_v62 = vld [vmem:[%s4795_s1 + $0x170] ss:$16 sps:$4 sm:$0xff]  }
 0x118   :  { %1404 = vmatprep.subr.bf16.mxu0 %v5207_v60  ;;  %1447 = vmatprep.subr.bf16.mxu1 %v5208_v61  ;;  %5211 = vst [vmem:[#allocation8_spill] sm:$0xff] %v3987_v54 }
 0x11b   :  { %1405 = vmatpush1.bf16.msra.mxu0 %v3778_v58  ;;  %1448 = vmatpush1.bf16.msra.mxu1 %v3783_v34 }
 0x11c   :  { %2422 = vmatprep.subr.msk.bf16.mxu0 %vm403_vm1, %v3785_v49  ;;  %2424 = vmatprep.subr.msk.bf16.mxu1 %vm403_vm1, %v3789_v44 }
 0x11f   :  { %1407 = vmatpush1.bf16.msra.mxu0 %v3799_v43  ;;  %1450 = vmatpush1.bf16.msra.mxu1 %v3802_v56 }
 0x120   :  { %1545 = vmatprep.subr.bf16.mxu0 %v3975_v0  ;;  %1588 = vmatprep.subr.bf16.mxu1 %v3981_v45  ;;  %v3998_v0 = vld [vmem:[%s4795_s1 + $0x178] ss:$16 sps:$4 sm:$0xff]   ;;  %v4004_v45 = vld [vmem:[%s4795_s1 + $0x194] ss:$16 sps:$4 sm:$0xff]  }
 0x121   :  { %5212 = vst [vmem:[#allocation9_spill] sm:$0xff] %v3998_v0  ;;  %5213 = vst [vmem:[#allocation10_spill] sm:$0xff] %v4004_v45 }
 0x122   :  { %1417 = vmatmul.mubr.bf16.vlgmr.msra.gmra.mrb[4].mxu0 %v1373_v50  ;;  %1460 = vmatmul.mubr.bf16.vlgmr.msra.gmra.mrb[4].mxu1 %v1373_v50  ;;  %v4010_v50 = vld [vmem:[%s4795_s1 + $0x19c] ss:$16 sps:$4 sm:$0xff]  }
 0x123   :  { %1546 = vmatpush1.bf16.msra.mxu0 %v3992_v62  ;;  %1589 = vmatpush1.bf16.msra.mxu1 %v3998_v0  ;;  %5214 = vst [vmem:[#allocation2_spill] sm:$0xff] %v4010_v50  ;;  %v4020_v0 = vld [vmem:[%s4795_s1 + $0x190] ss:$16 sps:$4 sm:$0xff]  }
 0x124   :  { %1547 = vmatprep.subr.bf16.mxu0 %v4004_v45  ;;  %1590 = vmatprep.subr.bf16.mxu1 %v4010_v50  ;;  %5215 = vst [vmem:[#allocation11_spill] sm:$0xff] %v4020_v0  ;;  %v4026_v45 = vld [vmem:[%s4795_s1 + $0x198] ss:$16 sps:$4 sm:$0xff]   ;;  %v4032_v50 = vld [vmem:[%s4795_s1 + $0x1b4] ss:$16 sps:$4 sm:$0xff]  }
 0x125   :  { %2435 = vmatprep.mubr.msk.bf16.mxu0 %vm399_vm0, %v3987_v54  ;;  %2437 = vmatprep.mubr.msk.bf16.mxu1 %vm399_vm0, %v3987_v54  ;;  %5216 = vst [vmem:[#allocation12_spill] sm:$0xff] %v4026_v45  ;;  %5217 = vst [vmem:[#allocation13_spill] sm:$0xff] %v4032_v50  ;;  %v4038_v54 = vld [vmem:[%s4795_s1 + $0x1bc] ss:$16 sps:$4 sm:$0xff]  }
 0x126   :  { %5218 = vst [vmem:[#allocation14_spill] sm:$0xff] %v4038_v54 }
 0x127   :  { %1548 = vmatpush1.bf16.msra.mxu0 %v4020_v0  ;;  %1591 = vmatpush1.bf16.msra.mxu1 %v4026_v45  ;;  %v4044_v0 = vld [vmem:[%s4795_s1 + $0x1b0] ss:$16 sps:$4 sm:$0xff]   ;;  %v4050_v45 = vld [vmem:[%s4795_s1 + $0x1b8] ss:$16 sps:$4 sm:$0xff]  }
 0x128   :  { %1549 = vmatprep.subr.bf16.mxu0 %v4032_v50  ;;  %1592 = vmatprep.subr.bf16.mxu1 %v4038_v54  ;;  %5219 = vst [vmem:[#allocation15_spill] sm:$0xff] %v4044_v0  ;;  %5220 = vst [vmem:[#allocation16_spill] sm:$0xff] %v4050_v45  ;;  %v4056_v50 = vld [vmem:[%s4795_s1 + $0x1d4] ss:$16 sps:$4 sm:$0xff]   ;;  %v4062_v54 = vld [vmem:[%s4795_s1 + $0x1dc] ss:$16 sps:$4 sm:$0xff]  }
 0x129   :  { %5221 = vst [vmem:[#allocation17_spill] sm:$0xff] %v4056_v50  ;;  %5222 = vst [vmem:[#allocation18_spill] sm:$0xff] %v4062_v54 }
 0x12b   :  { %1550 = vmatpush1.bf16.msra.mxu0 %v4044_v0  ;;  %1593 = vmatpush1.bf16.msra.mxu1 %v4050_v45  ;;  %v4068_v0 = vld [vmem:[%s4795_s1 + $0x1d0] ss:$16 sps:$4 sm:$0xff]   ;;  %v4074_v45 = vld [vmem:[%s4795_s1 + $0x1d8] ss:$16 sps:$4 sm:$0xff]  }
 0x12c   :  { %1551 = vmatprep.subr.bf16.mxu0 %v4056_v50  ;;  %1594 = vmatprep.subr.bf16.mxu1 %v4062_v54  ;;  %5223 = vst [vmem:[#allocation19_spill] sm:$0xff] %v4068_v0  ;;  %5224 = vst [vmem:[#allocation20_spill] sm:$0xff] %v4074_v45  ;;  %v4080_v50 = vld [vmem:[%s4795_s1 + $0x1f4] ss:$16 sps:$4 sm:$0xff]   ;;  %v4086_v54 = vld [vmem:[%s4795_s1 + $0x1fc] ss:$16 sps:$4 sm:$0xff]  }
 0x12d   :  { %5225 = vst [vmem:[#allocation21_spill] sm:$0xff] %v4080_v50  ;;  %5226 = vst [vmem:[#allocation22_spill] sm:$0xff] %v4086_v54 }
 0x12f   :  { %1552 = vmatpush1.bf16.msra.mxu0 %v4068_v0  ;;  %1595 = vmatpush1.bf16.msra.mxu1 %v4074_v45  ;;  %v4092_v0 = vld [vmem:[%s4795_s1 + $0x1f0] ss:$16 sps:$4 sm:$0xff]   ;;  %v4098_v45 = vld [vmem:[%s4795_s1 + $0x1f8] ss:$16 sps:$4 sm:$0xff]  }
 0x130   :  { %1553 = vmatprep.subr.bf16.mxu0 %v4080_v50  ;;  %1596 = vmatprep.subr.bf16.mxu1 %v4086_v54  ;;  %5227 = vst [vmem:[#allocation23_spill] sm:$0xff] %v4092_v0  ;;  %5228 = vst [vmem:[#allocation24_spill] sm:$0xff] %v4098_v45  ;;  %v4104_v50 = vld [vmem:[%s4795_s1 + $0x214] ss:$16 sps:$4 sm:$0xff]   ;;  %v4110_v54 = vld [vmem:[%s4795_s1 + $0x21c] ss:$16 sps:$4 sm:$0xff]  }
 0x131   :  { %5229 = vst [vmem:[#allocation25_spill] sm:$0xff] %v4104_v50  ;;  %5230 = vst [vmem:[#allocation26_spill] sm:$0xff] %v4110_v54 }
 0x133   :  { %1554 = vmatpush1.bf16.msra.mxu0 %v4092_v0  ;;  %1597 = vmatpush1.bf16.msra.mxu1 %v4098_v45  ;;  %v4116_v0 = vld [vmem:[%s4795_s1 + $0x210] ss:$16 sps:$4 sm:$0xff]   ;;  %v4122_v45 = vld [vmem:[%s4795_s1 + $0x218] ss:$16 sps:$4 sm:$0xff]  }
 0x134   :  { %1555 = vmatprep.subr.bf16.mxu0 %v4104_v50  ;;  %1598 = vmatprep.subr.bf16.mxu1 %v4110_v54  ;;  %5231 = vst [vmem:[#allocation27_spill] sm:$0xff] %v4116_v0  ;;  %5232 = vst [vmem:[#allocation28_spill] sm:$0xff] %v4122_v45  ;;  %v4128_v50 = vld [vmem:[%s4795_s1 + $0x234] ss:$16 sps:$4 sm:$0xff]   ;;  %v4134_v54 = vld [vmem:[%s4795_s1 + $0x23c] ss:$16 sps:$4 sm:$0xff]  }
 0x135   :  { %5233 = vst [vmem:[#allocation29_spill] sm:$0xff] %v4128_v50  ;;  %5234 = vst [vmem:[#allocation30_spill] sm:$0xff] %v4134_v54 }
 0x137   :  { %1556 = vmatpush1.bf16.msra.mxu0 %v4116_v0  ;;  %1599 = vmatpush1.bf16.msra.mxu1 %v4122_v45  ;;  %v4140_v0 = vld [vmem:[%s4795_s1 + $0x230] ss:$16 sps:$4 sm:$0xff]   ;;  %v4146_v45 = vld [vmem:[%s4795_s1 + $0x238] ss:$16 sps:$4 sm:$0xff]  }
 0x138   :  { %1557 = vmatprep.subr.bf16.mxu0 %v4128_v50  ;;  %1600 = vmatprep.subr.bf16.mxu1 %v4134_v54  ;;  %5235 = vst [vmem:[#allocation31_spill] sm:$0xff] %v4140_v0  ;;  %5236 = vst [vmem:[#allocation32_spill] sm:$0xff] %v4146_v45  ;;  %v4152_v50 = vld [vmem:[%s4795_s1 + $0x254] ss:$16 sps:$4 sm:$0xff]   ;;  %v4158_v54 = vld [vmem:[%s4795_s1 + $0x25c] ss:$16 sps:$4 sm:$0xff]  }
 0x139   :  { %5237 = vst [vmem:[#allocation33_spill] sm:$0xff] %v4152_v50  ;;  %5238 = vst [vmem:[#allocation34_spill] sm:$0xff] %v4158_v54 }
 0x13b   :  { %1558 = vmatpush1.bf16.msra.mxu0 %v4140_v0  ;;  %1601 = vmatpush1.bf16.msra.mxu1 %v4146_v45  ;;  %v4164_v0 = vld [vmem:[%s4795_s1 + $0x250] ss:$16 sps:$4 sm:$0xff]   ;;  %v4170_v45 = vld [vmem:[%s4795_s1 + $0x258] ss:$16 sps:$4 sm:$0xff]  }
 0x13c   :  { %1559 = vmatprep.subr.bf16.mxu0 %v4152_v50  ;;  %1602 = vmatprep.subr.bf16.mxu1 %v4158_v54  ;;  %5239 = vst [vmem:[#allocation35_spill] sm:$0xff] %v4164_v0  ;;  %5240 = vst [vmem:[#allocation36_spill] sm:$0xff] %v4170_v45  ;;  %v4176_v50 = vld [vmem:[%s4795_s1 + $0x274] ss:$16 sps:$4 sm:$0xff]   ;;  %v4182_v54 = vld [vmem:[%s4795_s1 + $0x27c] ss:$16 sps:$4 sm:$0xff]  }
 0x13d   :  { %5241 = vst [vmem:[#allocation37_spill] sm:$0xff] %v4176_v50  ;;  %5242 = vst [vmem:[#allocation38_spill] sm:$0xff] %v4182_v54 }
 0x13f   :  { %1560 = vmatpush1.bf16.msra.mxu0 %v4164_v0  ;;  %1603 = vmatpush1.bf16.msra.mxu1 %v4170_v45  ;;  %v4188_v0 = vld [vmem:[%s4795_s1 + $0x270] ss:$16 sps:$4 sm:$0xff]   ;;  %v4194_v45 = vld [vmem:[%s4795_s1 + $0x278] ss:$16 sps:$4 sm:$0xff]  }
 0x140   :  { %1561 = vmatprep.subr.bf16.mxu0 %v4176_v50  ;;  %1604 = vmatprep.subr.bf16.mxu1 %v4182_v54  ;;  %5243 = vst [vmem:[#allocation39_spill] sm:$0xff] %v4188_v0  ;;  %5244 = vst [vmem:[#allocation40_spill] sm:$0xff] %v4194_v45  ;;  %v4200_v50 = vld [vmem:[%s4795_s1 + $0x294] ss:$16 sps:$4 sm:$0xff]   ;;  %v4206_v54 = vld [vmem:[%s4795_s1 + $0x29c] ss:$16 sps:$4 sm:$0xff]  }
 0x141   :  { %5245 = vst [vmem:[#allocation41_spill] sm:$0xff] %v4200_v50  ;;  %5246 = vst [vmem:[#allocation42_spill] sm:$0xff] %v4206_v54 }
 0x143   :  { %1562 = vmatpush1.bf16.msra.mxu0 %v4188_v0  ;;  %1605 = vmatpush1.bf16.msra.mxu1 %v4194_v45  ;;  %v4212_v0 = vld [vmem:[%s4795_s1 + $0x290] ss:$16 sps:$4 sm:$0xff]   ;;  %v4218_v45 = vld [vmem:[%s4795_s1 + $0x298] ss:$16 sps:$4 sm:$0xff]  }
 0x144   :  { %1563 = vmatprep.subr.bf16.mxu0 %v4200_v50  ;;  %1606 = vmatprep.subr.bf16.mxu1 %v4206_v54  ;;  %5247 = vst [vmem:[#allocation43_spill] sm:$0xff] %v4212_v0  ;;  %5248 = vst [vmem:[#allocation44_spill] sm:$0xff] %v4218_v45  ;;  %v4224_v50 = vld [vmem:[%s4795_s1 + $0x2b4] ss:$16 sps:$4 sm:$0xff]   ;;  %v4230_v54 = vld [vmem:[%s4795_s1 + $0x2bc] ss:$16 sps:$4 sm:$0xff]  }
 0x145   :  { %5249 = vst [vmem:[#allocation45_spill] sm:$0xff] %v4230_v54 }
 0x147   :  { %1564 = vmatpush1.bf16.msra.mxu0 %v4212_v0  ;;  %1607 = vmatpush1.bf16.msra.mxu1 %v4218_v45  ;;  %v4236_v0 = vld [vmem:[%s4795_s1 + $0x2b0] ss:$16 sps:$4 sm:$0xff]   ;;  %v4242_v45 = vld [vmem:[%s4795_s1 + $0x2b8] ss:$16 sps:$4 sm:$0xff]  }
 0x148   :  { %1565 = vmatprep.subr.bf16.mxu0 %v4224_v50  ;;  %1608 = vmatprep.subr.bf16.mxu1 %v4230_v54  ;;  %5250 = vst [vmem:[#allocation46_spill] sm:$0xff] %v4236_v0  ;;  %v4252_v54 = vld [vmem:[%s4796_s0 + $0x30] ss:$8 sps:$4 sm:$0x3f]  }
 0x14b   :  { %1566 = vmatpush1.bf16.msra.mxu0 %v4236_v0  ;;  %1609 = vmatpush1.bf16.msra.mxu1 %v4242_v45  ;;  %v4259_v0 = vld [vmem:[%s4795_s1 + $0x4] ss:$16 sps:$4 sm:$0xff]  }
 0x14c   :  { %2434 = vmatprep.subr.msk.bf16.mxu0 %vm403_vm1, %v3181_v47  ;;  %2436 = vmatprep.subr.msk.bf16.mxu1 %vm403_vm1, %v3185_v48  ;;  %v4265_v48 = vld [vmem:[%s4795_s1 + $0xc] ss:$16 sps:$4 sm:$0xff]  }
 0x14f   :  { %1568 = vmatpush1.bf16.msra.mxu0 %v3199_v52  ;;  %1611 = vmatpush1.bf16.msra.mxu1 %v3202_v53  ;;  %v4271_v52 = vld [vmem:[%s4796_s0 + $0x24] ss:$8 sps:$4 sm:$0x3f]  }
 0x150   :  { %1643 = vmatprep.subr.bf16.mxu0 %v4259_v0  ;;  %1686 = vmatprep.subr.bf16.mxu1 %v4265_v48 }
 0x152   :  { %1578 = vmatmul.mubr.bf16.vlgmr.msra.gmra.mrb[8].mxu0 %v4252_v54  ;;  %1621 = vmatmul.mubr.bf16.vlgmr.msra.gmra.mrb[8].mxu1 %v4252_v54 }
 0x153   :  { %1644 = vmatpush1.bf16.msra.mxu0 %v5119_v1  ;;  %1687 = vmatpush1.bf16.msra.mxu1 %v5120_v2 }
 0x154   :  { %1645 = vmatprep.subr.bf16.mxu0 %v5121_v3  ;;  %1688 = vmatprep.subr.bf16.mxu1 %v5122_v4 }
 0x155   :  { %2441 = vmatprep.mubr.msk.bf16.mxu0 %vm399_vm0, %v4271_v52  ;;  %2443 = vmatprep.mubr.msk.bf16.mxu1 %vm399_vm0, %v4271_v52 }
 0x157   :  { %1646 = vmatpush1.bf16.msra.mxu0 %v5124_v6  ;;  %1689 = vmatpush1.bf16.msra.mxu1 %v5125_v7 }
 0x158   :  { %1647 = vmatprep.subr.bf16.mxu0 %v5126_v8  ;;  %1690 = vmatprep.subr.bf16.mxu1 %v5127_v9 }
 0x15b   :  { %1648 = vmatpush1.bf16.msra.mxu0 %v5128_v10  ;;  %1691 = vmatpush1.bf16.msra.mxu1 %v5129_v11  ;;  %v1738_v10 = vshll.u32 %v4271_v52, 16  ;;  %v5251_v11 = vld [vmem:[#allocation48_spill] sm:$0xff] }
 0x15c   :  { %1649 = vmatprep.subr.bf16.mxu0 %v5130_v12  ;;  %1692 = vmatprep.subr.bf16.mxu1 %v5131_v13  ;;  %v5252_v12 = vld [vmem:[#allocation49_spill] sm:$0xff]  ;;  %v5253_v13 = vld [vmem:[#allocation50_spill] sm:$0xff] }
 0x15f   :  { %1650 = vmatpush1.bf16.msra.mxu0 %v5132_v14  ;;  %1693 = vmatpush1.bf16.msra.mxu1 %v5133_v15  ;;  %v1736_v14 = vshrl.u32 %v4271_v52, 16  ;;  %v1740_v15 = vrot.slane %v1738_v10, 1  ;;  %v5258_v52 = vld [vmem:[#allocation56_spill] sm:$0xff]  ;;  %v5280_v10 = vld [vmem:[#allocation78_spill] sm:$0xff] }
 0x160   :  { %1651 = vmatprep.subr.bf16.mxu0 %v5134_v16  ;;  %1694 = vmatprep.subr.bf16.mxu1 %v5135_v17  ;;  %v2753_v16 = vld [vmem:[%s4796_s0 + $0x20] ss:$8 sps:$4 sm:$0x3f]  }
 0x161   :  { %v5254_v17 = vld [vmem:[#allocation54_spill] sm:$0xff] }
 0x163   :  { %1652 = vmatpush1.bf16.msra.mxu0 %v5136_v18  ;;  %1695 = vmatpush1.bf16.msra.mxu1 %v5137_v19  ;;  %v5255_v18 = vld [vmem:[#allocation51_spill] sm:$0xff]  ;;  %v5256_v19 = vld [vmem:[#allocation52_spill] sm:$0xff] }
 0x164   :  { %1653 = vmatprep.subr.bf16.mxu0 %v5138_v20  ;;  %1696 = vmatprep.subr.bf16.mxu1 %v5139_v21  ;;  %v4350_v20 = vor.u32 %v1740_v15, %v1736_v14  ;;  %v5257_v21 = vld [vmem:[#allocation55_spill] sm:$0xff]  ;;  %v5282_v14 = vld [vmem:[#allocation80_spill] sm:$0xff]  ;;  %v5283_v15 = vld [vmem:[#allocation81_spill] sm:$0xff] }
 0x165   :  { %v4299_v1 = vpop.f32.mrb[0].mxu0  ;;  %v4301_v2 = vpop.f32.mrb[0].mxu1 }
 0x166   :  { %v4303_v3 = vpop.f32.mrb[1].mxu0  ;;  %v4305_v4 = vpop.f32.mrb[1].mxu1 }
 0x167   :  { %v4307_v6 = vpop.f32.mrb[2].mxu0  ;;  %v4309_v7 = vpop.f32.mrb[2].mxu1  ;;  %1654 = vmatpush1.bf16.msra.mxu0 %v5140_v22  ;;  %1697 = vmatpush1.bf16.msra.mxu1 %v5141_v23  ;;  %v5259_v22 = vld [vmem:[#allocation57_spill] sm:$0xff]  ;;  %v5260_v23 = vld [vmem:[#allocation58_spill] sm:$0xff] }
 0x168   :  { %v4313_v8 = vpop.f32.mrb[3].mxu0  ;;  %v4315_v9 = vpop.f32.mrb[3].mxu1  ;;  %1655 = vmatprep.subr.bf16.mxu0 %v5142_v24  ;;  %1698 = vmatprep.subr.bf16.mxu1 %v5143_v25  ;;  %v5261_v24 = vld [vmem:[#allocation59_spill] sm:$0xff]  ;;  %v5262_v25 = vld [vmem:[#allocation60_spill] sm:$0xff] }
 0x16b   :  { %1656 = vmatpush1.bf16.msra.mxu0 %v5144_v26  ;;  %1699 = vmatpush1.bf16.msra.mxu1 %v5145_v27  ;;  %v5263_v26 = vld [vmem:[#allocation61_spill] sm:$0xff]  ;;  %v5264_v27 = vld [vmem:[#allocation62_spill] sm:$0xff] }
 0x16c   :  { %1657 = vmatprep.subr.bf16.mxu0 %v5146_v28  ;;  %1700 = vmatprep.subr.bf16.mxu1 %v5147_v29  ;;  %v5265_v28 = vld [vmem:[#allocation63_spill] sm:$0xff]  ;;  %v5266_v29 = vld [vmem:[#allocation64_spill] sm:$0xff] }
 0x16f   :  { %1658 = vmatpush1.bf16.msra.mxu0 %v5148_v30  ;;  %1701 = vmatpush1.bf16.msra.mxu1 %v5149_v31  ;;  %v5267_v30 = vld [vmem:[#allocation65_spill] sm:$0xff]  ;;  %v5268_v31 = vld [vmem:[#allocation66_spill] sm:$0xff] }
 0x170   :  { %1659 = vmatprep.subr.bf16.mxu0 %v5150_v32  ;;  %1702 = vmatprep.subr.bf16.mxu1 %v5151_v33  ;;  %v5269_v32 = vld [vmem:[#allocation67_spill] sm:$0xff]  ;;  %v5270_v33 = vld [vmem:[#allocation68_spill] sm:$0xff] }
 0x173   :  { %1660 = vmatpush1.bf16.msra.mxu0 %v5152_v35  ;;  %1703 = vmatpush1.bf16.msra.mxu1 %v5153_v36  ;;  %v5271_v35 = vld [vmem:[#allocation69_spill] sm:$0xff]  ;;  %v5272_v36 = vld [vmem:[#allocation70_spill] sm:$0xff] }
 0x174   :  { %1661 = vmatprep.subr.bf16.mxu0 %v5154_v37  ;;  %1704 = vmatprep.subr.bf16.mxu1 %v5155_v38  ;;  %v5273_v37 = vld [vmem:[#allocation71_spill] sm:$0xff]  ;;  %v5274_v38 = vld [vmem:[#allocation72_spill] sm:$0xff] }
 0x177   :  { %1662 = vmatpush1.bf16.msra.mxu0 %v5156_v39  ;;  %1705 = vmatpush1.bf16.msra.mxu1 %v5157_v40  ;;  %v5275_v39 = vld [vmem:[#allocation73_spill] sm:$0xff]  ;;  %v5276_v40 = vld [vmem:[#allocation74_spill] sm:$0xff] }
 0x178   :  { %1663 = vmatprep.subr.bf16.mxu0 %v5158_v41  ;;  %1706 = vmatprep.subr.bf16.mxu1 %v5159_v42  ;;  %v5277_v41 = vld [vmem:[#allocation75_spill] sm:$0xff]  ;;  %v5278_v42 = vld [vmem:[#allocation76_spill] sm:$0xff] }
 0x17b   :  { %1664 = vmatpush1.bf16.msra.mxu0 %v5160_v46  ;;  %1707 = vmatpush1.bf16.msra.mxu1 %v5251_v11  ;;  %v5279_v46 = vld [vmem:[#allocation77_spill] sm:$0xff]  ;;  %v5281_v11 = vld [vmem:[#allocation79_spill] sm:$0xff] }
 0x17c   :  { %2440 = vmatprep.subr.msk.bf16.mxu0 %vm403_vm1, %v5252_v12  ;;  %2442 = vmatprep.subr.msk.bf16.mxu1 %vm403_vm1, %v5253_v13 }
 0x17f   :  { %1666 = vmatpush1.bf16.msra.mxu0 %v5164_v59  ;;  %1709 = vmatpush1.bf16.msra.mxu1 %v5254_v17 }
 0x180   :  { %1746 = vmatprep.subr.bf16.mxu0 %v5255_v18  ;;  %1789 = vmatprep.subr.bf16.mxu1 %v5256_v19  ;;  %v5284_v18 = vld [vmem:[#allocation82_spill] sm:$0xff]  ;;  %v5285_v19 = vld [vmem:[#allocation83_spill] sm:$0xff] }
 0x182   :  { %1676 = vmatmul.mubr.bf16.vlgmr.msra.gmra.mrb[8].mxu0 %v2753_v16  ;;  %1719 = vmatmul.mubr.bf16.vlgmr.msra.gmra.mrb[8].mxu1 %v2753_v16 }
 0x183   :  { %1747 = vmatpush1.bf16.msra.mxu0 %v5257_v21  ;;  %1790 = vmatpush1.bf16.msra.mxu1 %v5258_v52  ;;  %v5286_v21 = vld [vmem:[#allocation84_spill] sm:$0xff]  ;;  %v5287_v52 = vld [vmem:[#allocation85_spill] sm:$0xff] }
 0x184   :  { %1748 = vmatprep.subr.bf16.mxu0 %v5259_v22  ;;  %1791 = vmatprep.subr.bf16.mxu1 %v5260_v23  ;;  %v5288_v22 = vld [vmem:[#allocation86_spill] sm:$0xff]  ;;  %v1732_v23 = vshll.u32 %v2753_v16, 16 }
 0x185   :  { %2445 = vmatprep.mubr.msk.bf16.mxu0 %vm399_vm0, %v4350_v20  ;;  %2447 = vmatprep.mubr.msk.bf16.mxu1 %vm399_vm0, %v4350_v20 }
 0x187   :  { %1749 = vmatpush1.bf16.msra.mxu0 %v5261_v24  ;;  %1792 = vmatpush1.bf16.msra.mxu1 %v5262_v25  ;;  %v5289_v24 = vld [vmem:[#allocation91_spill] sm:$0xff]  ;;  %v1730_v25 = vshrl.u32 %v2753_v16, 16  ;;  %v5298_v16 = vld [vmem:[#allocation14_spill] sm:$0xff] }
 0x188   :  { %1750 = vmatprep.subr.bf16.mxu0 %v5263_v26  ;;  %1793 = vmatprep.subr.bf16.mxu1 %v5264_v27  ;;  %v1734_v26 = vrot.slane %v1732_v23, 1  ;;  %v5300_v27 = vld [vmem:[#allocation16_spill] sm:$0xff]  ;;  %v5326_v23 = vld [vmem:[#allocation42_spill] sm:$0xff] }
 0x18b   :  { %1751 = vmatpush1.bf16.msra.mxu0 %v5265_v28  ;;  %1794 = vmatpush1.bf16.msra.mxu1 %v5266_v29  ;;  %v5301_v28 = vld [vmem:[#allocation17_spill] sm:$0xff]  ;;  %v5302_v29 = vld [vmem:[#allocation18_spill] sm:$0xff] }
 0x18c   :  { %1752 = vmatprep.subr.bf16.mxu0 %v5267_v30  ;;  %1795 = vmatprep.subr.bf16.mxu1 %v5268_v31  ;;  %v5303_v30 = vld [vmem:[#allocation19_spill] sm:$0xff]  ;;  %v5304_v31 = vld [vmem:[#allocation20_spill] sm:$0xff] }
 0x18f   :  { %1753 = vmatpush1.bf16.msra.mxu0 %v5269_v32  ;;  %1796 = vmatpush1.bf16.msra.mxu1 %v5270_v33  ;;  %v5306_v32 = vld [vmem:[#allocation22_spill] sm:$0xff]  ;;  %v5307_v33 = vld [vmem:[#allocation23_spill] sm:$0xff] }
 0x190   :  { %1754 = vmatprep.subr.bf16.mxu0 %v5271_v35  ;;  %1797 = vmatprep.subr.bf16.mxu1 %v5272_v36  ;;  %v5308_v35 = vld [vmem:[#allocation24_spill] sm:$0xff]  ;;  %v5309_v36 = vld [vmem:[#allocation25_spill] sm:$0xff] }
 0x193   :  { %1755 = vmatpush1.bf16.msra.mxu0 %v5273_v37  ;;  %1798 = vmatpush1.bf16.msra.mxu1 %v5274_v38  ;;  %v5310_v37 = vld [vmem:[#allocation26_spill] sm:$0xff]  ;;  %v5311_v38 = vld [vmem:[#allocation27_spill] sm:$0xff] }
 0x194   :  { %1756 = vmatprep.subr.bf16.mxu0 %v5275_v39  ;;  %1799 = vmatprep.subr.bf16.mxu1 %v5276_v40  ;;  %v5312_v39 = vld [vmem:[#allocation28_spill] sm:$0xff]  ;;  %v5313_v40 = vld [vmem:[#allocation29_spill] sm:$0xff] }
 0x197   :  { %1757 = vmatpush1.bf16.msra.mxu0 %v5277_v41  ;;  %1800 = vmatpush1.bf16.msra.mxu1 %v5278_v42  ;;  %v5314_v41 = vld [vmem:[#allocation30_spill] sm:$0xff]  ;;  %v5315_v42 = vld [vmem:[#allocation31_spill] sm:$0xff] }
 0x198   :  { %1758 = vmatprep.subr.bf16.mxu0 %v5279_v46  ;;  %1801 = vmatprep.subr.bf16.mxu1 %v5280_v10  ;;  %v5316_v46 = vld [vmem:[#allocation32_spill] sm:$0xff]  ;;  %v5317_v10 = vld [vmem:[#allocation33_spill] sm:$0xff] }
 0x19b   :  { %1759 = vmatpush1.bf16.msra.mxu0 %v5281_v11  ;;  %1802 = vmatpush1.bf16.msra.mxu1 %v5282_v14  ;;  %v5318_v11 = vld [vmem:[#allocation34_spill] sm:$0xff]  ;;  %v5319_v14 = vld [vmem:[#allocation35_spill] sm:$0xff] }
 0x19c   :  { %1760 = vmatprep.subr.bf16.mxu0 %v5283_v15  ;;  %1803 = vmatprep.subr.bf16.mxu1 %v5284_v18  ;;  %v5320_v15 = vld [vmem:[#allocation36_spill] sm:$0xff]  ;;  %v5321_v18 = vld [vmem:[#allocation37_spill] sm:$0xff] }
 0x19f   :  { %1761 = vmatpush1.bf16.msra.mxu0 %v5285_v19  ;;  %1804 = vmatpush1.bf16.msra.mxu1 %v5286_v21  ;;  %v5322_v19 = vld [vmem:[#allocation38_spill] sm:$0xff]  ;;  %v5323_v21 = vld [vmem:[#allocation39_spill] sm:$0xff] }
 0x1a0   :  { %1762 = vmatprep.subr.bf16.mxu0 %v5287_v52  ;;  %1805 = vmatprep.subr.bf16.mxu1 %v5288_v22  ;;  %v5324_v52 = vld [vmem:[#allocation40_spill] sm:$0xff]  ;;  %v5325_v22 = vld [vmem:[#allocation41_spill] sm:$0xff] }
 0x1a3   :  { %1763 = vmatpush1.bf16.msra.mxu0 %v5201_v51  ;;  %1806 = vmatpush1.bf16.msra.mxu1 %v5202_v55  ;;  %v1735_v51 = vor.u32 %v1734_v26, %v1730_v25  ;;  %v5290_v55 = vld [vmem:[#allocation5_spill] sm:$0xff]  ;;  %v5328_v25 = vld [vmem:[#allocation44_spill] sm:$0xff] }
 0x1a4   :  { %1764 = vmatprep.subr.bf16.mxu0 %v5203_v5  ;;  %1807 = vmatprep.subr.bf16.mxu1 %v5204_v57  ;;  %v5291_v57 = vld [vmem:[#allocation7_spill] sm:$0xff]  ;;  %v5329_v26 = vld [vmem:[#allocation45_spill] sm:$0xff] }
 0x1a5   :  { %v5295_v5 = vld [vmem:[#allocation11_spill] sm:$0xff] }
 0x1a7   :  { %1765 = vmatpush1.bf16.msra.mxu0 %v5289_v24  ;;  %1808 = vmatpush1.bf16.msra.mxu1 %v5206_v63  ;;  %v5294_v63 = vld [vmem:[#allocation2_spill] sm:$0xff]  ;;  %v5327_v24 = vld [vmem:[#allocation43_spill] sm:$0xff] }
 0x1a8   :  { %1766 = vmatprep.subr.bf16.mxu0 %v5207_v60  ;;  %1809 = vmatprep.subr.bf16.mxu1 %v5208_v61  ;;  %v5296_v60 = vld [vmem:[#allocation12_spill] sm:$0xff]  ;;  %v5297_v61 = vld [vmem:[#allocation13_spill] sm:$0xff] }
 0x1ab   :  { %1767 = vmatpush1.bf16.msra.mxu0 %v3778_v58  ;;  %1810 = vmatpush1.bf16.msra.mxu1 %v3783_v34  ;;  %v5292_v34 = vld [vmem:[#allocation9_spill] sm:$0xff]  ;;  %v5293_v58 = vld [vmem:[#allocation10_spill] sm:$0xff] }
 0x1ac   :  { %2444 = vmatprep.subr.msk.bf16.mxu0 %vm403_vm1, %v3785_v49  ;;  %2446 = vmatprep.subr.msk.bf16.mxu1 %vm403_vm1, %v3789_v44 }
 0x1af   :  { %1769 = vmatpush1.bf16.msra.mxu0 %v3799_v43  ;;  %1812 = vmatpush1.bf16.msra.mxu1 %v3802_v56 }
 0x1b0   :  { %1840 = vmatprep.subr.bf16.mxu0 %v5290_v55  ;;  %1883 = vmatprep.subr.bf16.mxu1 %v5291_v57  ;;  %v5330_v55 = vld [vmem:[#allocation46_spill] sm:$0xff]  ;;  %v5331_v57 = vld [vmem:[#allocation3_spill] sm:$0xff] }
 0x1b2   :  { %1779 = vmatmul.mubr.bf16.vlgmr.msra.gmra.mrb[8].mxu0 %v1735_v51  ;;  %1822 = vmatmul.mubr.bf16.vlgmr.msra.gmra.mrb[8].mxu1 %v1735_v51 }
 0x1b3   :  { %1841 = vmatpush1.bf16.msra.mxu0 %v3992_v62  ;;  %1884 = vmatpush1.bf16.msra.mxu1 %v5292_v34  ;;  %v5299_v62 = vld [vmem:[#allocation15_spill] sm:$0xff]  ;;  %v5332_v34 = vld [vmem:[#allocation4_spill] sm:$0xff] }
 0x1b4   :  { %1842 = vmatprep.subr.bf16.mxu0 %v5293_v58  ;;  %1885 = vmatprep.subr.bf16.mxu1 %v5294_v63  ;;  %v2806_v58 = vld [vmem:[%s4795_s1 + $0x44] ss:$16 sps:$4 sm:$0xff]   ;;  %v2807_v63 = vld [vmem:[%s4795_s1 + $0x4c] ss:$16 sps:$4 sm:$0xff]  }
 0x1b5   :  { %2449 = vmatprep.mubr.msk.bf16.mxu0 %vm399_vm0, %v4350_v20  ;;  %2451 = vmatprep.mubr.msk.bf16.mxu1 %vm399_vm0, %v4350_v20  ;;  %v5305_v20 = vld [vmem:[#allocation21_spill] sm:$0xff] }
 0x1b7   :  { %1843 = vmatpush1.bf16.msra.mxu0 %v5295_v5  ;;  %1886 = vmatpush1.bf16.msra.mxu1 %v5296_v60  ;;  %v1491_v5 = vlaneseq  ;;  %v2808_v60 = vld [vmem:[%s4795_s1 + $0x40] ss:$16 sps:$4 sm:$0xff]  }
 0x1b8   :  { %1844 = vmatprep.subr.bf16.mxu0 %v5297_v61  ;;  %1887 = vmatprep.subr.bf16.mxu1 %v5298_v16  ;;  %v2809_v61 = vld [vmem:[%s4795_s1 + $0x48] ss:$16 sps:$4 sm:$0xff]   ;;  %v2810_v16 = vld [vmem:[%s4795_s1 + $0x64] ss:$16 sps:$4 sm:$0xff]  }
 0x1bb   :  { %1845 = vmatpush1.bf16.msra.mxu0 %v5299_v62  ;;  %1888 = vmatpush1.bf16.msra.mxu1 %v5300_v27  ;;  %v2811_v62 = vld [vmem:[%s4795_s1 + $0x6c] ss:$16 sps:$4 sm:$0xff]   ;;  %v1492_v27 = vshrl.u32 %v1491_v5, 7 }
 0x1bc   :  { %1846 = vmatprep.subr.bf16.mxu0 %v5301_v28  ;;  %1889 = vmatprep.subr.bf16.mxu1 %v5302_v29  ;;  %v2812_v28 = vld [vmem:[%s4795_s1 + $0x60] ss:$16 sps:$4 sm:$0xff]   ;;  %v2813_v29 = vld [vmem:[%s4795_s1 + $0x68] ss:$16 sps:$4 sm:$0xff]  }
 0x1bf   :  { %1847 = vmatpush1.bf16.msra.mxu0 %v5303_v30  ;;  %1890 = vmatpush1.bf16.msra.mxu1 %v5304_v31  ;;  %v2814_v30 = vld [vmem:[%s4795_s1 + $0x84] ss:$16 sps:$4 sm:$0xff]   ;;  %v2815_v31 = vld [vmem:[%s4795_s1 + $0x8c] ss:$16 sps:$4 sm:$0xff]  }
 0x1c0   :  { %1848 = vmatprep.subr.bf16.mxu0 %v5305_v20  ;;  %1891 = vmatprep.subr.bf16.mxu1 %v5306_v32  ;;  %v1493_v20 = vsub.s32 0, %v1492_v27  ;;  %v2816_v32 = vld [vmem:[%s4795_s1 + $0x80] ss:$16 sps:$4 sm:$0xff]  }
 0x1c3   :  { %1849 = vmatpush1.bf16.msra.mxu0 %v5307_v33  ;;  %1892 = vmatpush1.bf16.msra.mxu1 %v5308_v35  ;;  %v2817_v33 = vld [vmem:[%s4795_s1 + $0x88] ss:$16 sps:$4 sm:$0xff]   ;;  %v155_v35 = vld [vmem:[%s4797_s2] sm:$0x3] }
 0x1c4   :  { %1850 = vmatprep.subr.bf16.mxu0 %v5309_v36  ;;  %1893 = vmatprep.subr.bf16.mxu1 %v5310_v37  ;;  %v1497_v36 = vsub.s32 1, %v1492_v27  ;;  %v2818_v37 = vld [vmem:[%s4795_s1 + $0xa4] ss:$16 sps:$4 sm:$0xff]  }
 0x1c7   :  { %1851 = vmatpush1.bf16.msra.mxu0 %v5311_v38  ;;  %1894 = vmatpush1.bf16.msra.mxu1 %v5312_v39  ;;  %v2819_v38 = vld [vmem:[%s4795_s1 + $0xac] ss:$16 sps:$4 sm:$0xff]  }
 0x1c8   :  { %1852 = vmatprep.subr.bf16.mxu0 %v5313_v40  ;;  %1895 = vmatprep.subr.bf16.mxu1 %v5314_v41 }
 0x1cb   :  { %1853 = vmatpush1.bf16.msra.mxu0 %v5315_v42  ;;  %1896 = vmatpush1.bf16.msra.mxu1 %v5316_v46  ;;  %v4529_v46 = vrot.slane %v155_v35, %v1493_v20  ;;  %v2833_v20 = vld [vmem:[%s4795_s1 + $0x108] ss:$16 sps:$4 sm:$0xff]  }
 0x1cc   :  { %1854 = vmatprep.subr.bf16.mxu0 %v5317_v10  ;;  %1897 = vmatprep.subr.bf16.mxu1 %v5318_v11 }
 0x1cf   :  { %1855 = vmatpush1.bf16.msra.mxu0 %v5319_v14  ;;  %1898 = vmatpush1.bf16.msra.mxu1 %v5320_v15 }
 0x1d0   :  { %1856 = vmatprep.subr.bf16.mxu0 %v5321_v18  ;;  %1899 = vmatprep.subr.bf16.mxu1 %v5322_v19  ;;  %v4533_v18 = vrot.slane %v155_v35, %v1497_v36  ;;  %v2836_v35 = vld [vmem:[%s4795_s1 + $0x120] ss:$16 sps:$4 sm:$0xff]   ;;  %v2837_v36 = vld [vmem:[%s4795_s1 + $0x128] ss:$16 sps:$4 sm:$0xff]  }
 0x1d3   :  { %1857 = vmatpush1.bf16.msra.mxu0 %v5323_v21  ;;  %1900 = vmatpush1.bf16.msra.mxu1 %v5324_v52  ;;  %v2820_v52 = vld [vmem:[%s4795_s1 + $0xa0] ss:$16 sps:$4 sm:$0xff]  }
 0x1d4   :  { %1858 = vmatprep.subr.bf16.mxu0 %v5325_v22  ;;  %1901 = vmatprep.subr.bf16.mxu1 %v5326_v23 }
 0x1d7   :  { %1859 = vmatpush1.bf16.msra.mxu0 %v5327_v24  ;;  %1902 = vmatpush1.bf16.msra.mxu1 %v5328_v25  ;;  %v2822_v24 = vld [vmem:[%s4795_s1 + $0xc4] ss:$16 sps:$4 sm:$0xff]   ;;  %v2823_v25 = vld [vmem:[%s4795_s1 + $0xcc] ss:$16 sps:$4 sm:$0xff]  }
 0x1d8   :  { %1860 = vmatprep.subr.bf16.mxu0 %v4224_v50  ;;  %1903 = vmatprep.subr.bf16.mxu1 %v5329_v26  ;;  %v2804_v50 = vld [vmem:[%s4795_s1 + $0x20] ss:$16 sps:$4 sm:$0xff]  }
 0x1db   :  { %1861 = vmatpush1.bf16.msra.mxu0 %v5330_v55  ;;  %1904 = vmatpush1.bf16.msra.mxu1 %v4242_v45  ;;  %v2800_v45 = vld [vmem:[%s4795_s1] ss:$16 sps:$4 sm:$0xff]  }
 0x1dc   :  { %2448 = vmatprep.subr.msk.bf16.mxu0 %vm403_vm1, %v3181_v47  ;;  %2450 = vmatprep.subr.msk.bf16.mxu1 %vm403_vm1, %v5331_v57  ;;  %v2801_v47 = vld [vmem:[%s4795_s1 + $0x8] ss:$16 sps:$4 sm:$0xff]  }
 0x1df   :  { %1863 = vmatpush1.bf16.msra.mxu0 %v5332_v34  ;;  %1906 = vmatpush1.bf16.msra.mxu1 %v3202_v53  ;;  %v2802_v53 = vld [vmem:[%s4795_s1 + $0x24] ss:$16 sps:$4 sm:$0xff]  }
 0x1e0   :  { %1926 = vmatprep.subr.bf16.mxu0 %v4259_v0  ;;  %1969 = vmatprep.subr.bf16.mxu1 %v4265_v48  ;;  %v2803_v48 = vld [vmem:[%s4795_s1 + $0x2c] ss:$16 sps:$4 sm:$0xff]   ;;  %v5333_v0 = vld [vmem:[#allocation8_spill] sm:$0xff] }
 0x1e2   :  { %1873 = vmatmul.mubr.bf16.vlgmr.msra.gmra.mrb[12].mxu0 %v1735_v51  ;;  %1916 = vmatmul.mubr.bf16.vlgmr.msra.gmra.mrb[12].mxu1 %v1735_v51  ;;  %v2805_v51 = vld [vmem:[%s4795_s1 + $0x28] ss:$16 sps:$4 sm:$0xff]  }
 0x1e3   :  { %1927 = vmatpush1.bf16.msra.mxu0 %v2800_v45  ;;  %1970 = vmatpush1.bf16.msra.mxu1 %v2801_v47  ;;  %v2824_v47 = vld [vmem:[%s4795_s1 + $0xc0] ss:$16 sps:$4 sm:$0xff]  }
 0x1e4   :  { %1928 = vmatprep.subr.bf16.mxu0 %v2802_v53  ;;  %1971 = vmatprep.subr.bf16.mxu1 %v2803_v48  ;;  %v2825_v53 = vld [vmem:[%s4795_s1 + $0xc8] ss:$16 sps:$4 sm:$0xff]   ;;  %v2826_v48 = vld [vmem:[%s4795_s1 + $0xe4] ss:$16 sps:$4 sm:$0xff]  }
 0x1e5   :  { %2453 = vmatprep.mubr.msk.bf16.mxu0 %vm399_vm0, %v5333_v0  ;;  %2455 = vmatprep.mubr.msk.bf16.mxu1 %vm399_vm0, %v5333_v0 }
 0x1e7   :  { %1929 = vmatpush1.bf16.msra.mxu0 %v2804_v50  ;;  %1972 = vmatpush1.bf16.msra.mxu1 %v2805_v51  ;;  %v2827_v50 = vld [vmem:[%s4795_s1 + $0xec] ss:$16 sps:$4 sm:$0xff]  }
 0x1e8   :  { %1930 = vmatprep.subr.bf16.mxu0 %v2806_v58  ;;  %1973 = vmatprep.subr.bf16.mxu1 %v2807_v63 }
 0x1eb   :  { %1931 = vmatpush1.bf16.msra.mxu0 %v2808_v60  ;;  %1974 = vmatpush1.bf16.msra.mxu1 %v2809_v61 }
 0x1ec   :  { %1932 = vmatprep.subr.bf16.mxu0 %v2810_v16  ;;  %1975 = vmatprep.subr.bf16.mxu1 %v2811_v62  ;;  %v2828_v16 = vld [vmem:[%s4795_s1 + $0xe0] ss:$16 sps:$4 sm:$0xff]   ;;  %v2829_v62 = vld [vmem:[%s4795_s1 + $0xe8] ss:$16 sps:$4 sm:$0xff]  }
 0x1ef   :  { %1933 = vmatpush1.bf16.msra.mxu0 %v2812_v28  ;;  %1976 = vmatpush1.bf16.msra.mxu1 %v2813_v29  ;;  %v2830_v28 = vld [vmem:[%s4795_s1 + $0x104] ss:$16 sps:$4 sm:$0xff]   ;;  %v2831_v29 = vld [vmem:[%s4795_s1 + $0x10c] ss:$16 sps:$4 sm:$0xff]  }
 0x1f0   :  { %1934 = vmatprep.subr.bf16.mxu0 %v2814_v30  ;;  %1977 = vmatprep.subr.bf16.mxu1 %v2815_v31  ;;  %v2832_v31 = vld [vmem:[%s4795_s1 + $0x100] ss:$16 sps:$4 sm:$0xff]  }
 0x1f3   :  { %1935 = vmatpush1.bf16.msra.mxu0 %v2816_v32  ;;  %1978 = vmatpush1.bf16.msra.mxu1 %v2817_v33  ;;  %v2834_v32 = vld [vmem:[%s4795_s1 + $0x124] ss:$16 sps:$4 sm:$0xff]   ;;  %v2835_v33 = vld [vmem:[%s4795_s1 + $0x12c] ss:$16 sps:$4 sm:$0xff]  }
 0x1f4   :  { %1936 = vmatprep.subr.bf16.mxu0 %v2818_v37  ;;  %1979 = vmatprep.subr.bf16.mxu1 %v2819_v38  ;;  %v2838_v37 = vld [vmem:[%s4795_s1 + $0x144] ss:$16 sps:$4 sm:$0xff]   ;;  %v2839_v38 = vld [vmem:[%s4795_s1 + $0x14c] ss:$16 sps:$4 sm:$0xff]  }
 0x1f5   :  { %v1418_v39 = vpop.f32.mrb[4].mxu0  ;;  %v1461_v40 = vpop.f32.mrb[4].mxu1 }
 0x1f6   :  { %v1478_v41 = vmax.f32 %v4299_v1, %v1418_v39  ;;  %v1480_v42 = vmax.f32 %v4301_v2, %v1461_v40  ;;  %v1420_v10 = vpop.f32.mrb[5].mxu0  ;;  %v1463_v11 = vpop.f32.mrb[5].mxu1  ;;  %v2821_v1 = vld [vmem:[%s4795_s1 + $0xa8] ss:$16 sps:$4 sm:$0xff]   ;;  %v2021_v39 = vshll.u32 %v5333_v0, 16 }
 0x1f7   :  { %v1479_v14 = vmax.f32 %v4303_v3, %v1420_v10  ;;  %v1481_v15 = vmax.f32 %v4305_v4, %v1463_v11  ;;  %v1422_v19 = vpop.f32.mrb[6].mxu0  ;;  %v1465_v21 = vpop.f32.mrb[6].mxu1  ;;  %1937 = vmatpush1.bf16.msra.mxu0 %v2820_v52  ;;  %1980 = vmatpush1.bf16.msra.mxu1 %v2821_v1  ;;  %v2840_v40 = vld [vmem:[%s4795_s1 + $0x140] ss:$16 sps:$4 sm:$0xff]   ;;  %v2842_v11 = vld [vmem:[%s4795_s1 + $0x2e4] ss:$16 sps:$4 sm:$0xff]  }
 0x1f8   :  { %v1486_v2 = vmax.f32 %v1478_v41, %v1480_v42  ;;  %v1482_v22 = vmax.f32 %v4307_v6, %v1422_v19  ;;  %v1484_v3 = vmax.f32 %v4309_v7, %v1465_v21  ;;  %v1424_v4 = vpop.f32.mrb[7].mxu0  ;;  %v1467_v23 = vpop.f32.mrb[7].mxu1  ;;  %1938 = vmatprep.subr.bf16.mxu0 %v2822_v24  ;;  %1981 = vmatprep.subr.bf16.mxu1 %v2823_v25  ;;  %v2841_v41 = vld [vmem:[%s4795_s1 + $0x148] ss:$16 sps:$4 sm:$0xff]   ;;  %v2019_v42 = vshrl.u32 %v5333_v0, 16 }
 0x1f9   :  { %v1487_v26 = vmax.f32 %v1479_v14, %v1481_v15  ;;  %v1483_v55 = vmax.f32 %v4313_v8, %v1424_v4  ;;  %v1485_v57 = vmax.f32 %v4315_v9, %v1467_v23  ;;  %v2023_v10 = vrot.slane %v2021_v39, 1  ;;  %v2843_v14 = vld [vmem:[%s4795_s1 + $0x2ec] ss:$16 sps:$4 sm:$0xff]   ;;  %v2848_v15 = vld [vmem:[%s4795_s1 + $0x300] ss:$16 sps:$4 sm:$0xff]  }
 0x1fa   :  { %v1501_v6 = vadd.f32 %v4529_v46, %v1486_v2  ;;  %v1488_v7 = vmax.f32 %v1482_v22, %v1484_v3  ;;  %v2847_v0 = vld [vmem:[%s4795_s1 + $0x30c] ss:$16 sps:$4 sm:$0xff]   ;;  %v2849_v19 = vld [vmem:[%s4795_s1 + $0x308] ss:$16 sps:$4 sm:$0xff]   ;;  %v2850_v21 = vld [vmem:[%s4795_s1 + $0x324] ss:$16 sps:$4 sm:$0xff]  }
 0x1fb   :  { %v1502_v34 = vadd.f32 %v4533_v18, %v1487_v26  ;;  %v1489_v45 = vmax.f32 %v1483_v55, %v1485_v57  ;;  %1939 = vmatpush1.bf16.msra.mxu0 %v2824_v47  ;;  %1982 = vmatpush1.bf16.msra.mxu1 %v2825_v53  ;;  %v2851_v52 = vld [vmem:[%s4795_s1 + $0x32c] ss:$16 sps:$4 sm:$0xff]   ;;  %v2852_v1 = vld [vmem:[%s4795_s1 + $0x320] ss:$16 sps:$4 sm:$0xff]   ;;  %v2853_v2 = vld [vmem:[%s4795_s1 + $0x328] ss:$16 sps:$4 sm:$0xff]  }
 0x1fc   :  { %v1505_v8 = vmax.f32 %v1501_v6, 0.0  ;;  %v1503_v9 = vadd.f32 %v4529_v46, %v1488_v7  ;;  %1940 = vmatprep.subr.bf16.mxu0 %v2826_v48  ;;  %1983 = vmatprep.subr.bf16.mxu1 %v2827_v50  ;;  %v2854_v22 = vld [vmem:[%s4795_s1 + $0x344] ss:$16 sps:$4 sm:$0xff]   ;;  %v2855_v3 = vld [vmem:[%s4795_s1 + $0x34c] ss:$16 sps:$4 sm:$0xff]  }
 0x1fd   :  { %v1506_v51 = vmax.f32 %v1502_v34, 0.0  ;;  %v1504_v58 = vadd.f32 %v4533_v18, %v1489_v45  ;;  %v2856_v4 = vld [vmem:[%s4795_s1 + $0x340] ss:$16 sps:$4 sm:$0xff]   ;;  %v2857_v23 = vld [vmem:[%s4795_s1 + $0x348] ss:$16 sps:$4 sm:$0xff]  }
 0x1fe   :  { %v1507_v5 = vmax.f32 %v1503_v9, 0.0  ;;  %v2858_v24 = vld [vmem:[%s4795_s1 + $0x364] ss:$16 sps:$4 sm:$0xff]   ;;  %v2859_v25 = vld [vmem:[%s4795_s1 + $0x36c] ss:$16 sps:$4 sm:$0xff]  }
 0x1ff   :  { %v2464_v60 = vpack.c.bf16 %v1506_v51, %v1505_v8  ;;  %v1508_v61 = vmax.f32 %v1504_v58, 0.0  ;;  %1941 = vmatpush1.bf16.msra.mxu0 %v2828_v16  ;;  %1984 = vmatpush1.bf16.msra.mxu1 %v2829_v62  ;;  %v2860_v26 = vld [vmem:[%s4795_s1 + $0x360] ss:$16 sps:$4 sm:$0xff]   ;;  %v2861_v55 = vld [vmem:[%s4795_s1 + $0x368] ss:$16 sps:$4 sm:$0xff]  }
 0x200   :  { %1942 = vmatprep.subr.bf16.mxu0 %v2830_v28  ;;  %1985 = vmatprep.subr.bf16.mxu1 %v2831_v29  ;;  %v2862_v57 = vld [vmem:[%s4795_s1 + $0x384] ss:$16 sps:$4 sm:$0xff]   ;;  %v2863_v6 = vld [vmem:[%s4795_s1 + $0x38c] ss:$16 sps:$4 sm:$0xff]   ;;  %v2864_v7 = vld [vmem:[%s4795_s1 + $0x380] ss:$16 sps:$4 sm:$0xff]  }
 0x201   :  { %1523 = vst.msk [vmem:[%s4798_s3] sm:$0xff] %vm4569_vm5, %v2464_v60  ;;  %v2465_v30 = vpack.c.bf16 %v1508_v61, %v1507_v5  ;;  %v2865_v34 = vld [vmem:[%s4795_s1 + $0x388] ss:$16 sps:$4 sm:$0xff]   ;;  %v2866_v45 = vld [vmem:[%s4795_s1 + $0x3a4] ss:$16 sps:$4 sm:$0xff]   ;;  %v2015_v28 = vshll.u32 %v4252_v54, 16 }
 0x202   :  { %v2867_v47 = vld [vmem:[%s4795_s1 + $0x3ac] ss:$16 sps:$4 sm:$0xff]   ;;  %v2868_v53 = vld [vmem:[%s4795_s1 + $0x3a0] ss:$16 sps:$4 sm:$0xff]   ;;  %v2869_v8 = vld [vmem:[%s4795_s1 + $0x3a8] ss:$16 sps:$4 sm:$0xff]  }
 0x203   :  { %1527 = vst.msk [vmem:[%s4798_s3 + $0x8] sm:$0x11] %vm4579_vm6, %v2465_v30  ;;  %1943 = vmatpush1.bf16.msra.mxu0 %v2832_v31  ;;  %1986 = vmatpush1.bf16.msra.mxu1 %v2833_v20  ;;  %v2870_v9 = vld [vmem:[%s4795_s1 + $0x3c4] ss:$16 sps:$4 sm:$0xff]   ;;  %v2871_v48 = vld [vmem:[%s4795_s1 + $0x3cc] ss:$16 sps:$4 sm:$0xff]  }
 0x204   :  { %1944 = vmatprep.subr.bf16.mxu0 %v2834_v32  ;;  %1987 = vmatprep.subr.bf16.mxu1 %v2835_v33  ;;  %v2872_v50 = vld [vmem:[%s4795_s1 + $0x3c0] ss:$16 sps:$4 sm:$0xff]   ;;  %v2873_v51 = vld [vmem:[%s4795_s1 + $0x3c8] ss:$16 sps:$4 sm:$0xff]   ;;  %v2874_v58 = vld [vmem:[%s4795_s1 + $0x3e4] ss:$16 sps:$4 sm:$0xff]  }
 0x205   :  { %v2875_v5 = vld [vmem:[%s4795_s1 + $0x3ec] ss:$16 sps:$4 sm:$0xff]   ;;  %v2876_v60 = vld [vmem:[%s4795_s1 + $0x3e0] ss:$16 sps:$4 sm:$0xff]   ;;  %v2877_v61 = vld [vmem:[%s4795_s1 + $0x3e8] ss:$16 sps:$4 sm:$0xff]  }
 0x206   :  { %v2878_v16 = vld [vmem:[%s4795_s1 + $0x404] ss:$16 sps:$4 sm:$0xff]   ;;  %v2879_v62 = vld [vmem:[%s4795_s1 + $0x40c] ss:$16 sps:$4 sm:$0xff]   ;;  %v2880_v29 = vld [vmem:[%s4795_s1 + $0x400] ss:$16 sps:$4 sm:$0xff]  }
 0x207   :  { %1945 = vmatpush1.bf16.msra.mxu0 %v2836_v35  ;;  %1988 = vmatpush1.bf16.msra.mxu1 %v2837_v36  ;;  %v2881_v30 = vld [vmem:[%s4795_s1 + $0x408] ss:$16 sps:$4 sm:$0xff]   ;;  %v2882_v31 = vld [vmem:[%s4795_s1 + $0x424] ss:$16 sps:$4 sm:$0xff]   ;;  %v2883_v20 = vld [vmem:[%s4795_s1 + $0x42c] ss:$16 sps:$4 sm:$0xff]  }
 0x208   :  { %1946 = vmatprep.subr.bf16.mxu0 %v2838_v37  ;;  %1989 = vmatprep.subr.bf16.mxu1 %v2839_v38  ;;  %v2013_v32 = vshrl.u32 %v4252_v54, 16  ;;  %v2017_v33 = vrot.slane %v2015_v28, 1  ;;  %v2884_v35 = vld [vmem:[%s4795_s1 + $0x420] ss:$16 sps:$4 sm:$0xff]   ;;  %v2885_v36 = vld [vmem:[%s4795_s1 + $0x428] ss:$16 sps:$4 sm:$0xff]  }
 0x20a   :  { %v2018_v37 = vor.u32 %v2017_v33, %v2013_v32 }
 0x20b   :  { %1947 = vmatpush1.bf16.msra.mxu0 %v2840_v40  ;;  %1990 = vmatpush1.bf16.msra.mxu1 %v2841_v41 }
 0x20c   :  { %2452 = vmatprep.subr.msk.bf16.mxu0 %vm403_vm1, %v5252_v12  ;;  %2454 = vmatprep.subr.msk.bf16.mxu1 %vm403_vm1, %v5253_v13  ;;  %v2024_v12 = vor.u32 %v2023_v10, %v2019_v42  ;;  %v2845_v13 = vld [vmem:[%s4795_s1 + $0x2e8] ss:$16 sps:$4 sm:$0xff]  }
 0x20f   :  { %1949 = vmatpush1.bf16.msra.mxu0 %v5164_v59  ;;  %1992 = vmatpush1.bf16.msra.mxu1 %v5254_v17  ;;  %v2844_v59 = vld [vmem:[%s4795_s1 + $0x2e0] ss:$16 sps:$4 sm:$0xff]   ;;  %v2846_v17 = vld [vmem:[%s4795_s1 + $0x304] ss:$16 sps:$4 sm:$0xff]  }
 0x210   :  { %2029 = vmatprep.subr.bf16.mxu0 %v2842_v11  ;;  %2072 = vmatprep.subr.bf16.mxu1 %v2843_v14 }
 0x212   :  { %1959 = vmatmul.mubr.bf16.vlgmr.msra.gmra.mrb[12].mxu0 %v4252_v54  ;;  %2002 = vmatmul.mubr.bf16.vlgmr.msra.gmra.mrb[12].mxu1 %v4252_v54 }
 0x213   :  { %2030 = vmatpush1.bf16.msra.mxu0 %v2844_v59  ;;  %2073 = vmatpush1.bf16.msra.mxu1 %v2845_v13 }
 0x214   :  { %2031 = vmatprep.subr.bf16.mxu0 %v2846_v17  ;;  %2074 = vmatprep.subr.bf16.mxu1 %v2847_v0 }
 0x215   :  { %2457 = vmatprep.mubr.msk.bf16.mxu0 %vm399_vm0, %v2024_v12  ;;  %2459 = vmatprep.mubr.msk.bf16.mxu1 %vm399_vm0, %v2024_v12 }
 0x217   :  { %2032 = vmatpush1.bf16.msra.mxu0 %v2848_v15  ;;  %2075 = vmatpush1.bf16.msra.mxu1 %v2849_v19 }
 0x218   :  { %2033 = vmatprep.subr.bf16.mxu0 %v2850_v21  ;;  %2076 = vmatprep.subr.bf16.mxu1 %v2851_v52 }
 0x21b   :  { %2034 = vmatpush1.bf16.msra.mxu0 %v2852_v1  ;;  %2077 = vmatpush1.bf16.msra.mxu1 %v2853_v2 }
 0x21c   :  { %2035 = vmatprep.subr.bf16.mxu0 %v2854_v22  ;;  %2078 = vmatprep.subr.bf16.mxu1 %v2855_v3 }
 0x21f   :  { %2036 = vmatpush1.bf16.msra.mxu0 %v2856_v4  ;;  %2079 = vmatpush1.bf16.msra.mxu1 %v2857_v23 }
 0x220   :  { %2037 = vmatprep.subr.bf16.mxu0 %v2858_v24  ;;  %2080 = vmatprep.subr.bf16.mxu1 %v2859_v25 }
 0x223   :  { %2038 = vmatpush1.bf16.msra.mxu0 %v2860_v26  ;;  %2081 = vmatpush1.bf16.msra.mxu1 %v2861_v55 }
 0x224   :  { %2039 = vmatprep.subr.bf16.mxu0 %v2862_v57  ;;  %2082 = vmatprep.subr.bf16.mxu1 %v2863_v6 }
 0x227   :  { %2040 = vmatpush1.bf16.msra.mxu0 %v2864_v7  ;;  %2083 = vmatpush1.bf16.msra.mxu1 %v2865_v34 }
 0x228   :  { %2041 = vmatprep.subr.bf16.mxu0 %v2866_v45  ;;  %2084 = vmatprep.subr.bf16.mxu1 %v2867_v47 }
 0x22b   :  { %2042 = vmatpush1.bf16.msra.mxu0 %v2868_v53  ;;  %2085 = vmatpush1.bf16.msra.mxu1 %v2869_v8 }
 0x22c   :  { %2043 = vmatprep.subr.bf16.mxu0 %v2870_v9  ;;  %2086 = vmatprep.subr.bf16.mxu1 %v2871_v48 }
 0x22f   :  { %2044 = vmatpush1.bf16.msra.mxu0 %v2872_v50  ;;  %2087 = vmatpush1.bf16.msra.mxu1 %v2873_v51 }
 0x230   :  { %2045 = vmatprep.subr.bf16.mxu0 %v2874_v58  ;;  %2088 = vmatprep.subr.bf16.mxu1 %v2875_v5 }
 0x233   :  { %2046 = vmatpush1.bf16.msra.mxu0 %v2876_v60  ;;  %2089 = vmatpush1.bf16.msra.mxu1 %v2877_v61 }
 0x234   :  { %2047 = vmatprep.subr.bf16.mxu0 %v2878_v16  ;;  %2090 = vmatprep.subr.bf16.mxu1 %v2879_v62 }
 0x237   :  { %2048 = vmatpush1.bf16.msra.mxu0 %v2880_v29  ;;  %2091 = vmatpush1.bf16.msra.mxu1 %v2881_v30 }
 0x238   :  { %2049 = vmatprep.subr.bf16.mxu0 %v2882_v31  ;;  %2092 = vmatprep.subr.bf16.mxu1 %v2883_v20 }
 0x23b   :  { %2050 = vmatpush1.bf16.msra.mxu0 %v2884_v35  ;;  %2093 = vmatpush1.bf16.msra.mxu1 %v2885_v36 }
 0x23c   :  { %2456 = vmatprep.subr.msk.bf16.mxu0 %vm403_vm1, %v3785_v49  ;;  %2458 = vmatprep.subr.msk.bf16.mxu1 %vm403_vm1, %v3789_v44 }
 0x23f   :  { %2052 = vmatpush1.bf16.msra.mxu0 %v3799_v43  ;;  %2095 = vmatpush1.bf16.msra.mxu1 %v3802_v56 }
 0x242   :  { %2062 = vmatmul.mubr.bf16.vlgmr.msra.gmra.mrb[12].mxu0 %v2018_v37  ;;  %2105 = vmatmul.mubr.bf16.vlgmr.msra.gmra.mrb[12].mxu1 %v2018_v37 }
 0x285   :  { %v1780_v54 = vpop.f32.mrb[8].mxu0  ;;  %v1823_v38 = vpop.f32.mrb[8].mxu1 }
 0x286   :  { %v1782_v39 = vpop.f32.mrb[9].mxu0  ;;  %v1825_v40 = vpop.f32.mrb[9].mxu1 }
 0x287   :  { %v1784_v41 = vpop.f32.mrb[10].mxu0  ;;  %v1827_v42 = vpop.f32.mrb[10].mxu1 }
 0x288   :  { %v1786_v10 = vpop.f32.mrb[11].mxu0  ;;  %v1829_v11 = vpop.f32.mrb[11].mxu1 }
 0x315   :  { %v2063_v14 = vpop.f32.mrb[12].mxu0  ;;  %v2106_v49 = vpop.f32.mrb[12].mxu1 }
 0x316   :  { %v2123_v12 = vmax.f32 %v1780_v54, %v2063_v14  ;;  %v2125_v59 = vmax.f32 %v1823_v38, %v2106_v49  ;;  %v2065_v44 = vpop.f32.mrb[13].mxu0  ;;  %v2108_v13 = vpop.f32.mrb[13].mxu1 }
 0x317   :  { %v2124_v17 = vmax.f32 %v1782_v39, %v2065_v44  ;;  %v2126_v43 = vmax.f32 %v1825_v40, %v2108_v13  ;;  %v2067_v0 = vpop.f32.mrb[14].mxu0  ;;  %v2110_v56 = vpop.f32.mrb[14].mxu1 }
 0x318   :  { %v2131_v15 = vmax.f32 %v2123_v12, %v2125_v59  ;;  %v2127_v19 = vmax.f32 %v1784_v41, %v2067_v0  ;;  %v2129_v21 = vmax.f32 %v1827_v42, %v2110_v56  ;;  %v2069_v52 = vpop.f32.mrb[15].mxu0  ;;  %v2112_v1 = vpop.f32.mrb[15].mxu1 }
 0x319   :  { %v2132_v2 = vmax.f32 %v2124_v17, %v2126_v43  ;;  %v2128_v22 = vmax.f32 %v1786_v10, %v2069_v52  ;;  %v2130_v3 = vmax.f32 %v1829_v11, %v2112_v1 }
 0x31a   :  { %v2135_v4 = vadd.f32 %v2131_v15, %v4529_v46  ;;  %v2133_v23 = vmax.f32 %v2127_v19, %v2129_v21 }
 0x31b   :  { %v2136_v24 = vadd.f32 %v2132_v2, %v4533_v18  ;;  %v2134_v25 = vmax.f32 %v2128_v22, %v2130_v3 }
 0x31c   :  { %v2139_v26 = vmax.f32 %v2135_v4, 0.0  ;;  %v2137_v55 = vadd.f32 %v2133_v23, %v4529_v46 }
 0x31d   :  { %v2140_v57 = vmax.f32 %v2136_v24, 0.0  ;;  %v2138_v6 = vadd.f32 %v2134_v25, %v4533_v18 }
 0x31e   :  { %v2141_v7 = vmax.f32 %v2137_v55, 0.0 }
 0x31f   :  { %v2466_v34 = vpack.c.bf16 %v2140_v57, %v2139_v26  ;;  %v2142_v45 = vmax.f32 %v2138_v6, 0.0 }
 0x321   :  { %2462 = vst.msk [vmem:[%s4798_s3 + $0x10] sm:$0xff] %vm4569_vm5, %v2466_v34  ;;  %v2467_v47 = vpack.c.bf16 %v2142_v45, %v2141_v7 }
 0x323   :  { %2463 = vst.msk [vmem:[%s4798_s3 + $0x18] sm:$0x11] %vm4579_vm6, %v2467_v47 }

// kernel: tile.28
= control target key start
LH: loop header
LB: loop body
LE: loop exit
PB: predicated region body
PF: predicated region fallthrough
CT: control target
= control target key end

     0   :  { %s22_s0 = inlined_call_operand.vmem [shape: f32[32], index: 0, kind: input, shape index: {}]   ;;  %s23_s1 = inlined_call_operand.vmem [shape: f32[4,32], index: 1, kind: output, shape index: {}]  }
   0x1   :  { %v4_v0 = vld [vmem:[%s22_s0] ss:$0 sm:$0xff] }
   0x2   :  { %5 = vst [vmem:[%s23_s1] sm:$0xf] %v4_v0 }

// kernel: tile.29
= control target key start
LH: loop header
LB: loop body
LE: loop exit
PB: predicated region body
PF: predicated region fallthrough
CT: control target
= control target key end

     0   :  { %vm7_vm0 = vcmask 261120   ;;  %s37_s8 = smov 32   ;;  %s38_s9 = smov 64   ;;  %vm13_vm1 = vcmask 1048320   ;;  %vm19_vm2 = vcmask 785920   ;;  %vm25_vm3 = vcmask 523520   ;;  %s55_s0 = inlined_call_operand.vmem [shape: f32[4,32], index: 0, kind: input, shape index: {}]   ;;  %s56_s1 = inlined_call_operand.vmem [shape: f32[1,128], index: 1, kind: output, shape index: {}]  }
   0x1   :  { %v4_v0 = vld [vmem:[%s55_s0] sm:$0xf]  ;;  %s36_s0 = smov 96  }
   0x2   :  { %5 = vst [vmem:[#allocation1] sm:$0xf] %v4_v0 }
   0x9   :  { %v10_v1 = vld [vmem:[#allocation1 + $0x3] sm:$0x1]   ;;  %v22_v2 = vld [vmem:[#allocation1 + $0x1] sm:$0x1]   ;;  %v6_v3 = vld [vmem:[#allocation1] sm:$0x1]  }
   0xa   :  { %11 = vrot.lane.b32.xlu0 %v10_v1, %s36_s0  ;;  %23 = vrot.lane.b32.xlu1 %v22_v2, %s37_s8  ;;  %v16_v4 = vld [vmem:[#allocation1 + $0x2] sm:$0x1]   ;;  %8 = vst.msk [vmem:[#allocation0] sm:$0x1] %vm7_vm0, %v6_v3  }
   0xe   :  { %17 = vrot.lane.b32.xlu0 %v16_v4, %s38_s9 }
  0x7c   :  { %v12_v5 = vpop.permute.xlu0 %11   ;;  %v24_v6 = vpop.permute.xlu1 %23  }
  0x7d   :  { %14 = vst.msk [vmem:[#allocation0] sm:$0x1] %vm13_vm1, %v12_v5  }
  0x80   :  { %v18_v7 = vpop.permute.xlu0 %17  }
  0x81   :  { %20 = vst.msk [vmem:[#allocation0] sm:$0x1] %vm19_vm2, %v18_v7  }
  0x82   :  { %26 = vst.msk [vmem:[#allocation0] sm:$0x1] %vm25_vm3, %v24_v6  }
  0x89   :  { %v30_v8 = vld [vmem:[#allocation0] sm:$0x1] }
  0x8a   :  { %32 = vst [vmem:[%s56_s1] sm:$0x1] %v30_v8 }

// kernel: network_forward.6
= control target key start
LH: loop header
LB: loop body
LE: loop exit
PB: predicated region body
PF: predicated region fallthrough
CT: control target
= control target key end

     0   :  { %vm186_vm0 = vcmask 261120   ;;  %s1915_s1 = inlined_call_operand.vmem [shape: bf16[3,160,256], index: 1, kind: input, shape index: {}]   ;;  %s1916_s0 = inlined_call_operand.vmem [shape: bf16[2,2,5,160], index: 0, kind: input, shape index: {}]   ;;  %s1917_s2 = inlined_call_operand.vmem [shape: f32[1,128], index: 2, kind: input, shape index: {}]   ;;  %s1918_s3 = inlined_call_operand.vmem [shape: bf16[2,4,128], index: 3, kind: output, shape index: {}]  }
   0x1   :  { %v1290_v0 = vld [vmem:[%s1915_s1 + $0xa4] ss:$8 sps:$4 sm:$0xff]   ;;  %v1295_v1 = vld [vmem:[%s1915_s1 + $0xa0] ss:$8 sps:$4 sm:$0xff]   ;;  %v1302_v2 = vld [vmem:[%s1915_s1 + $0xb4] ss:$8 sps:$4 sm:$0xff]  }
   0x2   :  { %190 = vmatprep.subr.bf16.mxu0 %v1290_v0  ;;  %541 = vmatprep.subr.bf16.mxu1 %v1290_v0  ;;  %v1309_v3 = vld [vmem:[%s1915_s1 + $0xb0] ss:$8 sps:$4 sm:$0xff]   ;;  %v1316_v4 = vld [vmem:[%s1915_s1 + $0xc4] ss:$8 sps:$4 sm:$0xff]   ;;  %v1323_v5 = vld [vmem:[%s1915_s1 + $0xc0] ss:$8 sps:$4 sm:$0xff]  }
   0x3   :  { %191 = vmatpush1.bf16.msra.mxu0 %v1295_v1  ;;  %542 = vmatpush1.bf16.msra.mxu1 %v1295_v1  ;;  %v1330_v6 = vld [vmem:[%s1915_s1 + $0xd4] ss:$8 sps:$4 sm:$0xff]   ;;  %v1337_v7 = vld [vmem:[%s1915_s1 + $0xd0] ss:$8 sps:$4 sm:$0xff]   ;;  %v1344_v8 = vld [vmem:[%s1915_s1 + $0xe4] ss:$8 sps:$4 sm:$0xff]  }
   0x4   :  { %192 = vmatprep.subr.bf16.mxu0 %v1302_v2  ;;  %543 = vmatprep.subr.bf16.mxu1 %v1302_v2  ;;  %v79_v9 = vld [vmem:[%s1916_s0 + $0x8] sm:$0x77]  ;;  %v78_v11 = vld [vmem:[%s1916_s0] sm:$0x77]  ;;  %v1366_v14 = vld [vmem:[%s1915_s1 + $0xf4] ss:$8 sps:$4 sm:$0xff]  }
   0x5   :  { %v1349_v10 = vcombine.high %v79_v9, %v79_v9  ;;  %v1359_v12 = vld [vmem:[%s1915_s1 + $0xe0] ss:$8 sps:$4 sm:$0xff]   ;;  %v1077_v13 = vcombine.high %v78_v11, %v78_v11  ;;  %v1375_v17 = vld [vmem:[%s1915_s1 + $0xf0] ss:$8 sps:$4 sm:$0xff]   ;;  %v1382_v19 = vld [vmem:[%s1915_s1 + $0x104] ss:$8 sps:$4 sm:$0xff]   ;;  %v1402_v23 = vcombine.low %v78_v11, %v78_v11  ;;  %v1448_v33 = vcombine.low %v79_v9, %v79_v9 }
   0x6   :  { %v1391_v21 = vld [vmem:[%s1915_s1 + $0x100] ss:$8 sps:$4 sm:$0xff]   ;;  %v1398_v22 = vld [vmem:[%s1915_s1 + $0x114] ss:$8 sps:$4 sm:$0xff]   ;;  %v1409_v24 = vld [vmem:[%s1915_s1 + $0x110] ss:$8 sps:$4 sm:$0xff]  }
   0x7   :  { %193 = vmatpush1.bf16.msra.mxu0 %v1309_v3  ;;  %544 = vmatpush1.bf16.msra.mxu1 %v1309_v3  ;;  %v388_v15 = vshrl.u32 %v1077_v13, 16  ;;  %v390_v16 = vshll.u32 %v1077_v13, 16  ;;  %v1416_v25 = vld [vmem:[%s1915_s1 + $0x124] ss:$8 sps:$4 sm:$0xff]   ;;  %v384_v26 = vshll.u32 %v1402_v23, 16  ;;  %v382_v29 = vshrl.u32 %v1402_v23, 16 }
   0x8   :  { %194 = vmatprep.subr.bf16.mxu0 %v1316_v4  ;;  %545 = vmatprep.subr.bf16.mxu1 %v1316_v4  ;;  %v1424_v27 = vld [vmem:[%s1915_s1 + $0x120] ss:$8 sps:$4 sm:$0xff]   ;;  %v1431_v28 = vld [vmem:[%s1915_s1 + $0x134] ss:$8 sps:$4 sm:$0xff]   ;;  %v1439_v31 = vld [vmem:[%s1915_s1 + $0x130] ss:$8 sps:$4 sm:$0xff]  }
   0x9   :  { %1075 = vmatprep.mubr.msk.bf16.mxu0 %vm186_vm0, %v1349_v10  ;;  %v392_v18 = vrot.slane %v390_v16, 1  ;;  %v386_v30 = vrot.slane %v384_v26, 1  ;;  %v1446_v32 = vld [vmem:[%s1915_s1 + $0x4] ss:$8 sps:$4 sm:$0xff]   ;;  %v1457_v35 = vld [vmem:[%s1915_s1] ss:$8 sps:$4 sm:$0xff]  }
   0xa   :  { %v1464_v36 = vld [vmem:[%s1915_s1 + $0x14] ss:$8 sps:$4 sm:$0xff]   ;;  %v1473_v37 = vld [vmem:[%s1915_s1 + $0x10] ss:$8 sps:$4 sm:$0xff]   ;;  %v1480_v38 = vld [vmem:[%s1915_s1 + $0x24] ss:$8 sps:$4 sm:$0xff]  }
   0xb   :  { %195 = vmatpush1.bf16.msra.mxu0 %v1323_v5  ;;  %546 = vmatpush1.bf16.msra.mxu1 %v1323_v5  ;;  %v1384_v20 = vor.u32 %v392_v18, %v388_v15  ;;  %v1450_v34 = vor.u32 %v386_v30, %v382_v29  ;;  %v1490_v39 = vld [vmem:[%s1915_s1 + $0x20] ss:$8 sps:$4 sm:$0xff]   ;;  %v1497_v40 = vld [vmem:[%s1915_s1 + $0x34] ss:$8 sps:$4 sm:$0xff]   ;;  %v1504_v41 = vld [vmem:[%s1915_s1 + $0x30] ss:$8 sps:$4 sm:$0xff]  }
   0xc   :  { %196 = vmatprep.subr.bf16.mxu0 %v1330_v6  ;;  %547 = vmatprep.subr.bf16.mxu1 %v1330_v6  ;;  %v1511_v42 = vld [vmem:[%s1915_s1 + $0x44] ss:$8 sps:$4 sm:$0xff]   ;;  %v1518_v43 = vld [vmem:[%s1915_s1 + $0x40] ss:$8 sps:$4 sm:$0xff]   ;;  %v1525_v44 = vld [vmem:[%s1915_s1 + $0x54] ss:$8 sps:$4 sm:$0xff]  }
   0xd   :  { %1120 = vmatprep.mubr.msk.bf16.mxu1 %vm186_vm0, %v1384_v20  ;;  %v1532_v45 = vld [vmem:[%s1915_s1 + $0x50] ss:$8 sps:$4 sm:$0xff]   ;;  %v1539_v46 = vld [vmem:[%s1915_s1 + $0x64] ss:$8 sps:$4 sm:$0xff]   ;;  %v1546_v47 = vld [vmem:[%s1915_s1 + $0x60] ss:$8 sps:$4 sm:$0xff]  }
   0xe   :  { %v1553_v48 = vld [vmem:[%s1915_s1 + $0x74] ss:$8 sps:$4 sm:$0xff]   ;;  %v1560_v49 = vld [vmem:[%s1915_s1 + $0x70] ss:$8 sps:$4 sm:$0xff]   ;;  %v1567_v50 = vld [vmem:[%s1915_s1 + $0x84] ss:$8 sps:$4 sm:$0xff]  }
   0xf   :  { %197 = vmatpush1.bf16.msra.mxu0 %v1337_v7  ;;  %548 = vmatpush1.bf16.msra.mxu1 %v1337_v7  ;;  %v1574_v51 = vld [vmem:[%s1915_s1 + $0x80] ss:$8 sps:$4 sm:$0xff]   ;;  %v1581_v52 = vld [vmem:[%s1915_s1 + $0x94] ss:$8 sps:$4 sm:$0xff]   ;;  %v632_v53 = vshll.u32 %v1349_v10, 16  ;;  %v630_v56 = vshrl.u32 %v1349_v10, 16 }
  0x10   :  { %198 = vmatprep.subr.bf16.mxu0 %v1344_v8  ;;  %549 = vmatprep.subr.bf16.mxu1 %v1344_v8  ;;  %v1589_v54 = vld [vmem:[%s1915_s1 + $0x90] ss:$8 sps:$4 sm:$0xff]   ;;  %v1596_v55 = vld [vmem:[%s1915_s1 + $0x144] ss:$8 sps:$4 sm:$0xff]   ;;  %v1604_v58 = vld [vmem:[%s1915_s1 + $0x140] ss:$8 sps:$4 sm:$0xff]  }
  0x11   :  { %v634_v57 = vrot.slane %v632_v53, 1  ;;  %v1611_v59 = vld [vmem:[%s1915_s1 + $0x154] ss:$8 sps:$4 sm:$0xff]   ;;  %v1620_v61 = vld [vmem:[%s1915_s1 + $0x150] ss:$8 sps:$4 sm:$0xff]  }
  0x12   :  { %v1627_v62 = vld [vmem:[%s1915_s1 + $0x164] ss:$8 sps:$4 sm:$0xff]   ;;  %v1637_v63 = vld [vmem:[%s1915_s1 + $0x160] ss:$8 sps:$4 sm:$0xff]   ;;  %v1644_v9 = vld [vmem:[%s1915_s1 + $0x174] ss:$8 sps:$4 sm:$0xff]  }
  0x13   :  { %199 = vmatpush1.bf16.msra.mxu0 %v1359_v12  ;;  %550 = vmatpush1.bf16.msra.mxu1 %v1359_v12  ;;  %v635_v60 = vor.u32 %v634_v57, %v630_v56  ;;  %v1658_v11 = vld [vmem:[%s1915_s1 + $0x184] ss:$8 sps:$4 sm:$0xff]   ;;  %v1672_v15 = vld [vmem:[%s1915_s1 + $0x194] ss:$8 sps:$4 sm:$0xff]   ;;  %v1679_v16 = vld [vmem:[%s1915_s1 + $0x190] ss:$8 sps:$4 sm:$0xff]  }
  0x14   :  { %200 = vmatprep.subr.bf16.mxu0 %v1366_v14  ;;  %551 = vmatprep.subr.bf16.mxu1 %v1366_v14  ;;  %1935 = vst [vmem:[#allocation2_spill] sm:$0xff] %v1672_v15  ;;  %1936 = vst [vmem:[#allocation3_spill] sm:$0xff] %v1679_v16  ;;  %v1686_v18 = vld [vmem:[%s1915_s1 + $0x1a4] ss:$8 sps:$4 sm:$0xff]   ;;  %v1124_v26 = vld [vmem:[%s1916_s0 + $0x10] sm:$0x77] }
  0x15   :  { %1937 = vst [vmem:[#allocation4_spill] sm:$0xff] %v1686_v18  ;;  %v1710_v29 = vld [vmem:[%s1915_s1 + $0x1b0] ss:$8 sps:$4 sm:$0xff]   ;;  %v1717_v30 = vld [vmem:[%s1915_s1 + $0x1c4] ss:$8 sps:$4 sm:$0xff]   ;;  %v1719_v53 = vcombine.high %v1124_v26, %v1124_v26  ;;  %v626_v56 = vshll.u32 %v1448_v33, 16 }
  0x16   :  { %1940 = vst [vmem:[#allocation7_spill] sm:$0xff] %v1710_v29  ;;  %1941 = vst [vmem:[#allocation8_spill] sm:$0xff] %v1717_v30  ;;  %v1727_v57 = vld [vmem:[%s1915_s1 + $0x1c0] ss:$8 sps:$4 sm:$0xff]  }
  0x17   :  { %201 = vmatpush1.bf16.msra.mxu0 %v1375_v17  ;;  %552 = vmatpush1.bf16.msra.mxu1 %v1375_v17  ;;  %1942 = vst [vmem:[#allocation9_spill] sm:$0xff] %v1727_v57 }
  0x18   :  { %202 = vmatprep.subr.bf16.mxu0 %v1382_v19  ;;  %553 = vmatprep.subr.bf16.mxu1 %v1382_v19 }
  0x1b   :  { %203 = vmatpush1.bf16.msra.mxu0 %v1391_v21  ;;  %554 = vmatpush1.bf16.msra.mxu1 %v1391_v21 }
  0x1c   :  { %204 = vmatprep.subr.bf16.mxu0 %v1398_v22  ;;  %555 = vmatprep.subr.bf16.mxu1 %v1398_v22 }
  0x1f   :  { %205 = vmatpush1.bf16.msra.mxu0 %v1409_v24  ;;  %556 = vmatpush1.bf16.msra.mxu1 %v1409_v24 }
  0x20   :  { %206 = vmatprep.subr.bf16.mxu0 %v1416_v25  ;;  %557 = vmatprep.subr.bf16.mxu1 %v1416_v25 }
  0x23   :  { %207 = vmatpush1.bf16.msra.mxu0 %v1424_v27  ;;  %558 = vmatpush1.bf16.msra.mxu1 %v1424_v27 }
  0x24   :  { %208 = vmatprep.subr.bf16.mxu0 %v1431_v28  ;;  %559 = vmatprep.subr.bf16.mxu1 %v1431_v28 }
  0x27   :  { %209 = vmatpush1.bf16.msra.mxu0 %v1439_v31  ;;  %560 = vmatpush1.bf16.msra.mxu1 %v1439_v31 }
  0x28   :  { %340 = vmatprep.subr.bf16.mxu0 %v1446_v32  ;;  %582 = vmatprep.subr.bf16.mxu1 %v1446_v32 }
  0x2a   :  { %223 = vmatmul.mubr.bf16.vlgmr.msra.gmra.mrb[0].mxu0 %v1448_v33  ;;  %574 = vmatmul.mubr.bf16.vlgmr.msra.gmra.mrb[0].mxu1 %v1450_v34 }
  0x2b   :  { %341 = vmatpush1.bf16.msra.mxu0 %v1457_v35  ;;  %583 = vmatpush1.bf16.msra.mxu1 %v1457_v35 }
  0x2c   :  { %342 = vmatprep.subr.bf16.mxu0 %v1464_v36  ;;  %584 = vmatprep.subr.bf16.mxu1 %v1464_v36 }
  0x2d   :  { %1098 = vmatprep.mubr.msk.bf16.mxu0 %vm186_vm0, %v1077_v13  ;;  %1121 = vmatprep.mubr.msk.bf16.mxu1 %vm186_vm0, %v1349_v10  ;;  %v1651_v10 = vld [vmem:[%s1915_s1 + $0x170] ss:$8 sps:$4 sm:$0xff]   ;;  %v1665_v13 = vld [vmem:[%s1915_s1 + $0x180] ss:$8 sps:$4 sm:$0xff]  }
  0x2f   :  { %343 = vmatpush1.bf16.msra.mxu0 %v1473_v37  ;;  %585 = vmatpush1.bf16.msra.mxu1 %v1473_v37 }
  0x30   :  { %344 = vmatprep.subr.bf16.mxu0 %v1480_v38  ;;  %586 = vmatprep.subr.bf16.mxu1 %v1480_v38 }
  0x33   :  { %345 = vmatpush1.bf16.msra.mxu0 %v1490_v39  ;;  %587 = vmatpush1.bf16.msra.mxu1 %v1490_v39 }
  0x34   :  { %346 = vmatprep.subr.bf16.mxu0 %v1497_v40  ;;  %588 = vmatprep.subr.bf16.mxu1 %v1497_v40 }
  0x37   :  { %347 = vmatpush1.bf16.msra.mxu0 %v1504_v41  ;;  %589 = vmatpush1.bf16.msra.mxu1 %v1504_v41 }
  0x38   :  { %348 = vmatprep.subr.bf16.mxu0 %v1511_v42  ;;  %590 = vmatprep.subr.bf16.mxu1 %v1511_v42 }
  0x3b   :  { %349 = vmatpush1.bf16.msra.mxu0 %v1518_v43  ;;  %591 = vmatpush1.bf16.msra.mxu1 %v1518_v43 }
  0x3c   :  { %350 = vmatprep.subr.bf16.mxu0 %v1525_v44  ;;  %592 = vmatprep.subr.bf16.mxu1 %v1525_v44 }
  0x3f   :  { %351 = vmatpush1.bf16.msra.mxu0 %v1532_v45  ;;  %593 = vmatpush1.bf16.msra.mxu1 %v1532_v45 }
  0x40   :  { %352 = vmatprep.subr.bf16.mxu0 %v1539_v46  ;;  %594 = vmatprep.subr.bf16.mxu1 %v1539_v46 }
  0x43   :  { %353 = vmatpush1.bf16.msra.mxu0 %v1546_v47  ;;  %595 = vmatpush1.bf16.msra.mxu1 %v1546_v47 }
  0x44   :  { %354 = vmatprep.subr.bf16.mxu0 %v1553_v48  ;;  %596 = vmatprep.subr.bf16.mxu1 %v1553_v48 }
  0x47   :  { %355 = vmatpush1.bf16.msra.mxu0 %v1560_v49  ;;  %597 = vmatpush1.bf16.msra.mxu1 %v1560_v49 }
  0x48   :  { %356 = vmatprep.subr.bf16.mxu0 %v1567_v50  ;;  %598 = vmatprep.subr.bf16.mxu1 %v1567_v50 }
  0x4b   :  { %357 = vmatpush1.bf16.msra.mxu0 %v1574_v51  ;;  %599 = vmatpush1.bf16.msra.mxu1 %v1574_v51 }
  0x4c   :  { %358 = vmatprep.subr.bf16.mxu0 %v1581_v52  ;;  %600 = vmatprep.subr.bf16.mxu1 %v1581_v52 }
  0x4f   :  { %359 = vmatpush1.bf16.msra.mxu0 %v1589_v54  ;;  %601 = vmatpush1.bf16.msra.mxu1 %v1589_v54 }
  0x50   :  { %498 = vmatprep.subr.bf16.mxu0 %v1596_v55  ;;  %640 = vmatprep.subr.bf16.mxu1 %v1596_v55 }
  0x52   :  { %373 = vmatmul.mubr.bf16.vlgmr.msra.gmra.mrb[0].mxu0 %v1402_v23  ;;  %615 = vmatmul.mubr.bf16.vlgmr.msra.gmra.mrb[0].mxu1 %v1448_v33  ;;  %v1700_v23 = vld [vmem:[%s1915_s1 + $0x1b4] ss:$8 sps:$4 sm:$0xff]  }
  0x53   :  { %499 = vmatpush1.bf16.msra.mxu0 %v1604_v58  ;;  %641 = vmatpush1.bf16.msra.mxu1 %v1604_v58  ;;  %1939 = vst [vmem:[#allocation6_spill] sm:$0xff] %v1700_v23 }
  0x54   :  { %500 = vmatprep.subr.bf16.mxu0 %v1611_v59  ;;  %642 = vmatprep.subr.bf16.mxu1 %v1611_v59 }
  0x55   :  { %1119 = vmatprep.mubr.msk.bf16.mxu0 %vm186_vm0, %v1384_v20  ;;  %1122 = vmatprep.mubr.msk.bf16.mxu1 %vm186_vm0, %v635_v60  ;;  %v1693_v20 = vld [vmem:[%s1915_s1 + $0x1a0] ss:$8 sps:$4 sm:$0xff]   ;;  %v1734_v60 = vld [vmem:[%s1915_s1 + $0x1d4] ss:$8 sps:$4 sm:$0xff]  }
  0x56   :  { %1938 = vst [vmem:[#allocation5_spill] sm:$0xff] %v1693_v20 }
  0x57   :  { %501 = vmatpush1.bf16.msra.mxu0 %v1620_v61  ;;  %643 = vmatpush1.bf16.msra.mxu1 %v1620_v61 }
  0x58   :  { %502 = vmatprep.subr.bf16.mxu0 %v1627_v62  ;;  %644 = vmatprep.subr.bf16.mxu1 %v1627_v62 }
  0x5b   :  { %503 = vmatpush1.bf16.msra.mxu0 %v1637_v63  ;;  %645 = vmatpush1.bf16.msra.mxu1 %v1637_v63 }
  0x5c   :  { %504 = vmatprep.subr.bf16.mxu0 %v1644_v9  ;;  %646 = vmatprep.subr.bf16.mxu1 %v1644_v9 }
  0x5f   :  { %505 = vmatpush1.bf16.msra.mxu0 %v1651_v10  ;;  %647 = vmatpush1.bf16.msra.mxu1 %v1651_v10 }
  0x60   :  { %506 = vmatprep.subr.bf16.mxu0 %v1658_v11  ;;  %648 = vmatprep.subr.bf16.mxu1 %v1658_v11 }
  0x63   :  { %507 = vmatpush1.bf16.msra.mxu0 %v1665_v13  ;;  %649 = vmatpush1.bf16.msra.mxu1 %v1665_v13 }
  0x64   :  { %508 = vmatprep.subr.bf16.mxu0 %v1672_v15  ;;  %650 = vmatprep.subr.bf16.mxu1 %v1672_v15 }
  0x67   :  { %509 = vmatpush1.bf16.msra.mxu0 %v1679_v16  ;;  %651 = vmatpush1.bf16.msra.mxu1 %v1679_v16 }
  0x68   :  { %510 = vmatprep.subr.bf16.mxu0 %v1686_v18  ;;  %652 = vmatprep.subr.bf16.mxu1 %v1686_v18  ;;  %v628_v18 = vrot.slane %v626_v56, 1 }
  0x6b   :  { %511 = vmatpush1.bf16.msra.mxu0 %v1693_v20  ;;  %653 = vmatpush1.bf16.msra.mxu1 %v1693_v20  ;;  %v624_v20 = vshrl.u32 %v1448_v33, 16  ;;  %v1125_v33 = vld [vmem:[%s1916_s0 + $0x18] sm:$0x77] }
  0x6c   :  { %512 = vmatprep.subr.bf16.mxu0 %v1700_v23  ;;  %654 = vmatprep.subr.bf16.mxu1 %v1700_v23  ;;  %v808_v23 = vshll.u32 %v1719_v53, 16  ;;  %v1755_v56 = vcombine.high %v1125_v33, %v1125_v33 }
  0x6d   :  { %v629_v15 = vor.u32 %v628_v18, %v624_v20 }
  0x6e   :  { %v810_v16 = vrot.slane %v808_v23, 1 }
  0x6f   :  { %513 = vmatpush1.bf16.msra.mxu0 %v1710_v29  ;;  %655 = vmatpush1.bf16.msra.mxu1 %v1710_v29  ;;  %v1743_v29 = vld [vmem:[%s1915_s1 + $0x1d0] ss:$8 sps:$4 sm:$0xff]  }
  0x70   :  { %514 = vmatprep.subr.bf16.mxu0 %v1717_v30  ;;  %656 = vmatprep.subr.bf16.mxu1 %v1717_v30  ;;  %v806_v30 = vshrl.u32 %v1719_v53, 16 }
  0x73   :  { %515 = vmatpush1.bf16.msra.mxu0 %v1727_v57  ;;  %657 = vmatpush1.bf16.msra.mxu1 %v1727_v57  ;;  %v1757_v57 = vor.u32 %v810_v16, %v806_v30 }
  0x74   :  { %516 = vmatprep.subr.bf16.mxu0 %v1734_v60  ;;  %658 = vmatprep.subr.bf16.mxu1 %v1734_v60 }
  0x77   :  { %517 = vmatpush1.bf16.msra.mxu0 %v1743_v29  ;;  %659 = vmatpush1.bf16.msra.mxu1 %v1743_v29 }
  0x78   :  { %708 = vmatprep.subr.bf16.mxu0 %v1290_v0  ;;  %859 = vmatprep.subr.bf16.mxu1 %v1290_v0  ;;  %v1788_v0 = vcombine.low %v1124_v26, %v1124_v26 }
  0x7a   :  { %531 = vmatmul.mubr.bf16.vlgmr.msra.gmra.mrb[0].mxu0 %v1450_v34  ;;  %673 = vmatmul.mubr.bf16.vlgmr.msra.gmra.mrb[0].mxu1 %v629_v15 }
  0x7b   :  { %709 = vmatpush1.bf16.msra.mxu0 %v1295_v1  ;;  %860 = vmatpush1.bf16.msra.mxu1 %v1295_v1  ;;  %v802_v1 = vshll.u32 %v1788_v0, 16 }
  0x7c   :  { %710 = vmatprep.subr.bf16.mxu0 %v1302_v2  ;;  %861 = vmatprep.subr.bf16.mxu1 %v1302_v2  ;;  %v800_v2 = vshrl.u32 %v1788_v0, 16 }
  0x7d   :  { %1128 = vmatprep.mubr.msk.bf16.mxu0 %vm186_vm0, %v1755_v56  ;;  %1133 = vmatprep.mubr.msk.bf16.mxu1 %vm186_vm0, %v1757_v57 }
  0x7f   :  { %711 = vmatpush1.bf16.msra.mxu0 %v1309_v3  ;;  %862 = vmatpush1.bf16.msra.mxu1 %v1309_v3  ;;  %v804_v3 = vrot.slane %v802_v1, 1 }
  0x80   :  { %712 = vmatprep.subr.bf16.mxu0 %v1316_v4  ;;  %863 = vmatprep.subr.bf16.mxu1 %v1316_v4  ;;  %v1804_v4 = vcombine.low %v1125_v33, %v1125_v33 }
  0x83   :  { %713 = vmatpush1.bf16.msra.mxu0 %v1323_v5  ;;  %864 = vmatpush1.bf16.msra.mxu1 %v1323_v5  ;;  %v1806_v5 = vor.u32 %v804_v3, %v800_v2 }
  0x84   :  { %714 = vmatprep.subr.bf16.mxu0 %v1330_v6  ;;  %865 = vmatprep.subr.bf16.mxu1 %v1330_v6  ;;  %v950_v6 = vshll.u32 %v1755_v56, 16 }
  0x87   :  { %715 = vmatpush1.bf16.msra.mxu0 %v1337_v7  ;;  %866 = vmatpush1.bf16.msra.mxu1 %v1337_v7  ;;  %v948_v7 = vshrl.u32 %v1755_v56, 16 }
  0x88   :  { %716 = vmatprep.subr.bf16.mxu0 %v1344_v8  ;;  %867 = vmatprep.subr.bf16.mxu1 %v1344_v8  ;;  %v952_v8 = vrot.slane %v950_v6, 1 }
  0x8b   :  { %717 = vmatpush1.bf16.msra.mxu0 %v1359_v12  ;;  %868 = vmatpush1.bf16.msra.mxu1 %v1359_v12  ;;  %v953_v12 = vor.u32 %v952_v8, %v948_v7 }
  0x8c   :  { %718 = vmatprep.subr.bf16.mxu0 %v1366_v14  ;;  %869 = vmatprep.subr.bf16.mxu1 %v1366_v14  ;;  %v1943_v14 = vld [vmem:[#allocation2_spill] sm:$0xff] }
  0x8f   :  { %719 = vmatpush1.bf16.msra.mxu0 %v1375_v17  ;;  %870 = vmatpush1.bf16.msra.mxu1 %v1375_v17  ;;  %v1944_v17 = vld [vmem:[#allocation3_spill] sm:$0xff] }
  0x90   :  { %720 = vmatprep.subr.bf16.mxu0 %v1382_v19  ;;  %871 = vmatprep.subr.bf16.mxu1 %v1382_v19  ;;  %v1945_v19 = vld [vmem:[#allocation4_spill] sm:$0xff] }
  0x93   :  { %721 = vmatpush1.bf16.msra.mxu0 %v1391_v21  ;;  %872 = vmatpush1.bf16.msra.mxu1 %v1391_v21  ;;  %v1946_v21 = vld [vmem:[#allocation5_spill] sm:$0xff] }
  0x94   :  { %722 = vmatprep.subr.bf16.mxu0 %v1398_v22  ;;  %873 = vmatprep.subr.bf16.mxu1 %v1398_v22  ;;  %v1947_v22 = vld [vmem:[#allocation6_spill] sm:$0xff] }
  0x97   :  { %723 = vmatpush1.bf16.msra.mxu0 %v1409_v24  ;;  %874 = vmatpush1.bf16.msra.mxu1 %v1409_v24  ;;  %v944_v24 = vshll.u32 %v1804_v4, 16 }
  0x98   :  { %724 = vmatprep.subr.bf16.mxu0 %v1416_v25  ;;  %875 = vmatprep.subr.bf16.mxu1 %v1416_v25  ;;  %v1948_v25 = vld [vmem:[#allocation7_spill] sm:$0xff] }
  0x9b   :  { %725 = vmatpush1.bf16.msra.mxu0 %v1424_v27  ;;  %876 = vmatpush1.bf16.msra.mxu1 %v1424_v27  ;;  %v1949_v27 = vld [vmem:[#allocation8_spill] sm:$0xff] }
  0x9c   :  { %726 = vmatprep.subr.bf16.mxu0 %v1431_v28  ;;  %877 = vmatprep.subr.bf16.mxu1 %v1431_v28  ;;  %v942_v28 = vshrl.u32 %v1804_v4, 16 }
  0x9f   :  { %727 = vmatpush1.bf16.msra.mxu0 %v1439_v31  ;;  %878 = vmatpush1.bf16.msra.mxu1 %v1439_v31  ;;  %v946_v31 = vrot.slane %v944_v24, 1 }
  0xa0   :  { %758 = vmatprep.subr.bf16.mxu0 %v1446_v32  ;;  %900 = vmatprep.subr.bf16.mxu1 %v1446_v32  ;;  %v1950_v32 = vld [vmem:[#allocation9_spill] sm:$0xff] }
  0xa1   :  { %v947_v34 = vor.u32 %v946_v31, %v942_v28 }
  0xa2   :  { %741 = vmatmul.mubr.bf16.vlgmr.msra.gmra.mrb[4].mxu0 %v1804_v4  ;;  %892 = vmatmul.mubr.bf16.vlgmr.msra.gmra.mrb[4].mxu1 %v1806_v5 }
  0xa3   :  { %759 = vmatpush1.bf16.msra.mxu0 %v1457_v35  ;;  %901 = vmatpush1.bf16.msra.mxu1 %v1457_v35 }
  0xa4   :  { %760 = vmatprep.subr.bf16.mxu0 %v1464_v36  ;;  %902 = vmatprep.subr.bf16.mxu1 %v1464_v36 }
  0xa5   :  { %1131 = vmatprep.mubr.msk.bf16.mxu0 %vm186_vm0, %v1719_v53  ;;  %1134 = vmatprep.mubr.msk.bf16.mxu1 %vm186_vm0, %v1755_v56 }
  0xa7   :  { %761 = vmatpush1.bf16.msra.mxu0 %v1473_v37  ;;  %903 = vmatpush1.bf16.msra.mxu1 %v1473_v37 }
  0xa8   :  { %762 = vmatprep.subr.bf16.mxu0 %v1480_v38  ;;  %904 = vmatprep.subr.bf16.mxu1 %v1480_v38 }
  0xab   :  { %763 = vmatpush1.bf16.msra.mxu0 %v1490_v39  ;;  %905 = vmatpush1.bf16.msra.mxu1 %v1490_v39 }
  0xac   :  { %764 = vmatprep.subr.bf16.mxu0 %v1497_v40  ;;  %906 = vmatprep.subr.bf16.mxu1 %v1497_v40 }
  0xaf   :  { %765 = vmatpush1.bf16.msra.mxu0 %v1504_v41  ;;  %907 = vmatpush1.bf16.msra.mxu1 %v1504_v41 }
  0xb0   :  { %766 = vmatprep.subr.bf16.mxu0 %v1511_v42  ;;  %908 = vmatprep.subr.bf16.mxu1 %v1511_v42 }
  0xb3   :  { %767 = vmatpush1.bf16.msra.mxu0 %v1518_v43  ;;  %909 = vmatpush1.bf16.msra.mxu1 %v1518_v43  ;;  %v1123_v43 = vld [vmem:[%s1917_s2] ss:$0 sm:$0xff] }
  0xb4   :  { %768 = vmatprep.subr.bf16.mxu0 %v1525_v44  ;;  %910 = vmatprep.subr.bf16.mxu1 %v1525_v44 }
  0xb7   :  { %769 = vmatpush1.bf16.msra.mxu0 %v1532_v45  ;;  %911 = vmatpush1.bf16.msra.mxu1 %v1532_v45 }
  0xb8   :  { %770 = vmatprep.subr.bf16.mxu0 %v1539_v46  ;;  %912 = vmatprep.subr.bf16.mxu1 %v1539_v46 }
  0xbb   :  { %771 = vmatpush1.bf16.msra.mxu0 %v1546_v47  ;;  %913 = vmatpush1.bf16.msra.mxu1 %v1546_v47 }
  0xbc   :  { %772 = vmatprep.subr.bf16.mxu0 %v1553_v48  ;;  %914 = vmatprep.subr.bf16.mxu1 %v1553_v48 }
  0xbf   :  { %773 = vmatpush1.bf16.msra.mxu0 %v1560_v49  ;;  %915 = vmatpush1.bf16.msra.mxu1 %v1560_v49 }
  0xc0   :  { %774 = vmatprep.subr.bf16.mxu0 %v1567_v50  ;;  %916 = vmatprep.subr.bf16.mxu1 %v1567_v50 }
  0xc3   :  { %775 = vmatpush1.bf16.msra.mxu0 %v1574_v51  ;;  %917 = vmatpush1.bf16.msra.mxu1 %v1574_v51 }
  0xc4   :  { %776 = vmatprep.subr.bf16.mxu0 %v1581_v52  ;;  %918 = vmatprep.subr.bf16.mxu1 %v1581_v52 }
  0xc7   :  { %777 = vmatpush1.bf16.msra.mxu0 %v1589_v54  ;;  %919 = vmatpush1.bf16.msra.mxu1 %v1589_v54 }
  0xc8   :  { %816 = vmatprep.subr.bf16.mxu0 %v1596_v55  ;;  %958 = vmatprep.subr.bf16.mxu1 %v1596_v55 }
  0xca   :  { %791 = vmatmul.mubr.bf16.vlgmr.msra.gmra.mrb[4].mxu0 %v1788_v0  ;;  %933 = vmatmul.mubr.bf16.vlgmr.msra.gmra.mrb[4].mxu1 %v1804_v4 }
  0xcb   :  { %817 = vmatpush1.bf16.msra.mxu0 %v1604_v58  ;;  %959 = vmatpush1.bf16.msra.mxu1 %v1604_v58 }
  0xcc   :  { %818 = vmatprep.subr.bf16.mxu0 %v1611_v59  ;;  %960 = vmatprep.subr.bf16.mxu1 %v1611_v59 }
  0xcd   :  { %1132 = vmatprep.mubr.msk.bf16.mxu0 %vm186_vm0, %v1757_v57  ;;  %1135 = vmatprep.mubr.msk.bf16.mxu1 %vm186_vm0, %v953_v12 }
  0xcf   :  { %819 = vmatpush1.bf16.msra.mxu0 %v1620_v61  ;;  %961 = vmatpush1.bf16.msra.mxu1 %v1620_v61 }
  0xd0   :  { %820 = vmatprep.subr.bf16.mxu0 %v1627_v62  ;;  %962 = vmatprep.subr.bf16.mxu1 %v1627_v62 }
  0xd3   :  { %821 = vmatpush1.bf16.msra.mxu0 %v1637_v63  ;;  %963 = vmatpush1.bf16.msra.mxu1 %v1637_v63 }
  0xd4   :  { %822 = vmatprep.subr.bf16.mxu0 %v1644_v9  ;;  %964 = vmatprep.subr.bf16.mxu1 %v1644_v9 }
  0xd7   :  { %823 = vmatpush1.bf16.msra.mxu0 %v1651_v10  ;;  %965 = vmatpush1.bf16.msra.mxu1 %v1651_v10 }
  0xd8   :  { %824 = vmatprep.subr.bf16.mxu0 %v1658_v11  ;;  %966 = vmatprep.subr.bf16.mxu1 %v1658_v11 }
  0xdb   :  { %825 = vmatpush1.bf16.msra.mxu0 %v1665_v13  ;;  %967 = vmatpush1.bf16.msra.mxu1 %v1665_v13 }
  0xdc   :  { %826 = vmatprep.subr.bf16.mxu0 %v1943_v14  ;;  %968 = vmatprep.subr.bf16.mxu1 %v1943_v14 }
  0xdf   :  { %827 = vmatpush1.bf16.msra.mxu0 %v1944_v17  ;;  %969 = vmatpush1.bf16.msra.mxu1 %v1944_v17 }
  0xe0   :  { %828 = vmatprep.subr.bf16.mxu0 %v1945_v19  ;;  %970 = vmatprep.subr.bf16.mxu1 %v1945_v19 }
  0xe3   :  { %829 = vmatpush1.bf16.msra.mxu0 %v1946_v21  ;;  %971 = vmatpush1.bf16.msra.mxu1 %v1946_v21 }
  0xe4   :  { %830 = vmatprep.subr.bf16.mxu0 %v1947_v22  ;;  %972 = vmatprep.subr.bf16.mxu1 %v1947_v22 }
  0xe7   :  { %831 = vmatpush1.bf16.msra.mxu0 %v1948_v25  ;;  %973 = vmatpush1.bf16.msra.mxu1 %v1948_v25 }
  0xe8   :  { %832 = vmatprep.subr.bf16.mxu0 %v1949_v27  ;;  %974 = vmatprep.subr.bf16.mxu1 %v1949_v27 }
  0xeb   :  { %833 = vmatpush1.bf16.msra.mxu0 %v1950_v32  ;;  %975 = vmatpush1.bf16.msra.mxu1 %v1950_v32 }
  0xec   :  { %834 = vmatprep.subr.bf16.mxu0 %v1734_v60  ;;  %976 = vmatprep.subr.bf16.mxu1 %v1734_v60 }
  0xef   :  { %835 = vmatpush1.bf16.msra.mxu0 %v1743_v29  ;;  %977 = vmatpush1.bf16.msra.mxu1 %v1743_v29 }
  0xf2   :  { %849 = vmatmul.mubr.bf16.vlgmr.msra.gmra.mrb[4].mxu0 %v1806_v5  ;;  %991 = vmatmul.mubr.bf16.vlgmr.msra.gmra.mrb[4].mxu1 %v947_v34 }
 0x14d   :  { %v532_v35 = vpop.f32.mrb[0].mxu0  ;;  %v674_v36 = vpop.f32.mrb[0].mxu1 }
 0x14e   :  { %v683_v37 = vmax.f32 %v532_v35, %v674_v36  ;;  %v534_v38 = vpop.f32.mrb[1].mxu0  ;;  %v676_v39 = vpop.f32.mrb[1].mxu1 }
 0x14f   :  { %v684_v40 = vmax.f32 %v534_v38, %v676_v39  ;;  %v536_v41 = vpop.f32.mrb[2].mxu0  ;;  %v678_v42 = vpop.f32.mrb[2].mxu1 }
 0x150   :  { %v537_v44 = vpop.f32.mrb[3].mxu0  ;;  %v679_v45 = vpop.f32.mrb[3].mxu1 }
 0x151   :  { %v685_v46 = vmax.f32 %v683_v37, %v684_v40 }
 0x153   :  { %v692_v47 = vadd.f32 %v1123_v43, %v685_v46 }
 0x155   :  { %v693_v48 = vmax.f32 %v692_v47, 0.0 }
 0x157   :  { %v694_v49 = vpack.c.bf16 %v693_v48, %v693_v48 }
 0x159   :  { %695 = vst [vmem:[%s1918_s3] sm:$0x3] %v694_v49 }
 0x1c5   :  { %v850_v50 = vpop.f32.mrb[4].mxu0  ;;  %v992_v51 = vpop.f32.mrb[4].mxu1 }
 0x1c6   :  { %v1001_v52 = vmax.f32 %v850_v50, %v992_v51  ;;  %v852_v54 = vpop.f32.mrb[5].mxu0  ;;  %v994_v55 = vpop.f32.mrb[5].mxu1 }
 0x1c7   :  { %v1002_v58 = vmax.f32 %v852_v54, %v994_v55  ;;  %v854_v59 = vpop.f32.mrb[6].mxu0  ;;  %v996_v61 = vpop.f32.mrb[6].mxu1 }
 0x1c8   :  { %v855_v62 = vpop.f32.mrb[7].mxu0  ;;  %v997_v63 = vpop.f32.mrb[7].mxu1 }
 0x1c9   :  { %v1003_v9 = vmax.f32 %v1001_v52, %v1002_v58 }
 0x1cb   :  { %v1004_v10 = vadd.f32 %v1123_v43, %v1003_v9 }
 0x1cd   :  { %v1005_v11 = vmax.f32 %v1004_v10, 0.0 }
 0x1cf   :  { %v1006_v13 = vpack.c.bf16 %v1005_v11, %v1005_v11 }
 0x1d1   :  { %1136 = vst [vmem:[%s1918_s3 + $0x2] sm:$0x3] %v1006_v13 }

// kernel: network_forward.7
= control target key start
LH: loop header
LB: loop body
LE: loop exit
PB: predicated region body
PF: predicated region fallthrough
CT: control target
= control target key end

     0   :  { %vm1553_vm0 = vmmov 0   ;;  %vm1030_vm1 = vcmask 523264   ;;  %vm1102_vm2 = vcmask 261120   ;;  %vm1146_vm3 = vcmask 15360   ;;  %s2031_s1 = inlined_call_operand.vmem [shape: bf16[512,512], index: 1, kind: input, shape index: {}]   ;;  %s2032_s0 = inlined_call_operand.vmem [shape: bf16[8,512], index: 0, kind: input, shape index: {}]   ;;  %s2033_s3 = inlined_call_operand.vmem [shape: bf16[64,32], index: 3, kind: input, shape index: {}]   ;;  %s2034_s2 = inlined_call_operand.vmem [shape: f32[1,64], index: 2, kind: input, shape index: {}]   ;;  %s2035_s6 = inlined_call_operand.vmem [shape: bf16[32,2], index: 6, kind: input, shape index: {}]   ;;  %s2036_s4 = inlined_call_operand.vmem [shape: f32[1,32], index: 4, kind: input, shape index: {}]   ;;  %s2037_s5 = inlined_call_operand.vmem [shape: bf16[8,32], index: 5, kind: input, shape index: {}]   ;;  %s2038_s7 = inlined_call_operand.vmem [shape: f32[1,2], index: 7, kind: input, shape index: {}]   ;;  %s2039_s8 = inlined_call_operand.vmem [shape: f32[8,2], index: 8, kind: output, shape index: {}]  }
   0x1   :  { %v1346_v0 = vld [vmem:[%s2031_s1 + $0x4] ss:$16 sps:$4 sm:$0xff]   ;;  %v1348_v1 = vld [vmem:[%s2031_s1 + $0xc] ss:$16 sps:$4 sm:$0xff]   ;;  %v1350_v2 = vld [vmem:[%s2031_s1] ss:$16 sps:$4 sm:$0xff]  }
   0x2   :  { %814 = vmatprep.subr.bf16.mxu0 %v1346_v0  ;;  %v1351_v3 = vld [vmem:[%s2031_s1 + $0x8] ss:$16 sps:$4 sm:$0xff]   ;;  %896 = vmatprep.subr.bf16.mxu1 %v1348_v1  ;;  %v1352_v4 = vld [vmem:[%s2031_s1 + $0x24] ss:$16 sps:$4 sm:$0xff]   ;;  %v1354_v5 = vld [vmem:[%s2031_s1 + $0x2c] ss:$16 sps:$4 sm:$0xff]  }
   0x3   :  { %815 = vmatpush1.bf16.msra.mxu0 %v1350_v2  ;;  %897 = vmatpush1.bf16.msra.mxu1 %v1351_v3  ;;  %v1356_v6 = vld [vmem:[%s2031_s1 + $0x20] ss:$16 sps:$4 sm:$0xff]   ;;  %v1357_v7 = vld [vmem:[%s2031_s1 + $0x28] ss:$16 sps:$4 sm:$0xff]   ;;  %v1358_v8 = vld [vmem:[%s2031_s1 + $0x44] ss:$16 sps:$4 sm:$0xff]  }
   0x4   :  { %816 = vmatprep.subr.bf16.mxu0 %v1352_v4  ;;  %898 = vmatprep.subr.bf16.mxu1 %v1354_v5  ;;  %v1360_v9 = vld [vmem:[%s2031_s1 + $0x4c] ss:$16 sps:$4 sm:$0xff]   ;;  %v1362_v10 = vld [vmem:[%s2031_s1 + $0x40] ss:$16 sps:$4 sm:$0xff]   ;;  %v1363_v11 = vld [vmem:[%s2031_s1 + $0x48] ss:$16 sps:$4 sm:$0xff]  }
   0x5   :  { %v1364_v12 = vld [vmem:[%s2031_s1 + $0x64] ss:$16 sps:$4 sm:$0xff]   ;;  %v1366_v13 = vld [vmem:[%s2031_s1 + $0x6c] ss:$16 sps:$4 sm:$0xff]   ;;  %v1368_v14 = vld [vmem:[%s2031_s1 + $0x60] ss:$16 sps:$4 sm:$0xff]  }
   0x6   :  { %v1369_v15 = vld [vmem:[%s2031_s1 + $0x68] ss:$16 sps:$4 sm:$0xff]   ;;  %v1370_v16 = vld [vmem:[%s2031_s1 + $0x84] ss:$16 sps:$4 sm:$0xff]   ;;  %v1372_v17 = vld [vmem:[%s2031_s1 + $0x8c] ss:$16 sps:$4 sm:$0xff]  }
   0x7   :  { %817 = vmatpush1.bf16.msra.mxu0 %v1356_v6  ;;  %899 = vmatpush1.bf16.msra.mxu1 %v1357_v7  ;;  %v1374_v18 = vld [vmem:[%s2031_s1 + $0x80] ss:$16 sps:$4 sm:$0xff]   ;;  %v1375_v19 = vld [vmem:[%s2031_s1 + $0x88] ss:$16 sps:$4 sm:$0xff]   ;;  %v1376_v20 = vld [vmem:[%s2031_s1 + $0xa4] ss:$16 sps:$4 sm:$0xff]  }
   0x8   :  { %818 = vmatprep.subr.bf16.mxu0 %v1358_v8  ;;  %900 = vmatprep.subr.bf16.mxu1 %v1360_v9  ;;  %v1378_v21 = vld [vmem:[%s2031_s1 + $0xac] ss:$16 sps:$4 sm:$0xff]   ;;  %v1380_v22 = vld [vmem:[%s2031_s1 + $0xa0] ss:$16 sps:$4 sm:$0xff]   ;;  %v1381_v23 = vld [vmem:[%s2031_s1 + $0xa8] ss:$16 sps:$4 sm:$0xff]  }
   0x9   :  { %v1382_v24 = vld [vmem:[%s2031_s1 + $0xc4] ss:$16 sps:$4 sm:$0xff]   ;;  %v1384_v25 = vld [vmem:[%s2031_s1 + $0xcc] ss:$16 sps:$4 sm:$0xff]   ;;  %v1386_v26 = vld [vmem:[%s2031_s1 + $0xc0] ss:$16 sps:$4 sm:$0xff]  }
   0xa   :  { %v1387_v27 = vld [vmem:[%s2031_s1 + $0xc8] ss:$16 sps:$4 sm:$0xff]   ;;  %v1388_v28 = vld [vmem:[%s2031_s1 + $0xe4] ss:$16 sps:$4 sm:$0xff]   ;;  %v1390_v29 = vld [vmem:[%s2031_s1 + $0xec] ss:$16 sps:$4 sm:$0xff]  }
   0xb   :  { %819 = vmatpush1.bf16.msra.mxu0 %v1362_v10  ;;  %901 = vmatpush1.bf16.msra.mxu1 %v1363_v11  ;;  %v1392_v30 = vld [vmem:[%s2031_s1 + $0xe0] ss:$16 sps:$4 sm:$0xff]   ;;  %v1393_v31 = vld [vmem:[%s2031_s1 + $0xe8] ss:$16 sps:$4 sm:$0xff]   ;;  %v1394_v32 = vld [vmem:[%s2031_s1 + $0x104] ss:$16 sps:$4 sm:$0xff]  }
   0xc   :  { %820 = vmatprep.subr.bf16.mxu0 %v1364_v12  ;;  %902 = vmatprep.subr.bf16.mxu1 %v1366_v13  ;;  %v1396_v33 = vld [vmem:[%s2031_s1 + $0x10c] ss:$16 sps:$4 sm:$0xff]   ;;  %v1398_v34 = vld [vmem:[%s2031_s1 + $0x100] ss:$16 sps:$4 sm:$0xff]   ;;  %v1399_v35 = vld [vmem:[%s2031_s1 + $0x108] ss:$16 sps:$4 sm:$0xff]  }
   0xd   :  { %v1400_v36 = vld [vmem:[%s2031_s1 + $0x124] ss:$16 sps:$4 sm:$0xff]   ;;  %v1402_v37 = vld [vmem:[%s2031_s1 + $0x12c] ss:$16 sps:$4 sm:$0xff]   ;;  %v1404_v38 = vld [vmem:[%s2031_s1 + $0x120] ss:$16 sps:$4 sm:$0xff]  }
   0xe   :  { %v1405_v39 = vld [vmem:[%s2031_s1 + $0x128] ss:$16 sps:$4 sm:$0xff]   ;;  %v1406_v40 = vld [vmem:[%s2031_s1 + $0x144] ss:$16 sps:$4 sm:$0xff]   ;;  %v1408_v41 = vld [vmem:[%s2031_s1 + $0x14c] ss:$16 sps:$4 sm:$0xff]  }
   0xf   :  { %821 = vmatpush1.bf16.msra.mxu0 %v1368_v14  ;;  %903 = vmatpush1.bf16.msra.mxu1 %v1369_v15  ;;  %v1410_v42 = vld [vmem:[%s2031_s1 + $0x140] ss:$16 sps:$4 sm:$0xff]   ;;  %v1411_v43 = vld [vmem:[%s2031_s1 + $0x148] ss:$16 sps:$4 sm:$0xff]   ;;  %v1412_v44 = vld [vmem:[%s2031_s1 + $0x164] ss:$16 sps:$4 sm:$0xff]  }
  0x10   :  { %822 = vmatprep.subr.bf16.mxu0 %v1370_v16  ;;  %904 = vmatprep.subr.bf16.mxu1 %v1372_v17  ;;  %v1414_v45 = vld [vmem:[%s2031_s1 + $0x16c] ss:$16 sps:$4 sm:$0xff]   ;;  %v30_v46 = vld [vmem:[%s2032_s0] sm:$0xff]  ;;  %v1417_v49 = vld [vmem:[%s2031_s1 + $0x168] ss:$16 sps:$4 sm:$0xff]  }
  0x11   :  { %v1166_v47 = vcombine.high %v30_v46, %v30_v46  ;;  %v1416_v48 = vld [vmem:[%s2031_s1 + $0x160] ss:$16 sps:$4 sm:$0xff]   ;;  %v1418_v50 = vld [vmem:[%s2031_s1 + $0x184] ss:$16 sps:$4 sm:$0xff]   ;;  %v1420_v51 = vld [vmem:[%s2031_s1 + $0x18c] ss:$16 sps:$4 sm:$0xff]   ;;  %v1165_v5 = vcombine.low %v30_v46, %v30_v46 }
  0x12   :  { %v1422_v52 = vld [vmem:[%s2031_s1 + $0x180] ss:$16 sps:$4 sm:$0xff]   ;;  %v1423_v53 = vld [vmem:[%s2031_s1 + $0x188] ss:$16 sps:$4 sm:$0xff]   ;;  %v1424_v54 = vld [vmem:[%s2031_s1 + $0x1a4] ss:$16 sps:$4 sm:$0xff]  }
  0x13   :  { %823 = vmatpush1.bf16.msra.mxu0 %v1374_v18  ;;  %905 = vmatpush1.bf16.msra.mxu1 %v1375_v19  ;;  %v1426_v55 = vld [vmem:[%s2031_s1 + $0x1ac] ss:$16 sps:$4 sm:$0xff]   ;;  %v1428_v56 = vld [vmem:[%s2031_s1 + $0x1a0] ss:$16 sps:$4 sm:$0xff]   ;;  %v1429_v57 = vld [vmem:[%s2031_s1 + $0x1a8] ss:$16 sps:$4 sm:$0xff]  }
  0x14   :  { %824 = vmatprep.subr.bf16.mxu0 %v1376_v20  ;;  %906 = vmatprep.subr.bf16.mxu1 %v1378_v21  ;;  %v1430_v58 = vld [vmem:[%s2031_s1 + $0x1c4] ss:$16 sps:$4 sm:$0xff]   ;;  %v1432_v59 = vld [vmem:[%s2031_s1 + $0x1cc] ss:$16 sps:$4 sm:$0xff]   ;;  %v1434_v60 = vld [vmem:[%s2031_s1 + $0x1c0] ss:$16 sps:$4 sm:$0xff]  }
  0x15   :  { %846 = vmatprep.mubr.bf16.mxu0 %v1166_v47  ;;  %928 = vmatprep.mubr.bf16.mxu1 %v1166_v47  ;;  %v1435_v61 = vld [vmem:[%s2031_s1 + $0x1c8] ss:$16 sps:$4 sm:$0xff]   ;;  %v1436_v62 = vld [vmem:[%s2031_s1 + $0x1e4] ss:$16 sps:$4 sm:$0xff]   ;;  %v1438_v63 = vld [vmem:[%s2031_s1 + $0x1ec] ss:$16 sps:$4 sm:$0xff]  }
  0x16   :  { %v1440_v0 = vld [vmem:[%s2031_s1 + $0x1e0] ss:$16 sps:$4 sm:$0xff]   ;;  %v1441_v1 = vld [vmem:[%s2031_s1 + $0x1e8] ss:$16 sps:$4 sm:$0xff]   ;;  %v1447_v2 = vld [vmem:[%s2031_s1 + $0x204] ss:$16 sps:$4 sm:$0xff]  }
  0x17   :  { %825 = vmatpush1.bf16.msra.mxu0 %v1380_v22  ;;  %907 = vmatpush1.bf16.msra.mxu1 %v1381_v23  ;;  %v1450_v3 = vld [vmem:[%s2031_s1 + $0x20c] ss:$16 sps:$4 sm:$0xff]   ;;  %v1445_v6 = vld [vmem:[%s2031_s1 + $0x200] ss:$16 sps:$4 sm:$0xff]   ;;  %v1448_v7 = vld [vmem:[%s2031_s1 + $0x208] ss:$16 sps:$4 sm:$0xff]  }
  0x18   :  { %826 = vmatprep.subr.bf16.mxu0 %v1382_v24  ;;  %908 = vmatprep.subr.bf16.mxu1 %v1384_v25  ;;  %v1803_v4 = vld [vmem:[%s2032_s0 + $0x8] sm:$0xff]  ;;  %v1453_v8 = vld [vmem:[%s2031_s1 + $0x224] ss:$16 sps:$4 sm:$0xff]   ;;  %v1451_v11 = vld [vmem:[%s2031_s1 + $0x220] ss:$16 sps:$4 sm:$0xff]  }
  0x19   :  { %v1456_v9 = vld [vmem:[%s2031_s1 + $0x22c] ss:$16 sps:$4 sm:$0xff]   ;;  %v1168_v10 = vcombine.high %v1803_v4, %v1803_v4  ;;  %v1454_v12 = vld [vmem:[%s2031_s1 + $0x228] ss:$16 sps:$4 sm:$0xff]   ;;  %v1459_v13 = vld [vmem:[%s2031_s1 + $0x244] ss:$16 sps:$4 sm:$0xff]  }
  0x1a   :  { %v1462_v14 = vld [vmem:[%s2031_s1 + $0x24c] ss:$16 sps:$4 sm:$0xff]   ;;  %v1457_v15 = vld [vmem:[%s2031_s1 + $0x240] ss:$16 sps:$4 sm:$0xff]   ;;  %v1460_v16 = vld [vmem:[%s2031_s1 + $0x248] ss:$16 sps:$4 sm:$0xff]  }
  0x1b   :  { %827 = vmatpush1.bf16.msra.mxu0 %v1386_v26  ;;  %909 = vmatpush1.bf16.msra.mxu1 %v1387_v27  ;;  %v1465_v17 = vld [vmem:[%s2031_s1 + $0x264] ss:$16 sps:$4 sm:$0xff]   ;;  %v1468_v18 = vld [vmem:[%s2031_s1 + $0x26c] ss:$16 sps:$4 sm:$0xff]   ;;  %v1463_v19 = vld [vmem:[%s2031_s1 + $0x260] ss:$16 sps:$4 sm:$0xff]  }
  0x1c   :  { %828 = vmatprep.subr.bf16.mxu0 %v1388_v28  ;;  %910 = vmatprep.subr.bf16.mxu1 %v1390_v29  ;;  %v1466_v20 = vld [vmem:[%s2031_s1 + $0x268] ss:$16 sps:$4 sm:$0xff]   ;;  %v1471_v21 = vld [vmem:[%s2031_s1 + $0x284] ss:$16 sps:$4 sm:$0xff]   ;;  %v1474_v22 = vld [vmem:[%s2031_s1 + $0x28c] ss:$16 sps:$4 sm:$0xff]  }
  0x1d   :  { %v1469_v23 = vld [vmem:[%s2031_s1 + $0x280] ss:$16 sps:$4 sm:$0xff]   ;;  %v1472_v24 = vld [vmem:[%s2031_s1 + $0x288] ss:$16 sps:$4 sm:$0xff]   ;;  %v1477_v25 = vld [vmem:[%s2031_s1 + $0x2a4] ss:$16 sps:$4 sm:$0xff]  }
  0x1e   :  { %v1480_v26 = vld [vmem:[%s2031_s1 + $0x2ac] ss:$16 sps:$4 sm:$0xff]   ;;  %v1475_v27 = vld [vmem:[%s2031_s1 + $0x2a0] ss:$16 sps:$4 sm:$0xff]   ;;  %v1478_v28 = vld [vmem:[%s2031_s1 + $0x2a8] ss:$16 sps:$4 sm:$0xff]  }
  0x1f   :  { %829 = vmatpush1.bf16.msra.mxu0 %v1392_v30  ;;  %911 = vmatpush1.bf16.msra.mxu1 %v1393_v31  ;;  %v1483_v29 = vld [vmem:[%s2031_s1 + $0x2c4] ss:$16 sps:$4 sm:$0xff]   ;;  %v1486_v30 = vld [vmem:[%s2031_s1 + $0x2cc] ss:$16 sps:$4 sm:$0xff]   ;;  %v1481_v31 = vld [vmem:[%s2031_s1 + $0x2c0] ss:$16 sps:$4 sm:$0xff]  }
  0x20   :  { %830 = vmatprep.subr.bf16.mxu0 %v1394_v32  ;;  %912 = vmatprep.subr.bf16.mxu1 %v1396_v33  ;;  %v1484_v32 = vld [vmem:[%s2031_s1 + $0x2c8] ss:$16 sps:$4 sm:$0xff]   ;;  %v1489_v33 = vld [vmem:[%s2031_s1 + $0x2e4] ss:$16 sps:$4 sm:$0xff]   ;;  %v1510_v46 = vld [vmem:[%s2031_s1 + $0x34c] ss:$16 sps:$4 sm:$0xff]  }
  0x21   :  { %v1505_v47 = vld [vmem:[%s2031_s1 + $0x340] ss:$16 sps:$4 sm:$0xff]  }
  0x23   :  { %831 = vmatpush1.bf16.msra.mxu0 %v1398_v34  ;;  %913 = vmatpush1.bf16.msra.mxu1 %v1399_v35  ;;  %v1492_v34 = vld [vmem:[%s2031_s1 + $0x2ec] ss:$16 sps:$4 sm:$0xff]   ;;  %v1487_v35 = vld [vmem:[%s2031_s1 + $0x2e0] ss:$16 sps:$4 sm:$0xff]  }
  0x24   :  { %832 = vmatprep.subr.bf16.mxu0 %v1400_v36  ;;  %914 = vmatprep.subr.bf16.mxu1 %v1402_v37  ;;  %v1490_v36 = vld [vmem:[%s2031_s1 + $0x2e8] ss:$16 sps:$4 sm:$0xff]   ;;  %v1495_v37 = vld [vmem:[%s2031_s1 + $0x304] ss:$16 sps:$4 sm:$0xff]  }
  0x27   :  { %833 = vmatpush1.bf16.msra.mxu0 %v1404_v38  ;;  %915 = vmatpush1.bf16.msra.mxu1 %v1405_v39  ;;  %v1498_v38 = vld [vmem:[%s2031_s1 + $0x30c] ss:$16 sps:$4 sm:$0xff]   ;;  %v1493_v39 = vld [vmem:[%s2031_s1 + $0x300] ss:$16 sps:$4 sm:$0xff]  }
  0x28   :  { %834 = vmatprep.subr.bf16.mxu0 %v1406_v40  ;;  %916 = vmatprep.subr.bf16.mxu1 %v1408_v41  ;;  %v1496_v40 = vld [vmem:[%s2031_s1 + $0x308] ss:$16 sps:$4 sm:$0xff]   ;;  %v1501_v41 = vld [vmem:[%s2031_s1 + $0x324] ss:$16 sps:$4 sm:$0xff]  }
  0x2b   :  { %835 = vmatpush1.bf16.msra.mxu0 %v1410_v42  ;;  %917 = vmatpush1.bf16.msra.mxu1 %v1411_v43  ;;  %v1504_v42 = vld [vmem:[%s2031_s1 + $0x32c] ss:$16 sps:$4 sm:$0xff]   ;;  %v1499_v43 = vld [vmem:[%s2031_s1 + $0x320] ss:$16 sps:$4 sm:$0xff]  }
  0x2c   :  { %836 = vmatprep.subr.bf16.mxu0 %v1412_v44  ;;  %918 = vmatprep.subr.bf16.mxu1 %v1414_v45  ;;  %v1502_v44 = vld [vmem:[%s2031_s1 + $0x328] ss:$16 sps:$4 sm:$0xff]   ;;  %v1507_v45 = vld [vmem:[%s2031_s1 + $0x344] ss:$16 sps:$4 sm:$0xff]  }
  0x2f   :  { %837 = vmatpush1.bf16.msra.mxu0 %v1416_v48  ;;  %919 = vmatpush1.bf16.msra.mxu1 %v1417_v49  ;;  %v1508_v48 = vld [vmem:[%s2031_s1 + $0x348] ss:$16 sps:$4 sm:$0xff]   ;;  %v1513_v49 = vld [vmem:[%s2031_s1 + $0x364] ss:$16 sps:$4 sm:$0xff]  }
  0x30   :  { %838 = vmatprep.subr.bf16.mxu0 %v1418_v50  ;;  %920 = vmatprep.subr.bf16.mxu1 %v1420_v51  ;;  %v1516_v50 = vld [vmem:[%s2031_s1 + $0x36c] ss:$16 sps:$4 sm:$0xff]   ;;  %v1511_v51 = vld [vmem:[%s2031_s1 + $0x360] ss:$16 sps:$4 sm:$0xff]  }
  0x33   :  { %839 = vmatpush1.bf16.msra.mxu0 %v1422_v52  ;;  %921 = vmatpush1.bf16.msra.mxu1 %v1423_v53  ;;  %v1514_v52 = vld [vmem:[%s2031_s1 + $0x368] ss:$16 sps:$4 sm:$0xff]   ;;  %v1519_v53 = vld [vmem:[%s2031_s1 + $0x384] ss:$16 sps:$4 sm:$0xff]  }
  0x34   :  { %840 = vmatprep.subr.bf16.mxu0 %v1424_v54  ;;  %922 = vmatprep.subr.bf16.mxu1 %v1426_v55  ;;  %v1522_v54 = vld [vmem:[%s2031_s1 + $0x38c] ss:$16 sps:$4 sm:$0xff]   ;;  %v1517_v55 = vld [vmem:[%s2031_s1 + $0x380] ss:$16 sps:$4 sm:$0xff]  }
  0x37   :  { %841 = vmatpush1.bf16.msra.mxu0 %v1428_v56  ;;  %923 = vmatpush1.bf16.msra.mxu1 %v1429_v57  ;;  %v1520_v56 = vld [vmem:[%s2031_s1 + $0x388] ss:$16 sps:$4 sm:$0xff]   ;;  %v1525_v57 = vld [vmem:[%s2031_s1 + $0x3a4] ss:$16 sps:$4 sm:$0xff]  }
  0x38   :  { %842 = vmatprep.subr.bf16.mxu0 %v1430_v58  ;;  %924 = vmatprep.subr.bf16.mxu1 %v1432_v59  ;;  %v1528_v58 = vld [vmem:[%s2031_s1 + $0x3ac] ss:$16 sps:$4 sm:$0xff]   ;;  %v1523_v59 = vld [vmem:[%s2031_s1 + $0x3a0] ss:$16 sps:$4 sm:$0xff]  }
  0x3b   :  { %843 = vmatpush1.bf16.msra.mxu0 %v1434_v60  ;;  %925 = vmatpush1.bf16.msra.mxu1 %v1435_v61  ;;  %v1526_v60 = vld [vmem:[%s2031_s1 + $0x3a8] ss:$16 sps:$4 sm:$0xff]   ;;  %v1531_v61 = vld [vmem:[%s2031_s1 + $0x3c4] ss:$16 sps:$4 sm:$0xff]  }
  0x3c   :  { %844 = vmatprep.subr.bf16.mxu0 %v1436_v62  ;;  %926 = vmatprep.subr.bf16.mxu1 %v1438_v63  ;;  %v1534_v62 = vld [vmem:[%s2031_s1 + $0x3cc] ss:$16 sps:$4 sm:$0xff]   ;;  %v1529_v63 = vld [vmem:[%s2031_s1 + $0x3c0] ss:$16 sps:$4 sm:$0xff]  }
  0x3f   :  { %845 = vmatpush1.bf16.msra.mxu0 %v1440_v0  ;;  %927 = vmatpush1.bf16.msra.mxu1 %v1441_v1  ;;  %v1532_v0 = vld [vmem:[%s2031_s1 + $0x3c8] ss:$16 sps:$4 sm:$0xff]   ;;  %v1537_v1 = vld [vmem:[%s2031_s1 + $0x3e4] ss:$16 sps:$4 sm:$0xff]  }
  0x40   :  { %855 = vmatprep.subr.bf16.mxu0 %v1447_v2  ;;  %937 = vmatprep.subr.bf16.mxu1 %v1450_v3  ;;  %v1540_v2 = vld [vmem:[%s2031_s1 + $0x3ec] ss:$16 sps:$4 sm:$0xff]   ;;  %v1535_v3 = vld [vmem:[%s2031_s1 + $0x3e0] ss:$16 sps:$4 sm:$0xff]  }
  0x42   :  { %847 = vmatmul.mubr.bf16.vlgmr.msra.gmra.mrb[0].mxu0 %v1165_v5  ;;  %929 = vmatmul.mubr.bf16.vlgmr.msra.gmra.mrb[0].mxu1 %v1165_v5  ;;  %v1538_v5 = vld [vmem:[%s2031_s1 + $0x3e8] ss:$16 sps:$4 sm:$0xff]  }
  0x43   :  { %856 = vmatpush1.bf16.msra.mxu0 %v1445_v6  ;;  %938 = vmatpush1.bf16.msra.mxu1 %v1448_v7  ;;  %v1167_v6 = vcombine.low %v1803_v4, %v1803_v4  ;;  %v1542_v7 = vld [vmem:[%s2033_s3] sm:$0xff]   ;;  %v1544_v4 = vld [vmem:[%s2033_s3 + $0x10] sm:$0xff]  }
  0x44   :  { %857 = vmatprep.subr.bf16.mxu0 %v1453_v8  ;;  %939 = vmatprep.subr.bf16.mxu1 %v1456_v9  ;;  %v1552_v8 = vmov 0.0   ;;  %v1543_v9 = vld [vmem:[%s2033_s3 + $0x8] sm:$0xff]  }
  0x45   :  { %887 = vmatprep.mubr.bf16.mxu0 %v1168_v10  ;;  %969 = vmatprep.mubr.bf16.mxu1 %v1168_v10  ;;  %v1545_v10 = vld [vmem:[%s2033_s3 + $0x18] sm:$0xff]  }
  0x47   :  { %858 = vmatpush1.bf16.msra.mxu0 %v1451_v11  ;;  %940 = vmatpush1.bf16.msra.mxu1 %v1454_v12 }
  0x48   :  { %859 = vmatprep.subr.bf16.mxu0 %v1459_v13  ;;  %941 = vmatprep.subr.bf16.mxu1 %v1462_v14 }
  0x4b   :  { %860 = vmatpush1.bf16.msra.mxu0 %v1457_v15  ;;  %942 = vmatpush1.bf16.msra.mxu1 %v1460_v16 }
  0x4c   :  { %861 = vmatprep.subr.bf16.mxu0 %v1465_v17  ;;  %943 = vmatprep.subr.bf16.mxu1 %v1468_v18 }
  0x4f   :  { %862 = vmatpush1.bf16.msra.mxu0 %v1463_v19  ;;  %944 = vmatpush1.bf16.msra.mxu1 %v1466_v20  ;;  %v1297_v19 = vld [vmem:[%s2034_s2] ss:$0 sm:$0xff] }
  0x50   :  { %863 = vmatprep.subr.bf16.mxu0 %v1471_v21  ;;  %945 = vmatprep.subr.bf16.mxu1 %v1474_v22 }
  0x53   :  { %864 = vmatpush1.bf16.msra.mxu0 %v1469_v23  ;;  %946 = vmatpush1.bf16.msra.mxu1 %v1472_v24 }
  0x54   :  { %865 = vmatprep.subr.bf16.mxu0 %v1477_v25  ;;  %947 = vmatprep.subr.bf16.mxu1 %v1480_v26  ;;  %v1546_v26 = vld [vmem:[%s2035_s6] sm:$0xff]  }
  0x57   :  { %866 = vmatpush1.bf16.msra.mxu0 %v1475_v27  ;;  %948 = vmatpush1.bf16.msra.mxu1 %v1478_v28  ;;  %v1547_v27 = vld [vmem:[%s2035_s6 + $0x8] sm:$0xff]   ;;  %v1298_v28 = vld [vmem:[%s2036_s4] ss:$0 sm:$0xff] }
  0x58   :  { %867 = vmatprep.subr.bf16.mxu0 %v1483_v29  ;;  %949 = vmatprep.subr.bf16.mxu1 %v1486_v30  ;;  %v1075_v29 = vld [vmem:[%s2037_s5] sm:$0xf] }
  0x5b   :  { %868 = vmatpush1.bf16.msra.mxu0 %v1481_v31  ;;  %950 = vmatpush1.bf16.msra.mxu1 %v1484_v32  ;;  %v1076_v32 = vunpack.c.l.bf16 %v1075_v29 }
  0x5c   :  { %869 = vmatprep.subr.bf16.mxu0 %v1489_v33  ;;  %951 = vmatprep.subr.bf16.mxu1 %v1492_v34 }
  0x5f   :  { %870 = vmatpush1.bf16.msra.mxu0 %v1487_v35  ;;  %952 = vmatpush1.bf16.msra.mxu1 %v1490_v36 }
  0x60   :  { %871 = vmatprep.subr.bf16.mxu0 %v1495_v37  ;;  %953 = vmatprep.subr.bf16.mxu1 %v1498_v38 }
  0x63   :  { %872 = vmatpush1.bf16.msra.mxu0 %v1493_v39  ;;  %954 = vmatpush1.bf16.msra.mxu1 %v1496_v40  ;;  %v1304_v39 = vld [vmem:[%s2038_s7] ss:$0 sm:$0xff] }
  0x64   :  { %873 = vmatprep.subr.bf16.mxu0 %v1501_v41  ;;  %955 = vmatprep.subr.bf16.mxu1 %v1504_v42 }
  0x67   :  { %874 = vmatpush1.bf16.msra.mxu0 %v1499_v43  ;;  %956 = vmatpush1.bf16.msra.mxu1 %v1502_v44 }
  0x68   :  { %875 = vmatprep.subr.bf16.mxu0 %v1507_v45  ;;  %957 = vmatprep.subr.bf16.mxu1 %v1510_v46 }
  0x6b   :  { %876 = vmatpush1.bf16.msra.mxu0 %v1505_v47  ;;  %958 = vmatpush1.bf16.msra.mxu1 %v1508_v48 }
  0x6c   :  { %877 = vmatprep.subr.bf16.mxu0 %v1513_v49  ;;  %959 = vmatprep.subr.bf16.mxu1 %v1516_v50 }
  0x6f   :  { %878 = vmatpush1.bf16.msra.mxu0 %v1511_v51  ;;  %960 = vmatpush1.bf16.msra.mxu1 %v1514_v52 }
  0x70   :  { %879 = vmatprep.subr.bf16.mxu0 %v1519_v53  ;;  %961 = vmatprep.subr.bf16.mxu1 %v1522_v54 }
  0x73   :  { %880 = vmatpush1.bf16.msra.mxu0 %v1517_v55  ;;  %962 = vmatpush1.bf16.msra.mxu1 %v1520_v56 }
  0x74   :  { %881 = vmatprep.subr.bf16.mxu0 %v1525_v57  ;;  %963 = vmatprep.subr.bf16.mxu1 %v1528_v58 }
  0x77   :  { %882 = vmatpush1.bf16.msra.mxu0 %v1523_v59  ;;  %964 = vmatpush1.bf16.msra.mxu1 %v1526_v60 }
  0x78   :  { %883 = vmatprep.subr.bf16.mxu0 %v1531_v61  ;;  %965 = vmatprep.subr.bf16.mxu1 %v1534_v62 }
  0x7b   :  { %884 = vmatpush1.bf16.msra.mxu0 %v1529_v63  ;;  %966 = vmatpush1.bf16.msra.mxu1 %v1532_v0 }
  0x7c   :  { %885 = vmatprep.subr.bf16.mxu0 %v1537_v1  ;;  %967 = vmatprep.subr.bf16.mxu1 %v1540_v2 }
  0x7f   :  { %886 = vmatpush1.bf16.msra.mxu0 %v1535_v3  ;;  %968 = vmatpush1.bf16.msra.mxu1 %v1538_v5 }
  0x80   :  { %1316 = vmatprep.subr.bf16.mxu0 %v1552_v8  ;;  %1328 = vmatprep.subr.bf16.mxu1 %v1552_v8 }
  0x82   :  { %888 = vmatmul.mubr.bf16.vlgmr.msra.gmra.mrb[0].mxu0 %v1167_v6  ;;  %970 = vmatmul.mubr.bf16.vlgmr.msra.gmra.mrb[0].mxu1 %v1167_v6 }
  0x83   :  { %1317 = vmatpush3.bf16.msra.mxu0 %v1542_v7  ;;  %1324 = vmatprep.mubr.msk.bf16.mxu0 %vm1553_vm0, %v1552_v8 }
  0x84   :  { %1318 = vmatprep.subr.bf16.mxu0 %v1552_v8  ;;  %1332 = vmatprep.mubr.msk.bf16.mxu1 %vm1553_vm0, %v1552_v8 }
  0x85   :  { %1329 = vmatpush3.bf16.msra.mxu1 %v1546_v26 }
  0x86   :  { %1330 = vmatprep.subr.bf16.mxu1 %v1552_v8 }
  0x87   :  { %1319 = vmatpush3.bf16.msra.mxu0 %v1543_v9 }
  0x88   :  { %1320 = vmatprep.subr.bf16.mxu0 %v1552_v8 }
  0x89   :  { %1331 = vmatpush3.bf16.msra.mxu1 %v1547_v27 }
  0x8b   :  { %1321 = vmatpush3.bf16.msra.mxu0 %v1544_v4 }
  0x8c   :  { %1322 = vmatprep.subr.bf16.mxu0 %v1552_v8 }
  0x8f   :  { %1323 = vmatpush3.bf16.msra.mxu0 %v1545_v10 }
 0x155   :  { %v889_v11 = vpop.f32.mrb[0].mxu0  ;;  %v971_v12 = vpop.f32.mrb[0].mxu1 }
 0x156   :  { %v891_v13 = vpop.f32.mrb[1].mxu0  ;;  %v973_v14 = vpop.f32.mrb[1].mxu1 }
 0x157   :  { %v978_v15 = vmax.f32 %v889_v11, %v891_v13  ;;  %v979_v16 = vmax.f32 %v971_v12, %v973_v14  ;;  %v893_v17 = vpop.f32.mrb[2].mxu0  ;;  %v975_v18 = vpop.f32.mrb[2].mxu1 }
 0x158   :  { %v894_v20 = vpop.f32.mrb[3].mxu0  ;;  %v976_v21 = vpop.f32.mrb[3].mxu1 }
 0x159   :  { %v980_v22 = vmax.f32 %v978_v15, %v979_v16 }
 0x15b   :  { %v988_v23 = vadd.f32 %v1297_v19, %v980_v22 }
 0x15d   :  { %v989_v24 = vmax.f32 %v988_v23, 0.0 }
 0x15f   :  { %v990_v25 = vpack.c.bf16 %v989_v24, %v989_v24 }
 0x161   :  { %1325 = vmatmul.mubr.msk.bf16.vlgmr.msra.gmra.mrb[4].mxu0 %vm1030_vm1, %v990_v25 }
 0x234   :  { %v1068_v30 = vpop.f32.mrb[4].mxu0 }
 0x235   :  { %v1069_v31 = vadd.f32 %v1298_v28, %v1068_v30  ;;  %v1326_v33 = vpop.f32.mrb[5].mxu0 }
 0x236   :  { %v1071_v34 = vpop.f32.mrb[6].mxu0 }
 0x237   :  { %v1074_v35 = vmax.f32 %v1069_v31, 0.0  ;;  %v1327_v36 = vpop.f32.mrb[7].mxu0 }
 0x239   :  { %v1077_v37 = vmul.f32 %v1076_v32, %v1074_v35 }
 0x23b   :  { %v1078_v38 = vpack.c.bf16 %v1077_v37, %v1077_v37 }
 0x23d   :  { %1333 = vmatmul.mubr.msk.bf16.vlgmr.msra.gmra.mrb[4].mxu1 %vm1102_vm2, %v1078_v38 }
 0x310   :  { %v1140_v40 = vpop.f32.mrb[4].mxu1 }
 0x311   :  { %v1141_v41 = vadd.f32 %v1304_v39, %v1140_v40  ;;  %v1334_v42 = vpop.f32.mrb[5].mxu1 }
 0x312   :  { %v1143_v43 = vpop.f32.mrb[6].mxu1 }
 0x313   :  { %v1335_v44 = vpop.f32.mrb[7].mxu1  ;;  %v1147_v45 = vsel %vm1146_vm3, %v1141_v41, -inf }
 0x314   :  { %1148 = vmax.xlane.f32.xlu0 %v1147_v45 }
 0x3a1   :  { %v1149_v46 = vpop.xlane.xlu0 %1148 }
 0x3a2   :  { %v1150_v47 = vsub.f32 %v1141_v41, %v1149_v46 }
 0x3a4   :  { %v1151_v48 = vmul.f32 1.442695, %v1150_v47 }
 0x3a6   :  { %1548 = vpow2.f32 %v1151_v48 }
 0x3b0   :  { %v1549_v49 = vpop.eup %1548 }
 0x3b1   :  { %v1153_v50 = vsel %vm1146_vm3, %v1549_v49, 0.0 }
 0x3b2   :  { %1154 = vadd.xlane.f32.xlu0 %v1153_v50 }
 0x43f   :  { %v1155_v51 = vpop.xlane.xlu0 %1154 }
 0x440   :  { %1550 = vlog2.f32 %v1155_v51 }
 0x44a   :  { %v1551_v52 = vpop.eup %1550 }
 0x44b   :  { %v1157_v53 = vmul.f32 0.6931472, %v1551_v52 }
 0x44d   :  { %v1158_v54 = vadd.f32 %v1157_v53, %v1149_v46 }
 0x44f   :  { %v1159_v55 = vsub.f32 %v1141_v41, %v1158_v54 }
 0x451   :  { %1160 = vst.msk [vmem:[%s2039_s8] sm:$0xff] %vm1146_vm3, %v1159_v55 }

</bundles_post_ra>
